<compile_context>
chip_gen: v6e
topology: v6e:2x2x1
jax: 0.10.0
libtpu: 0.0.40
codegen_flags: <defaults>
</compile_context>

<pallas_src>
import math
from functools import partial

import jax
import jax.numpy as jnp
import numpy as np
from jax.experimental import pallas as pl
from jax.experimental.pallas import tpu as pltpu

BN_EPS = 1e-5
LANES = 128
VMEM_LIMIT = 32 * 1024 * 1024  # explicit budget; safe on v5e/v6e/v7x


def _round_up(c, m=LANES):
    return ((c + m - 1) // m) * m


def _pick_tile(total, target, multiple=1):
    """Largest divisor of `total` that is <= target and a multiple of `multiple`."""
    if total <= target:
        return total
    best = None
    for d in range(1, total + 1):
        if total % d == 0 and d <= target and d % multiple == 0:
            best = d
    return best if best is not None else total


# ---------------------------------------------------------------------------
# Pass 1: 3x3 conv (9 shifted-slice MXU matmuls) + optional ReLU
#         + optional per-tile per-channel (sum, sumsq) BN partials.
# ---------------------------------------------------------------------------
def _make_conv_kernel(TH, WO, s, apply_relu, emit_stats):
    def kernel(xwin_ref, w_ref, y_ref, *maybe_stats):
        CIP = xwin_ref.shape[-1]
        COP = w_ref.shape[-1]
        acc = jnp.zeros((TH * WO, COP), jnp.float32)
        # 9 taps: contiguous slices of the (phases, rows, cols, C) VMEM window.
        for dy in range(3):
            for dx in range(3):
                ph = (dy % s) * s + (dx % s)
                oy, ox = dy // s, dx // s
                win = xwin_ref[ph, oy:oy + TH, ox:ox + WO, :]        # (TH, WO, CIP) bf16
                acc = acc + jnp.dot(win.reshape(TH * WO, CIP),
                                    w_ref[dy, dx],
                                    preferred_element_type=jnp.float32)
        if emit_stats:
            stats_ref = maybe_stats[0]
            stats_ref[...] = jnp.concatenate(
                [jnp.sum(acc, axis=0, keepdims=True),
                 jnp.sum(acc * acc, axis=0, keepdims=True)], axis=0)  # (2, COP) f32
        if apply_relu:
            acc = jnp.maximum(acc, 0.0)
        y_ref[...] = acc.reshape(TH, WO, COP).astype(y_ref.dtype)
    return kernel


def _conv_pass1(x, w, *, stride, apply_relu, emit_stats):
    """x: (N, H, W, CIP) bf16 channel-padded; w: (3, 3, CIP, COP) bf16."""
    N, H, W, CIP = x.shape
    COP = w.shape[-1]
    s = stride
    assert s in (1, 2)
    if s == 2:
        assert H % 2 == 0 and W % 2 == 0, "stride-2 path assumes even H, W"
    Ho, Wo = H // s, W // s

    th_target = max(1, 2048 // max(Wo, 1))      # ~2K output rows per grid step
    TH = _pick_tile(Ho, th_target)
    T = Ho // TH
    ROWS = TH + 2 // s                          # stride 1: TH+2 halo, stride 2: TH+1

    # Polyphase split: xph[n, py*s+px, i, j, c] = xpad[n, s*i+py, s*j+px, c]
    xpad = jnp.pad(x, ((0, 0), (1, 1), (1, 1), (0, 0)))
    xph = jnp.stack([xpad[:, py::s, px::s, :]
                     for py in range(s) for px in range(s)], axis=1)
    Wph = xph.shape[3]
    # Row windows with halo, duplicated once in HBM so the kernel uses plain
    # Blocked specs (fully auto-pipelined, parallel-safe).
    xwin = jnp.stack([xph[:, :, t * TH: t * TH + ROWS, :, :] for t in range(T)],
                     axis=1)                                   # (N, T, s*s, ROWS, Wph, CIP)
    xwin = xwin.reshape(N * T * s * s, ROWS, Wph, CIP)

    in_specs = [
        pl.BlockSpec((s * s, ROWS, Wph, CIP), lambda n, t: (n * T + t, 0, 0, 0)),
        pl.BlockSpec((3, 3, CIP, COP), lambda n, t: (0, 0, 0, 0)),  # fetched once
    ]
    y_spec = pl.BlockSpec((None, TH, Wo, COP), lambda n, t: (n, t, 0, 0))
    y_shape = jax.ShapeDtypeStruct((N, Ho, Wo, COP), jnp.bfloat16)

    kernel = _make_conv_kernel(TH, Wo, s, apply_relu, emit_stats)
    cp = pltpu.CompilerParams(dimension_semantics=("parallel", "parallel"),
                              vmem_limit_bytes=VMEM_LIMIT)

    if emit_stats:
        st_spec = pl.BlockSpec((None, None, 2, COP), lambda n, t: (n, t, 0, 0))
        st_shape = jax.ShapeDtypeStruct((N, T, 2, COP), jnp.float32)
        return pl.pallas_call(kernel, grid=(N, T), in_specs=in_specs,
                              out_specs=(y_spec, st_spec),
                              out_shape=(y_shape, st_shape),
                              compiler_params=cp)(xwin, w)
    return pl.pallas_call(kernel, grid=(N, T), in_specs=in_specs,
                          out_specs=y_spec, out_shape=y_shape,
                          compiler_params=cp)(xwin, w)


# ---------------------------------------------------------------------------
# Pass 2: lane-dense (M, 128) normalize (+ residual) + ReLU.
# ---------------------------------------------------------------------------
def _make_bn_kernel(has_res):
    def kernel(*refs):
        if has_res:
            y_ref, sc_ref, bi_ref, r_ref, o_ref = refs
        else:
            y_ref, sc_ref, bi_ref, o_ref = refs
        y = y_ref[...].astype(jnp.float32) * sc_ref[...] + bi_ref[...]
        if has_res:
            y = y + r_ref[...].astype(jnp.float32)
        o_ref[...] = jnp.maximum(y, 0.0).astype(o_ref.dtype)
    return kernel


def _bn_residual_relu(y, scale, bias, residual):
    N, Ho, Wo, COP = y.shape
    M = N * Ho * Wo
    TM = _pick_tile(M, 1024, multiple=8)
    y2 = y.reshape(M, COP)
    args = [y2, scale.reshape(1, COP), bias.reshape(1, COP)]
    in_specs = [pl.BlockSpec((TM, COP), lambda i: (i, 0)),
                pl.BlockSpec((1, COP), lambda i: (0, 0)),   # constant block: fetched once
                pl.BlockSpec((1, COP), lambda i: (0, 0))]
    if residual is not None:
        args.append(residual.reshape(M, COP))
        in_specs.append(pl.BlockSpec((TM, COP), lambda i: (i, 0)))
    out = pl.pallas_call(
        _make_bn_kernel(residual is not None),
        grid=(M // TM,), in_specs=in_specs,
        out_specs=pl.BlockSpec((TM, COP), lambda i: (i, 0)),
        out_shape=jax.ShapeDtypeStruct((M, COP), jnp.bfloat16),
        compiler_params=pltpu.CompilerParams(dimension_semantics=("parallel",),
                                             vmem_limit_bytes=VMEM_LIMIT),
    )(*args)
    return out.reshape(N, Ho, Wo, COP)


# ---------------------------------------------------------------------------
# conv3x3 (+BN +residual +ReLU) wrapper
# ---------------------------------------------------------------------------
def conv3x3(x, w, *, stride=1, bn=None, residual=None, relu=True):
    """x: (N,H,W,CIP) bf16 channel-padded; w: (3,3,CIP,COP) bf16.
       bn = (gamma_padded, beta_padded) f32 or None.  Returns bf16 NHWC."""
    if bn is None:
        return _conv_pass1(x, w, stride=stride, apply_relu=relu, emit_stats=False)

    y, stats = _conv_pass1(x, w, stride=stride, apply_relu=False, emit_stats=True)
    gamma_p, beta_p = bn
    N, Ho, Wo, COP = y.shape
    tot = jnp.sum(stats, axis=(0, 1))                       # (2, COP) f32
    cnt = jnp.float32(N * Ho * Wo)
    mean = tot[0] / cnt
    var = jnp.maximum(tot[1] / cnt - mean * mean, 0.0)      # biased, training-mode BN
    scale = gamma_p * jax.lax.rsqrt(var + BN_EPS)
    bias = beta_p - mean * scale
    # ReLU is always applied here: BN is followed by ReLU or add_relu in this module.
    return _bn_residual_relu(y, scale.astype(jnp.float32), bias.astype(jnp.float32),
                             residual)


# ---------------------------------------------------------------------------
# Parameter packing (PyTorch layout -> padded bf16 kernel layout)
# ---------------------------------------------------------------------------
def _prep_conv_w(w_pt):
    co, ci = w_pt.shape[0], w_pt.shape[1]
    cip, cop = _round_up(ci), _round_up(co)
    w = jnp.transpose(w_pt, (2, 3, 1, 0))                   # (3, 3, ci, co)
    w = jnp.pad(w, ((0, 0), (0, 0), (0, cip - ci), (0, cop - co)))
    return w.astype(jnp.bfloat16)


def _prep_bn(g, b):
    c = g.shape[0]
    cop = _round_up(c)
    return (jnp.pad(g, (0, cop - c)).astype(jnp.float32),
            jnp.pad(b, (0, cop - c)).astype(jnp.float32))


def _residual_block(h, p):
    # conv -> BN -> ReLU -> conv -> BN -> add_relu(out, h)
    t = conv3x3(h, _prep_conv_w(p['w1']), bn=_prep_bn(p['g1'], p['b1']))
    return conv3x3(t, _prep_conv_w(p['w2']), bn=_prep_bn(p['g2'], p['b2']), residual=h)


# ---------------------------------------------------------------------------
# Full forward of the innermost ResUnetSkipConnectionBlock
# ---------------------------------------------------------------------------
@jax.jit
def res_unet_block_forward(x_nchw, params):
    x = jnp.transpose(x_nchw, (0, 2, 3, 1))                 # NCHW -> NHWC (f32)
    N, H, W, cin = x.shape
    cinp = _round_up(cin)
    xq = jnp.pad(x, ((0, 0), (0, 0), (0, 0), (0, cinp - cin))).astype(jnp.bfloat16)

    # down: downconv(stride 2, bias=False) + ReLU (no norm on this branch)
    h = conv3x3(xq, _prep_conv_w(params['downconv_w']), stride=2, bn=None, relu=True)
    h = _residual_block(h, params['res_down1'])
    h = _residual_block(h, params['res_down2'])

    # up: nearest x2 upsample + upconv + upnorm + ReLU
    # TODO(synk): fold the nearest-neighbour upsample into the upconv window
    # gather instead of materializing the 4x repeated tensor in HBM.
    h = jnp.repeat(jnp.repeat(h, 2, axis=1), 2, axis=2)
    h = conv3x3(h, _prep_conv_w(params['upconv_w']),
                bn=_prep_bn(params['up_g'], params['up_b']))
    h = _residual_block(h, params['res_up1'])
    h = _residual_block(h, params['res_up2'])

    outer_nc = params['upconv_w'].shape[0]
    h = h[..., :outer_nc].astype(jnp.float32)
    out = jnp.concatenate([x, h], axis=-1)                  # skip concat [x, model(x)]
    return jnp.transpose(out, (0, 3, 1, 2))                 # NHWC -> NCHW


# ---------------------------------------------------------------------------
# Pure-JAX reference mirroring the kernel's dtype policy (bf16-rounded inputs,
# weights and stored activations; f32 conv accumulation and BN statistics).
# Isolates kernel/tiling/BN correctness from the deliberate bf16 storage.
# ---------------------------------------------------------------------------
def _q(x):
    return x.astype(jnp.bfloat16).astype(jnp.float32)


def _conv_ref(x, w_pt, stride):
    w = jnp.transpose(w_pt, (2, 3, 1, 0))
    return jax.lax.conv_general_dilated(
        _q(x), _q(w), (stride, stride), ((1, 1), (1, 1)),
        dimension_numbers=('NHWC', 'HWIO', 'NHWC'),
        precision=jax.lax.Precision.HIGHEST)


def _bn_relu_ref(y, g, b, res=None):
    m = jnp.mean(y, axis=(0, 1, 2))
    v = jnp.maximum(jnp.mean(y * y, axis=(0, 1, 2)) - m * m, 0.0)
    scale = g * jax.lax.rsqrt(v + BN_EPS)
    bias = b - m * scale
    out = _q(y) * scale + bias
    if res is not None:
        out = out + res
    return _q(jnp.maximum(out, 0.0))


def _res_block_ref(x, p):
    t = _bn_relu_ref(_conv_ref(x, p['w1'], 1), p['g1'], p['b1'])
    return _bn_relu_ref(_conv_ref(t, p['w2'], 1), p['g2'], p['b2'], res=x)


def forward_reference(x_nchw, p):
    x = jnp.transpose(x_nchw, (0, 2, 3, 1))
    h = _q(jax.nn.relu(_conv_ref(x, p['downconv_w'], 2)))
    h = _res_block_ref(h, p['res_down1'])
    h = _res_block_ref(h, p['res_down2'])
    h = jnp.repeat(jnp.repeat(h, 2, axis=1), 2, axis=2)
    h = _bn_relu_ref(_conv_ref(h, p['upconv_w'], 1), p['up_g'], p['up_b'])
    h = _res_block_ref(h, p['res_up1'])
    h = _res_block_ref(h, p['res_up2'])
    out = jnp.concatenate([x, h], axis=-1)
    return jnp.transpose(out, (0, 3, 1, 2))


# ---------------------------------------------------------------------------
# Deterministic parameter init (PyTorch-style shapes; BN gamma=1, beta=0)
# ---------------------------------------------------------------------------
def _conv_w(key, cout, cin):
    bound = 1.0 / math.sqrt(cin * 9)
    return jax.random.uniform(key, (cout, cin, 3, 3), jnp.float32, -bound, bound)


def _res_block_params(keys, c):
    return {'w1': _conv_w(keys[0], c, c),
            'g1': jnp.ones((c,), jnp.float32), 'b1': jnp.zeros((c,), jnp.float32),
            'w2': _conv_w(keys[1], c, c),
            'g2': jnp.ones((c,), jnp.float32), 'b2': jnp.zeros((c,), jnp.float32)}


def init_params(key, input_nc, inner_nc, outer_nc):
    ks = jax.random.split(key, 10)
    return {
        'downconv_w': _conv_w(ks[0], inner_nc, input_nc),
        'res_down1': _res_block_params(ks[1:3], inner_nc),
        'res_down2': _res_block_params(ks[3:5], inner_nc),
        'upconv_w': _conv_w(ks[5], outer_nc, inner_nc),
        'up_g': jnp.ones((outer_nc,), jnp.float32),
        'up_b': jnp.zeros((outer_nc,), jnp.float32),
        'res_up1': _res_block_params(ks[6:8], outer_nc),
        'res_up2': _res_block_params(ks[8:10], outer_nc),
    }


if __name__ == "__main__":
    key = jax.random.PRNGKey(0)
    kx, kp = jax.random.split(key)

    N, H, W = 2, 16, 16
    outer_nc = input_nc = 4
    inner_nc = 8

    x = jax.random.normal(kx, (N, input_nc, H, W), jnp.float32)
    params = init_params(kp, input_nc, inner_nc, outer_nc)

    out = jax.block_until_ready(res_unet_block_forward(x, params))
    assert out.shape == (N, input_nc + outer_nc, H, W), out.shape

    ref = forward_reference(x, params)
    np.testing.assert_allclose(np.asarray(out), np.asarray(ref),
                               rtol=2e-2, atol=2e-2)
    print("KERNEL_OK")
</pallas_src>

<mosaic_0001>
module attributes {stable_mosaic.version = 11 : i64} {
  func.func @kernel(%arg0: i32, %arg1: i32, %arg2: memref<4x9x9x128xbf16, #tpu.memory_space<vmem>>, %arg3: memref<3x3x128x128xbf16, #tpu.memory_space<vmem>>, %arg4: memref<1x8x8x128xbf16, #tpu.memory_space<vmem>>) attributes {dimension_semantics = [#tpu.dimension_semantics<parallel>, #tpu.dimension_semantics<parallel>], iteration_bounds = array<i64: 2, 1>, scalar_prefetch = 0 : i64, scratch_operands = 0 : i64, tpu.core_type = #tpu.core_type<tc>, window_params = [{transform_indices = @transform_0, window_bounds = array<i64: 4, 9, 9, 128>}, {pipeline_mode = #tpu.pipeline_mode<synchronous>, transform_indices = @transform_1, window_bounds = array<i64: 3, 3, 128, 128>}, {transform_indices = @transform_2, window_bounds = array<i64: 1, 8, 8, 128>}]} {
    %cst = arith.constant 0.000000e+00 : f32
    %0 = vector.broadcast %cst : f32 to vector<64x128xf32>
    %c0 = arith.constant 0 : index
    %c0_0 = arith.constant 0 : index
    %c0_1 = arith.constant 0 : index
    %c0_2 = arith.constant 0 : index
    %1 = vector.load %arg2[%c0, %c0_0, %c0_1, %c0_2] : memref<4x9x9x128xbf16, #tpu.memory_space<vmem>>, vector<1x8x8x128xbf16>
    %2 = vector.shape_cast %1 : vector<1x8x8x128xbf16> to vector<8x8x128xbf16>
    %3 = vector.shape_cast %2 : vector<8x8x128xbf16> to vector<64x128xbf16>
    %c0_3 = arith.constant 0 : index
    %c0_4 = arith.constant 0 : index
    %c0_5 = arith.constant 0 : index
    %c0_6 = arith.constant 0 : index
    %4 = vector.load %arg3[%c0_3, %c0_4, %c0_5, %c0_6] : memref<3x3x128x128xbf16, #tpu.memory_space<vmem>>, vector<1x1x128x128xbf16>
    %5 = vector.shape_cast %4 : vector<1x1x128x128xbf16> to vector<128x128xbf16>
    %cst_7 = arith.constant dense<0.000000e+00> : vector<64x128xf32>
    %6 = tpu.matmul %3, %5, %cst_7 {dimension_numbers = #tpu.dot_dimension_numbers<[1], [0], [0], [1], [0, 0, 1, 1], [], []>} : vector<64x128xbf16>, vector<128x128xbf16>, vector<64x128xf32> -> vector<64x128xf32>
    %7 = arith.addf %0, %6 : vector<64x128xf32>
    %c1 = arith.constant 1 : index
    %c0_8 = arith.constant 0 : index
    %c0_9 = arith.constant 0 : index
    %c0_10 = arith.constant 0 : index
    %8 = vector.load %arg2[%c1, %c0_8, %c0_9, %c0_10] : memref<4x9x9x128xbf16, #tpu.memory_space<vmem>>, vector<1x8x8x128xbf16>
    %9 = vector.shape_cast %8 : vector<1x8x8x128xbf16> to vector<8x8x128xbf16>
    %10 = vector.shape_cast %9 : vector<8x8x128xbf16> to vector<64x128xbf16>
    %c0_11 = arith.constant 0 : index
    %c1_12 = arith.constant 1 : index
    %c0_13 = arith.constant 0 : index
    %c0_14 = arith.constant 0 : index
    %11 = vector.load %arg3[%c0_11, %c1_12, %c0_13, %c0_14] : memref<3x3x128x128xbf16, #tpu.memory_space<vmem>>, vector<1x1x128x128xbf16>
    %12 = vector.shape_cast %11 : vector<1x1x128x128xbf16> to vector<128x128xbf16>
    %cst_15 = arith.constant dense<0.000000e+00> : vector<64x128xf32>
    %13 = tpu.matmul %10, %12, %cst_15 {dimension_numbers = #tpu.dot_dimension_numbers<[1], [0], [0], [1], [0, 0, 1, 1], [], []>} : vector<64x128xbf16>, vector<128x128xbf16>, vector<64x128xf32> -> vector<64x128xf32>
    %14 = arith.addf %7, %13 : vector<64x128xf32>
    %c0_16 = arith.constant 0 : index
    %c0_17 = arith.constant 0 : index
    %c1_18 = arith.constant 1 : index
    %c0_19 = arith.constant 0 : index
    %15 = vector.load %arg2[%c0_16, %c0_17, %c1_18, %c0_19] : memref<4x9x9x128xbf16, #tpu.memory_space<vmem>>, vector<1x8x8x128xbf16>
    %16 = vector.shape_cast %15 : vector<1x8x8x128xbf16> to vector<8x8x128xbf16>
    %17 = vector.shape_cast %16 : vector<8x8x128xbf16> to vector<64x128xbf16>
    %c0_20 = arith.constant 0 : index
    %c2 = arith.constant 2 : index
    %c0_21 = arith.constant 0 : index
    %c0_22 = arith.constant 0 : index
    %18 = vector.load %arg3[%c0_20, %c2, %c0_21, %c0_22] : memref<3x3x128x128xbf16, #tpu.memory_space<vmem>>, vector<1x1x128x128xbf16>
    %19 = vector.shape_cast %18 : vector<1x1x128x128xbf16> to vector<128x128xbf16>
    %cst_23 = arith.constant dense<0.000000e+00> : vector<64x128xf32>
    %20 = tpu.matmul %17, %19, %cst_23 {dimension_numbers = #tpu.dot_dimension_numbers<[1], [0], [0], [1], [0, 0, 1, 1], [], []>} : vector<64x128xbf16>, vector<128x128xbf16>, vector<64x128xf32> -> vector<64x128xf32>
    %21 = arith.addf %14, %20 : vector<64x128xf32>
    %c2_24 = arith.constant 2 : index
    %c0_25 = arith.constant 0 : index
    %c0_26 = arith.constant 0 : index
    %c0_27 = arith.constant 0 : index
    %22 = vector.load %arg2[%c2_24, %c0_25, %c0_26, %c0_27] : memref<4x9x9x128xbf16, #tpu.memory_space<vmem>>, vector<1x8x8x128xbf16>
    %23 = vector.shape_cast %22 : vector<1x8x8x128xbf16> to vector<8x8x128xbf16>
    %24 = vector.shape_cast %23 : vector<8x8x128xbf16> to vector<64x128xbf16>
    %c1_28 = arith.constant 1 : index
    %c0_29 = arith.constant 0 : index
    %c0_30 = arith.constant 0 : index
    %c0_31 = arith.constant 0 : index
    %25 = vector.load %arg3[%c1_28, %c0_29, %c0_30, %c0_31] : memref<3x3x128x128xbf16, #tpu.memory_space<vmem>>, vector<1x1x128x128xbf16>
    %26 = vector.shape_cast %25 : vector<1x1x128x128xbf16> to vector<128x128xbf16>
    %cst_32 = arith.constant dense<0.000000e+00> : vector<64x128xf32>
    %27 = tpu.matmul %24, %26, %cst_32 {dimension_numbers = #tpu.dot_dimension_numbers<[1], [0], [0], [1], [0, 0, 1, 1], [], []>} : vector<64x128xbf16>, vector<128x128xbf16>, vector<64x128xf32> -> vector<64x128xf32>
    %28 = arith.addf %21, %27 : vector<64x128xf32>
    %c3 = arith.constant 3 : index
    %c0_33 = arith.constant 0 : index
    %c0_34 = arith.constant 0 : index
    %c0_35 = arith.constant 0 : index
    %29 = vector.load %arg2[%c3, %c0_33, %c0_34, %c0_35] : memref<4x9x9x128xbf16, #tpu.memory_space<vmem>>, vector<1x8x8x128xbf16>
    %30 = vector.shape_cast %29 : vector<1x8x8x128xbf16> to vector<8x8x128xbf16>
    %31 = vector.shape_cast %30 : vector<8x8x128xbf16> to vector<64x128xbf16>
    %c1_36 = arith.constant 1 : index
    %c1_37 = arith.constant 1 : index
    %c0_38 = arith.constant 0 : index
    %c0_39 = arith.constant 0 : index
    %32 = vector.load %arg3[%c1_36, %c1_37, %c0_38, %c0_39] : memref<3x3x128x128xbf16, #tpu.memory_space<vmem>>, vector<1x1x128x128xbf16>
    %33 = vector.shape_cast %32 : vector<1x1x128x128xbf16> to vector<128x128xbf16>
    %cst_40 = arith.constant dense<0.000000e+00> : vector<64x128xf32>
    %34 = tpu.matmul %31, %33, %cst_40 {dimension_numbers = #tpu.dot_dimension_numbers<[1], [0], [0], [1], [0, 0, 1, 1], [], []>} : vector<64x128xbf16>, vector<128x128xbf16>, vector<64x128xf32> -> vector<64x128xf32>
    %35 = arith.addf %28, %34 : vector<64x128xf32>
    %c2_41 = arith.constant 2 : index
    %c0_42 = arith.constant 0 : index
    %c1_43 = arith.constant 1 : index
    %c0_44 = arith.constant 0 : index
    %36 = vector.load %arg2[%c2_41, %c0_42, %c1_43, %c0_44] : memref<4x9x9x128xbf16, #tpu.memory_space<vmem>>, vector<1x8x8x128xbf16>
    %37 = vector.shape_cast %36 : vector<1x8x8x128xbf16> to vector<8x8x128xbf16>
    %38 = vector.shape_cast %37 : vector<8x8x128xbf16> to vector<64x128xbf16>
    %c1_45 = arith.constant 1 : index
    %c2_46 = arith.constant 2 : index
    %c0_47 = arith.constant 0 : index
    %c0_48 = arith.constant 0 : index
    %39 = vector.load %arg3[%c1_45, %c2_46, %c0_47, %c0_48] : memref<3x3x128x128xbf16, #tpu.memory_space<vmem>>, vector<1x1x128x128xbf16>
    %40 = vector.shape_cast %39 : vector<1x1x128x128xbf16> to vector<128x128xbf16>
    %cst_49 = arith.constant dense<0.000000e+00> : vector<64x128xf32>
    %41 = tpu.matmul %38, %40, %cst_49 {dimension_numbers = #tpu.dot_dimension_numbers<[1], [0], [0], [1], [0, 0, 1, 1], [], []>} : vector<64x128xbf16>, vector<128x128xbf16>, vector<64x128xf32> -> vector<64x128xf32>
    %42 = arith.addf %35, %41 : vector<64x128xf32>
    %c0_50 = arith.constant 0 : index
    %c1_51 = arith.constant 1 : index
    %c0_52 = arith.constant 0 : index
    %c0_53 = arith.constant 0 : index
    %43 = vector.load %arg2[%c0_50, %c1_51, %c0_52, %c0_53] : memref<4x9x9x128xbf16, #tpu.memory_space<vmem>>, vector<1x8x8x128xbf16>
    %44 = vector.shape_cast %43 : vector<1x8x8x128xbf16> to vector<8x8x128xbf16>
    %45 = vector.shape_cast %44 : vector<8x8x128xbf16> to vector<64x128xbf16>
    %c2_54 = arith.constant 2 : index
    %c0_55 = arith.constant 0 : index
    %c0_56 = arith.constant 0 : index
    %c0_57 = arith.constant 0 : index
    %46 = vector.load %arg3[%c2_54, %c0_55, %c0_56, %c0_57] : memref<3x3x128x128xbf16, #tpu.memory_space<vmem>>, vector<1x1x128x128xbf16>
    %47 = vector.shape_cast %46 : vector<1x1x128x128xbf16> to vector<128x128xbf16>
    %cst_58 = arith.constant dense<0.000000e+00> : vector<64x128xf32>
    %48 = tpu.matmul %45, %47, %cst_58 {dimension_numbers = #tpu.dot_dimension_numbers<[1], [0], [0], [1], [0, 0, 1, 1], [], []>} : vector<64x128xbf16>, vector<128x128xbf16>, vector<64x128xf32> -> vector<64x128xf32>
    %49 = arith.addf %42, %48 : vector<64x128xf32>
    %c1_59 = arith.constant 1 : index
    %c1_60 = arith.constant 1 : index
    %c0_61 = arith.constant 0 : index
    %c0_62 = arith.constant 0 : index
    %50 = vector.load %arg2[%c1_59, %c1_60, %c0_61, %c0_62] : memref<4x9x9x128xbf16, #tpu.memory_space<vmem>>, vector<1x8x8x128xbf16>
    %51 = vector.shape_cast %50 : vector<1x8x8x128xbf16> to vector<8x8x128xbf16>
    %52 = vector.shape_cast %51 : vector<8x8x128xbf16> to vector<64x128xbf16>
    %c2_63 = arith.constant 2 : index
    %c1_64 = arith.constant 1 : index
    %c0_65 = arith.constant 0 : index
    %c0_66 = arith.constant 0 : index
    %53 = vector.load %arg3[%c2_63, %c1_64, %c0_65, %c0_66] : memref<3x3x128x128xbf16, #tpu.memory_space<vmem>>, vector<1x1x128x128xbf16>
    %54 = vector.shape_cast %53 : vector<1x1x128x128xbf16> to vector<128x128xbf16>
    %cst_67 = arith.constant dense<0.000000e+00> : vector<64x128xf32>
    %55 = tpu.matmul %52, %54, %cst_67 {dimension_numbers = #tpu.dot_dimension_numbers<[1], [0], [0], [1], [0, 0, 1, 1], [], []>} : vector<64x128xbf16>, vector<128x128xbf16>, vector<64x128xf32> -> vector<64x128xf32>
    %56 = arith.addf %49, %55 : vector<64x128xf32>
    %c0_68 = arith.constant 0 : index
    %c1_69 = arith.constant 1 : index
    %c1_70 = arith.constant 1 : index
    %c0_71 = arith.constant 0 : index
    %57 = vector.load %arg2[%c0_68, %c1_69, %c1_70, %c0_71] : memref<4x9x9x128xbf16, #tpu.memory_space<vmem>>, vector<1x8x8x128xbf16>
    %58 = vector.shape_cast %57 : vector<1x8x8x128xbf16> to vector<8x8x128xbf16>
    %59 = vector.shape_cast %58 : vector<8x8x128xbf16> to vector<64x128xbf16>
    %c2_72 = arith.constant 2 : index
    %c2_73 = arith.constant 2 : index
    %c0_74 = arith.constant 0 : index
    %c0_75 = arith.constant 0 : index
    %60 = vector.load %arg3[%c2_72, %c2_73, %c0_74, %c0_75] : memref<3x3x128x128xbf16, #tpu.memory_space<vmem>>, vector<1x1x128x128xbf16>
    %61 = vector.shape_cast %60 : vector<1x1x128x128xbf16> to vector<128x128xbf16>
    %cst_76 = arith.constant dense<0.000000e+00> : vector<64x128xf32>
    %62 = tpu.matmul %59, %61, %cst_76 {dimension_numbers = #tpu.dot_dimension_numbers<[1], [0], [0], [1], [0, 0, 1, 1], [], []>} : vector<64x128xbf16>, vector<128x128xbf16>, vector<64x128xf32> -> vector<64x128xf32>
    %63 = arith.addf %56, %62 : vector<64x128xf32>
    %cst_77 = arith.constant 0.000000e+00 : f32
    %64 = vector.broadcast %cst_77 : f32 to vector<64x128xf32>
    %65 = arith.maximumf %63, %64 : vector<64x128xf32>
    %66 = vector.shape_cast %65 : vector<64x128xf32> to vector<8x8x128xf32>
    %67 = arith.truncf %66 : vector<8x8x128xf32> to vector<8x8x128xbf16>
    %c0_78 = arith.constant 0 : index
    %c0_79 = arith.constant 0 : index
    %c0_80 = arith.constant 0 : index
    %c0_81 = arith.constant 0 : index
    %68 = vector.load %arg4[%c0_78, %c0_79, %c0_80, %c0_81] : memref<1x8x8x128xbf16, #tpu.memory_space<vmem>>, vector<1x8x8x128xbf16>
    %69 = vector.shape_cast %68 : vector<1x8x8x128xbf16> to vector<8x8x128xbf16>
    %70 = vector.shape_cast %67 : vector<8x8x128xbf16> to vector<1x8x8x128xbf16>
    tpu.vector_store %arg4[%c0_78, %c0_79, %c0_80, %c0_81], %70 {strides = array<i32>} : memref<1x8x8x128xbf16, #tpu.memory_space<vmem>>, vector<1x8x8x128xbf16>,
    return
  }
  func.func @transform_0(%arg0: i32, %arg1: i32) -> (i32, i32, i32, i32) {
    %c1_i32 = arith.constant 1 : i32
    %0 = arith.muli %arg0, %c1_i32 : i32
    %1 = arith.addi %0, %arg1 : i32
    %c0_i32 = arith.constant 0 : i32
    %c0_i32_0 = arith.constant 0 : i32
    %c0_i32_1 = arith.constant 0 : i32
    %c0_i32_2 = arith.constant 0 : i32
    return %1, %c0_i32, %c0_i32_0, %c0_i32_1 : i32, i32, i32, i32
  }
  func.func @transform_1(%arg0: i32, %arg1: i32) -> (i32, i32, i32, i32) {
    %c0_i32 = arith.constant 0 : i32
    %c0_i32_0 = arith.constant 0 : i32
    %c0_i32_1 = arith.constant 0 : i32
    %c0_i32_2 = arith.constant 0 : i32
    %c0_i32_3 = arith.constant 0 : i32
    return %c0_i32, %c0_i32_0, %c0_i32_1, %c0_i32_2 : i32, i32, i32, i32
  }
  func.func @transform_2(%arg0: i32, %arg1: i32) -> (i32, i32, i32, i32) {
    %c0_i32 = arith.constant 0 : i32
    %c0_i32_0 = arith.constant 0 : i32
    %c0_i32_1 = arith.constant 0 : i32
    return %arg0, %arg1, %c0_i32, %c0_i32_0 : i32, i32, i32, i32
  }
}

module attributes {stable_mosaic.version = 11 : i64} {
  func.func @kernel(%arg0: i32, %arg1: i32, %arg2: memref<1x10x10x128xbf16, #tpu.memory_space<vmem>>, %arg3: memref<3x3x128x128xbf16, #tpu.memory_space<vmem>>, %arg4: memref<1x8x8x128xbf16, #tpu.memory_space<vmem>>, %arg5: memref<1x1x2x128xf32, #tpu.memory_space<vmem>>) attributes {dimension_semantics = [#tpu.dimension_semantics<parallel>, #tpu.dimension_semantics<parallel>], iteration_bounds = array<i64: 2, 1>, scalar_prefetch = 0 : i64, scratch_operands = 0 : i64, tpu.core_type = #tpu.core_type<tc>, window_params = [{transform_indices = @transform_0, window_bounds = array<i64: 1, 10, 10, 128>}, {pipeline_mode = #tpu.pipeline_mode<synchronous>, transform_indices = @transform_1, window_bounds = array<i64: 3, 3, 128, 128>}, {transform_indices = @transform_2, window_bounds = array<i64: 1, 8, 8, 128>}, {transform_indices = @transform_3, window_bounds = array<i64: 1, 1, 2, 128>}]} {
    %cst = arith.constant 0.000000e+00 : f32
    %0 = vector.broadcast %cst : f32 to vector<64x128xf32>
    %c0 = arith.constant 0 : index
    %c0_0 = arith.constant 0 : index
    %c0_1 = arith.constant 0 : index
    %c0_2 = arith.constant 0 : index
    %1 = vector.load %arg2[%c0, %c0_0, %c0_1, %c0_2] : memref<1x10x10x128xbf16, #tpu.memory_space<vmem>>, vector<1x8x8x128xbf16>
    %2 = vector.shape_cast %1 : vector<1x8x8x128xbf16> to vector<8x8x128xbf16>
    %3 = vector.shape_cast %2 : vector<8x8x128xbf16> to vector<64x128xbf16>
    %c0_3 = arith.constant 0 : index
    %c0_4 = arith.constant 0 : index
    %c0_5 = arith.constant 0 : index
    %c0_6 = arith.constant 0 : index
    %4 = vector.load %arg3[%c0_3, %c0_4, %c0_5, %c0_6] : memref<3x3x128x128xbf16, #tpu.memory_space<vmem>>, vector<1x1x128x128xbf16>
    %5 = vector.shape_cast %4 : vector<1x1x128x128xbf16> to vector<128x128xbf16>
    %cst_7 = arith.constant dense<0.000000e+00> : vector<64x128xf32>
    %6 = tpu.matmul %3, %5, %cst_7 {dimension_numbers = #tpu.dot_dimension_numbers<[1], [0], [0], [1], [0, 0, 1, 1], [], []>} : vector<64x128xbf16>, vector<128x128xbf16>, vector<64x128xf32> -> vector<64x128xf32>
    %7 = arith.addf %0, %6 : vector<64x128xf32>
    %c0_8 = arith.constant 0 : index
    %c0_9 = arith.constant 0 : index
    %c1 = arith.constant 1 : index
    %c0_10 = arith.constant 0 : index
    %8 = vector.load %arg2[%c0_8, %c0_9, %c1, %c0_10] : memref<1x10x10x128xbf16, #tpu.memory_space<vmem>>, vector<1x8x8x128xbf16>
    %9 = vector.shape_cast %8 : vector<1x8x8x128xbf16> to vector<8x8x128xbf16>
    %10 = vector.shape_cast %9 : vector<8x8x128xbf16> to vector<64x128xbf16>
    %c0_11 = arith.constant 0 : index
    %c1_12 = arith.constant 1 : index
    %c0_13 = arith.constant 0 : index
    %c0_14 = arith.constant 0 : index
    %11 = vector.load %arg3[%c0_11, %c1_12, %c0_13, %c0_14] : memref<3x3x128x128xbf16, #tpu.memory_space<vmem>>, vector<1x1x128x128xbf16>
    %12 = vector.shape_cast %11 : vector<1x1x128x128xbf16> to vector<128x128xbf16>
    %cst_15 = arith.constant dense<0.000000e+00> : vector<64x128xf32>
    %13 = tpu.matmul %10, %12, %cst_15 {dimension_numbers = #tpu.dot_dimension_numbers<[1], [0], [0], [1], [0, 0, 1, 1], [], []>} : vector<64x128xbf16>, vector<128x128xbf16>, vector<64x128xf32> -> vector<64x128xf32>
    %14 = arith.addf %7, %13 : vector<64x128xf32>
    %c0_16 = arith.constant 0 : index
    %c0_17 = arith.constant 0 : index
    %c2 = arith.constant 2 : index
    %c0_18 = arith.constant 0 : index
    %15 = vector.load %arg2[%c0_16, %c0_17, %c2, %c0_18] : memref<1x10x10x128xbf16, #tpu.memory_space<vmem>>, vector<1x8x8x128xbf16>
    %16 = vector.shape_cast %15 : vector<1x8x8x128xbf16> to vector<8x8x128xbf16>
    %17 = vector.shape_cast %16 : vector<8x8x128xbf16> to vector<64x128xbf16>
    %c0_19 = arith.constant 0 : index
    %c2_20 = arith.constant 2 : index
    %c0_21 = arith.constant 0 : index
    %c0_22 = arith.constant 0 : index
    %18 = vector.load %arg3[%c0_19, %c2_20, %c0_21, %c0_22] : memref<3x3x128x128xbf16, #tpu.memory_space<vmem>>, vector<1x1x128x128xbf16>
    %19 = vector.shape_cast %18 : vector<1x1x128x128xbf16> to vector<128x128xbf16>
    %cst_23 = arith.constant dense<0.000000e+00> : vector<64x128xf32>
    %20 = tpu.matmul %17, %19, %cst_23 {dimension_numbers = #tpu.dot_dimension_numbers<[1], [0], [0], [1], [0, 0, 1, 1], [], []>} : vector<64x128xbf16>, vector<128x128xbf16>, vector<64x128xf32> -> vector<64x128xf32>
    %21 = arith.addf %14, %20 : vector<64x128xf32>
    %c0_24 = arith.constant 0 : index
    %c1_25 = arith.constant 1 : index
    %c0_26 = arith.constant 0 : index
    %c0_27 = arith.constant 0 : index
    %22 = vector.load %arg2[%c0_24, %c1_25, %c0_26, %c0_27] : memref<1x10x10x128xbf16, #tpu.memory_space<vmem>>, vector<1x8x8x128xbf16>
    %23 = vector.shape_cast %22 : vector<1x8x8x128xbf16> to vector<8x8x128xbf16>
    %24 = vector.shape_cast %23 : vector<8x8x128xbf16> to vector<64x128xbf16>
    %c1_28 = arith.constant 1 : index
    %c0_29 = arith.constant 0 : index
    %c0_30 = arith.constant 0 : index
    %c0_31 = arith.constant 0 : index
    %25 = vector.load %arg3[%c1_28, %c0_29, %c0_30, %c0_31] : memref<3x3x128x128xbf16, #tpu.memory_space<vmem>>, vector<1x1x128x128xbf16>
    %26 = vector.shape_cast %25 : vector<1x1x128x128xbf16> to vector<128x128xbf16>
    %cst_32 = arith.constant dense<0.000000e+00> : vector<64x128xf32>
    %27 = tpu.matmul %24, %26, %cst_32 {dimension_numbers = #tpu.dot_dimension_numbers<[1], [0], [0], [1], [0, 0, 1, 1], [], []>} : vector<64x128xbf16>, vector<128x128xbf16>, vector<64x128xf32> -> vector<64x128xf32>
    %28 = arith.addf %21, %27 : vector<64x128xf32>
    %c0_33 = arith.constant 0 : index
    %c1_34 = arith.constant 1 : index
    %c1_35 = arith.constant 1 : index
    %c0_36 = arith.constant 0 : index
    %29 = vector.load %arg2[%c0_33, %c1_34, %c1_35, %c0_36] : memref<1x10x10x128xbf16, #tpu.memory_space<vmem>>, vector<1x8x8x128xbf16>
    %30 = vector.shape_cast %29 : vector<1x8x8x128xbf16> to vector<8x8x128xbf16>
    %31 = vector.shape_cast %30 : vector<8x8x128xbf16> to vector<64x128xbf16>
    %c1_37 = arith.constant 1 : index
    %c1_38 = arith.constant 1 : index
    %c0_39 = arith.constant 0 : index
    %c0_40 = arith.constant 0 : index
    %32 = vector.load %arg3[%c1_37, %c1_38, %c0_39, %c0_40] : memref<3x3x128x128xbf16, #tpu.memory_space<vmem>>, vector<1x1x128x128xbf16>
    %33 = vector.shape_cast %32 : vector<1x1x128x128xbf16> to vector<128x128xbf16>
    %cst_41 = arith.constant dense<0.000000e+00> : vector<64x128xf32>
    %34 = tpu.matmul %31, %33, %cst_41 {dimension_numbers = #tpu.dot_dimension_numbers<[1], [0], [0], [1], [0, 0, 1, 1], [], []>} : vector<64x128xbf16>, vector<128x128xbf16>, vector<64x128xf32> -> vector<64x128xf32>
    %35 = arith.addf %28, %34 : vector<64x128xf32>
    %c0_42 = arith.constant 0 : index
    %c1_43 = arith.constant 1 : index
    %c2_44 = arith.constant 2 : index
    %c0_45 = arith.constant 0 : index
    %36 = vector.load %arg2[%c0_42, %c1_43, %c2_44, %c0_45] : memref<1x10x10x128xbf16, #tpu.memory_space<vmem>>, vector<1x8x8x128xbf16>
    %37 = vector.shape_cast %36 : vector<1x8x8x128xbf16> to vector<8x8x128xbf16>
    %38 = vector.shape_cast %37 : vector<8x8x128xbf16> to vector<64x128xbf16>
    %c1_46 = arith.constant 1 : index
    %c2_47 = arith.constant 2 : index
    %c0_48 = arith.constant 0 : index
    %c0_49 = arith.constant 0 : index
    %39 = vector.load %arg3[%c1_46, %c2_47, %c0_48, %c0_49] : memref<3x3x128x128xbf16, #tpu.memory_space<vmem>>, vector<1x1x128x128xbf16>
    %40 = vector.shape_cast %39 : vector<1x1x128x128xbf16> to vector<128x128xbf16>
    %cst_50 = arith.constant dense<0.000000e+00> : vector<64x128xf32>
    %41 = tpu.matmul %38, %40, %cst_50 {dimension_numbers = #tpu.dot_dimension_numbers<[1], [0], [0], [1], [0, 0, 1, 1], [], []>} : vector<64x128xbf16>, vector<128x128xbf16>, vector<64x128xf32> -> vector<64x128xf32>
    %42 = arith.addf %35, %41 : vector<64x128xf32>
    %c0_51 = arith.constant 0 : index
    %c2_52 = arith.constant 2 : index
    %c0_53 = arith.constant 0 : index
    %c0_54 = arith.constant 0 : index
    %43 = vector.load %arg2[%c0_51, %c2_52, %c0_53, %c0_54] : memref<1x10x10x128xbf16, #tpu.memory_space<vmem>>, vector<1x8x8x128xbf16>
    %44 = vector.shape_cast %43 : vector<1x8x8x128xbf16> to vector<8x8x128xbf16>
    %45 = vector.shape_cast %44 : vector<8x8x128xbf16> to vector<64x128xbf16>
    %c2_55 = arith.constant 2 : index
    %c0_56 = arith.constant 0 : index
    %c0_57 = arith.constant 0 : index
    %c0_58 = arith.constant 0 : index
    %46 = vector.load %arg3[%c2_55, %c0_56, %c0_57, %c0_58] : memref<3x3x128x128xbf16, #tpu.memory_space<vmem>>, vector<1x1x128x128xbf16>
    %47 = vector.shape_cast %46 : vector<1x1x128x128xbf16> to vector<128x128xbf16>
    %cst_59 = arith.constant dense<0.000000e+00> : vector<64x128xf32>
    %48 = tpu.matmul %45, %47, %cst_59 {dimension_numbers = #tpu.dot_dimension_numbers<[1], [0], [0], [1], [0, 0, 1, 1], [], []>} : vector<64x128xbf16>, vector<128x128xbf16>, vector<64x128xf32> -> vector<64x128xf32>
    %49 = arith.addf %42, %48 : vector<64x128xf32>
    %c0_60 = arith.constant 0 : index
    %c2_61 = arith.constant 2 : index
    %c1_62 = arith.constant 1 : index
    %c0_63 = arith.constant 0 : index
    %50 = vector.load %arg2[%c0_60, %c2_61, %c1_62, %c0_63] : memref<1x10x10x128xbf16, #tpu.memory_space<vmem>>, vector<1x8x8x128xbf16>
    %51 = vector.shape_cast %50 : vector<1x8x8x128xbf16> to vector<8x8x128xbf16>
    %52 = vector.shape_cast %51 : vector<8x8x128xbf16> to vector<64x128xbf16>
    %c2_64 = arith.constant 2 : index
    %c1_65 = arith.constant 1 : index
    %c0_66 = arith.constant 0 : index
    %c0_67 = arith.constant 0 : index
    %53 = vector.load %arg3[%c2_64, %c1_65, %c0_66, %c0_67] : memref<3x3x128x128xbf16, #tpu.memory_space<vmem>>, vector<1x1x128x128xbf16>
    %54 = vector.shape_cast %53 : vector<1x1x128x128xbf16> to vector<128x128xbf16>
    %cst_68 = arith.constant dense<0.000000e+00> : vector<64x128xf32>
    %55 = tpu.matmul %52, %54, %cst_68 {dimension_numbers = #tpu.dot_dimension_numbers<[1], [0], [0], [1], [0, 0, 1, 1], [], []>} : vector<64x128xbf16>, vector<128x128xbf16>, vector<64x128xf32> -> vector<64x128xf32>
    %56 = arith.addf %49, %55 : vector<64x128xf32>
    %c0_69 = arith.constant 0 : index
    %c2_70 = arith.constant 2 : index
    %c2_71 = arith.constant 2 : index
    %c0_72 = arith.constant 0 : index
    %57 = vector.load %arg2[%c0_69, %c2_70, %c2_71, %c0_72] : memref<1x10x10x128xbf16, #tpu.memory_space<vmem>>, vector<1x8x8x128xbf16>
    %58 = vector.shape_cast %57 : vector<1x8x8x128xbf16> to vector<8x8x128xbf16>
    %59 = vector.shape_cast %58 : vector<8x8x128xbf16> to vector<64x128xbf16>
    %c2_73 = arith.constant 2 : index
    %c2_74 = arith.constant 2 : index
    %c0_75 = arith.constant 0 : index
    %c0_76 = arith.constant 0 : index
    %60 = vector.load %arg3[%c2_73, %c2_74, %c0_75, %c0_76] : memref<3x3x128x128xbf16, #tpu.memory_space<vmem>>, vector<1x1x128x128xbf16>
    %61 = vector.shape_cast %60 : vector<1x1x128x128xbf16> to vector<128x128xbf16>
    %cst_77 = arith.constant dense<0.000000e+00> : vector<64x128xf32>
    %62 = tpu.matmul %59, %61, %cst_77 {dimension_numbers = #tpu.dot_dimension_numbers<[1], [0], [0], [1], [0, 0, 1, 1], [], []>} : vector<64x128xbf16>, vector<128x128xbf16>, vector<64x128xf32> -> vector<64x128xf32>
    %63 = arith.addf %56, %62 : vector<64x128xf32>
    %cst_78 = arith.constant dense<0.000000e+00> : vector<128xf32>
    %64 = vector.multi_reduction <add>, %63, %cst_78 [0] : vector<64x128xf32> to vector<128xf32>
    %65 = vector.shape_cast %64 : vector<128xf32> to vector<1x128xf32>
    %66 = arith.mulf %63, %63 : vector<64x128xf32>
    %cst_79 = arith.constant dense<0.000000e+00> : vector<128xf32>
    %67 = vector.multi_reduction <add>, %66, %cst_79 [0] : vector<64x128xf32> to vector<128xf32>
    %68 = vector.shape_cast %67 : vector<128xf32> to vector<1x128xf32>
    %69 = tpu.concatenate %65, %68 in 0 : vector<1x128xf32>, vector<1x128xf32> -> vector<2x128xf32>
    %c0_80 = arith.constant 0 : index
    %c0_81 = arith.constant 0 : index
    %c0_82 = arith.constant 0 : index
    %c0_83 = arith.constant 0 : index
    %70 = vector.load %arg5[%c0_80, %c0_81, %c0_82, %c0_83] : memref<1x1x2x128xf32, #tpu.memory_space<vmem>>, vector<1x1x2x128xf32>
    %71 = vector.shape_cast %70 : vector<1x1x2x128xf32> to vector<2x128xf32>
    %72 = vector.shape_cast %69 : vector<2x128xf32> to vector<1x1x2x128xf32>
    tpu.vector_store %arg5[%c0_80, %c0_81, %c0_82, %c0_83], %72 {strides = array<i32>} : memref<1x1x2x128xf32, #tpu.memory_space<vmem>>, vector<1x1x2x128xf32>,
    %73 = vector.shape_cast %63 : vector<64x128xf32> to vector<8x8x128xf32>
    %74 = arith.truncf %73 : vector<8x8x128xf32> to vector<8x8x128xbf16>
    %c0_84 = arith.constant 0 : index
    %c0_85 = arith.constant 0 : index
    %c0_86 = arith.constant 0 : index
    %c0_87 = arith.constant 0 : index
    %75 = vector.load %arg4[%c0_84, %c0_85, %c0_86, %c0_87] : memref<1x8x8x128xbf16, #tpu.memory_space<vmem>>, vector<1x8x8x128xbf16>
    %76 = vector.shape_cast %75 : vector<1x8x8x128xbf16> to vector<8x8x128xbf16>
    %77 = vector.shape_cast %74 : vector<8x8x128xbf16> to vector<1x8x8x128xbf16>
    tpu.vector_store %arg4[%c0_84, %c0_85, %c0_86, %c0_87], %77 {strides = array<i32>} : memref<1x8x8x128xbf16, #tpu.memory_space<vmem>>, vector<1x8x8x128xbf16>,
    return
  }
  func.func @transform_0(%arg0: i32, %arg1: i32) -> (i32, i32, i32, i32) {
    %c1_i32 = arith.constant 1 : i32
    %0 = arith.muli %arg0, %c1_i32 : i32
    %1 = arith.addi %0, %arg1 : i32
    %c0_i32 = arith.constant 0 : i32
    %c0_i32_0 = arith.constant 0 : i32
    %c0_i32_1 = arith.constant 0 : i32
    %c0_i32_2 = arith.constant 0 : i32
    return %1, %c0_i32, %c0_i32_0, %c0_i32_1 : i32, i32, i32, i32
  }
  func.func @transform_1(%arg0: i32, %arg1: i32) -> (i32, i32, i32, i32) {
    %c0_i32 = arith.constant 0 : i32
    %c0_i32_0 = arith.constant 0 : i32
    %c0_i32_1 = arith.constant 0 : i32
    %c0_i32_2 = arith.constant 0 : i32
    %c0_i32_3 = arith.constant 0 : i32
    return %c0_i32, %c0_i32_0, %c0_i32_1, %c0_i32_2 : i32, i32, i32, i32
  }
  func.func @transform_2(%arg0: i32, %arg1: i32) -> (i32, i32, i32, i32) {
    %c0_i32 = arith.constant 0 : i32
    %c0_i32_0 = arith.constant 0 : i32
    %c0_i32_1 = arith.constant 0 : i32
    return %arg0, %arg1, %c0_i32, %c0_i32_0 : i32, i32, i32, i32
  }
  func.func @transform_3(%arg0: i32, %arg1: i32) -> (i32, i32, i32, i32) {
    %c0_i32 = arith.constant 0 : i32
    %c0_i32_0 = arith.constant 0 : i32
    %c0_i32_1 = arith.constant 0 : i32
    return %arg0, %arg1, %c0_i32, %c0_i32_0 : i32, i32, i32, i32
  }
}

module attributes {stable_mosaic.version = 11 : i64} {
  func.func @kernel(%arg0: i32, %arg1: memref<128x128xbf16, #tpu.memory_space<vmem>>, %arg2: memref<1x128xf32, #tpu.memory_space<vmem>>, %arg3: memref<1x128xf32, #tpu.memory_space<vmem>>, %arg4: memref<128x128xbf16, #tpu.memory_space<vmem>>) attributes {dimension_semantics = [#tpu.dimension_semantics<parallel>], iteration_bounds = array<i64: 1>, scalar_prefetch = 0 : i64, scratch_operands = 0 : i64, tpu.core_type = #tpu.core_type<tc>, window_params = [{transform_indices = @transform_0, window_bounds = array<i64: 128, 128>}, {pipeline_mode = #tpu.pipeline_mode<synchronous>, transform_indices = @transform_1, window_bounds = array<i64: 1, 128>}, {pipeline_mode = #tpu.pipeline_mode<synchronous>, transform_indices = @transform_2, window_bounds = array<i64: 1, 128>}, {transform_indices = @transform_3, window_bounds = array<i64: 128, 128>}]} {
    %c0 = arith.constant 0 : index
    %c0_0 = arith.constant 0 : index
    %0 = vector.load %arg1[%c0, %c0_0] : memref<128x128xbf16, #tpu.memory_space<vmem>>, vector<128x128xbf16>
    %1 = arith.extf %0 : vector<128x128xbf16> to vector<128x128xf32>
    %c0_1 = arith.constant 0 : index
    %c0_2 = arith.constant 0 : index
    %2 = vector.load %arg2[%c0_1, %c0_2] : memref<1x128xf32, #tpu.memory_space<vmem>>, vector<1x128xf32>
    %3 = vector.broadcast %2 : vector<1x128xf32> to vector<128x128xf32>
    %4 = arith.mulf %1, %3 : vector<128x128xf32>
    %c0_3 = arith.constant 0 : index
    %c0_4 = arith.constant 0 : index
    %5 = vector.load %arg3[%c0_3, %c0_4] : memref<1x128xf32, #tpu.memory_space<vmem>>, vector<1x128xf32>
    %6 = vector.broadcast %5 : vector<1x128xf32> to vector<128x128xf32>
    %7 = arith.addf %4, %6 : vector<128x128xf32>
    %cst = arith.constant 0.000000e+00 : f32
    %8 = vector.broadcast %cst : f32 to vector<128x128xf32>
    %9 = arith.maximumf %7, %8 : vector<128x128xf32>
    %10 = arith.truncf %9 : vector<128x128xf32> to vector<128x128xbf16>
    %c0_5 = arith.constant 0 : index
    %c0_6 = arith.constant 0 : index
    %11 = vector.load %arg4[%c0_5, %c0_6] : memref<128x128xbf16, #tpu.memory_space<vmem>>, vector<128x128xbf16>
    tpu.vector_store %arg4[%c0_5, %c0_6], %10 {strides = array<i32>} : memref<128x128xbf16, #tpu.memory_space<vmem>>, vector<128x128xbf16>,
    return
  }
  func.func @transform_0(%arg0: i32) -> (i32, i32) {
    %c0_i32 = arith.constant 0 : i32
    %c0_i32_0 = arith.constant 0 : i32
    return %arg0, %c0_i32 : i32, i32
  }
  func.func @transform_1(%arg0: i32) -> (i32, i32) {
    %c0_i32 = arith.constant 0 : i32
    %c0_i32_0 = arith.constant 0 : i32
    %c0_i32_1 = arith.constant 0 : i32
    return %c0_i32, %c0_i32_0 : i32, i32
  }
  func.func @transform_2(%arg0: i32) -> (i32, i32) {
    %c0_i32 = arith.constant 0 : i32
    %c0_i32_0 = arith.constant 0 : i32
    %c0_i32_1 = arith.constant 0 : i32
    return %c0_i32, %c0_i32_0 : i32, i32
  }
  func.func @transform_3(%arg0: i32) -> (i32, i32) {
    %c0_i32 = arith.constant 0 : i32
    %c0_i32_0 = arith.constant 0 : i32
    return %arg0, %c0_i32 : i32, i32
  }
}

module attributes {stable_mosaic.version = 11 : i64} {
  func.func @kernel(%arg0: i32, %arg1: memref<128x128xbf16, #tpu.memory_space<vmem>>, %arg2: memref<1x128xf32, #tpu.memory_space<vmem>>, %arg3: memref<1x128xf32, #tpu.memory_space<vmem>>, %arg4: memref<128x128xbf16, #tpu.memory_space<vmem>>, %arg5: memref<128x128xbf16, #tpu.memory_space<vmem>>) attributes {dimension_semantics = [#tpu.dimension_semantics<parallel>], iteration_bounds = array<i64: 1>, scalar_prefetch = 0 : i64, scratch_operands = 0 : i64, tpu.core_type = #tpu.core_type<tc>, window_params = [{transform_indices = @transform_0, window_bounds = array<i64: 128, 128>}, {pipeline_mode = #tpu.pipeline_mode<synchronous>, transform_indices = @transform_1, window_bounds = array<i64: 1, 128>}, {pipeline_mode = #tpu.pipeline_mode<synchronous>, transform_indices = @transform_2, window_bounds = array<i64: 1, 128>}, {transform_indices = @transform_3, window_bounds = array<i64: 128, 128>}, {transform_indices = @transform_4, window_bounds = array<i64: 128, 128>}]} {
    %c0 = arith.constant 0 : index
    %c0_0 = arith.constant 0 : index
    %0 = vector.load %arg1[%c0, %c0_0] : memref<128x128xbf16, #tpu.memory_space<vmem>>, vector<128x128xbf16>
    %1 = arith.extf %0 : vector<128x128xbf16> to vector<128x128xf32>
    %c0_1 = arith.constant 0 : index
    %c0_2 = arith.constant 0 : index
    %2 = vector.load %arg2[%c0_1, %c0_2] : memref<1x128xf32, #tpu.memory_space<vmem>>, vector<1x128xf32>
    %3 = vector.broadcast %2 : vector<1x128xf32> to vector<128x128xf32>
    %4 = arith.mulf %1, %3 : vector<128x128xf32>
    %c0_3 = arith.constant 0 : index
    %c0_4 = arith.constant 0 : index
    %5 = vector.load %arg3[%c0_3, %c0_4] : memref<1x128xf32, #tpu.memory_space<vmem>>, vector<1x128xf32>
    %6 = vector.broadcast %5 : vector<1x128xf32> to vector<128x128xf32>
    %7 = arith.addf %4, %6 : vector<128x128xf32>
    %c0_5 = arith.constant 0 : index
    %c0_6 = arith.constant 0 : index
    %8 = vector.load %arg4[%c0_5, %c0_6] : memref<128x128xbf16, #tpu.memory_space<vmem>>, vector<128x128xbf16>
    %9 = arith.extf %8 : vector<128x128xbf16> to vector<128x128xf32>
    %10 = arith.addf %7, %9 : vector<128x128xf32>
    %cst = arith.constant 0.000000e+00 : f32
    %11 = vector.broadcast %cst : f32 to vector<128x128xf32>
    %12 = arith.maximumf %10, %11 : vector<128x128xf32>
    %13 = arith.truncf %12 : vector<128x128xf32> to vector<128x128xbf16>
    %c0_7 = arith.constant 0 : index
    %c0_8 = arith.constant 0 : index
    %14 = vector.load %arg5[%c0_7, %c0_8] : memref<128x128xbf16, #tpu.memory_space<vmem>>, vector<128x128xbf16>
    tpu.vector_store %arg5[%c0_7, %c0_8], %13 {strides = array<i32>} : memref<128x128xbf16, #tpu.memory_space<vmem>>, vector<128x128xbf16>,
    return
  }
  func.func @transform_0(%arg0: i32) -> (i32, i32) {
    %c0_i32 = arith.constant 0 : i32
    %c0_i32_0 = arith.constant 0 : i32
    return %arg0, %c0_i32 : i32, i32
  }
  func.func @transform_1(%arg0: i32) -> (i32, i32) {
    %c0_i32 = arith.constant 0 : i32
    %c0_i32_0 = arith.constant 0 : i32
    %c0_i32_1 = arith.constant 0 : i32
    return %c0_i32, %c0_i32_0 : i32, i32
  }
  func.func @transform_2(%arg0: i32) -> (i32, i32) {
    %c0_i32 = arith.constant 0 : i32
    %c0_i32_0 = arith.constant 0 : i32
    %c0_i32_1 = arith.constant 0 : i32
    return %c0_i32, %c0_i32_0 : i32, i32
  }
  func.func @transform_3(%arg0: i32) -> (i32, i32) {
    %c0_i32 = arith.constant 0 : i32
    %c0_i32_0 = arith.constant 0 : i32
    return %arg0, %c0_i32 : i32, i32
  }
  func.func @transform_4(%arg0: i32) -> (i32, i32) {
    %c0_i32 = arith.constant 0 : i32
    %c0_i32_0 = arith.constant 0 : i32
    return %arg0, %c0_i32 : i32, i32
  }
}

module attributes {stable_mosaic.version = 11 : i64} {
  func.func @kernel(%arg0: i32, %arg1: i32, %arg2: memref<1x18x18x128xbf16, #tpu.memory_space<vmem>>, %arg3: memref<3x3x128x128xbf16, #tpu.memory_space<vmem>>, %arg4: memref<1x16x16x128xbf16, #tpu.memory_space<vmem>>, %arg5: memref<1x1x2x128xf32, #tpu.memory_space<vmem>>) attributes {dimension_semantics = [#tpu.dimension_semantics<parallel>, #tpu.dimension_semantics<parallel>], iteration_bounds = array<i64: 2, 1>, scalar_prefetch = 0 : i64, scratch_operands = 0 : i64, tpu.core_type = #tpu.core_type<tc>, window_params = [{transform_indices = @transform_0, window_bounds = array<i64: 1, 18, 18, 128>}, {pipeline_mode = #tpu.pipeline_mode<synchronous>, transform_indices = @transform_1, window_bounds = array<i64: 3, 3, 128, 128>}, {transform_indices = @transform_2, window_bounds = array<i64: 1, 16, 16, 128>}, {transform_indices = @transform_3, window_bounds = array<i64: 1, 1, 2, 128>}]} {
    %cst = arith.constant 0.000000e+00 : f32
    %0 = vector.broadcast %cst : f32 to vector<256x128xf32>
    %c0 = arith.constant 0 : index
    %c0_0 = arith.constant 0 : index
    %c0_1 = arith.constant 0 : index
    %c0_2 = arith.constant 0 : index
    %1 = vector.load %arg2[%c0, %c0_0, %c0_1, %c0_2] : memref<1x18x18x128xbf16, #tpu.memory_space<vmem>>, vector<1x16x16x128xbf16>
    %2 = vector.shape_cast %1 : vector<1x16x16x128xbf16> to vector<16x16x128xbf16>
    %3 = vector.shape_cast %2 : vector<16x16x128xbf16> to vector<256x128xbf16>
    %c0_3 = arith.constant 0 : index
    %c0_4 = arith.constant 0 : index
    %c0_5 = arith.constant 0 : index
    %c0_6 = arith.constant 0 : index
    %4 = vector.load %arg3[%c0_3, %c0_4, %c0_5, %c0_6] : memref<3x3x128x128xbf16, #tpu.memory_space<vmem>>, vector<1x1x128x128xbf16>
    %5 = vector.shape_cast %4 : vector<1x1x128x128xbf16> to vector<128x128xbf16>
    %cst_7 = arith.constant dense<0.000000e+00> : vector<256x128xf32>
    %6 = tpu.matmul %3, %5, %cst_7 {dimension_numbers = #tpu.dot_dimension_numbers<[1], [0], [0], [1], [0, 0, 1, 1], [], []>} : vector<256x128xbf16>, vector<128x128xbf16>, vector<256x128xf32> -> vector<256x128xf32>
    %7 = arith.addf %0, %6 : vector<256x128xf32>
    %c0_8 = arith.constant 0 : index
    %c0_9 = arith.constant 0 : index
    %c1 = arith.constant 1 : index
    %c0_10 = arith.constant 0 : index
    %8 = vector.load %arg2[%c0_8, %c0_9, %c1, %c0_10] : memref<1x18x18x128xbf16, #tpu.memory_space<vmem>>, vector<1x16x16x128xbf16>
    %9 = vector.shape_cast %8 : vector<1x16x16x128xbf16> to vector<16x16x128xbf16>
    %10 = vector.shape_cast %9 : vector<16x16x128xbf16> to vector<256x128xbf16>
    %c0_11 = arith.constant 0 : index
    %c1_12 = arith.constant 1 : index
    %c0_13 = arith.constant 0 : index
    %c0_14 = arith.constant 0 : index
    %11 = vector.load %arg3[%c0_11, %c1_12, %c0_13, %c0_14] : memref<3x3x128x128xbf16, #tpu.memory_space<vmem>>, vector<1x1x128x128xbf16>
    %12 = vector.shape_cast %11 : vector<1x1x128x128xbf16> to vector<128x128xbf16>
    %cst_15 = arith.constant dense<0.000000e+00> : vector<256x128xf32>
    %13 = tpu.matmul %10, %12, %cst_15 {dimension_numbers = #tpu.dot_dimension_numbers<[1], [0], [0], [1], [0, 0, 1, 1], [], []>} : vector<256x128xbf16>, vector<128x128xbf16>, vector<256x128xf32> -> vector<256x128xf32>
    %14 = arith.addf %7, %13 : vector<256x128xf32>
    %c0_16 = arith.constant 0 : index
    %c0_17 = arith.constant 0 : index
    %c2 = arith.constant 2 : index
    %c0_18 = arith.constant 0 : index
    %15 = vector.load %arg2[%c0_16, %c0_17, %c2, %c0_18] : memref<1x18x18x128xbf16, #tpu.memory_space<vmem>>, vector<1x16x16x128xbf16>
    %16 = vector.shape_cast %15 : vector<1x16x16x128xbf16> to vector<16x16x128xbf16>
    %17 = vector.shape_cast %16 : vector<16x16x128xbf16> to vector<256x128xbf16>
    %c0_19 = arith.constant 0 : index
    %c2_20 = arith.constant 2 : index
    %c0_21 = arith.constant 0 : index
    %c0_22 = arith.constant 0 : index
    %18 = vector.load %arg3[%c0_19, %c2_20, %c0_21, %c0_22] : memref<3x3x128x128xbf16, #tpu.memory_space<vmem>>, vector<1x1x128x128xbf16>
    %19 = vector.shape_cast %18 : vector<1x1x128x128xbf16> to vector<128x128xbf16>
    %cst_23 = arith.constant dense<0.000000e+00> : vector<256x128xf32>
    %20 = tpu.matmul %17, %19, %cst_23 {dimension_numbers = #tpu.dot_dimension_numbers<[1], [0], [0], [1], [0, 0, 1, 1], [], []>} : vector<256x128xbf16>, vector<128x128xbf16>, vector<256x128xf32> -> vector<256x128xf32>
    %21 = arith.addf %14, %20 : vector<256x128xf32>
    %c0_24 = arith.constant 0 : index
    %c1_25 = arith.constant 1 : index
    %c0_26 = arith.constant 0 : index
    %c0_27 = arith.constant 0 : index
    %22 = vector.load %arg2[%c0_24, %c1_25, %c0_26, %c0_27] : memref<1x18x18x128xbf16, #tpu.memory_space<vmem>>, vector<1x16x16x128xbf16>
    %23 = vector.shape_cast %22 : vector<1x16x16x128xbf16> to vector<16x16x128xbf16>
    %24 = vector.shape_cast %23 : vector<16x16x128xbf16> to vector<256x128xbf16>
    %c1_28 = arith.constant 1 : index
    %c0_29 = arith.constant 0 : index
    %c0_30 = arith.constant 0 : index
    %c0_31 = arith.constant 0 : index
    %25 = vector.load %arg3[%c1_28, %c0_29, %c0_30, %c0_31] : memref<3x3x128x128xbf16, #tpu.memory_space<vmem>>, vector<1x1x128x128xbf16>
    %26 = vector.shape_cast %25 : vector<1x1x128x128xbf16> to vector<128x128xbf16>
    %cst_32 = arith.constant dense<0.000000e+00> : vector<256x128xf32>
    %27 = tpu.matmul %24, %26, %cst_32 {dimension_numbers = #tpu.dot_dimension_numbers<[1], [0], [0], [1], [0, 0, 1, 1], [], []>} : vector<256x128xbf16>, vector<128x128xbf16>, vector<256x128xf32> -> vector<256x128xf32>
    %28 = arith.addf %21, %27 : vector<256x128xf32>
    %c0_33 = arith.constant 0 : index
    %c1_34 = arith.constant 1 : index
    %c1_35 = arith.constant 1 : index
    %c0_36 = arith.constant 0 : index
    %29 = vector.load %arg2[%c0_33, %c1_34, %c1_35, %c0_36] : memref<1x18x18x128xbf16, #tpu.memory_space<vmem>>, vector<1x16x16x128xbf16>
    %30 = vector.shape_cast %29 : vector<1x16x16x128xbf16> to vector<16x16x128xbf16>
    %31 = vector.shape_cast %30 : vector<16x16x128xbf16> to vector<256x128xbf16>
    %c1_37 = arith.constant 1 : index
    %c1_38 = arith.constant 1 : index
    %c0_39 = arith.constant 0 : index
    %c0_40 = arith.constant 0 : index
    %32 = vector.load %arg3[%c1_37, %c1_38, %c0_39, %c0_40] : memref<3x3x128x128xbf16, #tpu.memory_space<vmem>>, vector<1x1x128x128xbf16>
    %33 = vector.shape_cast %32 : vector<1x1x128x128xbf16> to vector<128x128xbf16>
    %cst_41 = arith.constant dense<0.000000e+00> : vector<256x128xf32>
    %34 = tpu.matmul %31, %33, %cst_41 {dimension_numbers = #tpu.dot_dimension_numbers<[1], [0], [0], [1], [0, 0, 1, 1], [], []>} : vector<256x128xbf16>, vector<128x128xbf16>, vector<256x128xf32> -> vector<256x128xf32>
    %35 = arith.addf %28, %34 : vector<256x128xf32>
    %c0_42 = arith.constant 0 : index
    %c1_43 = arith.constant 1 : index
    %c2_44 = arith.constant 2 : index
    %c0_45 = arith.constant 0 : index
    %36 = vector.load %arg2[%c0_42, %c1_43, %c2_44, %c0_45] : memref<1x18x18x128xbf16, #tpu.memory_space<vmem>>, vector<1x16x16x128xbf16>
    %37 = vector.shape_cast %36 : vector<1x16x16x128xbf16> to vector<16x16x128xbf16>
    %38 = vector.shape_cast %37 : vector<16x16x128xbf16> to vector<256x128xbf16>
    %c1_46 = arith.constant 1 : index
    %c2_47 = arith.constant 2 : index
    %c0_48 = arith.constant 0 : index
    %c0_49 = arith.constant 0 : index
    %39 = vector.load %arg3[%c1_46, %c2_47, %c0_48, %c0_49] : memref<3x3x128x128xbf16, #tpu.memory_space<vmem>>, vector<1x1x128x128xbf16>
    %40 = vector.shape_cast %39 : vector<1x1x128x128xbf16> to vector<128x128xbf16>
    %cst_50 = arith.constant dense<0.000000e+00> : vector<256x128xf32>
    %41 = tpu.matmul %38, %40, %cst_50 {dimension_numbers = #tpu.dot_dimension_numbers<[1], [0], [0], [1], [0, 0, 1, 1], [], []>} : vector<256x128xbf16>, vector<128x128xbf16>, vector<256x128xf32> -> vector<256x128xf32>
    %42 = arith.addf %35, %41 : vector<256x128xf32>
    %c0_51 = arith.constant 0 : index
    %c2_52 = arith.constant 2 : index
    %c0_53 = arith.constant 0 : index
    %c0_54 = arith.constant 0 : index
    %43 = vector.load %arg2[%c0_51, %c2_52, %c0_53, %c0_54] : memref<1x18x18x128xbf16, #tpu.memory_space<vmem>>, vector<1x16x16x128xbf16>
    %44 = vector.shape_cast %43 : vector<1x16x16x128xbf16> to vector<16x16x128xbf16>
    %45 = vector.shape_cast %44 : vector<16x16x128xbf16> to vector<256x128xbf16>
    %c2_55 = arith.constant 2 : index
    %c0_56 = arith.constant 0 : index
    %c0_57 = arith.constant 0 : index
    %c0_58 = arith.constant 0 : index
    %46 = vector.load %arg3[%c2_55, %c0_56, %c0_57, %c0_58] : memref<3x3x128x128xbf16, #tpu.memory_space<vmem>>, vector<1x1x128x128xbf16>
    %47 = vector.shape_cast %46 : vector<1x1x128x128xbf16> to vector<128x128xbf16>
    %cst_59 = arith.constant dense<0.000000e+00> : vector<256x128xf32>
    %48 = tpu.matmul %45, %47, %cst_59 {dimension_numbers = #tpu.dot_dimension_numbers<[1], [0], [0], [1], [0, 0, 1, 1], [], []>} : vector<256x128xbf16>, vector<128x128xbf16>, vector<256x128xf32> -> vector<256x128xf32>
    %49 = arith.addf %42, %48 : vector<256x128xf32>
    %c0_60 = arith.constant 0 : index
    %c2_61 = arith.constant 2 : index
    %c1_62 = arith.constant 1 : index
    %c0_63 = arith.constant 0 : index
    %50 = vector.load %arg2[%c0_60, %c2_61, %c1_62, %c0_63] : memref<1x18x18x128xbf16, #tpu.memory_space<vmem>>, vector<1x16x16x128xbf16>
    %51 = vector.shape_cast %50 : vector<1x16x16x128xbf16> to vector<16x16x128xbf16>
    %52 = vector.shape_cast %51 : vector<16x16x128xbf16> to vector<256x128xbf16>
    %c2_64 = arith.constant 2 : index
    %c1_65 = arith.constant 1 : index
    %c0_66 = arith.constant 0 : index
    %c0_67 = arith.constant 0 : index
    %53 = vector.load %arg3[%c2_64, %c1_65, %c0_66, %c0_67] : memref<3x3x128x128xbf16, #tpu.memory_space<vmem>>, vector<1x1x128x128xbf16>
    %54 = vector.shape_cast %53 : vector<1x1x128x128xbf16> to vector<128x128xbf16>
    %cst_68 = arith.constant dense<0.000000e+00> : vector<256x128xf32>
    %55 = tpu.matmul %52, %54, %cst_68 {dimension_numbers = #tpu.dot_dimension_numbers<[1], [0], [0], [1], [0, 0, 1, 1], [], []>} : vector<256x128xbf16>, vector<128x128xbf16>, vector<256x128xf32> -> vector<256x128xf32>
    %56 = arith.addf %49, %55 : vector<256x128xf32>
    %c0_69 = arith.constant 0 : index
    %c2_70 = arith.constant 2 : index
    %c2_71 = arith.constant 2 : index
    %c0_72 = arith.constant 0 : index
    %57 = vector.load %arg2[%c0_69, %c2_70, %c2_71, %c0_72] : memref<1x18x18x128xbf16, #tpu.memory_space<vmem>>, vector<1x16x16x128xbf16>
    %58 = vector.shape_cast %57 : vector<1x16x16x128xbf16> to vector<16x16x128xbf16>
    %59 = vector.shape_cast %58 : vector<16x16x128xbf16> to vector<256x128xbf16>
    %c2_73 = arith.constant 2 : index
    %c2_74 = arith.constant 2 : index
    %c0_75 = arith.constant 0 : index
    %c0_76 = arith.constant 0 : index
    %60 = vector.load %arg3[%c2_73, %c2_74, %c0_75, %c0_76] : memref<3x3x128x128xbf16, #tpu.memory_space<vmem>>, vector<1x1x128x128xbf16>
    %61 = vector.shape_cast %60 : vector<1x1x128x128xbf16> to vector<128x128xbf16>
    %cst_77 = arith.constant dense<0.000000e+00> : vector<256x128xf32>
    %62 = tpu.matmul %59, %61, %cst_77 {dimension_numbers = #tpu.dot_dimension_numbers<[1], [0], [0], [1], [0, 0, 1, 1], [], []>} : vector<256x128xbf16>, vector<128x128xbf16>, vector<256x128xf32> -> vector<256x128xf32>
    %63 = arith.addf %56, %62 : vector<256x128xf32>
    %cst_78 = arith.constant dense<0.000000e+00> : vector<128xf32>
    %64 = vector.multi_reduction <add>, %63, %cst_78 [0] : vector<256x128xf32> to vector<128xf32>
    %65 = vector.shape_cast %64 : vector<128xf32> to vector<1x128xf32>
    %66 = arith.mulf %63, %63 : vector<256x128xf32>
    %cst_79 = arith.constant dense<0.000000e+00> : vector<128xf32>
    %67 = vector.multi_reduction <add>, %66, %cst_79 [0] : vector<256x128xf32> to vector<128xf32>
    %68 = vector.shape_cast %67 : vector<128xf32> to vector<1x128xf32>
    %69 = tpu.concatenate %65, %68 in 0 : vector<1x128xf32>, vector<1x128xf32> -> vector<2x128xf32>
    %c0_80 = arith.constant 0 : index
    %c0_81 = arith.constant 0 : index
    %c0_82 = arith.constant 0 : index
    %c0_83 = arith.constant 0 : index
    %70 = vector.load %arg5[%c0_80, %c0_81, %c0_82, %c0_83] : memref<1x1x2x128xf32, #tpu.memory_space<vmem>>, vector<1x1x2x128xf32>
    %71 = vector.shape_cast %70 : vector<1x1x2x128xf32> to vector<2x128xf32>
    %72 = vector.shape_cast %69 : vector<2x128xf32> to vector<1x1x2x128xf32>
    tpu.vector_store %arg5[%c0_80, %c0_81, %c0_82, %c0_83], %72 {strides = array<i32>} : memref<1x1x2x128xf32, #tpu.memory_space<vmem>>, vector<1x1x2x128xf32>,
    %73 = vector.shape_cast %63 : vector<256x128xf32> to vector<16x16x128xf32>
    %74 = arith.truncf %73 : vector<16x16x128xf32> to vector<16x16x128xbf16>
    %c0_84 = arith.constant 0 : index
    %c0_85 = arith.constant 0 : index
    %c0_86 = arith.constant 0 : index
    %c0_87 = arith.constant 0 : index
    %75 = vector.load %arg4[%c0_84, %c0_85, %c0_86, %c0_87] : memref<1x16x16x128xbf16, #tpu.memory_space<vmem>>, vector<1x16x16x128xbf16>
    %76 = vector.shape_cast %75 : vector<1x16x16x128xbf16> to vector<16x16x128xbf16>
    %77 = vector.shape_cast %74 : vector<16x16x128xbf16> to vector<1x16x16x128xbf16>
    tpu.vector_store %arg4[%c0_84, %c0_85, %c0_86, %c0_87], %77 {strides = array<i32>} : memref<1x16x16x128xbf16, #tpu.memory_space<vmem>>, vector<1x16x16x128xbf16>,
    return
  }
  func.func @transform_0(%arg0: i32, %arg1: i32) -> (i32, i32, i32, i32) {
    %c1_i32 = arith.constant 1 : i32
    %0 = arith.muli %arg0, %c1_i32 : i32
    %1 = arith.addi %0, %arg1 : i32
    %c0_i32 = arith.constant 0 : i32
    %c0_i32_0 = arith.constant 0 : i32
    %c0_i32_1 = arith.constant 0 : i32
    %c0_i32_2 = arith.constant 0 : i32
    return %1, %c0_i32, %c0_i32_0, %c0_i32_1 : i32, i32, i32, i32
  }
  func.func @transform_1(%arg0: i32, %arg1: i32) -> (i32, i32, i32, i32) {
    %c0_i32 = arith.constant 0 : i32
    %c0_i32_0 = arith.constant 0 : i32
    %c0_i32_1 = arith.constant 0 : i32
    %c0_i32_2 = arith.constant 0 : i32
    %c0_i32_3 = arith.constant 0 : i32
    return %c0_i32, %c0_i32_0, %c0_i32_1, %c0_i32_2 : i32, i32, i32, i32
  }
  func.func @transform_2(%arg0: i32, %arg1: i32) -> (i32, i32, i32, i32) {
    %c0_i32 = arith.constant 0 : i32
    %c0_i32_0 = arith.constant 0 : i32
    %c0_i32_1 = arith.constant 0 : i32
    return %arg0, %arg1, %c0_i32, %c0_i32_0 : i32, i32, i32, i32
  }
  func.func @transform_3(%arg0: i32, %arg1: i32) -> (i32, i32, i32, i32) {
    %c0_i32 = arith.constant 0 : i32
    %c0_i32_0 = arith.constant 0 : i32
    %c0_i32_1 = arith.constant 0 : i32
    return %arg0, %arg1, %c0_i32, %c0_i32_0 : i32, i32, i32, i32
  }
}

module attributes {stable_mosaic.version = 11 : i64} {
  func.func @kernel(%arg0: i32, %arg1: memref<512x128xbf16, #tpu.memory_space<vmem>>, %arg2: memref<1x128xf32, #tpu.memory_space<vmem>>, %arg3: memref<1x128xf32, #tpu.memory_space<vmem>>, %arg4: memref<512x128xbf16, #tpu.memory_space<vmem>>) attributes {dimension_semantics = [#tpu.dimension_semantics<parallel>], iteration_bounds = array<i64: 1>, scalar_prefetch = 0 : i64, scratch_operands = 0 : i64, tpu.core_type = #tpu.core_type<tc>, window_params = [{transform_indices = @transform_0, window_bounds = array<i64: 512, 128>}, {pipeline_mode = #tpu.pipeline_mode<synchronous>, transform_indices = @transform_1, window_bounds = array<i64: 1, 128>}, {pipeline_mode = #tpu.pipeline_mode<synchronous>, transform_indices = @transform_2, window_bounds = array<i64: 1, 128>}, {transform_indices = @transform_3, window_bounds = array<i64: 512, 128>}]} {
    %c0 = arith.constant 0 : index
    %c0_0 = arith.constant 0 : index
    %0 = vector.load %arg1[%c0, %c0_0] : memref<512x128xbf16, #tpu.memory_space<vmem>>, vector<512x128xbf16>
    %1 = arith.extf %0 : vector<512x128xbf16> to vector<512x128xf32>
    %c0_1 = arith.constant 0 : index
    %c0_2 = arith.constant 0 : index
    %2 = vector.load %arg2[%c0_1, %c0_2] : memref<1x128xf32, #tpu.memory_space<vmem>>, vector<1x128xf32>
    %3 = vector.broadcast %2 : vector<1x128xf32> to vector<512x128xf32>
    %4 = arith.mulf %1, %3 : vector<512x128xf32>
    %c0_3 = arith.constant 0 : index
    %c0_4 = arith.constant 0 : index
    %5 = vector.load %arg3[%c0_3, %c0_4] : memref<1x128xf32, #tpu.memory_space<vmem>>, vector<1x128xf32>
    %6 = vector.broadcast %5 : vector<1x128xf32> to vector<512x128xf32>
    %7 = arith.addf %4, %6 : vector<512x128xf32>
    %cst = arith.constant 0.000000e+00 : f32
    %8 = vector.broadcast %cst : f32 to vector<512x128xf32>
    %9 = arith.maximumf %7, %8 : vector<512x128xf32>
    %10 = arith.truncf %9 : vector<512x128xf32> to vector<512x128xbf16>
    %c0_5 = arith.constant 0 : index
    %c0_6 = arith.constant 0 : index
    %11 = vector.load %arg4[%c0_5, %c0_6] : memref<512x128xbf16, #tpu.memory_space<vmem>>, vector<512x128xbf16>
    tpu.vector_store %arg4[%c0_5, %c0_6], %10 {strides = array<i32>} : memref<512x128xbf16, #tpu.memory_space<vmem>>, vector<512x128xbf16>,
    return
  }
  func.func @transform_0(%arg0: i32) -> (i32, i32) {
    %c0_i32 = arith.constant 0 : i32
    %c0_i32_0 = arith.constant 0 : i32
    return %arg0, %c0_i32 : i32, i32
  }
  func.func @transform_1(%arg0: i32) -> (i32, i32) {
    %c0_i32 = arith.constant 0 : i32
    %c0_i32_0 = arith.constant 0 : i32
    %c0_i32_1 = arith.constant 0 : i32
    return %c0_i32, %c0_i32_0 : i32, i32
  }
  func.func @transform_2(%arg0: i32) -> (i32, i32) {
    %c0_i32 = arith.constant 0 : i32
    %c0_i32_0 = arith.constant 0 : i32
    %c0_i32_1 = arith.constant 0 : i32
    return %c0_i32, %c0_i32_0 : i32, i32
  }
  func.func @transform_3(%arg0: i32) -> (i32, i32) {
    %c0_i32 = arith.constant 0 : i32
    %c0_i32_0 = arith.constant 0 : i32
    return %arg0, %c0_i32 : i32, i32
  }
}

module attributes {stable_mosaic.version = 11 : i64} {
  func.func @kernel(%arg0: i32, %arg1: memref<512x128xbf16, #tpu.memory_space<vmem>>, %arg2: memref<1x128xf32, #tpu.memory_space<vmem>>, %arg3: memref<1x128xf32, #tpu.memory_space<vmem>>, %arg4: memref<512x128xbf16, #tpu.memory_space<vmem>>, %arg5: memref<512x128xbf16, #tpu.memory_space<vmem>>) attributes {dimension_semantics = [#tpu.dimension_semantics<parallel>], iteration_bounds = array<i64: 1>, scalar_prefetch = 0 : i64, scratch_operands = 0 : i64, tpu.core_type = #tpu.core_type<tc>, window_params = [{transform_indices = @transform_0, window_bounds = array<i64: 512, 128>}, {pipeline_mode = #tpu.pipeline_mode<synchronous>, transform_indices = @transform_1, window_bounds = array<i64: 1, 128>}, {pipeline_mode = #tpu.pipeline_mode<synchronous>, transform_indices = @transform_2, window_bounds = array<i64: 1, 128>}, {transform_indices = @transform_3, window_bounds = array<i64: 512, 128>}, {transform_indices = @transform_4, window_bounds = array<i64: 512, 128>}]} {
    %c0 = arith.constant 0 : index
    %c0_0 = arith.constant 0 : index
    %0 = vector.load %arg1[%c0, %c0_0] : memref<512x128xbf16, #tpu.memory_space<vmem>>, vector<512x128xbf16>
    %1 = arith.extf %0 : vector<512x128xbf16> to vector<512x128xf32>
    %c0_1 = arith.constant 0 : index
    %c0_2 = arith.constant 0 : index
    %2 = vector.load %arg2[%c0_1, %c0_2] : memref<1x128xf32, #tpu.memory_space<vmem>>, vector<1x128xf32>
    %3 = vector.broadcast %2 : vector<1x128xf32> to vector<512x128xf32>
    %4 = arith.mulf %1, %3 : vector<512x128xf32>
    %c0_3 = arith.constant 0 : index
    %c0_4 = arith.constant 0 : index
    %5 = vector.load %arg3[%c0_3, %c0_4] : memref<1x128xf32, #tpu.memory_space<vmem>>, vector<1x128xf32>
    %6 = vector.broadcast %5 : vector<1x128xf32> to vector<512x128xf32>
    %7 = arith.addf %4, %6 : vector<512x128xf32>
    %c0_5 = arith.constant 0 : index
    %c0_6 = arith.constant 0 : index
    %8 = vector.load %arg4[%c0_5, %c0_6] : memref<512x128xbf16, #tpu.memory_space<vmem>>, vector<512x128xbf16>
    %9 = arith.extf %8 : vector<512x128xbf16> to vector<512x128xf32>
    %10 = arith.addf %7, %9 : vector<512x128xf32>
    %cst = arith.constant 0.000000e+00 : f32
    %11 = vector.broadcast %cst : f32 to vector<512x128xf32>
    %12 = arith.maximumf %10, %11 : vector<512x128xf32>
    %13 = arith.truncf %12 : vector<512x128xf32> to vector<512x128xbf16>
    %c0_7 = arith.constant 0 : index
    %c0_8 = arith.constant 0 : index
    %14 = vector.load %arg5[%c0_7, %c0_8] : memref<512x128xbf16, #tpu.memory_space<vmem>>, vector<512x128xbf16>
    tpu.vector_store %arg5[%c0_7, %c0_8], %13 {strides = array<i32>} : memref<512x128xbf16, #tpu.memory_space<vmem>>, vector<512x128xbf16>,
    return
  }
  func.func @transform_0(%arg0: i32) -> (i32, i32) {
    %c0_i32 = arith.constant 0 : i32
    %c0_i32_0 = arith.constant 0 : i32
    return %arg0, %c0_i32 : i32, i32
  }
  func.func @transform_1(%arg0: i32) -> (i32, i32) {
    %c0_i32 = arith.constant 0 : i32
    %c0_i32_0 = arith.constant 0 : i32
    %c0_i32_1 = arith.constant 0 : i32
    return %c0_i32, %c0_i32_0 : i32, i32
  }
  func.func @transform_2(%arg0: i32) -> (i32, i32) {
    %c0_i32 = arith.constant 0 : i32
    %c0_i32_0 = arith.constant 0 : i32
    %c0_i32_1 = arith.constant 0 : i32
    return %c0_i32, %c0_i32_0 : i32, i32
  }
  func.func @transform_3(%arg0: i32) -> (i32, i32) {
    %c0_i32 = arith.constant 0 : i32
    %c0_i32_0 = arith.constant 0 : i32
    return %arg0, %c0_i32 : i32, i32
  }
  func.func @transform_4(%arg0: i32) -> (i32, i32) {
    %c0_i32 = arith.constant 0 : i32
    %c0_i32_0 = arith.constant 0 : i32
    return %arg0, %c0_i32 : i32, i32
  }
}

</mosaic_0001>

<bundles_post_ra>
// kernel: res_unet_block_forward.21
= control target key start
LH: loop header
LB: loop body
LE: loop exit
PB: predicated region body
PF: predicated region fallthrough
CT: control target
= control target key end

     0   :  { %s422_s0 = inlined_call_operand.vmem [shape: bf16[128,128], index: 0, kind: input, shape index: {}]   ;;  %s423_s1 = inlined_call_operand.vmem [shape: f32[1,128], index: 1, kind: input, shape index: {}]   ;;  %s424_s2 = inlined_call_operand.vmem [shape: f32[1,128], index: 2, kind: input, shape index: {}]   ;;  %s425_s3 = inlined_call_operand.vmem [shape: bf16[128,128], index: 3, kind: output, shape index: {}]  }
   0x1   :  { %v227_v0 = vld [vmem:[%s422_s0] sm:$0xff]   ;;  %v298_v4 = vld [vmem:[%s422_s0 + $0x8] sm:$0xff]   ;;  %v299_v5 = vld [vmem:[%s422_s0 + $0x10] sm:$0xff]  }
   0x2   :  { %v338_v1 = vld [vmem:[%s423_s1] ss:$0 sm:$0xff]  ;;  %v228_v2 = vunpack.c.l.bf16 %v227_v0  ;;  %v229_v3 = vunpack.c.h.bf16 %v227_v0  ;;  %v300_v6 = vld [vmem:[%s422_s0 + $0x18] sm:$0xff]   ;;  %v232_v8 = vunpack.c.l.bf16 %v298_v4  ;;  %v233_v9 = vunpack.c.h.bf16 %v298_v4  ;;  %v302_v33 = vld [vmem:[%s422_s0 + $0x28] sm:$0xff]  }
   0x3   :  { %v352_v7 = vld [vmem:[%s424_s2] ss:$0 sm:$0xff]  ;;  %v236_v10 = vunpack.c.l.bf16 %v299_v5  ;;  %v237_v11 = vunpack.c.h.bf16 %v299_v5  ;;  %v240_v14 = vunpack.c.l.bf16 %v300_v6  ;;  %v241_v15 = vunpack.c.h.bf16 %v300_v6  ;;  %v303_v38 = vld [vmem:[%s422_s0 + $0x30] sm:$0xff]   ;;  %v304_v43 = vld [vmem:[%s422_s0 + $0x38] sm:$0xff]  }
   0x4   :  { %v53_v12 = vmul.f32 %v228_v2, %v338_v1  ;;  %v54_v13 = vmul.f32 %v229_v3, %v338_v1  ;;  %v55_v16 = vmul.f32 %v232_v8, %v338_v1  ;;  %v56_v17 = vmul.f32 %v233_v9, %v338_v1  ;;  %v301_v28 = vld [vmem:[%s422_s0 + $0x20] sm:$0xff]  }
   0x5   :  { %v57_v18 = vmul.f32 %v236_v10, %v338_v1  ;;  %v58_v19 = vmul.f32 %v237_v11, %v338_v1  ;;  %v59_v22 = vmul.f32 %v240_v14, %v338_v1  ;;  %v60_v23 = vmul.f32 %v241_v15, %v338_v1 }
   0x6   :  { %v76_v20 = vadd.f32 %v352_v7, %v53_v12  ;;  %v77_v21 = vadd.f32 %v352_v7, %v54_v13  ;;  %v78_v24 = vadd.f32 %v352_v7, %v55_v16  ;;  %v79_v25 = vadd.f32 %v352_v7, %v56_v17 }
   0x7   :  { %v80_v26 = vadd.f32 %v352_v7, %v57_v18  ;;  %v81_v27 = vadd.f32 %v352_v7, %v58_v19  ;;  %v82_v31 = vadd.f32 %v352_v7, %v59_v22  ;;  %v83_v32 = vadd.f32 %v352_v7, %v60_v23 }
   0x8   :  { %v92_v29 = vmax.f32 %v76_v20, 0.0  ;;  %v93_v30 = vmax.f32 %v77_v21, 0.0  ;;  %v94_v34 = vmax.f32 %v78_v24, 0.0  ;;  %v95_v35 = vmax.f32 %v79_v25, 0.0 }
   0x9   :  { %v96_v36 = vmax.f32 %v80_v26, 0.0  ;;  %v97_v37 = vmax.f32 %v81_v27, 0.0  ;;  %v98_v40 = vmax.f32 %v82_v31, 0.0  ;;  %v99_v41 = vmax.f32 %v83_v32, 0.0 }
   0xa   :  { %v261_v39 = vpack.c.bf16 %v93_v30, %v92_v29  ;;  %v244_v42 = vunpack.c.l.bf16 %v301_v28  ;;  %v266_v44 = vpack.c.bf16 %v95_v35, %v94_v34  ;;  %v245_v46 = vunpack.c.h.bf16 %v301_v28 }
   0xb   :  { %v271_v45 = vpack.c.bf16 %v97_v37, %v96_v36  ;;  %v248_v47 = vunpack.c.l.bf16 %v302_v33  ;;  %v276_v48 = vpack.c.bf16 %v99_v41, %v98_v40  ;;  %v249_v50 = vunpack.c.h.bf16 %v302_v33 }
   0xc   :  { %262 = vst [vmem:[%s425_s3] sm:$0xff] %v261_v39   ;;  %v61_v49 = vmul.f32 %v244_v42, %v338_v1  ;;  %v252_v51 = vunpack.c.l.bf16 %v303_v38  ;;  %305 = vst [vmem:[%s425_s3 + $0x8] sm:$0xff] %v266_v44   ;;  %v62_v52 = vmul.f32 %v245_v46, %v338_v1  ;;  %v253_v54 = vunpack.c.h.bf16 %v303_v38 }
   0xd   :  { %306 = vst [vmem:[%s425_s3 + $0x10] sm:$0xff] %v271_v45   ;;  %v63_v53 = vmul.f32 %v248_v47, %v338_v1  ;;  %v256_v55 = vunpack.c.l.bf16 %v304_v43  ;;  %307 = vst [vmem:[%s425_s3 + $0x18] sm:$0xff] %v276_v48   ;;  %v64_v57 = vmul.f32 %v249_v50, %v338_v1  ;;  %v257_v59 = vunpack.c.h.bf16 %v304_v43 }
   0xe   :  { %v84_v56 = vadd.f32 %v352_v7, %v61_v49  ;;  %v65_v58 = vmul.f32 %v252_v51, %v338_v1  ;;  %v85_v60 = vadd.f32 %v352_v7, %v62_v52  ;;  %v66_v62 = vmul.f32 %v253_v54, %v338_v1 }
   0xf   :  { %v86_v61 = vadd.f32 %v352_v7, %v63_v53  ;;  %v67_v63 = vmul.f32 %v256_v55, %v338_v1  ;;  %v87_v2 = vadd.f32 %v352_v7, %v64_v57  ;;  %v68_v4 = vmul.f32 %v257_v59, %v338_v1 }
  0x10   :  { %v100_v0 = vmax.f32 %v84_v56, 0.0  ;;  %v88_v3 = vadd.f32 %v352_v7, %v65_v58  ;;  %v101_v5 = vmax.f32 %v85_v60, 0.0  ;;  %v89_v8 = vadd.f32 %v352_v7, %v66_v62 }
  0x11   :  { %v102_v6 = vmax.f32 %v86_v61, 0.0  ;;  %v90_v9 = vadd.f32 %v352_v7, %v67_v63  ;;  %v103_v10 = vmax.f32 %v87_v2, 0.0  ;;  %v91_v12 = vadd.f32 %v352_v7, %v68_v4 }
  0x12   :  { %v104_v11 = vmax.f32 %v88_v3, 0.0  ;;  %v281_v13 = vpack.c.bf16 %v101_v5, %v100_v0  ;;  %v105_v14 = vmax.f32 %v89_v8, 0.0 }
  0x13   :  { %v106_v15 = vmax.f32 %v90_v9, 0.0  ;;  %v286_v16 = vpack.c.bf16 %v103_v10, %v102_v6  ;;  %v107_v17 = vmax.f32 %v91_v12, 0.0 }
  0x14   :  { %308 = vst [vmem:[%s425_s3 + $0x20] sm:$0xff] %v281_v13   ;;  %v291_v1 = vpack.c.bf16 %v105_v14, %v104_v11 }
  0x15   :  { %309 = vst [vmem:[%s425_s3 + $0x28] sm:$0xff] %v286_v16   ;;  %v296_v18 = vpack.c.bf16 %v107_v17, %v106_v15 }
  0x16   :  { %310 = vst [vmem:[%s425_s3 + $0x30] sm:$0xff] %v291_v1  }
  0x17   :  { %311 = vst [vmem:[%s425_s3 + $0x38] sm:$0xff] %v296_v18  }

// kernel: res_unet_block_forward.23
= control target key start
LH: loop header
LB: loop body
LE: loop exit
PB: predicated region body
PF: predicated region fallthrough
CT: control target
= control target key end

     0   :  { %s541_s0 = inlined_call_operand.vmem [shape: bf16[128,128], index: 0, kind: input, shape index: {}]   ;;  %s542_s1 = inlined_call_operand.vmem [shape: f32[1,128], index: 1, kind: input, shape index: {}]   ;;  %s543_s2 = inlined_call_operand.vmem [shape: f32[1,128], index: 2, kind: input, shape index: {}]   ;;  %s544_s3 = inlined_call_operand.vmem [shape: bf16[128,128], index: 3, kind: input, shape index: {}]   ;;  %s545_s4 = inlined_call_operand.vmem [shape: bf16[128,128], index: 4, kind: output, shape index: {}]  }
   0x1   :  { %v278_v0 = vld [vmem:[%s541_s0] sm:$0xff]   ;;  %v381_v5 = vld [vmem:[%s541_s0 + $0x8] sm:$0xff]   ;;  %v382_v12 = vld [vmem:[%s541_s0 + $0x10] sm:$0xff]  }
   0x2   :  { %v433_v1 = vld [vmem:[%s542_s1] ss:$0 sm:$0xff]  ;;  %v279_v2 = vunpack.c.l.bf16 %v278_v0  ;;  %v280_v3 = vunpack.c.h.bf16 %v278_v0  ;;  %v388_v6 = vld [vmem:[%s544_s3 + $0x8] sm:$0xff]   ;;  %v283_v10 = vunpack.c.l.bf16 %v381_v5  ;;  %v284_v11 = vunpack.c.h.bf16 %v381_v5  ;;  %v389_v13 = vld [vmem:[%s544_s3 + $0x10] sm:$0xff]  }
   0x3   :  { %v310_v4 = vld [vmem:[%s544_s3] sm:$0xff]   ;;  %v315_v16 = vunpack.c.l.bf16 %v388_v6  ;;  %v316_v17 = vunpack.c.h.bf16 %v388_v6  ;;  %v287_v20 = vunpack.c.l.bf16 %v382_v12  ;;  %v288_v21 = vunpack.c.h.bf16 %v382_v12  ;;  %v383_v22 = vld [vmem:[%s541_s0 + $0x18] sm:$0xff]   ;;  %v385_v54 = vld [vmem:[%s541_s0 + $0x28] sm:$0xff]  }
   0x4   :  { %v447_v7 = vld [vmem:[%s543_s2] ss:$0 sm:$0xff]  ;;  %v311_v8 = vunpack.c.l.bf16 %v310_v4  ;;  %v312_v9 = vunpack.c.h.bf16 %v310_v4  ;;  %v56_v14 = vmul.f32 %v279_v2, %v433_v1  ;;  %v57_v15 = vmul.f32 %v280_v3, %v433_v1  ;;  %v390_v39 = vld [vmem:[%s544_s3 + $0x18] sm:$0xff]   ;;  %v392_v63 = vld [vmem:[%s544_s3 + $0x28] sm:$0xff]  }
   0x5   :  { %v58_v18 = vmul.f32 %v283_v10, %v433_v1  ;;  %v59_v19 = vmul.f32 %v284_v11, %v433_v1  ;;  %v319_v25 = vunpack.c.l.bf16 %v389_v13  ;;  %v320_v26 = vunpack.c.h.bf16 %v389_v13  ;;  %v384_v48 = vld [vmem:[%s541_s0 + $0x20] sm:$0xff]   ;;  %v386_v5 = vld [vmem:[%s541_s0 + $0x30] sm:$0xff]  }
   0x6   :  { %v79_v23 = vadd.f32 %v447_v7, %v56_v14  ;;  %v80_v24 = vadd.f32 %v447_v7, %v57_v15  ;;  %v60_v29 = vmul.f32 %v287_v20, %v433_v1  ;;  %v61_v30 = vmul.f32 %v288_v21, %v433_v1  ;;  %v391_v49 = vld [vmem:[%s544_s3 + $0x20] sm:$0xff]   ;;  %v393_v11 = vld [vmem:[%s544_s3 + $0x30] sm:$0xff]   ;;  %v387_v20 = vld [vmem:[%s541_s0 + $0x38] sm:$0xff]  }
   0x7   :  { %v81_v27 = vadd.f32 %v447_v7, %v58_v18  ;;  %v82_v28 = vadd.f32 %v447_v7, %v59_v19  ;;  %v291_v33 = vunpack.c.l.bf16 %v383_v22  ;;  %v292_v34 = vunpack.c.h.bf16 %v383_v22 }
   0x8   :  { %v127_v31 = vadd.f32 %v311_v8, %v79_v23  ;;  %v128_v32 = vadd.f32 %v312_v9, %v80_v24  ;;  %v83_v37 = vadd.f32 %v447_v7, %v60_v29  ;;  %v84_v38 = vadd.f32 %v447_v7, %v61_v30 }
   0x9   :  { %v129_v35 = vadd.f32 %v315_v16, %v81_v27  ;;  %v130_v36 = vadd.f32 %v316_v17, %v82_v28  ;;  %v62_v42 = vmul.f32 %v291_v33, %v433_v1  ;;  %v63_v43 = vmul.f32 %v292_v34, %v433_v1  ;;  %v394_v33 = vld [vmem:[%s544_s3 + $0x38] sm:$0xff]  }
   0xa   :  { %v143_v40 = vmax.f32 %v127_v31, 0.0  ;;  %v144_v41 = vmax.f32 %v128_v32, 0.0  ;;  %v131_v46 = vadd.f32 %v319_v25, %v83_v37  ;;  %v132_v47 = vadd.f32 %v320_v26, %v84_v38 }
   0xb   :  { %v145_v44 = vmax.f32 %v129_v35, 0.0  ;;  %v146_v45 = vmax.f32 %v130_v36, 0.0  ;;  %v85_v51 = vadd.f32 %v447_v7, %v62_v42  ;;  %v86_v52 = vadd.f32 %v447_v7, %v63_v43 }
   0xc   :  { %v344_v50 = vpack.c.bf16 %v144_v41, %v143_v40  ;;  %v323_v53 = vunpack.c.l.bf16 %v390_v39  ;;  %v147_v56 = vmax.f32 %v131_v46, 0.0  ;;  %v148_v57 = vmax.f32 %v132_v47, 0.0 }
   0xd   :  { %v349_v55 = vpack.c.bf16 %v146_v45, %v145_v44  ;;  %v324_v58 = vunpack.c.h.bf16 %v390_v39  ;;  %v295_v60 = vunpack.c.l.bf16 %v384_v48  ;;  %v296_v61 = vunpack.c.h.bf16 %v384_v48 }
   0xe   :  { %345 = vst [vmem:[%s545_s4] sm:$0xff] %v344_v50   ;;  %v133_v59 = vadd.f32 %v323_v53, %v85_v51  ;;  %v327_v62 = vunpack.c.l.bf16 %v391_v49  ;;  %v354_v0 = vpack.c.bf16 %v148_v57, %v147_v56  ;;  %v328_v3 = vunpack.c.h.bf16 %v391_v49 }
   0xf   :  { %395 = vst [vmem:[%s545_s4 + $0x8] sm:$0xff] %v349_v55   ;;  %v134_v2 = vadd.f32 %v324_v58, %v86_v52  ;;  %v299_v4 = vunpack.c.l.bf16 %v385_v54  ;;  %v64_v8 = vmul.f32 %v295_v60, %v433_v1  ;;  %v65_v9 = vmul.f32 %v296_v61, %v433_v1 }
  0x10   :  { %v149_v6 = vmax.f32 %v133_v59, 0.0  ;;  %v300_v10 = vunpack.c.h.bf16 %v385_v54  ;;  %396 = vst [vmem:[%s545_s4 + $0x10] sm:$0xff] %v354_v0   ;;  %v331_v14 = vunpack.c.l.bf16 %v392_v63  ;;  %v332_v15 = vunpack.c.h.bf16 %v392_v63 }
  0x11   :  { %v150_v12 = vmax.f32 %v134_v2, 0.0  ;;  %v66_v13 = vmul.f32 %v299_v4, %v433_v1  ;;  %v87_v16 = vadd.f32 %v447_v7, %v64_v8  ;;  %v88_v17 = vadd.f32 %v447_v7, %v65_v9 }
  0x12   :  { %v67_v18 = vmul.f32 %v300_v10, %v433_v1  ;;  %v303_v19 = vunpack.c.l.bf16 %v386_v5  ;;  %v304_v23 = vunpack.c.h.bf16 %v386_v5  ;;  %v335_v24 = vunpack.c.l.bf16 %v393_v11 }
  0x13   :  { %v359_v21 = vpack.c.bf16 %v150_v12, %v149_v6  ;;  %v89_v22 = vadd.f32 %v447_v7, %v66_v13  ;;  %v135_v25 = vadd.f32 %v327_v62, %v87_v16  ;;  %v136_v26 = vadd.f32 %v328_v3, %v88_v17 }
  0x14   :  { %v90_v27 = vadd.f32 %v447_v7, %v67_v18  ;;  %v68_v28 = vmul.f32 %v303_v19, %v433_v1  ;;  %v69_v30 = vmul.f32 %v304_v23, %v433_v1  ;;  %v336_v31 = vunpack.c.h.bf16 %v393_v11 }
  0x15   :  { %397 = vst [vmem:[%s545_s4 + $0x18] sm:$0xff] %v359_v21   ;;  %v137_v29 = vadd.f32 %v331_v14, %v89_v22  ;;  %v307_v32 = vunpack.c.l.bf16 %v387_v20  ;;  %v151_v34 = vmax.f32 %v135_v25, 0.0  ;;  %v152_v35 = vmax.f32 %v136_v26, 0.0 }
  0x16   :  { %v138_v36 = vadd.f32 %v332_v15, %v90_v27  ;;  %v91_v37 = vadd.f32 %v447_v7, %v68_v28  ;;  %v92_v39 = vadd.f32 %v447_v7, %v69_v30  ;;  %v308_v40 = vunpack.c.h.bf16 %v387_v20 }
  0x17   :  { %v153_v38 = vmax.f32 %v137_v29, 0.0  ;;  %v70_v41 = vmul.f32 %v307_v32, %v433_v1  ;;  %v364_v42 = vpack.c.bf16 %v152_v35, %v151_v34  ;;  %v339_v45 = vunpack.c.l.bf16 %v394_v33 }
  0x18   :  { %v154_v43 = vmax.f32 %v138_v36, 0.0  ;;  %v139_v44 = vadd.f32 %v335_v24, %v91_v37  ;;  %v140_v46 = vadd.f32 %v336_v31, %v92_v39  ;;  %v71_v47 = vmul.f32 %v308_v40, %v433_v1 }
  0x19   :  { %v93_v48 = vadd.f32 %v447_v7, %v70_v41  ;;  %v340_v49 = vunpack.c.h.bf16 %v394_v33  ;;  %398 = vst [vmem:[%s545_s4 + $0x20] sm:$0xff] %v364_v42  }
  0x1a   :  { %v369_v50 = vpack.c.bf16 %v154_v43, %v153_v38  ;;  %v155_v51 = vmax.f32 %v139_v44, 0.0  ;;  %v156_v52 = vmax.f32 %v140_v46, 0.0  ;;  %v94_v53 = vadd.f32 %v447_v7, %v71_v47 }
  0x1b   :  { %v141_v54 = vadd.f32 %v339_v45, %v93_v48 }
  0x1c   :  { %399 = vst [vmem:[%s545_s4 + $0x28] sm:$0xff] %v369_v50   ;;  %v374_v55 = vpack.c.bf16 %v156_v52, %v155_v51  ;;  %v142_v56 = vadd.f32 %v340_v49, %v94_v53 }
  0x1d   :  { %v157_v1 = vmax.f32 %v141_v54, 0.0 }
  0x1e   :  { %400 = vst [vmem:[%s545_s4 + $0x30] sm:$0xff] %v374_v55   ;;  %v158_v57 = vmax.f32 %v142_v56, 0.0 }
  0x20   :  { %v379_v58 = vpack.c.bf16 %v158_v57, %v157_v1 }
  0x22   :  { %401 = vst [vmem:[%s545_s4 + $0x38] sm:$0xff] %v379_v58  }

// kernel: res_unet_block_forward.20
= control target key start
LH: loop header
LB: loop body
LE: loop exit
PB: predicated region body
PF: predicated region fallthrough
CT: control target
= control target key end

     0   :  { %s3217_s12 = smov 0   ;;  %s3219_s13 = smov 0   ;;  %s3793_s0 = inlined_call_operand.vmem [shape: bf16[2,10,10,128], index: 0, kind: input, shape index: {}]   ;;  %s3794_s1 = inlined_call_operand.vmem [shape: bf16[3,3,128,128], index: 1, kind: input, shape index: {}]   ;;  %s3795_s2 = inlined_call_operand.vmem [shape: bf16[2,8,8,128], index: 2, kind: output, shape index: {0}]   ;;  %s3796_s3 = inlined_call_operand.vmem [shape: f32[2,1,2,128], index: 3, kind: output, shape index: {1}]  }
   0x1   :  { %s3221_s14 = smov 0  }
   0x2 LB: > { %s26_s15 = sadd.s32 1, %s3191_s13  ;;  %p2369_p0 = scmp.ge.s32.totalorder %s3195_s14, 1  ;;  %s3195_s14 = sphi %s3221_s14, %s14_s14   ;;  %s3191_s13 = sphi %s3219_s13, %s3810_s13   ;;  %s3187_s12 = sphi %s3217_s12, %s3809_s12  }
   0x3   : > { %p28_p1 = scmp.ge.s32.totalorder %s26_s15, 2  ;;  %p160_p2 = scmp.lt.s32.totalorder %s3195_s14, 3 }
   0x5   : > { %s3812_s15 = smov (%p28_p1, %s26_s15), 0  ;;  %p161_p3 = pnand %p2369_p0, %p160_p2 }
   0x7   : > { %164 = sbr.rel (%p161_p3) target bundleno = 404 (0x194), region = 28 }
   0xc   : > { %v3089_v0 = vld [vmem:[%s3794_s1 + $0x78] sm:$0xff]   ;;  %p197_p4 = scmp.lt.s32.totalorder %s3187_s12, 1  ;;  %v3091_v2 = vld [vmem:[%s3794_s1 + $0x70] sm:$0xff]   ;;  %v3093_v4 = vld [vmem:[%s3794_s1 + $0x68] sm:$0xff]   ;;  %vm253_vm0 = vsmask.f32 3328 }
   0xd   : > { %v3090_v1 = vld [vmem:[%s3794_s1 + $0x38] sm:$0xff]   ;;  %2832 = vmatprep.subr.bf16.mxu0 %v3089_v0  ;;  %v3092_v3 = vld [vmem:[%s3794_s1 + $0x30] sm:$0xff]   ;;  %v3094_v5 = vld [vmem:[%s3794_s1 + $0x28] sm:$0xff]   ;;  %vm254_vm1 = vsmask.f32 7440  ;;  %vm675_vm3 = vcmask 1042432  }
   0xe   : > { %2856 = vmatprep.subr.bf16.mxu1 %v3090_v1  ;;  %2833 = vmatpush3.bf16.msra.mxu0 %v3089_v0  ;;  %s3814_s12 = smov (!%p197_p4, %s3187_s12), 1  ;;  %v3095_v6 = vld [vmem:[%s3794_s1 + $0x60] sm:$0xff]   ;;  %v3097_v8 = vld [vmem:[%s3794_s1 + $0x58] sm:$0xff]   ;;  %v3099_v10 = vld [vmem:[%s3794_s1 + $0x50] sm:$0xff]   ;;  %vm676_vm4 = vcmask 1046532   ;;  %vm2224_vm6 = vcmask 1040384  }
   0xf   : > { %2857 = vmatpush3.bf16.msra.mxu1 %v3090_v1  ;;  %2834 = vmatprep.subr.bf16.mxu0 %v3091_v2  ;;  %v3096_v7 = vld [vmem:[%s3794_s1 + $0x20] sm:$0xff]   ;;  %s3064_s5 = smul.u32 80, %s3814_s12  ;;  %v3098_v9 = vld [vmem:[%s3794_s1 + $0x18] sm:$0xff]   ;;  %v3100_v14 = vld [vmem:[%s3794_s1 + $0x10] sm:$0xff]   ;;  %s2373_s7 = sshll.u32 %s3814_s12, 1 }
  0x10   : > { %2858 = vmatprep.subr.bf16.mxu1 %v3092_v3  ;;  %v3101_v17 = vld [vmem:[%s3794_s1 + $0x48] sm:$0xff]   ;;  %vm3314_vm2 = vmor %vm253_vm0, %vm254_vm1  ;;  %v3103_v46 = vld [vmem:[%s3794_s1 + $0x40] sm:$0xff]   ;;  %s219_s10 = scalar_lea.vmem %s3796_s3, %s2373_s7 }
  0x11   : > { %s3271_s16 = scalar_lea.vmem %s3793_s0, %s3064_s5  ;;  %v3102_v23 = vld [vmem:[%s3794_s1 + $0x8] sm:$0xff]   ;;  %v3104_v50 = vld [vmem:[%s3794_s1] sm:$0xff]   ;;  %v3107_v59 = vld [vmem:[%s3794_s1 + $0xb8] sm:$0xff]  }
  0x12   : > { %2835 = vmatpush3.bf16.msra.mxu0 %v3091_v2  ;;  %v221_v11 = vld [vmem:[%s3271_s16] sm:$0xf]  ;;  %v222_v12 = vld [vmem:[%s3271_s16 + $0x8] sm:$0xf]  ;;  %v3279_v13 = vld [vmem:[%s3271_s16 + $0x4] sm:$0x1] }
  0x13   : > { %2859 = vmatpush3.bf16.msra.mxu1 %v3092_v3  ;;  %2836 = vmatprep.subr.bf16.mxu0 %v3093_v4  ;;  %v3285_v15 = vld [vmem:[%s3271_s16 + $0xc] sm:$0x1]  ;;  %v2402_v16 = vcombine.low %v221_v11, %v222_v12  ;;  %v257_v18 = vshrl.u32 %v221_v11, 16  ;;  %v260_v19 = vshll.u32 %v221_v11, 16  ;;  %v266_v20 = vshll.u32 %v3279_v13, 16  ;;  %v3108_v62 = vld [vmem:[%s3794_s1 + $0xf8] sm:$0xff]   ;;  %vm3397_vm5 = vmor %vm675_vm3, %vm676_vm4 }
  0x14   : > { %2860 = vmatprep.subr.bf16.mxu1 %v3094_v5  ;;  %v271_v21 = vshrl.u32 %v222_v12, 16  ;;  %v3292_v22 = vld [vmem:[%s3271_s16 + $0x10] sm:$0xf]  ;;  %v274_v24 = vshll.u32 %v222_v12, 16  ;;  %v280_v25 = vshll.u32 %v3285_v15, 16  ;;  %v3112_v11 = vld [vmem:[%s3794_s1 + $0xe8] sm:$0xff]  }
  0x15   : > { %2872 = vmatprep.mubr.bf16.mxu1 %v2402_v16  ;;  %v3299_v26 = vld [vmem:[%s3271_s16 + $0x18] sm:$0xf]  ;;  %v259_v27 = vrot.slane %v257_v18, 4  ;;  %v262_v28 = vrot.slane %v260_v19, 5  ;;  %v268_v29 = vrot.slane %v266_v20, 5  ;;  %v285_v35 = vshrl.u32 %v3292_v22, 16 }
  0x16   : > { %2837 = vmatpush3.bf16.msra.mxu0 %v3093_v4  ;;  %v273_v30 = vrot.slane %v271_v21, 4  ;;  %v3302_v31 = vld [vmem:[%s3271_s16 + $0x14] sm:$0x1]  ;;  %v276_v32 = vrot.slane %v274_v24, 5  ;;  %v282_v33 = vrot.slane %v280_v25, 5  ;;  %v288_v36 = vshll.u32 %v3292_v22, 16 }
  0x17   : > { %2861 = vmatpush3.bf16.msra.mxu1 %v3094_v5  ;;  %2838 = vmatprep.subr.bf16.mxu0 %v3095_v6  ;;  %v3305_v34 = vld [vmem:[%s3271_s16 + $0x1c] sm:$0x1]  ;;  %v263_v37 = vor.u32 %v262_v28, %v259_v27  ;;  %v294_v38 = vshll.u32 %v3302_v31, 16  ;;  %v299_v39 = vshrl.u32 %v3299_v26, 16  ;;  %v302_v40 = vshll.u32 %v3299_v26, 16  ;;  %v3109_v3 = vld [vmem:[%s3794_s1 + $0xb0] sm:$0xff]  }
  0x18   : > { %2862 = vmatprep.subr.bf16.mxu1 %v3096_v7  ;;  %v277_v42 = vor.u32 %v276_v32, %v273_v30  ;;  %v287_v43 = vrot.slane %v285_v35, 4  ;;  %v290_v44 = vrot.slane %v288_v36, 5  ;;  %v308_v45 = vshll.u32 %v3305_v34, 16  ;;  %v3110_v5 = vld [vmem:[%s3794_s1 + $0xf0] sm:$0xff]   ;;  %v3370_v28 = vld [vmem:[%s3271_s16 + $0x3c] sm:$0x1] }
  0x19   : > { %v264_v47 = vrot.slane %v263_v37, 4  ;;  %v301_v48 = vrot.slane %v299_v39, 4  ;;  %v304_v49 = vrot.slane %v302_v40, 5  ;;  %v296_v53 = vrot.slane %v294_v38, 5  ;;  %v227_v18 = vld [vmem:[%s3271_s16 + $0x30] sm:$0xf] }
  0x1a   : > { %2839 = vmatpush3.bf16.msra.mxu0 %v3095_v6  ;;  %v278_v51 = vrot.slane %v277_v42, 4  ;;  %v291_v52 = vor.u32 %v290_v44, %v287_v43  ;;  %v310_v56 = vrot.slane %v308_v45, 5  ;;  %v2403_v2 = vcombine.low %v3292_v22, %v3299_v26  ;;  %v225_v6 = vld [vmem:[%s3271_s16 + $0x20] sm:$0xf]  ;;  %v228_v22 = vld [vmem:[%s3271_s16 + $0x38] sm:$0xf] }
  0x1b   : > { %2863 = vmatpush3.bf16.msra.mxu1 %v3096_v7  ;;  %2840 = vmatprep.subr.bf16.mxu0 %v3097_v8  ;;  %v269_v54 = vsel %vm3314_vm2, %v264_v47, %v268_v29  ;;  %v305_v55 = vor.u32 %v304_v49, %v301_v48  ;;  %v680_v4 = vrot.slane %v3279_v13, 5  ;;  %v3111_v7 = vld [vmem:[%s3794_s1 + $0xa8] sm:$0xff]   ;;  %v313_v12 = vshrl.u32 %v225_v6, 16  ;;  %v3113_v39 = vld [vmem:[%s3794_s1 + $0xa0] sm:$0xff]   ;;  %v654_v13 = vld [vmem:[%s3271_s16 + $0x18] sm:$0xe] }
  0x1c   : > { %2864 = vmatprep.subr.bf16.mxu1 %v3098_v9  ;;  %v283_v57 = vsel %vm3314_vm2, %v278_v51, %v282_v33  ;;  %v292_v58 = vrot.slane %v291_v52, 4  ;;  %v341_v32 = vshrl.u32 %v227_v18, 16  ;;  %v344_v33 = vshll.u32 %v227_v18, 16  ;;  %v3114_v45 = vld [vmem:[%s3794_s1 + $0xe0] sm:$0xff]  }
  0x1d   : > { %v2390_v60 = vcombine.low %v269_v54, %v283_v57  ;;  %v306_v61 = vrot.slane %v305_v55, 4  ;;  %v315_v24 = vrot.slane %v313_v12, 4  ;;  %v355_v37 = vshrl.u32 %v228_v22, 16  ;;  %v3115_v57 = vld [vmem:[%s3794_s1 + $0x98] sm:$0xff]   ;;  %v3168_v41 = vld [vmem:[%s3794_s1 + $0x220] sm:$0xff]  }
  0x1e   : > { %2841 = vmatpush3.bf16.msra.mxu0 %v3097_v8  ;;  %v297_v63 = vsel %vm3314_vm2, %v292_v58, %v296_v53  ;;  %v226_v8 = vld [vmem:[%s3271_s16 + $0x28] sm:$0xf]  ;;  %v358_v38 = vshll.u32 %v228_v22, 16  ;;  %v343_v42 = vrot.slane %v341_v32, 4  ;;  %v346_v43 = vrot.slane %v344_v33, 5 }
  0x1f   : > { %2865 = vmatpush3.bf16.msra.mxu1 %v3098_v9  ;;  %2842 = vmatprep.subr.bf16.mxu0 %v3099_v10  ;;  %v311_v0 = vsel %vm3314_vm2, %v306_v61, %v310_v56  ;;  %v3354_v9 = vld [vmem:[%s3271_s16 + $0x24] sm:$0x1]  ;;  %v330_v19 = vshll.u32 %v226_v8, 16  ;;  %v2404_v21 = vcombine.low %v225_v6, %v226_v8  ;;  %v364_v44 = vshll.u32 %v3370_v28, 16 }
  0x20   : > { %2866 = vmatprep.subr.bf16.mxu1 %v3100_v14  ;;  %2848 = vmatprep.mubr.bf16.mxu0 %v2390_v60  ;;  %v2391_v1 = vcombine.low %v297_v63, %v311_v0  ;;  %v322_v16 = vshll.u32 %v3354_v9, 16  ;;  %v357_v47 = vrot.slane %v355_v37, 4  ;;  %v360_v48 = vrot.slane %v358_v38, 5  ;;  %v651_v63 = vld [vmem:[%s3271_s16] sm:$0xe] }
  0x21   : > { %v332_v29 = vrot.slane %v330_v19, 5  ;;  %v2405_v52 = vcombine.low %v227_v18, %v228_v22  ;;  %v684_v53 = vrot.slane %v3285_v15, 5  ;;  %v366_v56 = vrot.slane %v364_v44, 5  ;;  %v3116_v15 = vld [vmem:[%s3794_s1 + $0xd8] sm:$0xff]   ;;  %v652_v0 = vld [vmem:[%s3271_s16 + $0x8] sm:$0xe] }
  0x22   : > { %2843 = vmatpush3.bf16.msra.mxu0 %v3099_v10  ;;  %v3357_v10 = vld [vmem:[%s3271_s16 + $0x2c] sm:$0x1]  ;;  %v324_v26 = vrot.slane %v322_v16, 5  ;;  %v361_v55 = vor.u32 %v360_v48, %v357_v47  ;;  %v653_v18 = vld [vmem:[%s3271_s16 + $0x10] sm:$0xe]  ;;  %v688_v19 = vrot.slane %v3302_v31, 5 }
  0x23   : > { %2867 = vmatpush3.bf16.msra.mxu1 %v3100_v14  ;;  %2844 = vmatprep.subr.bf16.mxu0 %v3101_v17  ;;  %v316_v14 = vshll.u32 %v225_v6, 16  ;;  %v336_v20 = vshll.u32 %v3357_v10, 16  ;;  %v2415_v6 = vrot.slane %v652_v0, 9  ;;  %v3121_v16 = vld [vmem:[%s3794_s1 + $0x88] sm:$0xff]   ;;  %v2416_v22 = vrot.slane %v653_v18, 9 }
  0x24   : > { %2868 = vmatprep.subr.bf16.mxu1 %v3102_v23  ;;  %v362_v61 = vrot.slane %v361_v55, 4  ;;  %v696_v31 = vrot.slane %v3354_v9, 5  ;;  %v657_v9 = vld [vmem:[%s3271_s16 + $0x30] sm:$0xe]  ;;  %v708_v37 = vrot.slane %v3370_v28, 5 }
  0x25   : > { %v318_v25 = vrot.slane %v316_v14, 5  ;;  %v338_v30 = vrot.slane %v336_v20, 5  ;;  %v685_v12 = vsel %vm3397_vm5, %v2415_v6, %v684_v53  ;;  %v3125_v14 = vld [vmem:[%s3271_s16 + $0x8] ss:$8 sps:$4 sm:$0xff]   ;;  %v692_v20 = vrot.slane %v3305_v34, 5 }
  0x26   : > { %2845 = vmatpush3.bf16.msra.mxu0 %v3101_v17  ;;  %v327_v17 = vshrl.u32 %v226_v8, 16  ;;  %v3120_v8 = vld [vmem:[%s3794_s1 + $0xd0] sm:$0xff]   ;;  %v700_v34 = vrot.slane %v3357_v10, 5  ;;  %v658_v10 = vld [vmem:[%s3271_s16 + $0x38] sm:$0xe] }
  0x27   : > { %2869 = vmatpush3.bf16.msra.mxu1 %v3102_v23  ;;  %2846 = vmatprep.subr.bf16.mxu0 %v3103_v46  ;;  %v3367_v23 = vld [vmem:[%s3271_s16 + $0x34] sm:$0x1]  ;;  %v319_v35 = vor.u32 %v318_v25, %v315_v24  ;;  %v2417_v24 = vrot.slane %v654_v13, 9  ;;  %v655_v25 = vld [vmem:[%s3271_s16 + $0x20] sm:$0xe]  ;;  %v2421_v44 = vrot.slane %v658_v10, 9 }
  0x28   : > { %2870 = vmatprep.subr.bf16.mxu1 %v3104_v50  ;;  %v329_v27 = vrot.slane %v327_v17, 4  ;;  %v350_v36 = vshll.u32 %v3367_v23, 16  ;;  %v2418_v32 = vrot.slane %v655_v25, 9  ;;  %v3130_v28 = vld [vmem:[%s3794_s1 + $0x170] sm:$0xff]   ;;  %v2486_v55 = vld [vmem:[%s3271_s16 + $0x8] sm:$0xf] }
  0x29   : > { %v3133_v47 = vld [vmem:[%s3271_s16 + $0x28] ss:$8 sps:$4 sm:$0xff]   ;;  %v3491_v6 = vld [vmem:[%s3271_s16 + $0x1c] sm:$0x1] }
  0x2a   : > { %2847 = vmatpush3.bf16.msra.mxu0 %v3103_v46  ;;  %v333_v40 = vor.u32 %v332_v29, %v329_v27  ;;  %v320_v46 = vrot.slane %v319_v35, 4  ;;  %v352_v51 = vrot.slane %v350_v36, 5  ;;  %v3124_v27 = vld [vmem:[%s3794_s1 + $0xc0] sm:$0xff]   ;;  %v704_v29 = vrot.slane %v3367_v23, 5  ;;  %v3127_v23 = vld [vmem:[%s3794_s1 + $0x178] sm:$0xff]   ;;  %v3140_v10 = vld [vmem:[%s3794_s1 + $0x150] sm:$0xff]  }
  0x2b   : > { %2871 = vmatpush3.bf16.msra.mxu1 %v3104_v50  ;;  %2880 = vmatprep.subr.bf16.mxu0 %v3107_v59  ;;  %v347_v50 = vor.u32 %v346_v43, %v343_v42  ;;  %v689_v35 = vsel %vm3397_vm5, %v2416_v22, %v688_v19  ;;  %v693_v36 = vsel %vm3397_vm5, %v2417_v24, %v692_v20  ;;  %v2420_v43 = vrot.slane %v657_v9, 9  ;;  %v2530_v20 = vld [vmem:[%s3271_s16 + $0x8] sm:$0xe] }
  0x2c   : > { %2904 = vmatprep.subr.bf16.mxu1 %v3108_v62  ;;  %v334_v49 = vrot.slane %v333_v40, 4  ;;  %v325_v54 = vsel %vm3314_vm2, %v320_v46, %v324_v26  ;;  %v656_v26 = vld [vmem:[%s3271_s16 + $0x28] sm:$0xe]  ;;  %v2439_v38 = vcombine.low %v689_v35, %v693_v36  ;;  %v697_v40 = vsel %vm3397_vm5, %v2418_v32, %v696_v31  ;;  %v3139_v32 = vld [vmem:[%s3794_s1 + $0x110] sm:$0xff]  }
  0x2d   : > { %2849 = vmatmul.mubr.bf16.vlgmr.msra.gmra.mxu0 %v2391_v1  ;;  %v2419_v33 = vrot.slane %v656_v26, 9  ;;  %v705_v48 = vsel %vm3397_vm5, %v2420_v43, %v704_v29  ;;  %v1089_v19 = vshll.u32 %v3491_v6, 16 }
  0x2e   : > { %2873 = vmatmul.mubr.bf16.vlgmr.msra.gmra.mxu1 %v2403_v2  ;;  %2881 = vmatpush3.bf16.msra.mxu0 %v3107_v59  ;;  %v339_v58 = vsel %vm3314_vm2, %v334_v49, %v338_v30  ;;  %v348_v59 = vrot.slane %v347_v50, 4  ;;  %v367_v2 = vsel %vm3314_vm2, %v362_v61, %v366_v56  ;;  %v3126_v30 = vld [vmem:[%s3794_s1 + $0x138] sm:$0xff]   ;;  %v709_v49 = vsel %vm3397_vm5, %v2421_v44, %v708_v37  ;;  %v3131_v50 = vld [vmem:[%s3794_s1 + $0x128] sm:$0xff]  }
  0x2f   : > { %2905 = vmatpush3.bf16.msra.mxu1 %v3108_v62  ;;  %2882 = vmatprep.subr.bf16.mxu0 %v3109_v3  ;;  %v2392_v60 = vcombine.low %v325_v54, %v339_v58  ;;  %v701_v42 = vsel %vm3397_vm5, %v2419_v33, %v700_v34  ;;  %v2441_v53 = vcombine.low %v705_v48, %v709_v49  ;;  %v3135_v54 = vld [vmem:[%s3794_s1 + $0x120] sm:$0xff]   ;;  %v3478_v56 = vld [vmem:[%s3271_s16 + $0xc] sm:$0x1]  ;;  %v2488_v58 = vld [vmem:[%s3271_s16 + $0x10] sm:$0xf] }
  0x30   : > { %2906 = vmatprep.subr.bf16.mxu1 %v3110_v5  ;;  %2876 = vmatprep.mubr.bf16.mxu1 %v2404_v21  ;;  %v353_v62 = vsel %vm3314_vm2, %v348_v59, %v352_v51  ;;  %v3123_v21 = vld [vmem:[%s3794_s1 + $0x80] sm:$0xff]   ;;  %v2440_v46 = vcombine.low %v697_v40, %v701_v42  ;;  %v3132_v51 = vld [vmem:[%s3794_s1 + $0x168] sm:$0xff]   ;;  %v3485_v59 = vld [vmem:[%s3271_s16 + $0x14] sm:$0x1]  ;;  %v1061_v61 = vshll.u32 %v3478_v56, 16 }
  0x31   : > { %2852 = vmatprep.mubr.bf16.mxu0 %v2392_v60  ;;  %v1055_v60 = vshll.u32 %v2486_v55, 16  ;;  %v1075_v0 = vshll.u32 %v3485_v59, 16  ;;  %v1347_v44 = vrot.slane %v3485_v59, 5  ;;  %v2494_v59 = vld [vmem:[%s3271_s16 + $0x28] sm:$0xf] }
  0x32   : > { %2883 = vmatpush3.bf16.msra.mxu0 %v3109_v3  ;;  %v3119_v3 = vld [vmem:[%s3794_s1 + $0x90] sm:$0xff]  }
  0x33   : > { %2907 = vmatpush3.bf16.msra.mxu1 %v3110_v5  ;;  %2884 = vmatprep.subr.bf16.mxu0 %v3111_v7  ;;  %v2414_v5 = vrot.slane %v651_v63, 9  ;;  %v1069_v63 = vshll.u32 %v2488_v58, 16 }
  0x34   : > { %2908 = vmatprep.subr.bf16.mxu1 %v3112_v11 }
  0x36   : > { %2885 = vmatpush3.bf16.msra.mxu0 %v3111_v7  ;;  %2877 = vmatmul.mubr.bf16.gmra.mxu1 %v2405_v52  ;;  %v2393_v7 = vcombine.low %v353_v62, %v367_v2  ;;  %v3134_v52 = vld [vmem:[%s3271_s16 + $0x38] ss:$8 sps:$4 sm:$0xff]   ;;  %v1066_v62 = vshrl.u32 %v2488_v58, 16 }
  0x37   : > { %2909 = vmatpush3.bf16.msra.mxu1 %v3112_v11  ;;  %2886 = vmatprep.subr.bf16.mxu0 %v3113_v39  ;;  %v681_v11 = vsel %vm3397_vm5, %v2414_v5, %v680_v4  ;;  %v3122_v4 = vld [vmem:[%s3794_s1 + $0xc8] sm:$0xff]   ;;  %v2490_v2 = vld [vmem:[%s3271_s16 + $0x18] sm:$0xf]  ;;  %v1057_v5 = vrot.slane %v1055_v60, 5 }
  0x38   : > { %2910 = vmatprep.subr.bf16.mxu1 %v3114_v45  ;;  %2853 = vmatmul.mubr.bf16.gmra.mxu0 %v2393_v7  ;;  %v2438_v17 = vcombine.low %v681_v11, %v685_v12  ;;  %v2492_v7 = vld [vmem:[%s3271_s16 + $0x20] sm:$0xf]  ;;  %v1068_v11 = vrot.slane %v1066_v62, 4  ;;  %v1071_v12 = vrot.slane %v1069_v63, 5  ;;  %v1080_v13 = vshrl.u32 %v2490_v2, 16 }
  0x39   : > { %2920 = vmatprep.mubr.bf16.mxu1 %v3125_v14  ;;  %v1077_v14 = vrot.slane %v1075_v0, 5  ;;  %v1094_v24 = vshrl.u32 %v2492_v7, 16  ;;  %v1097_v25 = vshll.u32 %v2492_v7, 16  ;;  %v3539_v60 = vld [vmem:[%s3271_s16 + $0x2c] sm:$0x1]  ;;  %v3143_v7 = vld [vmem:[%s3794_s1 + $0x100] sm:$0xff]  }
  0x3a   : > { %2887 = vmatpush3.bf16.msra.mxu0 %v3113_v39  ;;  %2896 = vmatprep.mubr.bf16.mxu0 %v2438_v17  ;;  %v3128_v39 = vld [vmem:[%s3271_s16 + $0x18] ss:$8 sps:$4 sm:$0xff]   ;;  %v1072_v22 = vor.u32 %v1071_v12, %v1068_v11  ;;  %v1082_v34 = vrot.slane %v1080_v13, 4  ;;  %v3543_v62 = vld [vmem:[%s3271_s16 + $0x34] sm:$0x1]  ;;  %v1117_v11 = vshll.u32 %v3539_v60, 16 }
  0x3b   : > { %2911 = vmatpush3.bf16.msra.mxu1 %v3114_v45  ;;  %2888 = vmatprep.subr.bf16.mxu0 %v3115_v57  ;;  %v3129_v45 = vld [vmem:[%s3794_s1 + $0x130] sm:$0xff]   ;;  %v3137_v17 = vld [vmem:[%s3794_s1 + $0x118] sm:$0xff]   ;;  %v1096_v35 = vrot.slane %v1094_v24, 4  ;;  %v1099_v36 = vrot.slane %v1097_v25, 5  ;;  %v1131_v13 = vshll.u32 %v3543_v62, 16  ;;  %v3144_v25 = vld [vmem:[%s3794_s1 + $0x140] sm:$0xff]  }
  0x3c   : > { %2912 = vmatprep.subr.bf16.mxu1 %v3116_v15  ;;  %v1073_v33 = vrot.slane %v1072_v22, 4 }
  0x3d   : > { %v1100_v42 = vor.u32 %v1099_v36, %v1096_v35 }
  0x3e   : > { %2889 = vmatpush3.bf16.msra.mxu0 %v3115_v57  ;;  %v3136_v57 = vld [vmem:[%s3794_s1 + $0x160] sm:$0xff]   ;;  %v1078_v40 = vsel %vm3314_vm2, %v1073_v33, %v1077_v14 }
  0x3f   : > { %2913 = vmatpush3.bf16.msra.mxu1 %v3116_v15  ;;  %2890 = vmatprep.subr.bf16.mxu0 %v3119_v3  ;;  %v1052_v15 = vshrl.u32 %v2486_v55, 16  ;;  %v3142_v55 = vld [vmem:[%s3794_s1 + $0x148] sm:$0xff]  }
  0x40   : > { %2914 = vmatprep.subr.bf16.mxu1 %v3120_v8 }
  0x42   : > { %2891 = vmatpush3.bf16.msra.mxu0 %v3119_v3  ;;  %v1054_v3 = vrot.slane %v1052_v15, 4 }
  0x43   : > { %2915 = vmatpush3.bf16.msra.mxu1 %v3120_v8  ;;  %2892 = vmatprep.subr.bf16.mxu0 %v3121_v16  ;;  %v1063_v8 = vrot.slane %v1061_v61, 5  ;;  %v2496_v61 = vld [vmem:[%s3271_s16 + $0x30] sm:$0xf] }
  0x44   : > { %2916 = vmatprep.subr.bf16.mxu1 %v3122_v4  ;;  %v1058_v18 = vor.u32 %v1057_v5, %v1054_v3  ;;  %v1111_v3 = vshll.u32 %v2494_v59, 16  ;;  %v2498_v5 = vld [vmem:[%s3271_s16 + $0x38] sm:$0xf]  ;;  %v1122_v12 = vshrl.u32 %v2496_v61, 16  ;;  %v1125_v14 = vshll.u32 %v2496_v61, 16  ;;  %v3148_v61 = vld [vmem:[%s3794_s1 + $0x1f0] sm:$0xff]  }
  0x45   : > { %v1139_v24 = vshll.u32 %v2498_v5, 16 }
  0x46   : > { %2893 = vmatpush3.bf16.msra.mxu0 %v3121_v16  ;;  %v3495_v16 = vld [vmem:[%s3271_s16 + $0x24] sm:$0x1]  ;;  %v1059_v31 = vrot.slane %v1058_v18, 4  ;;  %v1113_v18 = vrot.slane %v1111_v3, 5  ;;  %v1127_v22 = vrot.slane %v1125_v14, 5 }
  0x47   : > { %2917 = vmatpush3.bf16.msra.mxu1 %v3122_v4  ;;  %2894 = vmatprep.subr.bf16.mxu0 %v3123_v21  ;;  %v1083_v4 = vshll.u32 %v2490_v2, 16  ;;  %v1103_v26 = vshll.u32 %v3495_v16, 16  ;;  %v1355_v58 = vrot.slane %v3495_v16, 5  ;;  %v1108_v2 = vshrl.u32 %v2494_v59, 16  ;;  %v2500_v16 = vld [vmem:[%s3271_s16 + $0x40] sm:$0xf] }
  0x48   : > { %2918 = vmatprep.subr.bf16.mxu1 %v3124_v27  ;;  %v1153_v33 = vshll.u32 %v2500_v16, 16  ;;  %v3151_v14 = vld [vmem:[%s3794_s1 + $0x1a0] sm:$0xff]  }
  0x49   : > { %v1085_v29 = vrot.slane %v1083_v4, 5  ;;  %v1105_v9 = vrot.slane %v1103_v26, 5  ;;  %v3566_v4 = vld [vmem:[%s3271_s16 + $0x44] sm:$0x1] }
  0x4a   : > { %2895 = vmatpush3.bf16.msra.mxu0 %v3123_v21  ;;  %v3138_v21 = vld [vmem:[%s3794_s1 + $0x158] sm:$0xff]  }
  0x4b   : > { %2919 = vmatpush3.bf16.msra.mxu1 %v3124_v27  ;;  %2928 = vmatprep.subr.bf16.mxu0 %v3126_v30  ;;  %v2531_v27 = vld [vmem:[%s3271_s16 + $0x10] sm:$0xe]  ;;  %v1086_v37 = vor.u32 %v1085_v29, %v1082_v34 }
  0x4c   : > { %2952 = vmatprep.subr.bf16.mxu1 %v3127_v23  ;;  %v2539_v43 = vrot.slane %v2531_v27, 9  ;;  %v1133_v27 = vrot.slane %v1131_v13, 5  ;;  %v2610_v13 = vld [vmem:[%s3271_s16 + $0x10] sm:$0xf] }
  0x4d   : > { %2897 = vmatmul.mubr.bf16.vlgmr.msra.gmra.mxu0 %v2439_v38  ;;  %v2538_v38 = vrot.slane %v2530_v20, 9  ;;  %v1119_v20 = vrot.slane %v1117_v11, 5 }
  0x4e   : > { %2921 = vmatmul.mubr.bf16.vlgmr.msra.gmra.mxu1 %v3128_v39  ;;  %2929 = vmatpush3.bf16.msra.mxu0 %v3126_v30  ;;  %v1091_v30 = vrot.slane %v1089_v19, 5  ;;  %v1343_v39 = vrot.slane %v3478_v56, 5  ;;  %v1136_v19 = vshrl.u32 %v2498_v5, 16 }
  0x4f   : > { %2953 = vmatpush3.bf16.msra.mxu1 %v3127_v23  ;;  %2930 = vmatprep.subr.bf16.mxu0 %v3129_v45  ;;  %v1064_v23 = vsel %vm3314_vm2, %v1059_v31, %v1063_v8 }
  0x50   : > { %2954 = vmatprep.subr.bf16.mxu1 %v3130_v28  ;;  %2900 = vmatprep.mubr.bf16.mxu0 %v2440_v46  ;;  %v2518_v46 = vcombine.low %v1064_v23, %v1078_v40  ;;  %v1344_v48 = vsel %vm3397_vm5, %v2538_v38, %v1343_v39  ;;  %v1138_v31 = vrot.slane %v1136_v19, 4  ;;  %v3145_v23 = vld [vmem:[%s3794_s1 + $0x1b8] sm:$0xff]   ;;  %v1155_v40 = vrot.slane %v1153_v33, 5 }
  0x51   : > { %2924 = vmatprep.mubr.bf16.mxu1 %v3133_v47  ;;  %v1087_v47 = vrot.slane %v1086_v37, 4  ;;  %v2612_v19 = vld [vmem:[%s3271_s16 + $0x18] sm:$0xf] }
  0x52   : > { %2931 = vmatpush3.bf16.msra.mxu0 %v3129_v45  ;;  %v2532_v45 = vld [vmem:[%s3271_s16 + $0x18] sm:$0xe] }
  0x53   : > { %2955 = vmatpush3.bf16.msra.mxu1 %v3130_v28  ;;  %2932 = vmatprep.subr.bf16.mxu0 %v3131_v50  ;;  %v2533_v28 = vld [vmem:[%s3271_s16 + $0x20] sm:$0xe]  ;;  %v2540_v49 = vrot.slane %v2532_v45, 9  ;;  %v1092_v56 = vsel %vm3314_vm2, %v1087_v47, %v1091_v30  ;;  %v1141_v30 = vrot.slane %v1139_v24, 5  ;;  %v1363_v47 = vrot.slane %v3543_v62, 5 }
  0x54   : > { %2956 = vmatprep.subr.bf16.mxu1 %v3132_v51 }
  0x55   : > { %2901 = vmatmul.mubr.bf16.gmra.mxu0 %v2441_v53  ;;  %v1351_v53 = vrot.slane %v3491_v6, 5  ;;  %v3553_v6 = vld [vmem:[%s3271_s16 + $0x3c] sm:$0x1]  ;;  %v1142_v38 = vor.u32 %v1141_v30, %v1138_v31 }
  0x56   : > { %2933 = vmatpush3.bf16.msra.mxu0 %v3131_v50  ;;  %2925 = vmatmul.mubr.bf16.gmra.mxu1 %v3134_v52  ;;  %v3141_v50 = vld [vmem:[%s3794_s1 + $0x108] sm:$0xff]   ;;  %v1348_v52 = vsel %vm3397_vm5, %v2539_v43, %v1347_v44  ;;  %v1145_v34 = vshll.u32 %v3553_v6, 16  ;;  %v3146_v43 = vld [vmem:[%s3794_s1 + $0x1f8] sm:$0xff]  }
  0x57   : > { %2957 = vmatpush3.bf16.msra.mxu1 %v3132_v51  ;;  %2934 = vmatprep.subr.bf16.mxu0 %v3135_v54  ;;  %v1101_v51 = vrot.slane %v1100_v42, 4  ;;  %v3549_v0 = vsel %vm3397_vm5, %v2540_v49, %v1351_v53  ;;  %v2534_v42 = vld [vmem:[%s3271_s16 + $0x28] sm:$0xe]  ;;  %v2536_v53 = vld [vmem:[%s3271_s16 + $0x38] sm:$0xe] }
  0x58   : > { %2958 = vmatprep.subr.bf16.mxu1 %v3136_v57  ;;  %2944 = vmatprep.mubr.bf16.mxu0 %v2518_v46  ;;  %v1147_v36 = vrot.slane %v1145_v34, 5  ;;  %v2542_v46 = vrot.slane %v2534_v42, 9  ;;  %v3156_v42 = vld [vmem:[%s3794_s1 + $0x1d0] sm:$0xff]  }
  0x59   : > { %v1106_v15 = vsel %vm3314_vm2, %v1101_v51, %v1105_v9  ;;  %v1159_v9 = vshll.u32 %v3566_v4, 16 }
  0x5a   : > { %2935 = vmatpush3.bf16.msra.mxu0 %v3135_v54  ;;  %v2541_v54 = vrot.slane %v2533_v28, 9  ;;  %v3545_v63 = vcombine.low %v1092_v56, %v1106_v15  ;;  %v2535_v28 = vld [vmem:[%s3271_s16 + $0x30] sm:$0xe] }
  0x5b   : > { %2959 = vmatpush3.bf16.msra.mxu1 %v3136_v57  ;;  %2936 = vmatprep.subr.bf16.mxu0 %v3137_v17  ;;  %v2562_v57 = vcombine.low %v1344_v48, %v1348_v52  ;;  %v1161_v45 = vrot.slane %v1159_v9, 5  ;;  %v3147_v48 = vld [vmem:[%s3794_s1 + $0x1b0] sm:$0xff]   ;;  %v2543_v52 = vrot.slane %v2535_v28, 9  ;;  %v2616_v9 = vld [vmem:[%s3271_s16 + $0x28] sm:$0xf] }
  0x5c   : > { %2960 = vmatprep.subr.bf16.mxu1 %v3138_v21  ;;  %v3560_v8 = vsel %vm3397_vm5, %v2541_v54, %v1355_v58  ;;  %v2537_v54 = vld [vmem:[%s3271_s16 + $0x40] sm:$0xe]  ;;  %v1367_v58 = vrot.slane %v3553_v6, 5  ;;  %v3149_v6 = vld [vmem:[%s3794_s1 + $0x1a8] sm:$0xff]   ;;  %v1760_v28 = vshll.u32 %v2616_v9, 16 }
  0x5d   : > { %2968 = vmatprep.mubr.bf16.mxu1 %v2562_v57  ;;  %v2544_v57 = vrot.slane %v2536_v53, 9  ;;  %v1364_v15 = vsel %vm3397_vm5, %v2543_v52, %v1363_v47  ;;  %v3157_v53 = vld [vmem:[%s3794_s1 + $0x188] sm:$0xff]  }
  0x5e   : > { %2937 = vmatpush3.bf16.msra.mxu0 %v3137_v17  ;;  %v1110_v17 = vrot.slane %v1108_v2, 4  ;;  %v1762_v52 = vrot.slane %v1760_v28, 5  ;;  %v3165_v28 = vld [vmem:[%s3271_s16 + $0x30] ss:$8 sps:$4 sm:$0xff]  }
  0x5f   : > { %2961 = vmatpush3.bf16.msra.mxu1 %v3138_v21  ;;  %2938 = vmatprep.subr.bf16.mxu0 %v3139_v32  ;;  %v1124_v21 = vrot.slane %v1122_v12, 4 }
  0x60   : > { %2962 = vmatprep.subr.bf16.mxu1 %v3140_v10  ;;  %v1114_v26 = vor.u32 %v1113_v18, %v1110_v17  ;;  %v3161_v17 = vld [vmem:[%s3271_s16 + $0x10] ss:$8 sps:$4 sm:$0xff]  }
  0x61   : > { %v1128_v29 = vor.u32 %v1127_v22, %v1124_v21  ;;  %v3153_v18 = vld [vmem:[%s3794_s1 + $0x198] sm:$0xff]   ;;  %v1715_v21 = vshrl.u32 %v2610_v13, 16  ;;  %v1718_v22 = vshll.u32 %v2610_v13, 16 }
  0x62   : > { %2939 = vmatpush3.bf16.msra.mxu0 %v3139_v32  ;;  %v1150_v32 = vshrl.u32 %v2500_v16, 16  ;;  %v1115_v35 = vrot.slane %v1114_v26, 4  ;;  %v3152_v16 = vld [vmem:[%s3794_s1 + $0x1e0] sm:$0xff]   ;;  %v3154_v26 = vld [vmem:[%s3794_s1 + $0x1d8] sm:$0xff]  }
  0x63   : > { %2963 = vmatpush3.bf16.msra.mxu1 %v3140_v10  ;;  %2940 = vmatprep.subr.bf16.mxu0 %v3141_v50  ;;  %v1359_v10 = vrot.slane %v3539_v60, 5  ;;  %v1129_v37 = vrot.slane %v1128_v29, 4  ;;  %v2545_v60 = vrot.slane %v2537_v54, 9  ;;  %v1717_v34 = vrot.slane %v1715_v21, 4 }
  0x64   : > { %2964 = vmatprep.subr.bf16.mxu1 %v3142_v55  ;;  %v1152_v39 = vrot.slane %v1150_v32, 4  ;;  %v1120_v44 = vsel %vm3314_vm2, %v1115_v35, %v1119_v20  ;;  %v3634_v20 = vld [vmem:[%s3271_s16 + $0x1c] sm:$0x1]  ;;  %v1720_v29 = vrot.slane %v1718_v22, 5  ;;  %v2614_v32 = vld [vmem:[%s3271_s16 + $0x20] sm:$0xf] }
  0x65   : > { %v1134_v49 = vsel %vm3314_vm2, %v1129_v37, %v1133_v27  ;;  %v1360_v56 = vsel %vm3397_vm5, %v2542_v46, %v1359_v10  ;;  %v1732_v27 = vshll.u32 %v2612_v19, 16  ;;  %v1738_v31 = vshll.u32 %v3634_v20, 16  ;;  %v3155_v10 = vld [vmem:[%s3794_s1 + $0x190] sm:$0xff]   ;;  %v3685_v22 = vld [vmem:[%s3271_s16 + $0x44] sm:$0x1] }
  0x66   : > { %2941 = vmatpush3.bf16.msra.mxu0 %v3141_v50  ;;  %v1143_v50 = vrot.slane %v1142_v38, 4  ;;  %v1156_v51 = vor.u32 %v1155_v40, %v1152_v39  ;;  %v2520_v62 = vcombine.low %v1120_v44, %v1134_v49  ;;  %v2564_v2 = vcombine.low %v1360_v56, %v1364_v15  ;;  %v3650_v38 = vld [vmem:[%s3271_s16 + $0x2c] sm:$0x1] }
  0x67   : > { %2965 = vmatpush3.bf16.msra.mxu1 %v3142_v55  ;;  %2942 = vmatprep.subr.bf16.mxu0 %v3143_v7  ;;  %v2563_v55 = vcombine.low %v3549_v0, %v3560_v8  ;;  %v1371_v0 = vrot.slane %v3566_v4, 5  ;;  %v3150_v8 = vld [vmem:[%s3794_s1 + $0x1e8] sm:$0xff]   ;;  %v3630_v4 = vld [vmem:[%s3271_s16 + $0x14] sm:$0x1]  ;;  %v1734_v35 = vrot.slane %v1732_v27, 5  ;;  %v1740_v37 = vrot.slane %v1738_v31, 5 }
  0x68   : > { %2966 = vmatprep.subr.bf16.mxu1 %v3144_v25  ;;  %v1157_v59 = vrot.slane %v1156_v51, 4  ;;  %v1148_v3 = vsel %vm3314_vm2, %v1143_v50, %v1147_v36  ;;  %v1724_v24 = vshll.u32 %v3630_v4, 16  ;;  %v3643_v36 = vld [vmem:[%s3271_s16 + $0x24] sm:$0x1]  ;;  %v1743_v39 = vshrl.u32 %v2614_v32, 16  ;;  %v3158_v56 = vld [vmem:[%s3794_s1 + $0x1c8] sm:$0xff]  }
  0x69   : > { %v1746_v40 = vshll.u32 %v2614_v32, 16  ;;  %v1752_v44 = vshll.u32 %v3643_v36, 16  ;;  %v1766_v49 = vshll.u32 %v3650_v38, 16  ;;  %v2624_v31 = vld [vmem:[%s3271_s16 + $0x48] sm:$0xf] }
  0x6a   : > { %2943 = vmatpush3.bf16.msra.mxu0 %v3143_v7  ;;  %v1162_v5 = vsel %vm3314_vm2, %v1157_v59, %v1161_v45  ;;  %v1368_v7 = vsel %vm3397_vm5, %v2544_v57, %v1367_v58  ;;  %v1726_v33 = vrot.slane %v1724_v24, 5  ;;  %v1757_v45 = vshrl.u32 %v2616_v9, 16 }
  0x6b   : > { %2967 = vmatpush3.bf16.msra.mxu1 %v3144_v25  ;;  %2976 = vmatprep.subr.bf16.mxu0 %v3145_v23  ;;  %v2521_v11 = vcombine.low %v1148_v3, %v1162_v5  ;;  %v1729_v25 = vshrl.u32 %v2612_v19, 16  ;;  %v1745_v47 = vrot.slane %v1743_v39, 4  ;;  %v1754_v58 = vrot.slane %v1752_v44, 5  ;;  %v2620_v3 = vld [vmem:[%s3271_s16 + $0x38] sm:$0xf] }
  0x6c   : > { %3000 = vmatprep.subr.bf16.mxu1 %v3146_v43  ;;  %v1759_v51 = vrot.slane %v1757_v45, 4  ;;  %v1808_v9 = vshll.u32 %v3685_v22, 16  ;;  %v3164_v45 = vld [vmem:[%s3794_s1 + $0x230] sm:$0xff]  }
  0x6d   : > { %2945 = vmatmul.mubr.bf16.vlgmr.msra.gmra.mxu0 %v3545_v63  ;;  %v1372_v63 = vsel %vm3397_vm5, %v2545_v60, %v1371_v0  ;;  %v1731_v30 = vrot.slane %v1729_v25, 4 }
  0x6e   : > { %2969 = vmatmul.mubr.bf16.vlgmr.msra.gmra.mxu1 %v2563_v55  ;;  %2977 = vmatpush3.bf16.msra.mxu0 %v3145_v23  ;;  %v2565_v12 = vcombine.low %v1368_v7, %v1372_v63  ;;  %v1721_v23 = vor.u32 %v1720_v29, %v1717_v34  ;;  %v1763_v59 = vor.u32 %v1762_v52, %v1759_v51  ;;  %v3676_v7 = vld [vmem:[%s3271_s16 + $0x3c] sm:$0x1]  ;;  %v3693_v34 = vld [vmem:[%s3271_s16 + $0x4c] sm:$0x1]  ;;  %v3162_v29 = vld [vmem:[%s3271_s16 + $0x20] ss:$8 sps:$4 sm:$0xff]  }
  0x6f   : > { %3001 = vmatpush3.bf16.msra.mxu1 %v3146_v43  ;;  %2978 = vmatprep.subr.bf16.mxu0 %v3147_v48  ;;  %v1735_v43 = vor.u32 %v1734_v35, %v1731_v30  ;;  %v3163_v30 = vld [vmem:[%s3794_s1 + $0x238] sm:$0xff]   ;;  %v1822_v39 = vshll.u32 %v3693_v34, 16  ;;  %v1810_v51 = vrot.slane %v1808_v9, 5  ;;  %v2034_v9 = vrot.slane %v3693_v34, 5 }
  0x70   : > { %3002 = vmatprep.subr.bf16.mxu1 %v3148_v61  ;;  %2948 = vmatprep.mubr.bf16.mxu0 %v2520_v62  ;;  %v1722_v46 = vrot.slane %v1721_v23, 4  ;;  %v2618_v62 = vld [vmem:[%s3271_s16 + $0x30] sm:$0xf]  ;;  %v1764_v0 = vrot.slane %v1763_v59, 4  ;;  %v1813_v23 = vshrl.u32 %v2624_v31, 16  ;;  %v2006_v59 = vrot.slane %v3630_v4, 5 }
  0x71   : > { %2972 = vmatprep.mubr.bf16.mxu1 %v2564_v2  ;;  %v1736_v50 = vrot.slane %v1735_v43, 4  ;;  %v3669_v2 = vld [vmem:[%s3271_s16 + $0x34] sm:$0x1]  ;;  %v1771_v5 = vshrl.u32 %v2618_v62, 16  ;;  %v1774_v63 = vshll.u32 %v2618_v62, 16  ;;  %v1824_v52 = vrot.slane %v1822_v39, 5 }
  0x72   : > { %2979 = vmatpush3.bf16.msra.mxu0 %v3147_v48  ;;  %v1748_v48 = vrot.slane %v1746_v40, 5  ;;  %v1727_v54 = vsel %vm3314_vm2, %v1722_v46, %v1726_v33  ;;  %v2010_v62 = vrot.slane %v3634_v20, 5  ;;  %v2026_v4 = vrot.slane %v3676_v7, 5  ;;  %v3166_v20 = vld [vmem:[%s3271_s16 + $0x40] ss:$8 sps:$4 sm:$0xff]  }
  0x73   : > { %3003 = vmatpush3.bf16.msra.mxu1 %v3148_v61  ;;  %2980 = vmatprep.subr.bf16.mxu0 %v3149_v6  ;;  %v1741_v57 = vsel %vm3314_vm2, %v1736_v50, %v1740_v37  ;;  %v1768_v61 = vrot.slane %v1766_v49, 5  ;;  %v1776_v13 = vrot.slane %v1774_v63, 5  ;;  %v1816_v37 = vshll.u32 %v2624_v31, 16  ;;  %v2659_v63 = vld [vmem:[%s3271_s16 + $0x38] sm:$0xe] }
  0x74   : > { %3004 = vmatprep.subr.bf16.mxu1 %v3150_v8  ;;  %v1749_v55 = vor.u32 %v1748_v48, %v1745_v47  ;;  %v2642_v15 = vcombine.low %v1727_v54, %v1741_v57  ;;  %v1815_v47 = vrot.slane %v1813_v23, 4  ;;  %v2661_v31 = vld [vmem:[%s3271_s16 + $0x48] sm:$0xe] }
  0x75   : > { %2949 = vmatmul.mubr.bf16.gmra.mxu0 %v2521_v11  ;;  %v1785_v11 = vshrl.u32 %v2620_v3, 16  ;;  %v1769_v25 = vsel %vm3314_vm2, %v1764_v0, %v1768_v61  ;;  %v1818_v48 = vrot.slane %v1816_v37, 5  ;;  %v2022_v0 = vrot.slane %v3669_v2, 5 }
  0x76   : > { %2981 = vmatpush3.bf16.msra.mxu0 %v3149_v6  ;;  %2973 = vmatmul.mubr.bf16.gmra.mxu1 %v2565_v12  ;;  %v1750_v60 = vrot.slane %v1749_v55, 4  ;;  %v3159_v6 = vld [vmem:[%s3794_s1 + $0x180] sm:$0xff]   ;;  %v3167_v55 = vld [vmem:[%s3794_s1 + $0x228] sm:$0xff]   ;;  %v2669_v37 = vrot.slane %v2661_v31, 9 }
  0x77   : > { %3005 = vmatpush3.bf16.msra.mxu1 %v3150_v8  ;;  %2982 = vmatprep.subr.bf16.mxu0 %v3151_v14  ;;  %v1780_v8 = vshll.u32 %v3669_v2, 16  ;;  %v3160_v12 = vld [vmem:[%s3794_s1 + $0x1c0] sm:$0xff]   ;;  %v1787_v21 = vrot.slane %v1785_v11, 4  ;;  %v1819_v54 = vor.u32 %v1818_v48, %v1815_v47 }
  0x78   : > { %3006 = vmatprep.subr.bf16.mxu1 %v3152_v16  ;;  %2992 = vmatprep.mubr.bf16.mxu0 %v3161_v17  ;;  %v1794_v17 = vshll.u32 %v3676_v7, 16  ;;  %v1755_v24 = vsel %vm3314_vm2, %v1750_v60, %v1754_v58  ;;  %v2654_v58 = vld [vmem:[%s3271_s16 + $0x10] sm:$0xe]  ;;  %v2655_v60 = vld [vmem:[%s3271_s16 + $0x18] sm:$0xe]  ;;  %v2035_v34 = vsel %vm3397_vm5, %v2669_v37, %v2034_v9 }
  0x79   : > { %3016 = vmatprep.mubr.bf16.mxu1 %v2642_v15  ;;  %v1782_v19 = vrot.slane %v1780_v8, 5  ;;  %v2643_v44 = vcombine.low %v1755_v24, %v1769_v25  ;;  %v1820_v15 = vrot.slane %v1819_v54, 4  ;;  %v2662_v61 = vrot.slane %v2654_v58, 9  ;;  %v3171_v24 = vld [vmem:[%s3794_s1 + $0x208] sm:$0xff]   ;;  %v2656_v25 = vld [vmem:[%s3271_s16 + $0x20] sm:$0xe] }
  0x7a   : > { %2983 = vmatpush3.bf16.msra.mxu0 %v3151_v14  ;;  %v1773_v14 = vrot.slane %v1771_v5, 4  ;;  %v1796_v27 = vrot.slane %v1794_v17, 5  ;;  %v2663_v5 = vrot.slane %v2655_v60, 9 }
  0x7b   : > { %3007 = vmatpush3.bf16.msra.mxu1 %v3152_v16  ;;  %2984 = vmatprep.subr.bf16.mxu0 %v3153_v18  ;;  %v1788_v16 = vshll.u32 %v2620_v3, 16  ;;  %v1825_v8 = vsel %vm3314_vm2, %v1820_v15, %v1824_v52  ;;  %v2007_v2 = vsel %vm3397_vm5, %v2662_v61, %v2006_v59 }
  0x7c   : > { %3008 = vmatprep.subr.bf16.mxu1 %v3154_v26  ;;  %v1777_v32 = vor.u32 %v1776_v13, %v1773_v14  ;;  %v2011_v14 = vsel %vm3397_vm5, %v2663_v5, %v2010_v62 }
  0x7e   : > { %2985 = vmatpush3.bf16.msra.mxu0 %v3153_v18  ;;  %v2622_v18 = vld [vmem:[%s3271_s16 + $0x40] sm:$0xf]  ;;  %v1778_v40 = vrot.slane %v1777_v32, 4 }
  0x7f   : > { %3009 = vmatpush3.bf16.msra.mxu1 %v3154_v26  ;;  %2986 = vmatprep.subr.bf16.mxu0 %v3155_v10  ;;  %v1790_v26 = vrot.slane %v1788_v16, 5  ;;  %v1799_v33 = vshrl.u32 %v2622_v18, 16  ;;  %v1802_v35 = vshll.u32 %v2622_v18, 16  ;;  %v2686_v18 = vcombine.low %v2007_v2, %v2011_v14 }
  0x80   : > { %3010 = vmatprep.subr.bf16.mxu1 %v3156_v42  ;;  %v1783_v49 = vsel %vm3314_vm2, %v1778_v40, %v1782_v19  ;;  %v3169_v19 = vld [vmem:[%s3794_s1 + $0x218] sm:$0xff]  }
  0x81   : > { %v1804_v43 = vrot.slane %v1802_v35, 5  ;;  %v2030_v35 = vrot.slane %v3685_v22, 5 }
  0x82   : > { %2987 = vmatpush3.bf16.msra.mxu0 %v3155_v10  ;;  %v1791_v10 = vor.u32 %v1790_v26, %v1787_v21  ;;  %v3170_v21 = vld [vmem:[%s3794_s1 + $0x210] sm:$0xff]   ;;  %v2657_v26 = vld [vmem:[%s3271_s16 + $0x28] sm:$0xe] }
  0x83   : > { %3011 = vmatpush3.bf16.msra.mxu1 %v3156_v42  ;;  %2988 = vmatprep.subr.bf16.mxu0 %v3157_v53  ;;  %v1801_v42 = vrot.slane %v1799_v33, 4  ;;  %v2665_v32 = vrot.slane %v2657_v26, 9  ;;  %v2018_v33 = vrot.slane %v3650_v38, 5 }
  0x84   : > { %3012 = vmatprep.subr.bf16.mxu1 %v3158_v56  ;;  %v1792_v46 = vrot.slane %v1791_v10, 4  ;;  %v3172_v10 = vld [vmem:[%s3794_s1 + $0x200] sm:$0xff]  }
  0x85   : > { %v1805_v50 = vor.u32 %v1804_v43, %v1801_v42  ;;  %v2019_v38 = vsel %vm3397_vm5, %v2665_v32, %v2018_v33 }
  0x86   : > { %2989 = vmatpush3.bf16.msra.mxu0 %v3157_v53  ;;  %v1797_v53 = vsel %vm3314_vm2, %v1792_v46, %v1796_v27  ;;  %v2660_v27 = vld [vmem:[%s3271_s16 + $0x40] sm:$0xe] }
  0x87   : > { %3013 = vmatpush3.bf16.msra.mxu1 %v3158_v56  ;;  %2990 = vmatprep.subr.bf16.mxu0 %v3159_v6  ;;  %v2644_v56 = vcombine.low %v1783_v49, %v1797_v53  ;;  %v1806_v57 = vrot.slane %v1805_v50, 4  ;;  %v2668_v23 = vrot.slane %v2660_v27, 9 }
  0x88   : > { %3014 = vmatprep.subr.bf16.mxu1 %v3160_v12 }
  0x89   : > { %v1811_v3 = vsel %vm3314_vm2, %v1806_v57, %v1810_v51  ;;  %v2031_v22 = vsel %vm3397_vm5, %v2668_v23, %v2030_v35 }
  0x8a   : > { %2991 = vmatpush3.bf16.msra.mxu0 %v3159_v6  ;;  %v2658_v6 = vld [vmem:[%s3271_s16 + $0x30] sm:$0xe]  ;;  %v2645_v16 = vcombine.low %v1811_v3, %v1825_v8  ;;  %v2689_v40 = vcombine.low %v2031_v22, %v2035_v34  ;;  %s2700_s16 = sshll.u32 %s3814_s12, 5 }
  0x8b   : > { %3015 = vmatpush3.bf16.msra.mxu1 %v3160_v12  ;;  %3024 = vmatprep.subr.bf16.mxu0 %v3163_v30  ;;  %v2666_v11 = vrot.slane %v2658_v6, 9  ;;  %v2667_v12 = vrot.slane %v2659_v63, 9  ;;  %s211_s6 = scalar_lea.vmem %s3795_s2, %s2700_s16 }
  0x8c   : > { %3048 = vmatprep.subr.bf16.mxu1 %v3163_v30 }
  0x8d   : > { %2993 = vmatmul.mubr.bf16.vlgmr.msra.gmra.mxu0 %v3162_v29  ;;  %v2023_v7 = vsel %vm3397_vm5, %v2666_v11, %v2022_v0  ;;  %v2027_v17 = vsel %vm3397_vm5, %v2667_v12, %v2026_v4  ;;  %v2664_v29 = vrot.slane %v2656_v25, 9 }
  0x8e   : > { %3017 = vmatmul.mubr.bf16.vlgmr.msra.gmra.mxu1 %v2643_v44  ;;  %3025 = vmatpush3.bf16.msra.mxu0 %v3163_v30  ;;  %v2688_v13 = vcombine.low %v2023_v7, %v2027_v17 }
  0x8f   : > { %3056 = vmatpush3.bf16.msra.mxu1 %v3163_v30  ;;  %3026 = vmatprep.subr.bf16.mxu0 %v3164_v45  ;;  %v2014_v30 = vrot.slane %v3643_v36, 5 }
  0x90   : > { %3049 = vmatprep.subr.bf16.mxu1 %v3164_v45  ;;  %2996 = vmatprep.mubr.bf16.mxu0 %v3165_v28 }
  0x91   : > { %3020 = vmatprep.mubr.bf16.mxu1 %v2644_v56  ;;  %v2015_v36 = vsel %vm3397_vm5, %v2664_v29, %v2014_v30 }
  0x92   : > { %3027 = vmatpush3.bf16.msra.mxu0 %v3164_v45  ;;  %v2687_v39 = vcombine.low %v2015_v36, %v2019_v38 }
  0x93   : > { %3057 = vmatpush3.bf16.msra.mxu1 %v3164_v45  ;;  %3028 = vmatprep.subr.bf16.mxu0 %v3167_v55 }
  0x94   : > { %3050 = vmatprep.subr.bf16.mxu1 %v3167_v55 }
  0x95   : > { %2997 = vmatmul.mubr.bf16.gmra.mxu0 %v3166_v20 }
  0x96   : > { %3029 = vmatpush3.bf16.msra.mxu0 %v3167_v55  ;;  %3021 = vmatmul.mubr.bf16.gmra.mxu1 %v2645_v16 }
  0x97   : > { %3058 = vmatpush3.bf16.msra.mxu1 %v3167_v55  ;;  %3030 = vmatprep.subr.bf16.mxu0 %v3168_v41 }
  0x98   : > { %3051 = vmatprep.subr.bf16.mxu1 %v3168_v41  ;;  %3040 = vmatprep.mubr.bf16.mxu0 %v2686_v18 }
  0x99   : > { %3044 = vmatprep.mubr.bf16.mxu1 %v2688_v13 }
  0x9a   : > { %3031 = vmatpush3.bf16.msra.mxu0 %v3168_v41 }
  0x9b   : > { %3059 = vmatpush3.bf16.msra.mxu1 %v3168_v41  ;;  %3032 = vmatprep.subr.bf16.mxu0 %v3169_v19 }
  0x9c   : > { %3052 = vmatprep.subr.bf16.mxu1 %v3169_v19 }
  0x9e   : > { %3033 = vmatpush3.bf16.msra.mxu0 %v3169_v19 }
  0x9f   : > { %3060 = vmatpush3.bf16.msra.mxu1 %v3169_v19  ;;  %3034 = vmatprep.subr.bf16.mxu0 %v3170_v21 }
  0xa0   : > { %3053 = vmatprep.subr.bf16.mxu1 %v3170_v21 }
  0xa2   : > { %3035 = vmatpush3.bf16.msra.mxu0 %v3170_v21 }
  0xa3   : > { %3061 = vmatpush3.bf16.msra.mxu1 %v3170_v21  ;;  %3036 = vmatprep.subr.bf16.mxu0 %v3171_v24 }
  0xa4   : > { %3054 = vmatprep.subr.bf16.mxu1 %v3171_v24 }
  0xa6   : > { %3037 = vmatpush3.bf16.msra.mxu0 %v3171_v24 }
  0xa7   : > { %3062 = vmatpush3.bf16.msra.mxu1 %v3171_v24  ;;  %3038 = vmatprep.subr.bf16.mxu0 %v3172_v10 }
  0xa8   : > { %3055 = vmatprep.subr.bf16.mxu1 %v3172_v10 }
  0xaa   : > { %3039 = vmatpush3.bf16.msra.mxu0 %v3172_v10 }
  0xab   : > { %3063 = vmatpush3.bf16.msra.mxu1 %v3172_v10 }
  0xad   : > { %3041 = vmatmul.mubr.bf16.vlgmr.msra.gmra.mxu0 %v2687_v39 }
  0xae   : > { %3045 = vmatmul.mubr.bf16.vlgmr.msra.gmra.mxu1 %v2689_v40 }
  0xed   : > { %v2850_v42 = vpop.f32.mrf.mxu0 }
  0xee   : > { %v2874_v43 = vpop.f32.mrf.mxu1 }
  0xef   : > { %v483_v44 = vpop.f32.mrf.mxu0  ;;  %v629_v23 = vadd.f32 %v2874_v43, %v2850_v42 }
  0xf0   : > { %v620_v45 = vpop.f32.mrf.mxu1 }
  0xf1   : > { %v2851_v28 = vpop.f32.mrf.mxu0  ;;  %v621_v37 = vadd.f32 %v620_v45, %v483_v44 }
  0xf2   : > { %v2875_v46 = vpop.f32.mrf.mxu1 }
  0xf3   : > { %v486_v47 = vpop.f32.mrf.mxu0  ;;  %v632_v36 = vadd.f32 %v2875_v46, %v2851_v28 }
  0xf4   : > { %v623_v48 = vpop.f32.mrf.mxu1 }
  0xf5   : > { %v624_v39 = vadd.f32 %v623_v48, %v486_v47 }
  0xf6   : > { %v2878_v50 = vpop.f32.mrf.mxu1 }
  0xf8   : > { %v2854_v49 = vpop.f32.mrf.mxu0  ;;  %v636_v1 = vpop.f32.mrf.mxu1 }
  0xf9   : > { %v645_v38 = vadd.f32 %v2878_v50, %v2854_v49 }
  0xfa   : > { %v499_v51 = vpop.f32.mrf.mxu0  ;;  %v2879_v53 = vpop.f32.mrf.mxu1 }
  0xfc   : > { %v2855_v52 = vpop.f32.mrf.mxu0  ;;  %v639_v55 = vpop.f32.mrf.mxu1 }
  0xfd   : > { %v648_v22 = vadd.f32 %v2879_v53, %v2855_v52 }
  0xfe   : > { %v502_v54 = vpop.f32.mrf.mxu0 }
  0xff   : > { %v640_v42 = vadd.f32 %v639_v55, %v502_v54 }
 0x10d   : > { %v2898_v56 = vpop.f32.mrf.mxu0 }
 0x10e   : > { %v2922_v57 = vpop.f32.mrf.mxu1  ;;  %v858_v40 = vadd.f32 %v2898_v56, %v629_v23 }
 0x10f   : > { %v825_v58 = vpop.f32.mrf.mxu0 }
 0x110   : > { %v996_v59 = vpop.f32.mrf.mxu1  ;;  %v1029_v50 = vadd.f32 %v2922_v57, %v858_v40 }
 0x111   : > { %v2899_v15 = vpop.f32.mrf.mxu0 }
 0x112   : > { %v2923_v60 = vpop.f32.mrf.mxu1 }
 0x113   : > { %v828_v61 = vpop.f32.mrf.mxu0 }
 0x114   : > { %v999_v62 = vpop.f32.mrf.mxu1  ;;  %v857_v45 = vadd.f32 %v828_v61, %v624_v39 }
 0x115   : > { %v2902_v0 = vpop.f32.mrf.mxu0 }
 0x116   : > { %v2926_v3 = vpop.f32.mrf.mxu1  ;;  %v862_v43 = vadd.f32 %v2902_v0, %v645_v38  ;;  %v1028_v56 = vadd.f32 %v999_v62, %v857_v45 }
 0x117   : > { %v841_v5 = vpop.f32.mrf.mxu0 }
 0x118   : > { %v1012_v6 = vpop.f32.mrf.mxu1  ;;  %v1033_v48 = vadd.f32 %v2926_v3, %v862_v43 }
 0x119   : > { %v2903_v63 = vpop.f32.mrf.mxu0 }
 0x11a   : > { %v2927_v4 = vpop.f32.mrf.mxu1  ;;  %v863_v44 = vadd.f32 %v2903_v63, %v648_v22 }
 0x11b   : > { %v844_v8 = vpop.f32.mrf.mxu0 }
 0x11c   : > { %v1015_v11 = vpop.f32.mrf.mxu1  ;;  %v861_v46 = vadd.f32 %v844_v8, %v640_v42  ;;  %v1034_v23 = vadd.f32 %v2927_v4, %v863_v44 }
 0x12d   : > { %v2946_v12 = vpop.f32.mrf.mxu0 }
 0x12e   : > { %v2970_v20 = vpop.f32.mrf.mxu1 }
 0x12f   : > { %v1278_v2 = vpop.f32.mrf.mxu0 }
 0x130   : > { %v1488_v14 = vpop.f32.mrf.mxu1 }
 0x131   : > { %v2947_v16 = vpop.f32.mrf.mxu0 }
 0x132   : > { %v2971_v7 = vpop.f32.mrf.mxu1 }
 0x133   : > { %v1281_v17 = vpop.f32.mrf.mxu0 }
 0x134   : > { %v1491_v41 = vpop.f32.mrf.mxu1  ;;  %v1310_v0 = vadd.f32 %v1281_v17, %v1028_v56 }
 0x135   : > { %v2950_v18 = vpop.f32.mrf.mxu0 }
 0x136   : > { %v2974_v13 = vpop.f32.mrf.mxu1  ;;  %v1520_v4 = vadd.f32 %v1491_v41, %v1310_v0 }
 0x137   : > { %v1294_v19 = vpop.f32.mrf.mxu0 }
 0x138   : > { %v1504_v21 = vpop.f32.mrf.mxu1 }
 0x139   : > { %v2951_v24 = vpop.f32.mrf.mxu0 }
 0x13a   : > { %v2975_v25 = vpop.f32.mrf.mxu1  ;;  %v1316_v54 = vadd.f32 %v2951_v24, %v1034_v23 }
 0x13b   : > { %v1297_v26 = vpop.f32.mrf.mxu0 }
 0x13c   : > { %v1507_v27 = vpop.f32.mrf.mxu1 }
 0x14d   : > { %v2994_v31 = vpop.f32.mrf.mxu0 }
 0x14e   : > { %v3764_v29 = vpop.f32.mrf.mxu1 }
 0x14f   : > { %3801 = vst [vmem:[#allocation2_spill] sm:$0xff] %v3764_v29  ;;  %v1659_v30 = vpop.f32.mrf.mxu0  ;;  %v856_v29 = vadd.f32 %v825_v58, %v621_v37  ;;  %v1311_v37 = vadd.f32 %v2946_v12, %v1029_v50 }
 0x150   : > { %v3766_v32 = vpop.f32.mrf.mxu1 }
 0x151   : > { %3802 = vst [vmem:[#allocation3_spill] sm:$0xff] %v3766_v32  ;;  %v2995_v33 = vpop.f32.mrf.mxu0  ;;  %v859_v32 = vadd.f32 %v2899_v15, %v632_v36  ;;  %v1027_v52 = vadd.f32 %v996_v59, %v856_v29  ;;  %v1521_v8 = vadd.f32 %v2970_v20, %v1311_v37  ;;  %v1526_v29 = vadd.f32 %v2975_v25, %v1316_v54 }
 0x152   : > { %v3768_v35 = vpop.f32.mrf.mxu1 }
 0x153   : > { %3803 = vst [vmem:[#allocation4_spill] sm:$0xff] %v3768_v35  ;;  %v1662_v9 = vpop.f32.mrf.mxu0  ;;  %v1030_v53 = vadd.f32 %v2923_v60, %v859_v32  ;;  %v1309_v58 = vadd.f32 %v1278_v2, %v1027_v52  ;;  %v1692_v62 = vadd.f32 %v2994_v31, %v1521_v8 }
 0x154   : > { %v3770_v10 = vpop.f32.mrf.mxu1  ;;  %v1691_v32 = vadd.f32 %v1662_v9, %v1520_v4 }
 0x155   : > { %3804 = vst [vmem:[#allocation5_spill] sm:$0xff] %v3770_v10  ;;  %v2998_v34 = vpop.f32.mrf.mxu0  ;;  %v637_v10 = vadd.f32 %v636_v1, %v499_v51  ;;  %v1312_v15 = vadd.f32 %v2947_v16, %v1030_v53  ;;  %v1032_v1 = vadd.f32 %v1015_v11, %v861_v46  ;;  %v1315_v51 = vadd.f32 %v2950_v18, %v1033_v48 }
 0x156   : > { %v3022_v35 = vpop.f32.mrf.mxu1  ;;  %v1519_v57 = vadd.f32 %v1488_v14, %v1309_v58 }
 0x157   : > { %v860_v28 = vadd.f32 %v841_v5, %v637_v10  ;;  %v1675_v49 = vpop.f32.mrf.mxu0  ;;  %v1314_v63 = vadd.f32 %v1297_v26, %v1032_v1  ;;  %v1522_v59 = vadd.f32 %v2971_v7, %v1312_v15  ;;  %v1525_v60 = vadd.f32 %v2974_v13, %v1315_v51  ;;  %v3805_v7 = vld [vmem:[#allocation2_spill] sm:$0xff] }
 0x158   : > { %v1957_v47 = vpop.f32.mrf.mxu1  ;;  %v1690_v12 = vadd.f32 %v1659_v30, %v1519_v57  ;;  %v1974_v13 = vadd.f32 %v3805_v7, %v1692_v62  ;;  %v3806_v25 = vld [vmem:[#allocation3_spill] sm:$0xff] }
 0x159   : > { %v1031_v36 = vadd.f32 %v1012_v6, %v860_v28  ;;  %v2999_v55 = vpop.f32.mrf.mxu0  ;;  %v1693_v2 = vadd.f32 %v2995_v33, %v1522_v59  ;;  %v1524_v16 = vadd.f32 %v1507_v27, %v1314_v63  ;;  %v1696_v18 = vadd.f32 %v2998_v34, %v1525_v60 }
 0x15a   : > { %v3023_v61 = vpop.f32.mrf.mxu1  ;;  %v1697_v24 = vadd.f32 %v2999_v55, %v1526_v29  ;;  %v1972_v10 = vadd.f32 %v3806_v25, %v1690_v12  ;;  %v3807_v41 = vld [vmem:[#allocation4_spill] sm:$0xff] }
 0x15b   : > { %v1313_v5 = vadd.f32 %v1294_v19, %v1031_v36  ;;  %v1678_v3 = vpop.f32.mrf.mxu0  ;;  %v1975_v31 = vadd.f32 %v3807_v41, %v1693_v2  ;;  %v1978_v33 = vadd.f32 %v3022_v35, %v1696_v18 }
 0x15c   : > { %v1960_v6 = vpop.f32.mrf.mxu1  ;;  %v1695_v20 = vadd.f32 %v1678_v3, %v1524_v16  ;;  %v1979_v38 = vadd.f32 %v3023_v61, %v1697_v24  ;;  %v3808_v27 = vld [vmem:[#allocation5_spill] sm:$0xff] }
 0x15d   : > { %v1523_v11 = vadd.f32 %v1504_v21, %v1313_v5  ;;  %v1973_v22 = vadd.f32 %v3808_v27, %v1691_v32 }
 0x15e   : > { %v1977_v43 = vadd.f32 %v1960_v6, %v1695_v20 }
 0x15f   : > { %v1694_v26 = vadd.f32 %v1675_v49, %v1523_v11 }
 0x161   : > { %v1976_v42 = vadd.f32 %v1957_v47, %v1694_v26 }
 0x16d   : > { %v3042_v17 = vpop.f32.mrf.mxu0 }
 0x16e   : > { %v3046_v19 = vpop.f32.mrf.mxu1  ;;  %v2184_v34 = vadd.f32 %v3042_v17, %v1974_v13 }
 0x16f   : > { %v2151_v14 = vpop.f32.mrf.mxu0  ;;  %v2188_v44 = vadd.f32 %v3046_v19, %v1978_v33 }
 0x170   : > { %v2167_v30 = vpop.f32.mrf.mxu1  ;;  %v2182_v39 = vadd.f32 %v2151_v14, %v1972_v10  ;;  %v2205_v58 = vmul.f32 %v2184_v34, %v2184_v34 }
 0x171   : > { %v3043_v21 = vpop.f32.mrf.mxu0  ;;  %v2186_v50 = vadd.f32 %v2167_v30, %v1976_v42  ;;  %v2209_v57 = vmul.f32 %v2188_v44, %v2188_v44 }
 0x172   : > { %v2185_v9 = vadd.f32 %v3043_v21, %v1975_v31  ;;  %v3047_v40 = vpop.f32.mrf.mxu1  ;;  %v2203_v48 = vmul.f32 %v2182_v39, %v2182_v39 }
 0x173   : > { %v2189_v45 = vadd.f32 %v3047_v40, %v1979_v38  ;;  %v2154_v28 = vpop.f32.mrf.mxu0  ;;  %v2207_v55 = vmul.f32 %v2186_v50, %v2186_v50 }
 0x174   : > { %v2709_v46 = vpack.c.bf16 %v2185_v9, %v2184_v34  ;;  %v2183_v49 = vadd.f32 %v2154_v28, %v1973_v22  ;;  %v2170_v35 = vpop.f32.mrf.mxu1  ;;  %v2206_v1 = vmul.f32 %v2185_v9, %v2185_v9 }
 0x175   : > { %v2719_v52 = vpack.c.bf16 %v2189_v45, %v2188_v44  ;;  %v2187_v53 = vadd.f32 %v2170_v35, %v1977_v43  ;;  %v2210_v29 = vmul.f32 %v2189_v45, %v2189_v45 }
 0x176   : > { %2721 = vst [vmem:[%s211_s6 + $0x8] sm:$0xff] %v2709_v46   ;;  %v2190_v23 = vadd.f32 %v2183_v49, %v2182_v39  ;;  %v2204_v56 = vmul.f32 %v2183_v49, %v2183_v49  ;;  %v2704_v37 = vpack.c.bf16 %v2183_v49, %v2182_v39 }
 0x177   : > { %2723 = vst [vmem:[%s211_s6 + $0x18] sm:$0xff] %v2719_v52   ;;  %v2714_v47 = vpack.c.bf16 %v2187_v53, %v2186_v50  ;;  %v2208_v63 = vmul.f32 %v2187_v53, %v2187_v53 }
 0x178   : > { %v2191_v15 = vadd.f32 %v2190_v23, %v2184_v34  ;;  %v2211_v36 = vadd.f32 %v2204_v56, %v2203_v48  ;;  %2705 = vst [vmem:[%s211_s6] sm:$0xff] %v2704_v37  }
 0x179   : > { %2722 = vst [vmem:[%s211_s6 + $0x10] sm:$0xff] %v2714_v47  }
 0x17a   : > { %v2212_v51 = vadd.f32 %v2211_v36, %v2205_v58  ;;  %v2192_v54 = vadd.f32 %v2191_v15, %v2185_v9 }
 0x17c   : > { %v2193_v0 = vadd.f32 %v2192_v54, %v2186_v50  ;;  %v2213_v61 = vadd.f32 %v2212_v51, %v2206_v1 }
 0x17e   : > { %v2194_v5 = vadd.f32 %v2193_v0, %v2187_v53  ;;  %v2214_v8 = vadd.f32 %v2213_v61, %v2207_v55 }
 0x180   : > { %v2195_v59 = vadd.f32 %v2194_v5, %v2188_v44  ;;  %v2215_v60 = vadd.f32 %v2214_v8, %v2208_v63 }
 0x182   : > { %v2196_v3 = vadd.f32 %v2195_v59, %v2189_v45  ;;  %v2216_v4 = vadd.f32 %v2215_v60, %v2209_v57 }
 0x184   : > { %v2197_v62 = vrot.slane %v2196_v3, 4  ;;  %v2217_v12 = vadd.f32 %v2216_v4, %v2210_v29 }
 0x186   : > { %v2198_v2 = vadd.f32 %v2197_v62, %v2196_v3  ;;  %v2218_v6 = vrot.slane %v2217_v12, 4 }
 0x188   : > { %v2199_v11 = vrot.slane %v2198_v2, 2  ;;  %v2219_v16 = vadd.f32 %v2218_v6, %v2217_v12 }
 0x18a   : > { %v2200_v18 = vadd.f32 %v2199_v11, %v2198_v2  ;;  %v2220_v24 = vrot.slane %v2219_v16, 2 }
 0x18c   : > { %v2201_v17 = vrot.slane %v2200_v18, 1  ;;  %v2221_v32 = vadd.f32 %v2220_v24, %v2219_v16 }
 0x18e   : > { %v2222_v19 = vrot.slane %v2221_v32, 1  ;;  %v2202_v26 = vadd.f32 %v2201_v17, %v2200_v18 }
 0x190   : > { %v2223_v20 = vadd.f32 %v2222_v19, %v2221_v32 }
 0x192   : > { %v2225_v14 = vsel %vm2224_vm6, %v2202_v26, %v2223_v20 }
 0x193   : > { %2226 = vst [vmem:[%s219_s10] sm:$0x3] %v2225_v14 }
 0x194 PF: > { %s14_s14 = sadd.s32 1, %s3195_s14   ;;  %s3809_s12 = smov %s3191_s13 }
 0x195   : > { %p11_p5 = scmp.ge.s32.totalorder %s14_s14, 4   ;;  %s3810_s13 = smov %s3812_s15 }
 0x197   :  { %13 = sbr.rel (!%p11_p5) target bundleno = 2 (0x2), region = 80 }

// kernel: res_unet_block_forward.19
= control target key start
LH: loop header
LB: loop body
LE: loop exit
PB: predicated region body
PF: predicated region fallthrough
CT: control target
= control target key end

     0   :  { %s2985_s9 = smov 0   ;;  %s2987_s10 = smov 0   ;;  %s3387_s0 = inlined_call_operand.vmem [shape: bf16[8,9,9,128], index: 0, kind: input, shape index: {}]   ;;  %s3388_s1 = inlined_call_operand.vmem [shape: bf16[3,3,128,128], index: 1, kind: input, shape index: {}]   ;;  %s3389_s2 = inlined_call_operand.vmem [shape: bf16[2,8,8,128], index: 2, kind: output, shape index: {}]  }
   0x1   :  { %s2989_s11 = smov 0  }
   0x2 LB: > { %s24_s12 = sadd.s32 1, %s2964_s10  ;;  %p2146_p0 = scmp.ge.s32.totalorder %s2968_s11, 1  ;;  %s2968_s11 = sphi %s2989_s11, %s12_s11   ;;  %s2964_s10 = sphi %s2987_s10, %s3403_s10   ;;  %s2960_s9 = sphi %s2985_s9, %s3402_s9  }
   0x3   : > { %p26_p1 = scmp.ge.s32.totalorder %s24_s12, 2  ;;  %p132_p2 = scmp.lt.s32.totalorder %s2968_s11, 3 }
   0x5   : > { %s3405_s12 = smov (%p26_p1, %s24_s12), 0  ;;  %p133_p3 = pnand %p2146_p0, %p132_p2 }
   0x7   : > { %136 = sbr.rel (%p133_p3) target bundleno = 380 (0x17c), region = 28 }
   0xc   : > { %v2850_v0 = vld [vmem:[%s3388_s1 + $0x78] sm:$0xff]   ;;  %s2147_s15 = sshll.u32 %s2960_s9, 2  ;;  %v2852_v2 = vld [vmem:[%s3388_s1 + $0x70] sm:$0xff]   ;;  %v2854_v4 = vld [vmem:[%s3388_s1 + $0x68] sm:$0xff]   ;;  %vm520_vm0 = vsmask.f32 3328 }
   0xd   : > { %v2851_v1 = vld [vmem:[%s3388_s1 + $0x38] sm:$0xff]   ;;  %p162_p4 = scmp.lt.s32.totalorder %s2147_s15, 7  ;;  %2593 = vmatprep.subr.bf16.mxu0 %v2850_v0  ;;  %v2853_v3 = vld [vmem:[%s3388_s1 + $0x30] sm:$0xff]   ;;  %v2855_v5 = vld [vmem:[%s3388_s1 + $0x28] sm:$0xff]   ;;  %vm521_vm1 = vsmask.f32 7440 }
   0xe   : > { %2617 = vmatprep.subr.bf16.mxu1 %v2851_v1  ;;  %2594 = vmatpush3.bf16.msra.mxu0 %v2850_v0  ;;  %v2856_v6 = vld [vmem:[%s3388_s1 + $0x60] sm:$0xff]   ;;  %v2858_v8 = vld [vmem:[%s3388_s1 + $0x58] sm:$0xff]   ;;  %v2860_v10 = vld [vmem:[%s3388_s1 + $0x50] sm:$0xff]   ;;  %p170_p5 = scmp.lt.s32.totalorder %s2960_s9, 1 }
   0xf   : > { %2618 = vmatpush3.bf16.msra.mxu1 %v2851_v1  ;;  %2595 = vmatprep.subr.bf16.mxu0 %v2852_v2  ;;  %s3407_s15 = smov (!%p162_p4, %s2147_s15), 7  ;;  %v2857_v7 = vld [vmem:[%s3388_s1 + $0x20] sm:$0xff]   ;;  %v2859_v9 = vld [vmem:[%s3388_s1 + $0x18] sm:$0xff]   ;;  %v2861_v11 = vld [vmem:[%s3388_s1 + $0x10] sm:$0xff]  }
  0x10   : > { %2619 = vmatprep.subr.bf16.mxu1 %v2853_v3  ;;  %s2825_s30 = smul.u32 72, %s3407_s15  ;;  %v2862_v14 = vld [vmem:[%s3388_s1 + $0x48] sm:$0xff]   ;;  %v2864_v16 = vld [vmem:[%s3388_s1 + $0x40] sm:$0xff]   ;;  %v2870_v19 = vld [vmem:[%s3388_s1 + $0xb8] sm:$0xff]   ;;  %s3409_s9 = smov (!%p170_p5, %s2960_s9), 1 }
  0x11   : > { %v2863_v15 = vld [vmem:[%s3388_s1 + $0x8] sm:$0xff]   ;;  %v2865_v17 = vld [vmem:[%s3388_s1] sm:$0xff]   ;;  %v2871_v20 = vld [vmem:[%s3388_s1 + $0xf8] sm:$0xff]   ;;  %s2461_s22 = sshll.u32 %s3409_s9, 5 }
  0x12   : > { %2596 = vmatpush3.bf16.msra.mxu0 %v2852_v2  ;;  %s3039_s13 = scalar_lea.vmem %s3387_s0, %s2825_s30  ;;  %v2872_v22 = vld [vmem:[%s3388_s1 + $0xb0] sm:$0xff]   ;;  %v2874_v26 = vld [vmem:[%s3388_s1 + $0xa8] sm:$0xff]   ;;  %v2876_v28 = vld [vmem:[%s3388_s1 + $0xa0] sm:$0xff]   ;;  %s177_s25 = scalar_lea.vmem %s3389_s2, %s2461_s22 }
  0x13   : > { %2620 = vmatpush3.bf16.msra.mxu1 %v2853_v3  ;;  %2597 = vmatprep.subr.bf16.mxu0 %v2854_v4  ;;  %v2866_v12 = vld [vmem:[%s3039_s13 + $0x48] ss:$8 sps:$4 sm:$0xff]   ;;  %v2868_v18 = vld [vmem:[%s3039_s13 + $0x58] ss:$8 sps:$4 sm:$0xff]   ;;  %v505_v33 = vld [vmem:[%s3039_s13 + $0x4] sm:$0x1] }
  0x14   : > { %2621 = vmatprep.subr.bf16.mxu1 %v2855_v5  ;;  %v2867_v13 = vld [vmem:[%s3039_s13] ss:$8 sps:$4 sm:$0xff]   ;;  %2609 = vmatprep.mubr.bf16.mxu0 %v2866_v12  ;;  %v2869_v21 = vld [vmem:[%s3039_s13 + $0x10] ss:$8 sps:$4 sm:$0xff]   ;;  %v507_v35 = vld [vmem:[%s3039_s13 + $0xc] sm:$0x1] }
  0x15   : > { %2633 = vmatprep.mubr.bf16.mxu1 %v2867_v13  ;;  %v2873_v23 = vld [vmem:[%s3388_s1 + $0xf0] sm:$0xff]   ;;  %v2881_v25 = vld [vmem:[%s3039_s13 + $0x20] ss:$8 sps:$4 sm:$0xff]   ;;  %v2878_v36 = vld [vmem:[%s3388_s1 + $0x98] sm:$0xff]   ;;  %v533_v39 = vshll.u32 %v505_v33, 16  ;;  %v547_v42 = vshll.u32 %v507_v35, 16 }
  0x16   : > { %2598 = vmatpush3.bf16.msra.mxu0 %v2854_v4  ;;  %v2880_v24 = vld [vmem:[%s3039_s13 + $0x68] ss:$8 sps:$4 sm:$0xff]   ;;  %v2882_v29 = vld [vmem:[%s3039_s13 + $0x78] ss:$8 sps:$4 sm:$0xff]   ;;  %v509_v51 = vld [vmem:[%s3039_s13 + $0x14] sm:$0x1] }
  0x17   : > { %2622 = vmatpush3.bf16.msra.mxu1 %v2855_v5  ;;  %2599 = vmatprep.subr.bf16.mxu0 %v2856_v6  ;;  %v2875_v27 = vld [vmem:[%s3388_s1 + $0xe8] sm:$0xff]   ;;  %v2877_v30 = vld [vmem:[%s3388_s1 + $0xe0] sm:$0xff]   ;;  %v2883_v31 = vld [vmem:[%s3039_s13 + $0x30] ss:$8 sps:$4 sm:$0xff]   ;;  %v535_v49 = vrot.slane %v533_v39, 5  ;;  %v561_v57 = vshll.u32 %v509_v51, 16 }
  0x18   : > { %2623 = vmatprep.subr.bf16.mxu1 %v2857_v7  ;;  %v504_v32 = vld [vmem:[%s3039_s13] sm:$0xf]  ;;  %v506_v34 = vld [vmem:[%s3039_s13 + $0x8] sm:$0xf]  ;;  %v2890_v43 = vld [vmem:[%s3039_s13 + $0x90] ss:$8 sps:$4 sm:$0xff]  }
  0x19   : > { %v524_v37 = vshrl.u32 %v504_v32, 16  ;;  %v527_v38 = vshll.u32 %v504_v32, 16  ;;  %v538_v40 = vshrl.u32 %v506_v34, 16  ;;  %v541_v41 = vshll.u32 %v506_v34, 16  ;;  %v2879_v44 = vld [vmem:[%s3388_s1 + $0xd8] sm:$0xff]   ;;  %v2884_v58 = vld [vmem:[%s3388_s1 + $0x90] sm:$0xff]   ;;  %vm3111_vm2 = vmor %vm520_vm0, %vm521_vm1 }
  0x1a   : > { %2600 = vmatpush3.bf16.msra.mxu0 %v2856_v6  ;;  %v508_v48 = vld [vmem:[%s3039_s13 + $0x10] sm:$0xf]  ;;  %v510_v52 = vld [vmem:[%s3039_s13 + $0x18] sm:$0xf]  ;;  %v511_v54 = vld [vmem:[%s3039_s13 + $0x1c] sm:$0x1] }
  0x1b   : > { %2624 = vmatpush3.bf16.msra.mxu1 %v2857_v7  ;;  %2601 = vmatprep.subr.bf16.mxu0 %v2858_v8  ;;  %v526_v45 = vrot.slane %v524_v37, 4  ;;  %v529_v46 = vrot.slane %v527_v38, 5  ;;  %v540_v47 = vrot.slane %v538_v40, 4  ;;  %v543_v50 = vrot.slane %v541_v41, 5  ;;  %v2885_v4 = vld [vmem:[%s3388_s1 + $0xd0] sm:$0xff]   ;;  %v2892_v51 = vld [vmem:[%s3388_s1 + $0x138] sm:$0xff]  }
  0x1c   : > { %2625 = vmatprep.subr.bf16.mxu1 %v2859_v9  ;;  %v552_v55 = vshrl.u32 %v508_v48, 16  ;;  %v555_v56 = vshll.u32 %v508_v48, 16  ;;  %v549_v61 = vrot.slane %v547_v42, 5  ;;  %v566_v62 = vshrl.u32 %v510_v52, 16  ;;  %v518_v40 = vld [vmem:[%s3039_s13 + $0x38] sm:$0xf] }
  0x1d   : > { %v530_v53 = vor.u32 %v529_v46, %v526_v45  ;;  %v544_v60 = vor.u32 %v543_v50, %v540_v47  ;;  %v569_v63 = vshll.u32 %v510_v52, 16  ;;  %v575_v3 = vshll.u32 %v511_v54, 16 }
  0x1e   : > { %2602 = vmatpush3.bf16.msra.mxu0 %v2858_v8  ;;  %v554_v1 = vrot.slane %v552_v55, 4  ;;  %v557_v2 = vrot.slane %v555_v56, 5  ;;  %v3118_v6 = vrot.slane %v561_v57, 5  ;;  %v568_v7 = vrot.slane %v566_v62, 4  ;;  %v2893_v55 = vld [vmem:[%s3388_s1 + $0x178] sm:$0xff]  }
  0x1f   : > { %2626 = vmatpush3.bf16.msra.mxu1 %v2859_v9  ;;  %2603 = vmatprep.subr.bf16.mxu0 %v2860_v10  ;;  %v531_v0 = vrot.slane %v530_v53, 4  ;;  %v545_v5 = vrot.slane %v544_v60, 4  ;;  %v571_v8 = vrot.slane %v569_v63, 5  ;;  %v2886_v9 = vld [vmem:[%s3388_s1 + $0x88] sm:$0xff]   ;;  %v625_v50 = vshll.u32 %v518_v40, 16 }
  0x20   : > { %2627 = vmatprep.subr.bf16.mxu1 %v2861_v11 }
  0x21   : > { %v550_v12 = vsel %vm3111_vm2, %v545_v5, %v549_v61  ;;  %v572_v13 = vor.u32 %v571_v8, %v568_v7  ;;  %v2891_v61 = vld [vmem:[%s3039_s13 + $0xa0] ss:$8 sps:$4 sm:$0xff]   ;;  %v2895_v7 = vld [vmem:[%s3388_s1 + $0x170] sm:$0xff]  }
  0x22   : > { %2604 = vmatpush3.bf16.msra.mxu0 %v2860_v10  ;;  %v536_v10 = vsel %vm3111_vm2, %v531_v0, %v535_v49  ;;  %v622_v49 = vshrl.u32 %v518_v40, 16  ;;  %v2304_v40 = vld [vmem:[%s3039_s13 + $0xa4] sm:$0x1] }
  0x23   : > { %2628 = vmatpush3.bf16.msra.mxu1 %v2861_v11  ;;  %2605 = vmatprep.subr.bf16.mxu0 %v2862_v14  ;;  %v558_v11 = vor.u32 %v557_v2, %v554_v1 }
  0x24   : > { %2629 = vmatprep.subr.bf16.mxu1 %v2863_v15  ;;  %v624_v57 = vrot.slane %v622_v49, 4 }
  0x26   : > { %2606 = vmatpush3.bf16.msra.mxu0 %v2862_v14  ;;  %v2215_v14 = vcombine.low %v536_v10, %v550_v12  ;;  %v2896_v10 = vld [vmem:[%s3388_s1 + $0x128] sm:$0xff]  }
  0x27   : > { %2630 = vmatpush3.bf16.msra.mxu1 %v2863_v15  ;;  %2607 = vmatprep.subr.bf16.mxu0 %v2864_v16  ;;  %v559_v15 = vrot.slane %v558_v11, 4 }
  0x28   : > { %2631 = vmatprep.subr.bf16.mxu1 %v2865_v17 }
  0x2a   : > { %2608 = vmatpush3.bf16.msra.mxu0 %v2864_v16  ;;  %v577_v16 = vrot.slane %v575_v3, 5 }
  0x2b   : > { %2632 = vmatpush3.bf16.msra.mxu1 %v2865_v17  ;;  %2641 = vmatprep.subr.bf16.mxu0 %v2870_v19  ;;  %v2887_v17 = vld [vmem:[%s3388_s1 + $0xc8] sm:$0xff]  }
  0x2c   : > { %2665 = vmatprep.subr.bf16.mxu1 %v2871_v20 }
  0x2d   : > { %2610 = vmatmul.mubr.bf16.vlgmr.msra.gmra.mxu0 %v2868_v18  ;;  %v573_v18 = vrot.slane %v572_v13, 4  ;;  %v2897_v13 = vld [vmem:[%s3388_s1 + $0x168] sm:$0xff]  }
  0x2e   : > { %2634 = vmatmul.mubr.bf16.vlgmr.msra.gmra.mxu1 %v2869_v21  ;;  %2642 = vmatpush3.bf16.msra.mxu0 %v2870_v19  ;;  %v512_v19 = vld [vmem:[%s3039_s13 + $0x20] sm:$0xf]  ;;  %v514_v21 = vld [vmem:[%s3039_s13 + $0x28] sm:$0xf] }
  0x2f   : > { %2666 = vmatpush3.bf16.msra.mxu1 %v2871_v20  ;;  %2643 = vmatprep.subr.bf16.mxu0 %v2872_v22  ;;  %v513_v20 = vld [vmem:[%s3039_s13 + $0x24] sm:$0x1]  ;;  %v578_v32 = vsel %vm3111_vm2, %v573_v18, %v577_v16  ;;  %v2902_v18 = vld [vmem:[%s3388_s1 + $0x118] sm:$0xff]  }
  0x30   : > { %2667 = vmatprep.subr.bf16.mxu1 %v2873_v23  ;;  %2613 = vmatprep.mubr.bf16.mxu0 %v2880_v24  ;;  %v583_v24 = vshll.u32 %v512_v19, 16  ;;  %v2900_v16 = vld [vmem:[%s3388_s1 + $0x120] sm:$0xff]  }
  0x31   : > { %2637 = vmatprep.mubr.bf16.mxu1 %v2881_v25  ;;  %v2888_v25 = vld [vmem:[%s3388_s1 + $0x80] sm:$0xff]  }
  0x32   : > { %2644 = vmatpush3.bf16.msra.mxu0 %v2872_v22  ;;  %v515_v22 = vld [vmem:[%s3039_s13 + $0x2c] sm:$0x1]  ;;  %v585_v34 = vrot.slane %v583_v24, 5 }
  0x33   : > { %2668 = vmatpush3.bf16.msra.mxu1 %v2873_v23  ;;  %2645 = vmatprep.subr.bf16.mxu0 %v2874_v26  ;;  %v580_v23 = vshrl.u32 %v512_v19, 16  ;;  %v603_v35 = vshll.u32 %v515_v22, 16  ;;  %v2910_v19 = vld [vmem:[%s3039_s13 + $0xd8] ss:$8 sps:$4 sm:$0xff]  }
  0x34   : > { %2669 = vmatprep.subr.bf16.mxu1 %v2875_v27  ;;  %v2301_v22 = vld [vmem:[%s3039_s13 + $0x98] sm:$0xf] }
  0x35   : > { %2614 = vmatmul.mubr.bf16.gmra.mxu0 %v2882_v29  ;;  %v597_v29 = vshll.u32 %v514_v21, 16  ;;  %v582_v33 = vrot.slane %v580_v23, 4  ;;  %v2302_v23 = vld [vmem:[%s3039_s13 + $0x9c] sm:$0x1] }
  0x36   : > { %2646 = vmatpush3.bf16.msra.mxu0 %v2874_v26  ;;  %2638 = vmatmul.mubr.bf16.gmra.mxu1 %v2883_v31  ;;  %v564_v26 = vsel %vm3111_vm2, %v559_v15, %v3118_v6  ;;  %v2889_v31 = vld [vmem:[%s3388_s1 + $0xc0] sm:$0xff]   ;;  %v2898_v6 = vld [vmem:[%s3039_s13 + $0xb0] ss:$8 sps:$4 sm:$0xff]  }
  0x37   : > { %2670 = vmatpush3.bf16.msra.mxu1 %v2875_v27  ;;  %2647 = vmatprep.subr.bf16.mxu0 %v2876_v28  ;;  %v589_v27 = vshll.u32 %v513_v20, 16  ;;  %v599_v39 = vrot.slane %v597_v29, 5  ;;  %v586_v42 = vor.u32 %v585_v34, %v582_v33  ;;  %v2216_v60 = vcombine.low %v564_v26, %v578_v32  ;;  %v2899_v15 = vld [vmem:[%s3039_s13 + $0xc0] ss:$8 sps:$4 sm:$0xff]   ;;  %v2299_v20 = vld [vmem:[%s3039_s13 + $0x90] sm:$0xf] }
  0x38   : > { %2671 = vmatprep.subr.bf16.mxu1 %v2877_v30  ;;  %2681 = vmatprep.mubr.bf16.mxu1 %v2890_v43  ;;  %v605_v43 = vrot.slane %v603_v35, 5  ;;  %v1148_v24 = vshrl.u32 %v2299_v20, 16  ;;  %v1171_v29 = vshll.u32 %v2302_v23, 16  ;;  %v2904_v33 = vld [vmem:[%s3388_s1 + $0x110] sm:$0xff]   ;;  %v2311_v23 = vld [vmem:[%s3039_s13 + $0xc0] sm:$0xf] }
  0x39   : > { %2657 = vmatprep.mubr.bf16.mxu0 %v2215_v14  ;;  %v591_v37 = vrot.slane %v589_v27, 5  ;;  %v587_v52 = vrot.slane %v586_v42, 4  ;;  %v1162_v27 = vshrl.u32 %v2301_v22, 16  ;;  %v2306_v42 = vld [vmem:[%s3039_s13 + $0xac] sm:$0x1] }
  0x3a   : > { %2648 = vmatpush3.bf16.msra.mxu0 %v2876_v28  ;;  %v594_v28 = vshrl.u32 %v514_v21, 16  ;;  %v2300_v21 = vld [vmem:[%s3039_s13 + $0x94] sm:$0x1] }
  0x3b   : > { %2672 = vmatpush3.bf16.msra.mxu1 %v2877_v30  ;;  %2649 = vmatprep.subr.bf16.mxu0 %v2878_v36  ;;  %v516_v30 = vld [vmem:[%s3039_s13 + $0x30] sm:$0xf]  ;;  %v592_v62 = vsel %vm3111_vm2, %v587_v52, %v591_v37  ;;  %v1157_v26 = vshll.u32 %v2300_v21, 16  ;;  %v1164_v35 = vrot.slane %v1162_v27, 4  ;;  %v1173_v37 = vrot.slane %v1171_v29, 5 }
  0x3c   : > { %2673 = vmatprep.subr.bf16.mxu1 %v2879_v44  ;;  %v596_v38 = vrot.slane %v594_v28, 4  ;;  %v608_v41 = vshrl.u32 %v516_v30, 16  ;;  %v611_v45 = vshll.u32 %v516_v30, 16  ;;  %v1165_v28 = vshll.u32 %v2301_v22, 16  ;;  %v2903_v30 = vld [vmem:[%s3388_s1 + $0x158] sm:$0xff]  }
  0x3d   : > { %v1159_v34 = vrot.slane %v1157_v26, 5  ;;  %v2313_v29 = vld [vmem:[%s3039_s13 + $0xc8] sm:$0xf] }
  0x3e   : > { %2650 = vmatpush3.bf16.msra.mxu0 %v2878_v36  ;;  %v517_v36 = vld [vmem:[%s3039_s13 + $0x34] sm:$0x1]  ;;  %v600_v47 = vor.u32 %v599_v39, %v596_v38  ;;  %v610_v48 = vrot.slane %v608_v41, 4  ;;  %v613_v53 = vrot.slane %v611_v45, 5  ;;  %v2303_v38 = vld [vmem:[%s3039_s13 + $0xa0] sm:$0xf] }
  0x3f   : > { %2674 = vmatpush3.bf16.msra.mxu1 %v2879_v44  ;;  %2651 = vmatprep.subr.bf16.mxu0 %v2884_v58  ;;  %v519_v44 = vld [vmem:[%s3039_s13 + $0x3c] sm:$0x1]  ;;  %v617_v46 = vshll.u32 %v517_v36, 16  ;;  %v1167_v36 = vrot.slane %v1165_v28, 5  ;;  %v2305_v41 = vld [vmem:[%s3039_s13 + $0xa8] sm:$0xf] }
  0x40   : > { %2675 = vmatprep.subr.bf16.mxu1 %v2885_v4  ;;  %v631_v54 = vshll.u32 %v519_v44, 16  ;;  %v601_v56 = vrot.slane %v600_v47, 4  ;;  %v614_v63 = vor.u32 %v613_v53, %v610_v48  ;;  %v1176_v45 = vshrl.u32 %v2303_v38, 16 }
  0x41   : > { %v619_v1 = vrot.slane %v617_v46, 5  ;;  %v1168_v44 = vor.u32 %v1167_v36, %v1164_v35  ;;  %v1179_v46 = vshll.u32 %v2303_v38, 16  ;;  %v1185_v47 = vshll.u32 %v2304_v40, 16  ;;  %v2916_v35 = vld [vmem:[%s3039_s13 + $0xf8] ss:$8 sps:$4 sm:$0xff]   ;;  %v2914_v40 = vld [vmem:[%s3388_s1 + $0x1b0] sm:$0xff]  }
  0x42   : > { %2652 = vmatpush3.bf16.msra.mxu0 %v2884_v58  ;;  %v627_v58 = vrot.slane %v625_v50, 5  ;;  %v606_v0 = vsel %vm3111_vm2, %v601_v56, %v605_v43  ;;  %v633_v3 = vrot.slane %v631_v54, 5  ;;  %v615_v5 = vrot.slane %v614_v63, 4  ;;  %v2905_v43 = vld [vmem:[%s3388_s1 + $0x150] sm:$0xff]  }
  0x43   : > { %2676 = vmatpush3.bf16.msra.mxu1 %v2885_v4  ;;  %2653 = vmatprep.subr.bf16.mxu0 %v2886_v9  ;;  %v2894_v4 = vld [vmem:[%s3388_s1 + $0x130] sm:$0xff]   ;;  %v2217_v8 = vcombine.low %v592_v62, %v606_v0  ;;  %v1190_v49 = vshrl.u32 %v2305_v41, 16  ;;  %v1193_v50 = vshll.u32 %v2305_v41, 16  ;;  %v1169_v52 = vrot.slane %v1168_v44, 4 }
  0x44   : > { %2677 = vmatprep.subr.bf16.mxu1 %v2887_v17  ;;  %v628_v2 = vor.u32 %v627_v58, %v624_v57  ;;  %v620_v11 = vsel %vm3111_vm2, %v615_v5, %v619_v1  ;;  %v1178_v53 = vrot.slane %v1176_v45, 4  ;;  %v1181_v54 = vrot.slane %v1179_v46, 5  ;;  %v2915_v45 = vld [vmem:[%s3388_s1 + $0x1f0] sm:$0xff]  }
  0x45   : > { %v1192_v57 = vrot.slane %v1190_v49, 4  ;;  %v1195_v58 = vrot.slane %v1193_v50, 5  ;;  %v1187_v0 = vrot.slane %v1185_v47, 5  ;;  %v1246_v38 = vshrl.u32 %v2313_v29, 16 }
  0x46   : > { %2654 = vmatpush3.bf16.msra.mxu0 %v2886_v9  ;;  %v629_v9 = vrot.slane %v628_v2, 4  ;;  %v1182_v62 = vor.u32 %v1181_v54, %v1178_v53 }
  0x47   : > { %2678 = vmatpush3.bf16.msra.mxu1 %v2887_v17  ;;  %2655 = vmatprep.subr.bf16.mxu0 %v2888_v25  ;;  %v2901_v17 = vld [vmem:[%s3388_s1 + $0x160] sm:$0xff]   ;;  %v1196_v1 = vor.u32 %v1195_v58, %v1192_v57  ;;  %v1248_v47 = vrot.slane %v1246_v38, 4  ;;  %v2919_v58 = vld [vmem:[%s3388_s1 + $0x1e8] sm:$0xff]   ;;  %v2935_v38 = vld [vmem:[%s3388_s1 + $0x230] sm:$0xff]  }
  0x48   : > { %2679 = vmatprep.subr.bf16.mxu1 %v2889_v31  ;;  %v634_v12 = vsel %vm3111_vm2, %v629_v9, %v633_v3  ;;  %v1183_v3 = vrot.slane %v1182_v62, 4  ;;  %v2912_v9 = vld [vmem:[%s3388_s1 + $0x1b8] sm:$0xff]   ;;  %v2917_v62 = vld [vmem:[%s3039_s13 + $0x108] ss:$8 sps:$4 sm:$0xff]  }
  0x49   : > { %v2218_v14 = vcombine.low %v620_v11, %v634_v12  ;;  %v1197_v5 = vrot.slane %v1196_v1, 4  ;;  %v2308_v11 = vld [vmem:[%s3039_s13 + $0xb4] sm:$0x1]  ;;  %v2309_v12 = vld [vmem:[%s3039_s13 + $0xb8] sm:$0xf] }
  0x4a   : > { %2656 = vmatpush3.bf16.msra.mxu0 %v2888_v25  ;;  %v1151_v25 = vshll.u32 %v2299_v20, 16  ;;  %v1221_v21 = vshll.u32 %v2309_v12, 16 }
  0x4b   : > { %2680 = vmatpush3.bf16.msra.mxu1 %v2889_v31  ;;  %2689 = vmatprep.subr.bf16.mxu0 %v2892_v51  ;;  %v1150_v31 = vrot.slane %v1148_v24, 4  ;;  %v2312_v24 = vld [vmem:[%s3039_s13 + $0xc4] sm:$0x1] }
  0x4c   : > { %2713 = vmatprep.subr.bf16.mxu1 %v2893_v55  ;;  %v1153_v32 = vrot.slane %v1151_v25, 5 }
  0x4d   : > { %2658 = vmatmul.mubr.bf16.vlgmr.msra.gmra.mxu0 %v2216_v60  ;;  %v2907_v60 = vld [vmem:[%s3388_s1 + $0x148] sm:$0xff]  }
  0x4e   : > { %2682 = vmatmul.mubr.bf16.vlgmr.msra.gmra.mxu1 %v2891_v61  ;;  %2690 = vmatpush3.bf16.msra.mxu0 %v2892_v51  ;;  %v1154_v39 = vor.u32 %v1153_v32, %v1150_v31  ;;  %v1199_v51 = vshll.u32 %v2306_v42, 16  ;;  %v1174_v61 = vsel %vm3111_vm2, %v1169_v52, %v1173_v37  ;;  %v2314_v32 = vld [vmem:[%s3039_s13 + $0xcc] sm:$0x1]  ;;  %v1241_v37 = vshll.u32 %v2312_v24, 16  ;;  %v2423_v24 = vld [vmem:[%s3039_s13 + $0x28] sm:$0xf] }
  0x4f   : > { %2714 = vmatpush3.bf16.msra.mxu1 %v2893_v55  ;;  %2691 = vmatprep.subr.bf16.mxu0 %v2894_v4  ;;  %v2906_v55 = vld [vmem:[%s3388_s1 + $0x108] sm:$0xff]   ;;  %v1255_v44 = vshll.u32 %v2314_v32, 16  ;;  %v2426_v32 = vld [vmem:[%s3039_s13 + $0x34] sm:$0x1] }
  0x50   : > { %2715 = vmatprep.subr.bf16.mxu1 %v2895_v7  ;;  %2661 = vmatprep.mubr.bf16.mxu0 %v2217_v8  ;;  %v1155_v48 = vrot.slane %v1154_v39, 4  ;;  %v1201_v2 = vrot.slane %v1199_v51, 5  ;;  %v1249_v39 = vshll.u32 %v2313_v29, 16  ;;  %v1243_v51 = vrot.slane %v1241_v37, 5 }
  0x51   : > { %2685 = vmatprep.mubr.bf16.mxu1 %v2898_v6  ;;  %v2909_v6 = vld [vmem:[%s3388_s1 + $0x140] sm:$0xff]   ;;  %v1257_v54 = vrot.slane %v1255_v44, 5  ;;  %v1831_v37 = vshll.u32 %v2423_v24, 16 }
  0x52   : > { %2692 = vmatpush3.bf16.msra.mxu0 %v2894_v4  ;;  %v1160_v56 = vsel %vm3111_vm2, %v1155_v48, %v1159_v34  ;;  %v2908_v4 = vld [vmem:[%s3388_s1 + $0x100] sm:$0xff]   ;;  %v1202_v8 = vsel %vm3111_vm2, %v1197_v5, %v1201_v2  ;;  %v1235_v34 = vshll.u32 %v2311_v23, 16  ;;  %v1251_v48 = vrot.slane %v1249_v39, 5  ;;  %v2930_v5 = vld [vmem:[%s3039_s13 + $0x8] ss:$8 sps:$4 sm:$0xff]  }
  0x53   : > { %2716 = vmatpush3.bf16.msra.mxu1 %v2895_v7  ;;  %2693 = vmatprep.subr.bf16.mxu0 %v2896_v10  ;;  %v2331_v63 = vcombine.low %v1160_v56, %v1174_v61  ;;  %v1188_v7 = vsel %vm3111_vm2, %v1183_v3, %v1187_v0  ;;  %v2920_v2 = vld [vmem:[%s3388_s1 + $0x1a0] sm:$0xff]  }
  0x54   : > { %2717 = vmatprep.subr.bf16.mxu1 %v2897_v13  ;;  %v2332_v20 = vcombine.low %v1188_v7, %v1202_v8  ;;  %v1252_v53 = vor.u32 %v1251_v48, %v1248_v47  ;;  %v2921_v3 = vld [vmem:[%s3388_s1 + $0x1e0] sm:$0xff]   ;;  %v2923_v7 = vld [vmem:[%s3388_s1 + $0x1d8] sm:$0xff]   ;;  %v2924_v8 = vld [vmem:[%s3388_s1 + $0x190] sm:$0xff]   ;;  %v1851_v47 = vshll.u32 %v2426_v32, 16 }
  0x55   : > { %2662 = vmatmul.mubr.bf16.gmra.mxu0 %v2218_v14  ;;  %v2310_v14 = vld [vmem:[%s3039_s13 + $0xbc] sm:$0x1]  ;;  %v2939_v48 = vld [vmem:[%s3039_s13 + $0x70] ss:$8 sps:$4 sm:$0xff]   ;;  %v2430_v32 = vld [vmem:[%s3039_s13 + $0x44] sm:$0x1] }
  0x56   : > { %2694 = vmatpush3.bf16.msra.mxu0 %v2896_v10  ;;  %2686 = vmatmul.mubr.bf16.gmra.mxu1 %v2899_v15  ;;  %v2307_v10 = vld [vmem:[%s3039_s13 + $0xb0] sm:$0xf]  ;;  %v1227_v22 = vshll.u32 %v2310_v14, 16  ;;  %v1253_v61 = vrot.slane %v1252_v53, 4  ;;  %v2934_v14 = vld [vmem:[%s3388_s1 + $0x238] sm:$0xff]  }
  0x57   : > { %2718 = vmatpush3.bf16.msra.mxu1 %v2897_v13  ;;  %2695 = vmatprep.subr.bf16.mxu0 %v2900_v16  ;;  %v2913_v13 = vld [vmem:[%s3388_s1 + $0x1f8] sm:$0xff]   ;;  %v1204_v15 = vshrl.u32 %v2307_v10, 16 }
  0x58   : > { %2719 = vmatprep.subr.bf16.mxu1 %v2901_v17  ;;  %2705 = vmatprep.mubr.bf16.mxu0 %v2910_v19  ;;  %v2911_v19 = vld [vmem:[%s3039_s13 + $0xe8] ss:$8 sps:$4 sm:$0xff]   ;;  %v1229_v31 = vrot.slane %v1227_v22, 5  ;;  %v1258_v0 = vsel %vm3111_vm2, %v1253_v61, %v1257_v54  ;;  %v2937_v61 = vld [vmem:[%s3039_s13 + $0x38] ss:$8 sps:$4 sm:$0xff]  }
  0x59   : > { %2729 = vmatprep.mubr.bf16.mxu1 %v2331_v63  ;;  %v1206_v25 = vrot.slane %v1204_v15, 4  ;;  %v2415_v15 = vld [vmem:[%s3039_s13 + $0x8] sm:$0xf] }
  0x5a   : > { %2696 = vmatpush3.bf16.msra.mxu0 %v2900_v16  ;;  %v1207_v16 = vshll.u32 %v2307_v10, 16  ;;  %v2926_v10 = vld [vmem:[%s3388_s1 + $0x188] sm:$0xff]  }
  0x5b   : > { %2720 = vmatpush3.bf16.msra.mxu1 %v2901_v17  ;;  %2697 = vmatprep.subr.bf16.mxu0 %v2902_v18  ;;  %v1213_v17 = vshll.u32 %v2308_v11, 16  ;;  %v2927_v11 = vld [vmem:[%s3388_s1 + $0x1c8] sm:$0xff]  }
  0x5c   : > { %2721 = vmatprep.subr.bf16.mxu1 %v2903_v30  ;;  %v1209_v26 = vrot.slane %v1207_v16, 5  ;;  %v2416_v16 = vld [vmem:[%s3039_s13 + $0xc] sm:$0x1] }
  0x5d   : > { %v1215_v27 = vrot.slane %v1213_v17, 5  ;;  %v2417_v17 = vld [vmem:[%s3039_s13 + $0x10] sm:$0xf]  ;;  %v1781_v22 = vshll.u32 %v2416_v16, 16 }
  0x5e   : > { %2698 = vmatpush3.bf16.msra.mxu0 %v2902_v18  ;;  %v1218_v18 = vshrl.u32 %v2309_v12, 16  ;;  %v1210_v36 = vor.u32 %v1209_v26, %v1206_v25  ;;  %v2928_v12 = vld [vmem:[%s3388_s1 + $0x180] sm:$0xff]   ;;  %v1789_v25 = vshll.u32 %v2417_v17, 16  ;;  %v2424_v26 = vld [vmem:[%s3039_s13 + $0x2c] sm:$0x1] }
  0x5f   : > { %2722 = vmatpush3.bf16.msra.mxu1 %v2903_v30  ;;  %2699 = vmatprep.subr.bf16.mxu0 %v2904_v33  ;;  %v1223_v30 = vrot.slane %v1221_v21, 5  ;;  %v1775_v21 = vshll.u32 %v2415_v15, 16 }
  0x60   : > { %2723 = vmatprep.subr.bf16.mxu1 %v2905_v43  ;;  %v1220_v28 = vrot.slane %v1218_v18, 4  ;;  %v1211_v46 = vrot.slane %v1210_v36, 4  ;;  %v2418_v18 = vld [vmem:[%s3039_s13 + $0x14] sm:$0x1]  ;;  %v1828_v36 = vshrl.u32 %v2423_v24, 16 }
  0x61   : > { %v1777_v29 = vrot.slane %v1775_v21, 5  ;;  %v2420_v21 = vld [vmem:[%s3039_s13 + $0x1c] sm:$0x1] }
  0x62   : > { %2700 = vmatpush3.bf16.msra.mxu0 %v2904_v33  ;;  %v1232_v33 = vshrl.u32 %v2311_v23, 16  ;;  %v1224_v41 = vor.u32 %v1223_v30, %v1220_v28  ;;  %v1216_v52 = vsel %vm3111_vm2, %v1211_v46, %v1215_v27  ;;  %v1786_v23 = vshrl.u32 %v2417_v17, 16  ;;  %v2425_v27 = vld [vmem:[%s3039_s13 + $0x30] sm:$0xf] }
  0x63   : > { %2724 = vmatpush3.bf16.msra.mxu1 %v2905_v43  ;;  %2701 = vmatprep.subr.bf16.mxu0 %v2906_v55  ;;  %v1237_v43 = vrot.slane %v1235_v34, 5  ;;  %v1783_v34 = vrot.slane %v1781_v22, 5  ;;  %v1833_v46 = vrot.slane %v1831_v37, 5  ;;  %v2944_v37 = vld [vmem:[%s3388_s1 + $0x208] sm:$0xff]  }
  0x64   : > { %2725 = vmatprep.subr.bf16.mxu1 %v2907_v60  ;;  %v1234_v42 = vrot.slane %v1232_v33, 4  ;;  %v1225_v49 = vrot.slane %v1224_v41, 4  ;;  %v1788_v30 = vrot.slane %v1786_v23, 4  ;;  %v2933_v33 = vld [vmem:[%s3039_s13 + $0x60] ss:$8 sps:$4 sm:$0xff]   ;;  %v1842_v41 = vshrl.u32 %v2425_v27, 16 }
  0x66   : > { %2702 = vmatpush3.bf16.msra.mxu0 %v2906_v55  ;;  %v1238_v50 = vor.u32 %v1237_v43, %v1234_v42  ;;  %v2918_v55 = vld [vmem:[%s3388_s1 + $0x1a8] sm:$0xff]   ;;  %v1230_v56 = vsel %vm3111_vm2, %v1225_v49, %v1229_v31  ;;  %v1795_v31 = vshll.u32 %v2418_v18, 16  ;;  %v1845_v42 = vshll.u32 %v2425_v27, 16 }
  0x67   : > { %2726 = vmatpush3.bf16.msra.mxu1 %v2907_v60  ;;  %2703 = vmatprep.subr.bf16.mxu0 %v2908_v4  ;;  %v2333_v60 = vcombine.low %v1216_v52, %v1230_v56  ;;  %v2936_v43 = vld [vmem:[%s3039_s13 + $0x28] ss:$8 sps:$4 sm:$0xff]  }
  0x68   : > { %2727 = vmatprep.subr.bf16.mxu1 %v2909_v6  ;;  %v1239_v57 = vrot.slane %v1238_v50, 4  ;;  %v1797_v50 = vrot.slane %v1795_v31, 5  ;;  %v1847_v52 = vrot.slane %v1845_v42, 5  ;;  %v2938_v56 = vld [vmem:[%s3388_s1 + $0x228] sm:$0xff]   ;;  %v2428_v31 = vld [vmem:[%s3039_s13 + $0x3c] sm:$0x1] }
  0x6a   : > { %2704 = vmatpush3.bf16.msra.mxu0 %v2908_v4  ;;  %v1244_v63 = vsel %vm3111_vm2, %v1239_v57, %v1243_v51  ;;  %v2922_v4 = vld [vmem:[%s3388_s1 + $0x198] sm:$0xff]   ;;  %v1844_v51 = vrot.slane %v1842_v41, 4  ;;  %v1879_v41 = vshll.u32 %v2430_v32, 16 }
  0x6b   : > { %2728 = vmatpush3.bf16.msra.mxu1 %v2909_v6  ;;  %2737 = vmatprep.subr.bf16.mxu0 %v2912_v9  ;;  %v2334_v1 = vcombine.low %v1244_v63, %v1258_v0  ;;  %v2931_v6 = vld [vmem:[%s3039_s13 + $0x50] ss:$8 sps:$4 sm:$0xff]  }
  0x6c   : > { %2761 = vmatprep.subr.bf16.mxu1 %v2913_v13  ;;  %v1848_v57 = vor.u32 %v1847_v52, %v1844_v51 }
  0x6d   : > { %2706 = vmatmul.mubr.bf16.vlgmr.msra.gmra.mxu0 %v2911_v19  ;;  %v2932_v19 = vld [vmem:[%s3039_s13 + $0x18] ss:$8 sps:$4 sm:$0xff]  }
  0x6e   : > { %2730 = vmatmul.mubr.bf16.vlgmr.msra.gmra.mxu1 %v2332_v20  ;;  %2738 = vmatpush3.bf16.msra.mxu0 %v2912_v9  ;;  %v2925_v9 = vld [vmem:[%s3388_s1 + $0x1d0] sm:$0xff]   ;;  %v1772_v20 = vshrl.u32 %v2415_v15, 16  ;;  %v1849_v0 = vrot.slane %v1848_v57, 4  ;;  %v2942_v15 = vld [vmem:[%s3388_s1 + $0x218] sm:$0xff]  }
  0x6f   : > { %2762 = vmatpush3.bf16.msra.mxu1 %v2913_v13  ;;  %2739 = vmatprep.subr.bf16.mxu0 %v2914_v40  ;;  %v2929_v13 = vld [vmem:[%s3388_s1 + $0x1c0] sm:$0xff]  }
  0x70   : > { %2763 = vmatprep.subr.bf16.mxu1 %v2915_v45  ;;  %2709 = vmatprep.mubr.bf16.mxu0 %v2916_v35  ;;  %v1774_v28 = vrot.slane %v1772_v20, 4  ;;  %v1791_v35 = vrot.slane %v1789_v25, 5  ;;  %v2943_v20 = vld [vmem:[%s3388_s1 + $0x210] sm:$0xff]  }
  0x71   : > { %2733 = vmatprep.mubr.bf16.mxu1 %v2333_v60 }
  0x72   : > { %2740 = vmatpush3.bf16.msra.mxu0 %v2914_v40  ;;  %v1778_v39 = vor.u32 %v1777_v29, %v1774_v28  ;;  %v1837_v40 = vshll.u32 %v2424_v26, 16  ;;  %v1792_v44 = vor.u32 %v1791_v35, %v1788_v30  ;;  %v2422_v26 = vld [vmem:[%s3039_s13 + $0x24] sm:$0x1] }
  0x73   : > { %2764 = vmatpush3.bf16.msra.mxu1 %v2915_v45  ;;  %2741 = vmatprep.subr.bf16.mxu0 %v2918_v55  ;;  %v1830_v45 = vrot.slane %v1828_v36, 4  ;;  %v1823_v36 = vshll.u32 %v2422_v26, 16 }
  0x74   : > { %2765 = vmatprep.subr.bf16.mxu1 %v2919_v58  ;;  %v1779_v49 = vrot.slane %v1778_v39, 4  ;;  %v1793_v53 = vrot.slane %v1792_v44, 4  ;;  %v1865_v39 = vshll.u32 %v2428_v31, 16 }
  0x75   : > { %2710 = vmatmul.mubr.bf16.gmra.mxu0 %v2917_v62  ;;  %v1834_v54 = vor.u32 %v1833_v46, %v1830_v45  ;;  %v1825_v45 = vrot.slane %v1823_v36, 5  ;;  %v2945_v46 = vld [vmem:[%s3388_s1 + $0x200] sm:$0xff]  }
  0x76   : > { %2742 = vmatpush3.bf16.msra.mxu0 %v2918_v55  ;;  %2734 = vmatmul.mubr.bf16.gmra.mxu1 %v2334_v1  ;;  %v1839_v55 = vrot.slane %v1837_v40, 5  ;;  %v1784_v62 = vsel %vm3111_vm2, %v1779_v49, %v1783_v34  ;;  %v1798_v63 = vsel %vm3111_vm2, %v1793_v53, %v1797_v50  ;;  %v2940_v1 = vld [vmem:[%s3039_s13 + $0x80] ss:$8 sps:$4 sm:$0xff]   ;;  %v1809_v34 = vshll.u32 %v2420_v21, 16 }
  0x77   : > { %2766 = vmatpush3.bf16.msra.mxu1 %v2919_v58  ;;  %2743 = vmatprep.subr.bf16.mxu0 %v2920_v2  ;;  %v1853_v58 = vrot.slane %v1851_v47, 5  ;;  %v1835_v60 = vrot.slane %v1834_v54, 4  ;;  %v1881_v50 = vrot.slane %v1879_v41, 5 }
  0x78   : > { %2767 = vmatprep.subr.bf16.mxu1 %v2921_v3  ;;  %2753 = vmatprep.mubr.bf16.mxu0 %v2930_v5  ;;  %v2419_v5 = vld [vmem:[%s3039_s13 + $0x18] sm:$0xf] }
  0x79   : > { %2777 = vmatprep.mubr.bf16.mxu1 %v2931_v6  ;;  %v2421_v6 = vld [vmem:[%s3039_s13 + $0x20] sm:$0xf] }
  0x7a   : > { %2744 = vmatpush3.bf16.msra.mxu0 %v2920_v2  ;;  %v1840_v2 = vsel %vm3111_vm2, %v1835_v60, %v1839_v55 }
  0x7b   : > { %2768 = vmatpush3.bf16.msra.mxu1 %v2921_v3  ;;  %2745 = vmatprep.subr.bf16.mxu0 %v2922_v4  ;;  %v2941_v3 = vld [vmem:[%s3388_s1 + $0x220] sm:$0xff]  }
  0x7c   : > { %2769 = vmatprep.subr.bf16.mxu1 %v2923_v7 }
  0x7e   : > { %2746 = vmatpush3.bf16.msra.mxu0 %v2922_v4  ;;  %v1854_v4 = vsel %vm3111_vm2, %v1849_v0, %v1853_v58 }
  0x7f   : > { %2770 = vmatpush3.bf16.msra.mxu1 %v2923_v7  ;;  %2747 = vmatprep.subr.bf16.mxu0 %v2924_v8  ;;  %v2447_v7 = vcombine.low %v1784_v62, %v1798_v63 }
  0x80   : > { %2771 = vmatprep.subr.bf16.mxu1 %v2925_v9 }
  0x82   : > { %2748 = vmatpush3.bf16.msra.mxu0 %v2924_v8  ;;  %v2427_v8 = vld [vmem:[%s3039_s13 + $0x38] sm:$0xf] }
  0x83   : > { %2772 = vmatpush3.bf16.msra.mxu1 %v2925_v9  ;;  %2749 = vmatprep.subr.bf16.mxu0 %v2926_v10  ;;  %v2429_v9 = vld [vmem:[%s3039_s13 + $0x40] sm:$0xf]  ;;  %v1856_v16 = vshrl.u32 %v2427_v8, 16  ;;  %v1859_v17 = vshll.u32 %v2427_v8, 16 }
  0x84   : > { %2773 = vmatprep.subr.bf16.mxu1 %v2927_v11  ;;  %v1870_v18 = vshrl.u32 %v2429_v9, 16 }
  0x85   : > { %v1858_v27 = vrot.slane %v1856_v16, 4  ;;  %v1861_v28 = vrot.slane %v1859_v17, 5 }
  0x86   : > { %2750 = vmatpush3.bf16.msra.mxu0 %v2926_v10  ;;  %v2449_v10 = vcombine.low %v1840_v2, %v1854_v4  ;;  %v1872_v29 = vrot.slane %v1870_v18, 4 }
  0x87   : > { %2774 = vmatpush3.bf16.msra.mxu1 %v2927_v11  ;;  %2751 = vmatprep.subr.bf16.mxu0 %v2928_v12  ;;  %v1800_v11 = vshrl.u32 %v2419_v5, 16 }
  0x88   : > { %2775 = vmatprep.subr.bf16.mxu1 %v2929_v13 }
  0x89   : > { %v1802_v22 = vrot.slane %v1800_v11, 4 }
  0x8a   : > { %2752 = vmatpush3.bf16.msra.mxu0 %v2928_v12  ;;  %v1803_v12 = vshll.u32 %v2419_v5, 16 }
  0x8b   : > { %2776 = vmatpush3.bf16.msra.mxu1 %v2929_v13  ;;  %2785 = vmatprep.subr.bf16.mxu0 %v2934_v14  ;;  %v1814_v13 = vshrl.u32 %v2421_v6, 16 }
  0x8c   : > { %2809 = vmatprep.subr.bf16.mxu1 %v2934_v14  ;;  %v1805_v23 = vrot.slane %v1803_v12, 5 }
  0x8d   : > { %2754 = vmatmul.mubr.bf16.vlgmr.msra.gmra.mxu0 %v2932_v19  ;;  %v1873_v19 = vshll.u32 %v2429_v9, 16  ;;  %v1816_v24 = vrot.slane %v1814_v13, 4 }
  0x8e   : > { %2778 = vmatmul.mubr.bf16.vlgmr.msra.gmra.mxu1 %v2933_v33  ;;  %2786 = vmatpush3.bf16.msra.mxu0 %v2934_v14  ;;  %v1806_v33 = vor.u32 %v1805_v23, %v1802_v22 }
  0x8f   : > { %2817 = vmatpush3.bf16.msra.mxu1 %v2934_v14  ;;  %2787 = vmatprep.subr.bf16.mxu0 %v2935_v38  ;;  %v1817_v14 = vshll.u32 %v2421_v6, 16  ;;  %v1875_v30 = vrot.slane %v1873_v19, 5 }
  0x90   : > { %2810 = vmatprep.subr.bf16.mxu1 %v2935_v38  ;;  %2757 = vmatprep.mubr.bf16.mxu0 %v2936_v43  ;;  %v1807_v42 = vrot.slane %v1806_v33, 4  ;;  %v1811_v43 = vrot.slane %v1809_v34, 5 }
  0x91   : > { %2781 = vmatprep.mubr.bf16.mxu1 %v2939_v48  ;;  %v1819_v25 = vrot.slane %v1817_v14, 5  ;;  %v1876_v40 = vor.u32 %v1875_v30, %v1872_v29  ;;  %v1867_v48 = vrot.slane %v1865_v39, 5 }
  0x92   : > { %2788 = vmatpush3.bf16.msra.mxu0 %v2935_v38  ;;  %v1812_v51 = vsel %vm3111_vm2, %v1807_v42, %v1811_v43 }
  0x93   : > { %2818 = vmatpush3.bf16.msra.mxu1 %v2935_v38  ;;  %2789 = vmatprep.subr.bf16.mxu0 %v2938_v56  ;;  %v1820_v35 = vor.u32 %v1819_v25, %v1816_v24  ;;  %v1862_v38 = vor.u32 %v1861_v28, %v1858_v27  ;;  %v1877_v49 = vrot.slane %v1876_v40, 4 }
  0x94   : > { %2811 = vmatprep.subr.bf16.mxu1 %v2938_v56 }
  0x95   : > { %2758 = vmatmul.mubr.bf16.gmra.mxu0 %v2937_v61  ;;  %v1821_v44 = vrot.slane %v1820_v35, 4  ;;  %v1863_v47 = vrot.slane %v1862_v38, 4  ;;  %v1882_v54 = vsel %vm3111_vm2, %v1877_v49, %v1881_v50 }
  0x96   : > { %2790 = vmatpush3.bf16.msra.mxu0 %v2938_v56  ;;  %2782 = vmatmul.mubr.bf16.gmra.mxu1 %v2940_v1 }
  0x97   : > { %2819 = vmatpush3.bf16.msra.mxu1 %v2938_v56  ;;  %2791 = vmatprep.subr.bf16.mxu0 %v2941_v3  ;;  %v1826_v52 = vsel %vm3111_vm2, %v1821_v44, %v1825_v45  ;;  %v1868_v53 = vsel %vm3111_vm2, %v1863_v47, %v1867_v48 }
  0x98   : > { %2812 = vmatprep.subr.bf16.mxu1 %v2941_v3  ;;  %2801 = vmatprep.mubr.bf16.mxu0 %v2447_v7  ;;  %v2448_v55 = vcombine.low %v1812_v51, %v1826_v52  ;;  %v2450_v56 = vcombine.low %v1868_v53, %v1882_v54 }
  0x99   : > { %2805 = vmatprep.mubr.bf16.mxu1 %v2449_v10 }
  0x9a   : > { %2792 = vmatpush3.bf16.msra.mxu0 %v2941_v3 }
  0x9b   : > { %2820 = vmatpush3.bf16.msra.mxu1 %v2941_v3  ;;  %2793 = vmatprep.subr.bf16.mxu0 %v2942_v15 }
  0x9c   : > { %2813 = vmatprep.subr.bf16.mxu1 %v2942_v15 }
  0x9e   : > { %2794 = vmatpush3.bf16.msra.mxu0 %v2942_v15 }
  0x9f   : > { %2821 = vmatpush3.bf16.msra.mxu1 %v2942_v15  ;;  %2795 = vmatprep.subr.bf16.mxu0 %v2943_v20 }
  0xa0   : > { %2814 = vmatprep.subr.bf16.mxu1 %v2943_v20 }
  0xa2   : > { %2796 = vmatpush3.bf16.msra.mxu0 %v2943_v20 }
  0xa3   : > { %2822 = vmatpush3.bf16.msra.mxu1 %v2943_v20  ;;  %2797 = vmatprep.subr.bf16.mxu0 %v2944_v37 }
  0xa4   : > { %2815 = vmatprep.subr.bf16.mxu1 %v2944_v37 }
  0xa6   : > { %2798 = vmatpush3.bf16.msra.mxu0 %v2944_v37 }
  0xa7   : > { %2823 = vmatpush3.bf16.msra.mxu1 %v2944_v37  ;;  %2799 = vmatprep.subr.bf16.mxu0 %v2945_v46 }
  0xa8   : > { %2816 = vmatprep.subr.bf16.mxu1 %v2945_v46 }
  0xaa   : > { %2800 = vmatpush3.bf16.msra.mxu0 %v2945_v46 }
  0xab   : > { %2824 = vmatpush3.bf16.msra.mxu1 %v2945_v46 }
  0xad   : > { %2802 = vmatmul.mubr.bf16.vlgmr.msra.gmra.mxu0 %v2448_v55 }
  0xae   : > { %2806 = vmatmul.mubr.bf16.vlgmr.msra.gmra.mxu1 %v2450_v56 }
  0xed   : > { %v2611_v57 = vpop.f32.mrf.mxu0 }
  0xee   : > { %v2635_v60 = vpop.f32.mrf.mxu1 }
  0xef   : > { %v336_v58 = vpop.f32.mrf.mxu0  ;;  %v482_v48 = vadd.f32 %v2635_v60, %v2611_v57 }
  0xf0   : > { %v473_v62 = vpop.f32.mrf.mxu1 }
  0xf1   : > { %v2612_v61 = vpop.f32.mrf.mxu0  ;;  %v474_v50 = vadd.f32 %v473_v62, %v336_v58 }
  0xf2   : > { %v2636_v1 = vpop.f32.mrf.mxu1 }
  0xf3   : > { %v339_v63 = vpop.f32.mrf.mxu0  ;;  %v485_v51 = vadd.f32 %v2636_v1, %v2612_v61 }
  0xf4   : > { %v476_v3 = vpop.f32.mrf.mxu1 }
  0xf5   : > { %v2615_v0 = vpop.f32.mrf.mxu0 }
  0xf6   : > { %v2639_v4 = vpop.f32.mrf.mxu1 }
  0xf7   : > { %v352_v2 = vpop.f32.mrf.mxu0  ;;  %v498_v49 = vadd.f32 %v2639_v4, %v2615_v0 }
  0xf8   : > { %v489_v5 = vpop.f32.mrf.mxu1 }
  0xf9   : > { %v2616_v59 = vpop.f32.mrf.mxu0  ;;  %v490_v54 = vadd.f32 %v489_v5, %v352_v2 }
  0xfa   : > { %v2640_v8 = vpop.f32.mrf.mxu1 }
  0xfb   : > { %v355_v6 = vpop.f32.mrf.mxu0  ;;  %v501_v55 = vadd.f32 %v2640_v8, %v2616_v59 }
  0xfc   : > { %v492_v10 = vpop.f32.mrf.mxu1 }
  0xfd   : > { %v493_v60 = vadd.f32 %v492_v10, %v355_v6 }
 0x10d   : > { %v2659_v7 = vpop.f32.mrf.mxu0 }
 0x10e   : > { %v2683_v11 = vpop.f32.mrf.mxu1  ;;  %v783_v52 = vadd.f32 %v2659_v7, %v482_v48 }
 0x10f   : > { %v750_v9 = vpop.f32.mrf.mxu0 }
 0x110   : > { %v921_v13 = vpop.f32.mrf.mxu1  ;;  %v954_v58 = vadd.f32 %v2683_v11, %v783_v52 }
 0x111   : > { %v2660_v12 = vpop.f32.mrf.mxu0 }
 0x112   : > { %v2684_v15 = vpop.f32.mrf.mxu1 }
 0x113   : > { %v753_v14 = vpop.f32.mrf.mxu0 }
 0x114   : > { %v924_v17 = vpop.f32.mrf.mxu1 }
 0x115   : > { %v2663_v16 = vpop.f32.mrf.mxu0 }
 0x116   : > { %v2687_v19 = vpop.f32.mrf.mxu1  ;;  %v787_v56 = vadd.f32 %v2663_v16, %v498_v49 }
 0x117   : > { %v766_v18 = vpop.f32.mrf.mxu0 }
 0x118   : > { %v937_v21 = vpop.f32.mrf.mxu1  ;;  %v785_v0 = vadd.f32 %v766_v18, %v490_v54  ;;  %v958_v1 = vadd.f32 %v2687_v19, %v787_v56 }
 0x119   : > { %v2664_v20 = vpop.f32.mrf.mxu0 }
 0x11a   : > { %v2688_v23 = vpop.f32.mrf.mxu1  ;;  %v788_v4 = vadd.f32 %v2664_v20, %v501_v55  ;;  %v956_v8 = vadd.f32 %v937_v21, %v785_v0 }
 0x11b   : > { %v769_v22 = vpop.f32.mrf.mxu0 }
 0x11c   : > { %v940_v25 = vpop.f32.mrf.mxu1  ;;  %v786_v61 = vadd.f32 %v769_v22, %v493_v60  ;;  %v959_v59 = vadd.f32 %v2688_v23, %v788_v4 }
 0x12d   : > { %v2707_v24 = vpop.f32.mrf.mxu0 }
 0x12e   : > { %v2731_v27 = vpop.f32.mrf.mxu1  ;;  %v1125_v2 = vadd.f32 %v2707_v24, %v954_v58 }
 0x12f   : > { %v1092_v26 = vpop.f32.mrf.mxu0 }
 0x130   : > { %v1374_v29 = vpop.f32.mrf.mxu1  ;;  %v1407_v11 = vadd.f32 %v2731_v27, %v1125_v2 }
 0x131   : > { %v2708_v28 = vpop.f32.mrf.mxu0 }
 0x132   : > { %v2732_v31 = vpop.f32.mrf.mxu1 }
 0x133   : > { %v1095_v30 = vpop.f32.mrf.mxu0 }
 0x134   : > { %v3356_v33 = vpop.f32.mrf.mxu1 }
 0x135   : > { %v2711_v32 = vpop.f32.mrf.mxu0  ;;  %3392 = vst [vmem:[#allocation2_spill] sm:$0xff] %v3356_v33 }
 0x136   : > { %v2735_v34 = vpop.f32.mrf.mxu1  ;;  %v1129_v16 = vadd.f32 %v2711_v32, %v958_v1 }
 0x137   : > { %v1108_v35 = vpop.f32.mrf.mxu0 }
 0x138   : > { %v1390_v36 = vpop.f32.mrf.mxu1  ;;  %v1127_v6 = vadd.f32 %v1108_v35, %v956_v8  ;;  %v1411_v20 = vadd.f32 %v2735_v34, %v1129_v16 }
 0x139   : > { %v2712_v37 = vpop.f32.mrf.mxu0 }
 0x13a   : > { %v2736_v38 = vpop.f32.mrf.mxu1  ;;  %v1130_v10 = vadd.f32 %v2712_v37, %v959_v59  ;;  %v1409_v21 = vadd.f32 %v1390_v36, %v1127_v6 }
 0x13b   : > { %v1111_v39 = vpop.f32.mrf.mxu0 }
 0x13c   : > { %v1393_v41 = vpop.f32.mrf.mxu1  ;;  %v1412_v23 = vadd.f32 %v2736_v38, %v1130_v10 }
 0x14d   : > { %v2755_v40 = vpop.f32.mrf.mxu0 }
 0x14e   : > { %v3358_v42 = vpop.f32.mrf.mxu1  ;;  %v1578_v24 = vadd.f32 %v2755_v40, %v1407_v11 }
 0x14f   : > { %3393 = vst [vmem:[#allocation3_spill] sm:$0xff] %v3358_v42  ;;  %v1545_v43 = vpop.f32.mrf.mxu0  ;;  %v477_v42 = vadd.f32 %v476_v3, %v339_v63 }
 0x150   : > { %v3360_v44 = vpop.f32.mrf.mxu1 }
 0x151   : > { %3394 = vst [vmem:[#allocation4_spill] sm:$0xff] %v3360_v44  ;;  %v2756_v45 = vpop.f32.mrf.mxu0  ;;  %v781_v44 = vadd.f32 %v750_v9, %v474_v50  ;;  %v782_v62 = vadd.f32 %v753_v14, %v477_v42 }
 0x152   : > { %v3362_v46 = vpop.f32.mrf.mxu1 }
 0x153   : > { %3395 = vst [vmem:[#allocation5_spill] sm:$0xff] %v3362_v46  ;;  %v1548_v47 = vpop.f32.mrf.mxu0  ;;  %v784_v46 = vadd.f32 %v2660_v12, %v485_v51  ;;  %v952_v48 = vadd.f32 %v921_v13, %v781_v44  ;;  %v953_v63 = vadd.f32 %v924_v17, %v782_v62  ;;  %v957_v12 = vadd.f32 %v940_v25, %v786_v61 }
 0x154   : > { %v3364_v53 = vpop.f32.mrf.mxu1 }
 0x155   : > { %3396 = vst [vmem:[#allocation6_spill] sm:$0xff] %v3364_v53  ;;  %v2759_v33 = vpop.f32.mrf.mxu0  ;;  %v955_v53 = vadd.f32 %v2684_v15, %v784_v46  ;;  %v1123_v3 = vadd.f32 %v1092_v26, %v952_v48  ;;  %v1124_v14 = vadd.f32 %v1095_v30, %v953_v63  ;;  %v1128_v22 = vadd.f32 %v1111_v39, %v957_v12 }
 0x156   : > { %v2783_v57 = vpop.f32.mrf.mxu1  ;;  %v1582_v17 = vadd.f32 %v2759_v33, %v1411_v20  ;;  %v3398_v39 = vld [vmem:[#allocation3_spill] sm:$0xff] }
 0x157   : > { %v1561_v7 = vpop.f32.mrf.mxu0  ;;  %v1126_v9 = vadd.f32 %v2708_v28, %v955_v53  ;;  %v1405_v13 = vadd.f32 %v1374_v29, %v1123_v3  ;;  %v3397_v28 = vld [vmem:[#allocation2_spill] sm:$0xff]  ;;  %v1410_v27 = vadd.f32 %v1393_v41, %v1128_v22  ;;  %v1749_v29 = vadd.f32 %v3398_v39, %v1578_v24 }
 0x158   : > { %v1732_v5 = vpop.f32.mrf.mxu1  ;;  %v1406_v25 = vadd.f32 %v3397_v28, %v1124_v14  ;;  %v1580_v30 = vadd.f32 %v1561_v7, %v1409_v21  ;;  %v1753_v44 = vadd.f32 %v2783_v57, %v1582_v17  ;;  %v3399_v33 = vld [vmem:[#allocation4_spill] sm:$0xff] }
 0x159   : > { %v2760_v18 = vpop.f32.mrf.mxu0  ;;  %v1408_v15 = vadd.f32 %v2732_v31, %v1126_v9  ;;  %v1576_v32 = vadd.f32 %v1545_v43, %v1405_v13 }
 0x15a   : > { %v2784_v19 = vpop.f32.mrf.mxu1  ;;  %v1583_v42 = vadd.f32 %v2760_v18, %v1412_v23  ;;  %v1577_v31 = vadd.f32 %v1548_v47, %v1406_v25  ;;  %v3400_v49 = vld [vmem:[#allocation5_spill] sm:$0xff]  ;;  %v1751_v51 = vadd.f32 %v1732_v5, %v1580_v30 }
 0x15b   : > { %v1564_v26 = vpop.f32.mrf.mxu0  ;;  %v1579_v35 = vadd.f32 %v2756_v45, %v1408_v15  ;;  %v1747_v46 = vadd.f32 %v3399_v33, %v1576_v32 }
 0x15c   : > { %v1735_v37 = vpop.f32.mrf.mxu1  ;;  %v1581_v36 = vadd.f32 %v1564_v26, %v1410_v27  ;;  %v1754_v41 = vadd.f32 %v2784_v19, %v1583_v42  ;;  %v3401_v54 = vld [vmem:[#allocation6_spill] sm:$0xff] }
 0x15d   : > { %v1750_v50 = vadd.f32 %v3400_v49, %v1579_v35  ;;  %v1748_v55 = vadd.f32 %v3401_v54, %v1577_v31 }
 0x15e   : > { %v1752_v0 = vadd.f32 %v1735_v37, %v1581_v36 }
 0x16d   : > { %v2803_v34 = vpop.f32.mrf.mxu0 }
 0x16e   : > { %v2807_v40 = vpop.f32.mrf.mxu1  ;;  %v2031_v43 = vadd.f32 %v2803_v34, %v1749_v29 }
 0x16f   : > { %v1998_v38 = vpop.f32.mrf.mxu0  ;;  %v2035_v52 = vadd.f32 %v2807_v40, %v1753_v44 }
 0x170   : > { %v2014_v45 = vpop.f32.mrf.mxu1  ;;  %v2029_v56 = vadd.f32 %v1998_v38, %v1747_v46  ;;  %v2039_v62 = vmax.f32 %v2031_v43, 0.0 }
 0x171   : > { %v2804_v53 = vpop.f32.mrf.mxu0  ;;  %v2033_v57 = vadd.f32 %v2014_v45, %v1751_v51  ;;  %v2043_v48 = vmax.f32 %v2035_v52, 0.0 }
 0x172   : > { %v2032_v47 = vadd.f32 %v2804_v53, %v1750_v50  ;;  %v2808_v60 = vpop.f32.mrf.mxu1  ;;  %v2037_v8 = vmax.f32 %v2029_v56, 0.0 }
 0x173   : > { %v2036_v4 = vadd.f32 %v2808_v60, %v1754_v41  ;;  %v2001_v58 = vpop.f32.mrf.mxu0  ;;  %v2041_v63 = vmax.f32 %v2033_v57, 0.0 }
 0x174   : > { %v2040_v1 = vmax.f32 %v2032_v47, 0.0  ;;  %v2030_v61 = vadd.f32 %v2001_v58, %v1748_v55  ;;  %v2017_v7 = vpop.f32.mrf.mxu1 }
 0x175   : > { %v2044_v2 = vmax.f32 %v2036_v4, 0.0  ;;  %v2034_v5 = vadd.f32 %v2017_v7, %v1752_v0 }
 0x176   : > { %v2470_v59 = vpack.c.bf16 %v2040_v1, %v2039_v62  ;;  %v2038_v16 = vmax.f32 %v2030_v61, 0.0 }
 0x177   : > { %v2480_v3 = vpack.c.bf16 %v2044_v2, %v2043_v48  ;;  %v2042_v9 = vmax.f32 %v2034_v5, 0.0 }
 0x178   : > { %2482 = vst [vmem:[%s177_s25 + $0x8] sm:$0xff] %v2470_v59   ;;  %v2465_v12 = vpack.c.bf16 %v2038_v16, %v2037_v8 }
 0x179   : > { %2484 = vst [vmem:[%s177_s25 + $0x18] sm:$0xff] %v2480_v3   ;;  %v2475_v6 = vpack.c.bf16 %v2042_v9, %v2041_v63 }
 0x17a   : > { %2466 = vst [vmem:[%s177_s25] sm:$0xff] %v2465_v12  }
 0x17b   : > { %2483 = vst [vmem:[%s177_s25 + $0x10] sm:$0xff] %v2475_v6  }
 0x17c PF: > { %s12_s11 = sadd.s32 1, %s2968_s11   ;;  %s3402_s9 = smov %s2964_s10 }
 0x17d   : > { %p9_p6 = scmp.ge.s32.totalorder %s12_s11, 4   ;;  %s3403_s10 = smov %s3405_s12 }
 0x17f   :  { %11 = sbr.rel (!%p9_p6) target bundleno = 2 (0x2), region = 71 }

// kernel: res_unet_block_forward.29
= control target key start
LH: loop header
LB: loop body
LE: loop exit
PB: predicated region body
PF: predicated region fallthrough
CT: control target
= control target key end

     0   :  { %s1502_s0 = inlined_call_operand.vmem [shape: bf16[512,128], index: 0, kind: input, shape index: {}]   ;;  %s1503_s1 = inlined_call_operand.vmem [shape: f32[1,128], index: 1, kind: input, shape index: {}]   ;;  %s1504_s2 = inlined_call_operand.vmem [shape: f32[1,128], index: 2, kind: input, shape index: {}]   ;;  %s1505_s3 = inlined_call_operand.vmem [shape: bf16[512,128], index: 3, kind: output, shape index: {}]  }
   0x1   :  { %v803_v0 = vld [vmem:[%s1502_s0] sm:$0xff]   ;;  %v1090_v4 = vld [vmem:[%s1502_s0 + $0x8] sm:$0xff]   ;;  %v1091_v5 = vld [vmem:[%s1502_s0 + $0x10] sm:$0xff]  }
   0x2   :  { %v1178_v1 = vld [vmem:[%s1503_s1] ss:$0 sm:$0xff]  ;;  %v804_v2 = vunpack.c.l.bf16 %v803_v0  ;;  %v805_v3 = vunpack.c.h.bf16 %v803_v0  ;;  %v1092_v6 = vld [vmem:[%s1502_s0 + $0x18] sm:$0xff]   ;;  %v808_v8 = vunpack.c.l.bf16 %v1090_v4  ;;  %v809_v9 = vunpack.c.h.bf16 %v1090_v4  ;;  %v1094_v33 = vld [vmem:[%s1502_s0 + $0x28] sm:$0xff]  }
   0x3   :  { %v1192_v7 = vld [vmem:[%s1504_s2] ss:$0 sm:$0xff]  ;;  %v812_v10 = vunpack.c.l.bf16 %v1091_v5  ;;  %v813_v11 = vunpack.c.h.bf16 %v1091_v5  ;;  %v816_v14 = vunpack.c.l.bf16 %v1092_v6  ;;  %v817_v15 = vunpack.c.h.bf16 %v1092_v6  ;;  %v1095_v38 = vld [vmem:[%s1502_s0 + $0x30] sm:$0xff]   ;;  %v1096_v43 = vld [vmem:[%s1502_s0 + $0x38] sm:$0xff]  }
   0x4   :  { %v149_v12 = vmul.f32 %v804_v2, %v1178_v1  ;;  %v150_v13 = vmul.f32 %v805_v3, %v1178_v1  ;;  %v151_v16 = vmul.f32 %v808_v8, %v1178_v1  ;;  %v152_v17 = vmul.f32 %v809_v9, %v1178_v1  ;;  %v1093_v28 = vld [vmem:[%s1502_s0 + $0x20] sm:$0xff]  }
   0x5   :  { %v153_v18 = vmul.f32 %v812_v10, %v1178_v1  ;;  %v154_v19 = vmul.f32 %v813_v11, %v1178_v1  ;;  %v155_v22 = vmul.f32 %v816_v14, %v1178_v1  ;;  %v156_v23 = vmul.f32 %v817_v15, %v1178_v1  ;;  %v1097_v0 = vld [vmem:[%s1502_s0 + $0x40] sm:$0xff]   ;;  %v1098_v11 = vld [vmem:[%s1502_s0 + $0x48] sm:$0xff]  }
   0x6   :  { %v220_v20 = vadd.f32 %v1192_v7, %v149_v12  ;;  %v221_v21 = vadd.f32 %v1192_v7, %v150_v13  ;;  %v222_v24 = vadd.f32 %v1192_v7, %v151_v16  ;;  %v223_v25 = vadd.f32 %v1192_v7, %v152_v17  ;;  %v1099_v16 = vld [vmem:[%s1502_s0 + $0x50] sm:$0xff]  }
   0x7   :  { %v224_v26 = vadd.f32 %v1192_v7, %v153_v18  ;;  %v225_v27 = vadd.f32 %v1192_v7, %v154_v19  ;;  %v226_v31 = vadd.f32 %v1192_v7, %v155_v22  ;;  %v227_v32 = vadd.f32 %v1192_v7, %v156_v23 }
   0x8   :  { %v284_v29 = vmax.f32 %v220_v20, 0.0  ;;  %v285_v30 = vmax.f32 %v221_v21, 0.0  ;;  %v286_v34 = vmax.f32 %v222_v24, 0.0  ;;  %v287_v35 = vmax.f32 %v223_v25, 0.0  ;;  %v1100_v25 = vld [vmem:[%s1502_s0 + $0x58] sm:$0xff]  }
   0x9   :  { %v288_v36 = vmax.f32 %v224_v26, 0.0  ;;  %v289_v37 = vmax.f32 %v225_v27, 0.0  ;;  %v290_v40 = vmax.f32 %v226_v31, 0.0  ;;  %v291_v41 = vmax.f32 %v227_v32, 0.0 }
   0xa   :  { %v933_v39 = vpack.c.bf16 %v285_v30, %v284_v29  ;;  %v820_v42 = vunpack.c.l.bf16 %v1093_v28  ;;  %v938_v44 = vpack.c.bf16 %v287_v35, %v286_v34  ;;  %v821_v46 = vunpack.c.h.bf16 %v1093_v28 }
   0xb   :  { %v943_v45 = vpack.c.bf16 %v289_v37, %v288_v36  ;;  %v824_v47 = vunpack.c.l.bf16 %v1094_v33  ;;  %v948_v48 = vpack.c.bf16 %v291_v41, %v290_v40  ;;  %v825_v50 = vunpack.c.h.bf16 %v1094_v33 }
   0xc   :  { %934 = vst [vmem:[%s1505_s3] sm:$0xff] %v933_v39   ;;  %v157_v49 = vmul.f32 %v820_v42, %v1178_v1  ;;  %v828_v51 = vunpack.c.l.bf16 %v1095_v38  ;;  %1121 = vst [vmem:[%s1505_s3 + $0x8] sm:$0xff] %v938_v44   ;;  %v158_v52 = vmul.f32 %v821_v46, %v1178_v1  ;;  %v829_v54 = vunpack.c.h.bf16 %v1095_v38  ;;  %v1101_v38 = vld [vmem:[%s1502_s0 + $0x60] sm:$0xff]  }
   0xd   :  { %1122 = vst [vmem:[%s1505_s3 + $0x10] sm:$0xff] %v943_v45   ;;  %v159_v53 = vmul.f32 %v824_v47, %v1178_v1  ;;  %v832_v55 = vunpack.c.l.bf16 %v1096_v43  ;;  %1123 = vst [vmem:[%s1505_s3 + $0x18] sm:$0xff] %v948_v48   ;;  %v160_v57 = vmul.f32 %v825_v50, %v1178_v1  ;;  %v833_v59 = vunpack.c.h.bf16 %v1096_v43 }
   0xe   :  { %v228_v56 = vadd.f32 %v1192_v7, %v157_v49  ;;  %v161_v58 = vmul.f32 %v828_v51, %v1178_v1  ;;  %v229_v60 = vadd.f32 %v1192_v7, %v158_v52  ;;  %v162_v62 = vmul.f32 %v829_v54, %v1178_v1  ;;  %v1102_v51 = vld [vmem:[%s1502_s0 + $0x68] sm:$0xff]  }
   0xf   :  { %v230_v61 = vadd.f32 %v1192_v7, %v159_v53  ;;  %v163_v63 = vmul.f32 %v832_v55, %v1178_v1  ;;  %v231_v3 = vadd.f32 %v1192_v7, %v160_v57  ;;  %v164_v5 = vmul.f32 %v833_v59, %v1178_v1 }
  0x10   :  { %v292_v2 = vmax.f32 %v228_v56, 0.0  ;;  %v232_v4 = vadd.f32 %v1192_v7, %v161_v58  ;;  %v293_v6 = vmax.f32 %v229_v60, 0.0  ;;  %v233_v9 = vadd.f32 %v1192_v7, %v162_v62  ;;  %v1103_v60 = vld [vmem:[%s1502_s0 + $0x70] sm:$0xff]  }
  0x11   :  { %v294_v8 = vmax.f32 %v230_v61, 0.0  ;;  %v234_v10 = vadd.f32 %v1192_v7, %v163_v63  ;;  %v295_v12 = vmax.f32 %v231_v3, 0.0  ;;  %v235_v14 = vadd.f32 %v1192_v7, %v164_v5 }
  0x12   :  { %v296_v13 = vmax.f32 %v232_v4, 0.0  ;;  %v836_v15 = vunpack.c.l.bf16 %v1097_v0  ;;  %v953_v17 = vpack.c.bf16 %v293_v6, %v292_v2  ;;  %v297_v18 = vmax.f32 %v233_v9, 0.0  ;;  %v1104_v2 = vld [vmem:[%s1502_s0 + $0x78] sm:$0xff]  }
  0x13   :  { %v298_v19 = vmax.f32 %v234_v10, 0.0  ;;  %v837_v20 = vunpack.c.h.bf16 %v1097_v0  ;;  %v958_v21 = vpack.c.bf16 %v295_v12, %v294_v8  ;;  %v299_v22 = vmax.f32 %v235_v14, 0.0  ;;  %v1105_v12 = vld [vmem:[%s1502_s0 + $0x80] sm:$0xff]  }
  0x14   :  { %v165_v23 = vmul.f32 %v836_v15, %v1178_v1  ;;  %v840_v24 = vunpack.c.l.bf16 %v1098_v11  ;;  %1124 = vst [vmem:[%s1505_s3 + $0x20] sm:$0xff] %v953_v17   ;;  %v963_v26 = vpack.c.bf16 %v297_v18, %v296_v13  ;;  %v841_v28 = vunpack.c.h.bf16 %v1098_v11 }
  0x15   :  { %v166_v27 = vmul.f32 %v837_v20, %v1178_v1  ;;  %v844_v29 = vunpack.c.l.bf16 %v1099_v16  ;;  %1125 = vst [vmem:[%s1505_s3 + $0x28] sm:$0xff] %v958_v21   ;;  %v968_v30 = vpack.c.bf16 %v299_v22, %v298_v19  ;;  %v845_v33 = vunpack.c.h.bf16 %v1099_v16 }
  0x16   :  { %v236_v31 = vadd.f32 %v1192_v7, %v165_v23  ;;  %v167_v32 = vmul.f32 %v840_v24, %v1178_v1  ;;  %1126 = vst [vmem:[%s1505_s3 + $0x30] sm:$0xff] %v963_v26   ;;  %v168_v35 = vmul.f32 %v841_v28, %v1178_v1  ;;  %v848_v37 = vunpack.c.l.bf16 %v1100_v25 }
  0x17   :  { %v237_v34 = vadd.f32 %v1192_v7, %v166_v27  ;;  %v169_v36 = vmul.f32 %v844_v29, %v1178_v1  ;;  %1127 = vst [vmem:[%s1505_s3 + $0x38] sm:$0xff] %v968_v30   ;;  %v170_v41 = vmul.f32 %v845_v33, %v1178_v1  ;;  %v849_v42 = vunpack.c.h.bf16 %v1100_v25  ;;  %v1106_v29 = vld [vmem:[%s1502_s0 + $0x88] sm:$0xff]  }
  0x18   :  { %v300_v39 = vmax.f32 %v236_v31, 0.0  ;;  %v238_v40 = vadd.f32 %v1192_v7, %v167_v32  ;;  %v239_v44 = vadd.f32 %v1192_v7, %v168_v35  ;;  %v171_v46 = vmul.f32 %v848_v37, %v1178_v1 }
  0x19   :  { %v301_v43 = vmax.f32 %v237_v34, 0.0  ;;  %v240_v45 = vadd.f32 %v1192_v7, %v169_v36  ;;  %v241_v48 = vadd.f32 %v1192_v7, %v170_v41  ;;  %v172_v49 = vmul.f32 %v849_v42, %v1178_v1  ;;  %v1107_v34 = vld [vmem:[%s1502_s0 + $0x90] sm:$0xff]  }
  0x1a   :  { %v302_v47 = vmax.f32 %v238_v40, 0.0  ;;  %v852_v50 = vunpack.c.l.bf16 %v1101_v38  ;;  %v303_v53 = vmax.f32 %v239_v44, 0.0  ;;  %v242_v55 = vadd.f32 %v1192_v7, %v171_v46 }
  0x1b   :  { %v973_v52 = vpack.c.bf16 %v301_v43, %v300_v39  ;;  %v304_v54 = vmax.f32 %v240_v45, 0.0  ;;  %v305_v56 = vmax.f32 %v241_v48, 0.0  ;;  %v243_v57 = vadd.f32 %v1192_v7, %v172_v49  ;;  %v1108_v43 = vld [vmem:[%s1502_s0 + $0x98] sm:$0xff]  }
  0x1c   :  { %v853_v58 = vunpack.c.h.bf16 %v1101_v38  ;;  %v173_v59 = vmul.f32 %v852_v50, %v1178_v1  ;;  %v978_v61 = vpack.c.bf16 %v303_v53, %v302_v47  ;;  %v306_v62 = vmax.f32 %v242_v55, 0.0 }
  0x1d   :  { %1128 = vst [vmem:[%s1505_s3 + $0x40] sm:$0xff] %v973_v52   ;;  %v856_v63 = vunpack.c.l.bf16 %v1102_v51  ;;  %v857_v0 = vunpack.c.h.bf16 %v1102_v51  ;;  %v983_v3 = vpack.c.bf16 %v305_v56, %v304_v54  ;;  %v307_v4 = vmax.f32 %v243_v57, 0.0  ;;  %v1109_v56 = vld [vmem:[%s1502_s0 + $0xa0] sm:$0xff]  }
  0x1e   :  { %v174_v5 = vmul.f32 %v853_v58, %v1178_v1  ;;  %v244_v6 = vadd.f32 %v1192_v7, %v173_v59  ;;  %1129 = vst [vmem:[%s1505_s3 + $0x48] sm:$0xff] %v978_v61   ;;  %v860_v10 = vunpack.c.l.bf16 %v1103_v60  ;;  %v861_v11 = vunpack.c.h.bf16 %v1103_v60 }
  0x1f   :  { %v175_v8 = vmul.f32 %v856_v63, %v1178_v1  ;;  %v176_v9 = vmul.f32 %v857_v0, %v1178_v1  ;;  %1130 = vst [vmem:[%s1505_s3 + $0x50] sm:$0xff] %v983_v3   ;;  %v988_v13 = vpack.c.bf16 %v307_v4, %v306_v62  ;;  %v864_v16 = vunpack.c.l.bf16 %v1104_v2 }
  0x20   :  { %v245_v14 = vadd.f32 %v1192_v7, %v174_v5  ;;  %v308_v15 = vmax.f32 %v244_v6, 0.0  ;;  %v177_v19 = vmul.f32 %v860_v10, %v1178_v1  ;;  %v178_v20 = vmul.f32 %v861_v11, %v1178_v1 }
  0x21   :  { %v246_v17 = vadd.f32 %v1192_v7, %v175_v8  ;;  %v247_v18 = vadd.f32 %v1192_v7, %v176_v9  ;;  %1131 = vst [vmem:[%s1505_s3 + $0x58] sm:$0xff] %v988_v13   ;;  %v865_v22 = vunpack.c.h.bf16 %v1104_v2  ;;  %v179_v23 = vmul.f32 %v864_v16, %v1178_v1  ;;  %v1110_v2 = vld [vmem:[%s1502_s0 + $0xa8] sm:$0xff]   ;;  %v1111_v16 = vld [vmem:[%s1502_s0 + $0xb0] sm:$0xff]  }
  0x22   :  { %v309_v21 = vmax.f32 %v245_v14, 0.0  ;;  %v868_v24 = vunpack.c.l.bf16 %v1105_v12  ;;  %v248_v27 = vadd.f32 %v1192_v7, %v177_v19  ;;  %v249_v28 = vadd.f32 %v1192_v7, %v178_v20 }
  0x23   :  { %v310_v25 = vmax.f32 %v246_v17, 0.0  ;;  %v311_v26 = vmax.f32 %v247_v18, 0.0  ;;  %v180_v31 = vmul.f32 %v865_v22, %v1178_v1  ;;  %v250_v32 = vadd.f32 %v1192_v7, %v179_v23 }
  0x24   :  { %v993_v30 = vpack.c.bf16 %v309_v21, %v308_v15  ;;  %v869_v33 = vunpack.c.h.bf16 %v1105_v12  ;;  %v312_v36 = vmax.f32 %v248_v27, 0.0  ;;  %v313_v37 = vmax.f32 %v249_v28, 0.0  ;;  %v1112_v21 = vld [vmem:[%s1502_s0 + $0xb8] sm:$0xff]  }
  0x25   :  { %v998_v35 = vpack.c.bf16 %v311_v26, %v310_v25  ;;  %v181_v38 = vmul.f32 %v868_v24, %v1178_v1  ;;  %v251_v39 = vadd.f32 %v1192_v7, %v180_v31  ;;  %v314_v40 = vmax.f32 %v250_v32, 0.0 }
  0x26   :  { %1132 = vst [vmem:[%s1505_s3 + $0x60] sm:$0xff] %v993_v30   ;;  %v182_v41 = vmul.f32 %v869_v33, %v1178_v1  ;;  %v872_v42 = vunpack.c.l.bf16 %v1106_v29  ;;  %v1003_v44 = vpack.c.bf16 %v313_v37, %v312_v36  ;;  %v873_v46 = vunpack.c.h.bf16 %v1106_v29 }
  0x27   :  { %1133 = vst [vmem:[%s1505_s3 + $0x68] sm:$0xff] %v998_v35   ;;  %v252_v45 = vadd.f32 %v1192_v7, %v181_v38  ;;  %v876_v47 = vunpack.c.l.bf16 %v1107_v34  ;;  %v315_v48 = vmax.f32 %v251_v39, 0.0  ;;  %v877_v51 = vunpack.c.h.bf16 %v1107_v34  ;;  %v1113_v34 = vld [vmem:[%s1502_s0 + $0xc0] sm:$0xff]  }
  0x28   :  { %v253_v49 = vadd.f32 %v1192_v7, %v182_v41  ;;  %v183_v50 = vmul.f32 %v872_v42, %v1178_v1  ;;  %1134 = vst [vmem:[%s1505_s3 + $0x70] sm:$0xff] %v1003_v44   ;;  %v184_v53 = vmul.f32 %v873_v46, %v1178_v1  ;;  %v880_v55 = vunpack.c.l.bf16 %v1108_v43 }
  0x29   :  { %v316_v52 = vmax.f32 %v252_v45, 0.0  ;;  %v185_v54 = vmul.f32 %v876_v47, %v1178_v1  ;;  %v1008_v57 = vpack.c.bf16 %v315_v48, %v314_v40  ;;  %v186_v60 = vmul.f32 %v877_v51, %v1178_v1  ;;  %v1114_v47 = vld [vmem:[%s1502_s0 + $0xc8] sm:$0xff]  }
  0x2a   :  { %v317_v58 = vmax.f32 %v253_v49, 0.0  ;;  %v254_v59 = vadd.f32 %v1192_v7, %v183_v50  ;;  %v255_v61 = vadd.f32 %v1192_v7, %v184_v53  ;;  %v881_v63 = vunpack.c.h.bf16 %v1108_v43 }
  0x2b   :  { %v256_v62 = vadd.f32 %v1192_v7, %v185_v54  ;;  %v187_v0 = vmul.f32 %v880_v55, %v1178_v1  ;;  %1135 = vst [vmem:[%s1505_s3 + $0x78] sm:$0xff] %v1008_v57   ;;  %v257_v5 = vadd.f32 %v1192_v7, %v186_v60  ;;  %v884_v6 = vunpack.c.l.bf16 %v1109_v56 }
  0x2c   :  { %v1013_v3 = vpack.c.bf16 %v317_v58, %v316_v52  ;;  %v318_v4 = vmax.f32 %v254_v59, 0.0  ;;  %v319_v8 = vmax.f32 %v255_v61, 0.0  ;;  %v188_v10 = vmul.f32 %v881_v63, %v1178_v1  ;;  %v1115_v52 = vld [vmem:[%s1502_s0 + $0xd0] sm:$0xff]   ;;  %v1116_v61 = vld [vmem:[%s1502_s0 + $0xd8] sm:$0xff]  }
  0x2d   :  { %v320_v9 = vmax.f32 %v256_v62, 0.0  ;;  %v258_v11 = vadd.f32 %v1192_v7, %v187_v0  ;;  %v321_v12 = vmax.f32 %v257_v5, 0.0  ;;  %v885_v13 = vunpack.c.h.bf16 %v1109_v56 }
  0x2e   :  { %1136 = vst [vmem:[%s1505_s3 + $0x80] sm:$0xff] %v1013_v3   ;;  %v189_v14 = vmul.f32 %v884_v6, %v1178_v1  ;;  %v888_v15 = vunpack.c.l.bf16 %v1110_v2  ;;  %v1018_v17 = vpack.c.bf16 %v319_v8, %v318_v4  ;;  %v259_v18 = vadd.f32 %v1192_v7, %v188_v10 }
  0x2f   :  { %v322_v19 = vmax.f32 %v258_v11, 0.0  ;;  %v889_v20 = vunpack.c.h.bf16 %v1110_v2  ;;  %v1023_v22 = vpack.c.bf16 %v321_v12, %v320_v9  ;;  %v190_v23 = vmul.f32 %v885_v13, %v1178_v1  ;;  %v1117_v12 = vld [vmem:[%s1502_s0 + $0xe0] sm:$0xff]  }
  0x30   :  { %v260_v24 = vadd.f32 %v1192_v7, %v189_v14  ;;  %v191_v25 = vmul.f32 %v888_v15, %v1178_v1  ;;  %1137 = vst [vmem:[%s1505_s3 + $0x88] sm:$0xff] %v1018_v17   ;;  %v323_v26 = vmax.f32 %v259_v18, 0.0  ;;  %v892_v28 = vunpack.c.l.bf16 %v1111_v16 }
  0x31   :  { %v192_v27 = vmul.f32 %v889_v20, %v1178_v1  ;;  %v893_v29 = vunpack.c.h.bf16 %v1111_v16  ;;  %1138 = vst [vmem:[%s1505_s3 + $0x90] sm:$0xff] %v1023_v22   ;;  %v261_v30 = vadd.f32 %v1192_v7, %v190_v23  ;;  %v896_v33 = vunpack.c.l.bf16 %v1112_v21 }
  0x32   :  { %v324_v31 = vmax.f32 %v260_v24, 0.0  ;;  %v262_v32 = vadd.f32 %v1192_v7, %v191_v25  ;;  %v1028_v35 = vpack.c.bf16 %v323_v26, %v322_v19  ;;  %v193_v37 = vmul.f32 %v892_v28, %v1178_v1 }
  0x33   :  { %v263_v36 = vadd.f32 %v1192_v7, %v192_v27  ;;  %v194_v38 = vmul.f32 %v893_v29, %v1178_v1  ;;  %v325_v39 = vmax.f32 %v261_v30, 0.0  ;;  %v897_v41 = vunpack.c.h.bf16 %v1112_v21  ;;  %v1118_v21 = vld [vmem:[%s1502_s0 + $0xe8] sm:$0xff]  }
  0x34   :  { %v326_v40 = vmax.f32 %v262_v32, 0.0  ;;  %v195_v42 = vmul.f32 %v896_v33, %v1178_v1  ;;  %1139 = vst [vmem:[%s1505_s3 + $0x98] sm:$0xff] %v1028_v35   ;;  %v264_v44 = vadd.f32 %v1192_v7, %v193_v37  ;;  %v900_v46 = vunpack.c.l.bf16 %v1113_v34 }
  0x35   :  { %v327_v43 = vmax.f32 %v263_v36, 0.0  ;;  %v265_v45 = vadd.f32 %v1192_v7, %v194_v38  ;;  %v1033_v48 = vpack.c.bf16 %v325_v39, %v324_v31  ;;  %v196_v49 = vmul.f32 %v897_v41, %v1178_v1  ;;  %v1120_v39 = vld [vmem:[%s1502_s0 + $0xf8] sm:$0xff]  }
  0x36   :  { %v266_v50 = vadd.f32 %v1192_v7, %v195_v42  ;;  %v901_v51 = vunpack.c.h.bf16 %v1113_v34  ;;  %v328_v54 = vmax.f32 %v264_v44, 0.0  ;;  %v197_v56 = vmul.f32 %v900_v46, %v1178_v1  ;;  %v1119_v34 = vld [vmem:[%s1502_s0 + $0xf0] sm:$0xff]  }
  0x37   :  { %v1038_v53 = vpack.c.bf16 %v327_v43, %v326_v40  ;;  %v329_v55 = vmax.f32 %v265_v45, 0.0  ;;  %1140 = vst [vmem:[%s1505_s3 + $0xa0] sm:$0xff] %v1033_v48   ;;  %v267_v57 = vadd.f32 %v1192_v7, %v196_v49  ;;  %v904_v60 = vunpack.c.l.bf16 %v1114_v47 }
  0x38   :  { %v330_v58 = vmax.f32 %v266_v50, 0.0  ;;  %v198_v59 = vmul.f32 %v901_v51, %v1178_v1  ;;  %v268_v63 = vadd.f32 %v1192_v7, %v197_v56  ;;  %v905_v0 = vunpack.c.h.bf16 %v1114_v47 }
  0x39   :  { %1141 = vst [vmem:[%s1505_s3 + $0xa8] sm:$0xff] %v1038_v53   ;;  %v1043_v62 = vpack.c.bf16 %v329_v55, %v328_v54  ;;  %v908_v2 = vunpack.c.l.bf16 %v1115_v52  ;;  %v331_v3 = vmax.f32 %v267_v57, 0.0  ;;  %v199_v5 = vmul.f32 %v904_v60, %v1178_v1 }
  0x3a   :  { %v269_v4 = vadd.f32 %v1192_v7, %v198_v59  ;;  %v909_v6 = vunpack.c.h.bf16 %v1115_v52  ;;  %v332_v8 = vmax.f32 %v268_v63, 0.0  ;;  %v200_v9 = vmul.f32 %v905_v0, %v1178_v1 }
  0x3b   :  { %1142 = vst [vmem:[%s1505_s3 + $0xb0] sm:$0xff] %v1043_v62   ;;  %v201_v10 = vmul.f32 %v908_v2, %v1178_v1  ;;  %v912_v11 = vunpack.c.l.bf16 %v1116_v61  ;;  %v1048_v13 = vpack.c.bf16 %v331_v3, %v330_v58  ;;  %v270_v15 = vadd.f32 %v1192_v7, %v199_v5 }
  0x3c   :  { %v333_v14 = vmax.f32 %v269_v4, 0.0  ;;  %v202_v16 = vmul.f32 %v909_v6, %v1178_v1  ;;  %v271_v17 = vadd.f32 %v1192_v7, %v200_v9  ;;  %v913_v19 = vunpack.c.h.bf16 %v1116_v61 }
  0x3d   :  { %v272_v18 = vadd.f32 %v1192_v7, %v201_v10  ;;  %v203_v20 = vmul.f32 %v912_v11, %v1178_v1  ;;  %1143 = vst [vmem:[%s1505_s3 + $0xb8] sm:$0xff] %v1048_v13   ;;  %v334_v23 = vmax.f32 %v270_v15, 0.0  ;;  %v916_v25 = vunpack.c.l.bf16 %v1117_v12 }
  0x3e   :  { %v1053_v22 = vpack.c.bf16 %v333_v14, %v332_v8  ;;  %v273_v24 = vadd.f32 %v1192_v7, %v202_v16  ;;  %v335_v26 = vmax.f32 %v271_v17, 0.0  ;;  %v204_v28 = vmul.f32 %v913_v19, %v1178_v1 }
  0x3f   :  { %v336_v27 = vmax.f32 %v272_v18, 0.0  ;;  %v274_v29 = vadd.f32 %v1192_v7, %v203_v20  ;;  %v917_v31 = vunpack.c.h.bf16 %v1117_v12  ;;  %v205_v32 = vmul.f32 %v916_v25, %v1178_v1 }
  0x40   :  { %1144 = vst [vmem:[%s1505_s3 + $0xc0] sm:$0xff] %v1053_v22   ;;  %v337_v30 = vmax.f32 %v273_v24, 0.0  ;;  %v920_v33 = vunpack.c.l.bf16 %v1118_v21  ;;  %v1058_v35 = vpack.c.bf16 %v335_v26, %v334_v23  ;;  %v275_v36 = vadd.f32 %v1192_v7, %v204_v28 }
  0x41   :  { %v338_v37 = vmax.f32 %v274_v29, 0.0  ;;  %v921_v38 = vunpack.c.h.bf16 %v1118_v21  ;;  %v206_v41 = vmul.f32 %v917_v31, %v1178_v1  ;;  %v276_v42 = vadd.f32 %v1192_v7, %v205_v32 }
  0x42   :  { %v1063_v40 = vpack.c.bf16 %v337_v30, %v336_v27  ;;  %v207_v43 = vmul.f32 %v920_v33, %v1178_v1  ;;  %1145 = vst [vmem:[%s1505_s3 + $0xc8] sm:$0xff] %v1058_v35   ;;  %v339_v44 = vmax.f32 %v275_v36, 0.0  ;;  %v924_v46 = vunpack.c.l.bf16 %v1119_v34 }
  0x43   :  { %v208_v45 = vmul.f32 %v921_v38, %v1178_v1  ;;  %v925_v47 = vunpack.c.h.bf16 %v1119_v34  ;;  %v277_v48 = vadd.f32 %v1192_v7, %v206_v41  ;;  %v340_v49 = vmax.f32 %v276_v42, 0.0 }
  0x44   :  { %1146 = vst [vmem:[%s1505_s3 + $0xd0] sm:$0xff] %v1063_v40   ;;  %v278_v50 = vadd.f32 %v1192_v7, %v207_v43  ;;  %v928_v51 = vunpack.c.l.bf16 %v1120_v39  ;;  %v1068_v52 = vpack.c.bf16 %v339_v44, %v338_v37  ;;  %v209_v54 = vmul.f32 %v924_v46, %v1178_v1 }
  0x45   :  { %v279_v53 = vadd.f32 %v1192_v7, %v208_v45  ;;  %v210_v55 = vmul.f32 %v925_v47, %v1178_v1  ;;  %v341_v56 = vmax.f32 %v277_v48, 0.0  ;;  %v929_v58 = vunpack.c.h.bf16 %v1120_v39 }
  0x46   :  { %v342_v57 = vmax.f32 %v278_v50, 0.0  ;;  %v211_v59 = vmul.f32 %v928_v51, %v1178_v1  ;;  %1147 = vst [vmem:[%s1505_s3 + $0xd8] sm:$0xff] %v1068_v52   ;;  %v280_v61 = vadd.f32 %v1192_v7, %v209_v54 }
  0x47   :  { %v343_v60 = vmax.f32 %v279_v53, 0.0  ;;  %v281_v62 = vadd.f32 %v1192_v7, %v210_v55  ;;  %v1073_v63 = vpack.c.bf16 %v341_v56, %v340_v49  ;;  %v212_v0 = vmul.f32 %v929_v58, %v1178_v1 }
  0x48   :  { %v282_v2 = vadd.f32 %v1192_v7, %v211_v59  ;;  %v344_v4 = vmax.f32 %v280_v61, 0.0 }
  0x49   :  { %v1078_v3 = vpack.c.bf16 %v343_v60, %v342_v57  ;;  %v345_v5 = vmax.f32 %v281_v62, 0.0  ;;  %1148 = vst [vmem:[%s1505_s3 + $0xe0] sm:$0xff] %v1073_v63   ;;  %v283_v6 = vadd.f32 %v1192_v7, %v212_v0 }
  0x4a   :  { %v346_v8 = vmax.f32 %v282_v2, 0.0 }
  0x4b   :  { %1149 = vst [vmem:[%s1505_s3 + $0xe8] sm:$0xff] %v1078_v3   ;;  %v1083_v9 = vpack.c.bf16 %v345_v5, %v344_v4  ;;  %v347_v10 = vmax.f32 %v283_v6, 0.0 }
  0x4d   :  { %1150 = vst [vmem:[%s1505_s3 + $0xf0] sm:$0xff] %v1083_v9   ;;  %v1088_v1 = vpack.c.bf16 %v347_v10, %v346_v8 }
  0x4f   :  { %1151 = vst [vmem:[%s1505_s3 + $0xf8] sm:$0xff] %v1088_v1  }

// kernel: res_unet_block_forward.33
= control target key start
LH: loop header
LB: loop body
LE: loop exit
PB: predicated region body
PF: predicated region fallthrough
CT: control target
= control target key end

     0   :  { %s1957_s0 = inlined_call_operand.vmem [shape: bf16[512,128], index: 0, kind: input, shape index: {}]   ;;  %s1958_s1 = inlined_call_operand.vmem [shape: f32[1,128], index: 1, kind: input, shape index: {}]   ;;  %s1959_s2 = inlined_call_operand.vmem [shape: f32[1,128], index: 2, kind: input, shape index: {}]   ;;  %s1960_s3 = inlined_call_operand.vmem [shape: bf16[512,128], index: 3, kind: input, shape index: {}]   ;;  %s1961_s4 = inlined_call_operand.vmem [shape: bf16[512,128], index: 4, kind: output, shape index: {}]  }
   0x1   :  { %v998_v0 = vld [vmem:[%s1957_s0] sm:$0xff]   ;;  %v1413_v5 = vld [vmem:[%s1957_s0 + $0x8] sm:$0xff]   ;;  %v1414_v12 = vld [vmem:[%s1957_s0 + $0x10] sm:$0xff]  }
   0x2   :  { %v1537_v1 = vld [vmem:[%s1958_s1] ss:$0 sm:$0xff]  ;;  %v999_v2 = vunpack.c.l.bf16 %v998_v0  ;;  %v1000_v3 = vunpack.c.h.bf16 %v998_v0  ;;  %v1444_v6 = vld [vmem:[%s1960_s3 + $0x8] sm:$0xff]   ;;  %v1003_v10 = vunpack.c.l.bf16 %v1413_v5  ;;  %v1004_v11 = vunpack.c.h.bf16 %v1413_v5  ;;  %v1445_v13 = vld [vmem:[%s1960_s3 + $0x10] sm:$0xff]  }
   0x3   :  { %v1126_v4 = vld [vmem:[%s1960_s3] sm:$0xff]   ;;  %v1131_v16 = vunpack.c.l.bf16 %v1444_v6  ;;  %v1132_v17 = vunpack.c.h.bf16 %v1444_v6  ;;  %v1007_v20 = vunpack.c.l.bf16 %v1414_v12  ;;  %v1008_v21 = vunpack.c.h.bf16 %v1414_v12  ;;  %v1415_v22 = vld [vmem:[%s1957_s0 + $0x18] sm:$0xff]   ;;  %v1417_v54 = vld [vmem:[%s1957_s0 + $0x28] sm:$0xff]  }
   0x4   :  { %v1551_v7 = vld [vmem:[%s1959_s2] ss:$0 sm:$0xff]  ;;  %v1127_v8 = vunpack.c.l.bf16 %v1126_v4  ;;  %v1128_v9 = vunpack.c.h.bf16 %v1126_v4  ;;  %v152_v14 = vmul.f32 %v999_v2, %v1537_v1  ;;  %v153_v15 = vmul.f32 %v1000_v3, %v1537_v1  ;;  %v1446_v39 = vld [vmem:[%s1960_s3 + $0x18] sm:$0xff]   ;;  %v1448_v63 = vld [vmem:[%s1960_s3 + $0x28] sm:$0xff]  }
   0x5   :  { %v154_v18 = vmul.f32 %v1003_v10, %v1537_v1  ;;  %v155_v19 = vmul.f32 %v1004_v11, %v1537_v1  ;;  %v1135_v25 = vunpack.c.l.bf16 %v1445_v13  ;;  %v1136_v26 = vunpack.c.h.bf16 %v1445_v13  ;;  %v1416_v48 = vld [vmem:[%s1957_s0 + $0x20] sm:$0xff]   ;;  %v1418_v5 = vld [vmem:[%s1957_s0 + $0x30] sm:$0xff]  }
   0x6   :  { %v223_v23 = vadd.f32 %v1551_v7, %v152_v14  ;;  %v224_v24 = vadd.f32 %v1551_v7, %v153_v15  ;;  %v156_v29 = vmul.f32 %v1007_v20, %v1537_v1  ;;  %v157_v30 = vmul.f32 %v1008_v21, %v1537_v1  ;;  %v1447_v49 = vld [vmem:[%s1960_s3 + $0x20] sm:$0xff]   ;;  %v1449_v11 = vld [vmem:[%s1960_s3 + $0x30] sm:$0xff]   ;;  %v1419_v20 = vld [vmem:[%s1957_s0 + $0x38] sm:$0xff]  }
   0x7   :  { %v225_v27 = vadd.f32 %v1551_v7, %v154_v18  ;;  %v226_v28 = vadd.f32 %v1551_v7, %v155_v19  ;;  %v1011_v33 = vunpack.c.l.bf16 %v1415_v22  ;;  %v1012_v34 = vunpack.c.h.bf16 %v1415_v22 }
   0x8   :  { %v415_v31 = vadd.f32 %v1127_v8, %v223_v23  ;;  %v416_v32 = vadd.f32 %v1128_v9, %v224_v24  ;;  %v227_v37 = vadd.f32 %v1551_v7, %v156_v29  ;;  %v228_v38 = vadd.f32 %v1551_v7, %v157_v30 }
   0x9   :  { %v417_v35 = vadd.f32 %v1131_v16, %v225_v27  ;;  %v418_v36 = vadd.f32 %v1132_v17, %v226_v28  ;;  %v158_v42 = vmul.f32 %v1011_v33, %v1537_v1  ;;  %v159_v43 = vmul.f32 %v1012_v34, %v1537_v1  ;;  %v1450_v33 = vld [vmem:[%s1960_s3 + $0x38] sm:$0xff]  }
   0xa   :  { %v479_v40 = vmax.f32 %v415_v31, 0.0  ;;  %v480_v41 = vmax.f32 %v416_v32, 0.0  ;;  %v419_v46 = vadd.f32 %v1135_v25, %v227_v37  ;;  %v420_v47 = vadd.f32 %v1136_v26, %v228_v38 }
   0xb   :  { %v481_v44 = vmax.f32 %v417_v35, 0.0  ;;  %v482_v45 = vmax.f32 %v418_v36, 0.0  ;;  %v229_v51 = vadd.f32 %v1551_v7, %v158_v42  ;;  %v230_v52 = vadd.f32 %v1551_v7, %v159_v43  ;;  %v1420_v42 = vld [vmem:[%s1957_s0 + $0x40] sm:$0xff]  }
   0xc   :  { %v1256_v50 = vpack.c.bf16 %v480_v41, %v479_v40  ;;  %v1139_v53 = vunpack.c.l.bf16 %v1446_v39  ;;  %v483_v56 = vmax.f32 %v419_v46, 0.0  ;;  %v484_v57 = vmax.f32 %v420_v47, 0.0  ;;  %v1451_v47 = vld [vmem:[%s1960_s3 + $0x40] sm:$0xff]  }
   0xd   :  { %v1261_v55 = vpack.c.bf16 %v482_v45, %v481_v44  ;;  %v1140_v58 = vunpack.c.h.bf16 %v1446_v39  ;;  %v1015_v60 = vunpack.c.l.bf16 %v1416_v48  ;;  %v1016_v61 = vunpack.c.h.bf16 %v1416_v48 }
   0xe   :  { %1257 = vst [vmem:[%s1961_s4] sm:$0xff] %v1256_v50   ;;  %v421_v59 = vadd.f32 %v1139_v53, %v229_v51  ;;  %v1143_v62 = vunpack.c.l.bf16 %v1447_v49  ;;  %v1266_v0 = vpack.c.bf16 %v484_v57, %v483_v56  ;;  %v1144_v3 = vunpack.c.h.bf16 %v1447_v49 }
   0xf   :  { %1475 = vst [vmem:[%s1961_s4 + $0x8] sm:$0xff] %v1261_v55   ;;  %v422_v2 = vadd.f32 %v1140_v58, %v230_v52  ;;  %v1019_v4 = vunpack.c.l.bf16 %v1417_v54  ;;  %v160_v8 = vmul.f32 %v1015_v60, %v1537_v1  ;;  %v161_v9 = vmul.f32 %v1016_v61, %v1537_v1  ;;  %v1421_v52 = vld [vmem:[%s1957_s0 + $0x48] sm:$0xff]  }
  0x10   :  { %v485_v6 = vmax.f32 %v421_v59, 0.0  ;;  %v1020_v10 = vunpack.c.h.bf16 %v1417_v54  ;;  %1476 = vst [vmem:[%s1961_s4 + $0x10] sm:$0xff] %v1266_v0   ;;  %v1147_v14 = vunpack.c.l.bf16 %v1448_v63  ;;  %v1148_v15 = vunpack.c.h.bf16 %v1448_v63  ;;  %v1452_v61 = vld [vmem:[%s1960_s3 + $0x48] sm:$0xff]  }
  0x11   :  { %v486_v12 = vmax.f32 %v422_v2, 0.0  ;;  %v162_v13 = vmul.f32 %v1019_v4, %v1537_v1  ;;  %v231_v16 = vadd.f32 %v1551_v7, %v160_v8  ;;  %v232_v17 = vadd.f32 %v1551_v7, %v161_v9 }
  0x12   :  { %v163_v18 = vmul.f32 %v1020_v10, %v1537_v1  ;;  %v1023_v19 = vunpack.c.l.bf16 %v1418_v5  ;;  %v1024_v23 = vunpack.c.h.bf16 %v1418_v5  ;;  %v1151_v24 = vunpack.c.l.bf16 %v1449_v11 }
  0x13   :  { %v1271_v21 = vpack.c.bf16 %v486_v12, %v485_v6  ;;  %v233_v22 = vadd.f32 %v1551_v7, %v162_v13  ;;  %v423_v25 = vadd.f32 %v1143_v62, %v231_v16  ;;  %v424_v26 = vadd.f32 %v1144_v3, %v232_v17  ;;  %v1422_v3 = vld [vmem:[%s1957_s0 + $0x50] sm:$0xff]  }
  0x14   :  { %v234_v27 = vadd.f32 %v1551_v7, %v163_v18  ;;  %v164_v28 = vmul.f32 %v1023_v19, %v1537_v1  ;;  %v165_v30 = vmul.f32 %v1024_v23, %v1537_v1  ;;  %v1152_v31 = vunpack.c.h.bf16 %v1449_v11  ;;  %v1453_v13 = vld [vmem:[%s1960_s3 + $0x50] sm:$0xff]  }
  0x15   :  { %1477 = vst [vmem:[%s1961_s4 + $0x18] sm:$0xff] %v1271_v21   ;;  %v425_v29 = vadd.f32 %v1147_v14, %v233_v22  ;;  %v1027_v32 = vunpack.c.l.bf16 %v1419_v20  ;;  %v487_v34 = vmax.f32 %v423_v25, 0.0  ;;  %v488_v35 = vmax.f32 %v424_v26, 0.0  ;;  %v1423_v22 = vld [vmem:[%s1957_s0 + $0x58] sm:$0xff]  }
  0x16   :  { %v426_v36 = vadd.f32 %v1148_v15, %v234_v27  ;;  %v235_v37 = vadd.f32 %v1551_v7, %v164_v28  ;;  %v236_v39 = vadd.f32 %v1551_v7, %v165_v30  ;;  %v1028_v40 = vunpack.c.h.bf16 %v1419_v20 }
  0x17   :  { %v489_v38 = vmax.f32 %v425_v29, 0.0  ;;  %v166_v41 = vmul.f32 %v1027_v32, %v1537_v1  ;;  %v1276_v43 = vpack.c.bf16 %v488_v35, %v487_v34  ;;  %v1155_v46 = vunpack.c.l.bf16 %v1450_v33 }
  0x18   :  { %v490_v44 = vmax.f32 %v426_v36, 0.0  ;;  %v427_v45 = vadd.f32 %v1151_v24, %v235_v37  ;;  %v428_v48 = vadd.f32 %v1152_v31, %v236_v39  ;;  %v167_v49 = vmul.f32 %v1028_v40, %v1537_v1  ;;  %v1454_v31 = vld [vmem:[%s1960_s3 + $0x58] sm:$0xff]   ;;  %v1424_v36 = vld [vmem:[%s1957_s0 + $0x60] sm:$0xff]  }
  0x19   :  { %v237_v50 = vadd.f32 %v1551_v7, %v166_v41  ;;  %v1156_v51 = vunpack.c.h.bf16 %v1450_v33  ;;  %1478 = vst [vmem:[%s1961_s4 + $0x20] sm:$0xff] %v1276_v43   ;;  %v1031_v55 = vunpack.c.l.bf16 %v1420_v42  ;;  %v1032_v56 = vunpack.c.h.bf16 %v1420_v42 }
  0x1a   :  { %v1281_v53 = vpack.c.bf16 %v490_v44, %v489_v38  ;;  %v491_v54 = vmax.f32 %v427_v45, 0.0  ;;  %v492_v57 = vmax.f32 %v428_v48, 0.0  ;;  %v238_v58 = vadd.f32 %v1551_v7, %v167_v49  ;;  %v1455_v45 = vld [vmem:[%s1960_s3 + $0x60] sm:$0xff]  }
  0x1b   :  { %v429_v59 = vadd.f32 %v1155_v46, %v237_v50  ;;  %v1159_v60 = vunpack.c.l.bf16 %v1451_v47  ;;  %v168_v62 = vmul.f32 %v1031_v55, %v1537_v1  ;;  %v169_v63 = vmul.f32 %v1032_v56, %v1537_v1  ;;  %v1425_v50 = vld [vmem:[%s1957_s0 + $0x68] sm:$0xff]  }
  0x1c   :  { %1479 = vst [vmem:[%s1961_s4 + $0x28] sm:$0xff] %v1281_v53   ;;  %v1160_v0 = vunpack.c.h.bf16 %v1451_v47  ;;  %v1035_v2 = vunpack.c.l.bf16 %v1421_v52  ;;  %v1286_v4 = vpack.c.bf16 %v492_v57, %v491_v54  ;;  %v430_v5 = vadd.f32 %v1156_v51, %v238_v58 }
  0x1d   :  { %v493_v6 = vmax.f32 %v429_v59, 0.0  ;;  %v1036_v8 = vunpack.c.h.bf16 %v1421_v52  ;;  %v239_v9 = vadd.f32 %v1551_v7, %v168_v62  ;;  %v240_v10 = vadd.f32 %v1551_v7, %v169_v63  ;;  %v1456_v59 = vld [vmem:[%s1960_s3 + $0x68] sm:$0xff]  }
  0x1e   :  { %v170_v11 = vmul.f32 %v1035_v2, %v1537_v1  ;;  %v1163_v12 = vunpack.c.l.bf16 %v1452_v61  ;;  %1480 = vst [vmem:[%s1961_s4 + $0x30] sm:$0xff] %v1286_v4   ;;  %v494_v14 = vmax.f32 %v430_v5, 0.0  ;;  %v1164_v16 = vunpack.c.h.bf16 %v1452_v61  ;;  %v1426_v5 = vld [vmem:[%s1957_s0 + $0x70] sm:$0xff]  }
  0x1f   :  { %v171_v15 = vmul.f32 %v1036_v8, %v1537_v1  ;;  %v1039_v17 = vunpack.c.l.bf16 %v1422_v3  ;;  %v431_v18 = vadd.f32 %v1159_v60, %v239_v9  ;;  %v432_v19 = vadd.f32 %v1160_v0, %v240_v10 }
  0x20   :  { %v241_v20 = vadd.f32 %v1551_v7, %v170_v11  ;;  %v1040_v21 = vunpack.c.h.bf16 %v1422_v3  ;;  %v1291_v23 = vpack.c.bf16 %v494_v14, %v493_v6  ;;  %v1167_v26 = vunpack.c.l.bf16 %v1453_v13  ;;  %v1457_v11 = vld [vmem:[%s1960_s3 + $0x70] sm:$0xff]  }
  0x21   :  { %v242_v24 = vadd.f32 %v1551_v7, %v171_v15  ;;  %v172_v25 = vmul.f32 %v1039_v17, %v1537_v1  ;;  %v495_v27 = vmax.f32 %v431_v18, 0.0  ;;  %v496_v28 = vmax.f32 %v432_v19, 0.0 }
  0x22   :  { %v433_v29 = vadd.f32 %v1163_v12, %v241_v20  ;;  %v173_v30 = vmul.f32 %v1040_v21, %v1537_v1  ;;  %1481 = vst [vmem:[%s1961_s4 + $0x38] sm:$0xff] %v1291_v23   ;;  %v1168_v34 = vunpack.c.h.bf16 %v1453_v13  ;;  %v1043_v35 = vunpack.c.l.bf16 %v1423_v22  ;;  %v1427_v20 = vld [vmem:[%s1957_s0 + $0x78] sm:$0xff]  }
  0x23   :  { %v434_v32 = vadd.f32 %v1164_v16, %v242_v24  ;;  %v243_v33 = vadd.f32 %v1551_v7, %v172_v25  ;;  %v1296_v37 = vpack.c.bf16 %v496_v28, %v495_v27  ;;  %v1044_v40 = vunpack.c.h.bf16 %v1423_v22 }
  0x24   :  { %v497_v38 = vmax.f32 %v433_v29, 0.0  ;;  %v244_v39 = vadd.f32 %v1551_v7, %v173_v30  ;;  %v174_v43 = vmul.f32 %v1043_v35, %v1537_v1  ;;  %v1171_v44 = vunpack.c.l.bf16 %v1454_v31  ;;  %v1458_v29 = vld [vmem:[%s1960_s3 + $0x78] sm:$0xff]  }
  0x25   :  { %v498_v41 = vmax.f32 %v434_v32, 0.0  ;;  %v435_v42 = vadd.f32 %v1167_v26, %v243_v33  ;;  %1482 = vst [vmem:[%s1961_s4 + $0x40] sm:$0xff] %v1296_v37   ;;  %v175_v47 = vmul.f32 %v1044_v40, %v1537_v1  ;;  %v1172_v48 = vunpack.c.h.bf16 %v1454_v31 }
  0x26   :  { %v436_v46 = vadd.f32 %v1168_v34, %v244_v39  ;;  %v1047_v49 = vunpack.c.l.bf16 %v1424_v36  ;;  %v245_v53 = vadd.f32 %v1551_v7, %v174_v43  ;;  %v1048_v54 = vunpack.c.h.bf16 %v1424_v36  ;;  %v1428_v34 = vld [vmem:[%s1957_s0 + $0x80] sm:$0xff]  }
  0x27   :  { %v1301_v51 = vpack.c.bf16 %v498_v41, %v497_v38  ;;  %v499_v52 = vmax.f32 %v435_v42, 0.0  ;;  %v246_v56 = vadd.f32 %v1551_v7, %v175_v47  ;;  %v1175_v58 = vunpack.c.l.bf16 %v1455_v45  ;;  %v1459_v43 = vld [vmem:[%s1960_s3 + $0x80] sm:$0xff]  }
  0x28   :  { %v500_v55 = vmax.f32 %v436_v46, 0.0  ;;  %v176_v57 = vmul.f32 %v1047_v49, %v1537_v1  ;;  %v437_v60 = vadd.f32 %v1171_v44, %v245_v53  ;;  %v177_v61 = vmul.f32 %v1048_v54, %v1537_v1 }
  0x29   :  { %1483 = vst [vmem:[%s1961_s4 + $0x48] sm:$0xff] %v1301_v51   ;;  %v1176_v62 = vunpack.c.h.bf16 %v1455_v45  ;;  %v1051_v63 = vunpack.c.l.bf16 %v1425_v50  ;;  %v438_v2 = vadd.f32 %v1172_v48, %v246_v56  ;;  %v1052_v4 = vunpack.c.h.bf16 %v1425_v50 }
  0x2a   :  { %v1306_v0 = vpack.c.bf16 %v500_v55, %v499_v52  ;;  %v247_v3 = vadd.f32 %v1551_v7, %v176_v57  ;;  %v501_v6 = vmax.f32 %v437_v60, 0.0  ;;  %v248_v8 = vadd.f32 %v1551_v7, %v177_v61  ;;  %v1429_v52 = vld [vmem:[%s1957_s0 + $0x88] sm:$0xff]  }
  0x2b   :  { %v178_v9 = vmul.f32 %v1051_v63, %v1537_v1  ;;  %v1179_v10 = vunpack.c.l.bf16 %v1456_v59  ;;  %v502_v12 = vmax.f32 %v438_v2, 0.0  ;;  %v179_v14 = vmul.f32 %v1052_v4, %v1537_v1  ;;  %v1460_v57 = vld [vmem:[%s1960_s3 + $0x88] sm:$0xff]  }
  0x2c   :  { %1484 = vst [vmem:[%s1961_s4 + $0x50] sm:$0xff] %v1306_v0   ;;  %v439_v13 = vadd.f32 %v1175_v58, %v247_v3  ;;  %v1180_v15 = vunpack.c.h.bf16 %v1456_v59  ;;  %v440_v16 = vadd.f32 %v1176_v62, %v248_v8  ;;  %v1055_v18 = vunpack.c.l.bf16 %v1426_v5  ;;  %v1430_v3 = vld [vmem:[%s1957_s0 + $0x90] sm:$0xff]  }
  0x2d   :  { %v249_v17 = vadd.f32 %v1551_v7, %v178_v9  ;;  %v1056_v19 = vunpack.c.h.bf16 %v1426_v5  ;;  %v1311_v21 = vpack.c.bf16 %v502_v12, %v501_v6  ;;  %v250_v23 = vadd.f32 %v1551_v7, %v179_v14  ;;  %v1461_v9 = vld [vmem:[%s1960_s3 + $0x90] sm:$0xff]  }
  0x2e   :  { %v503_v22 = vmax.f32 %v439_v13, 0.0  ;;  %v1183_v24 = vunpack.c.l.bf16 %v1457_v11  ;;  %v504_v25 = vmax.f32 %v440_v16, 0.0  ;;  %v180_v27 = vmul.f32 %v1055_v18, %v1537_v1  ;;  %v1431_v18 = vld [vmem:[%s1957_s0 + $0x98] sm:$0xff]  }
  0x2f   :  { %v441_v26 = vadd.f32 %v1179_v10, %v249_v17  ;;  %v181_v28 = vmul.f32 %v1056_v19, %v1537_v1  ;;  %1485 = vst [vmem:[%s1961_s4 + $0x58] sm:$0xff] %v1311_v21   ;;  %v442_v30 = vadd.f32 %v1180_v15, %v250_v23  ;;  %v1184_v31 = vunpack.c.h.bf16 %v1457_v11  ;;  %v1462_v23 = vld [vmem:[%s1960_s3 + $0x98] sm:$0xff]  }
  0x30   :  { %v1059_v32 = vunpack.c.l.bf16 %v1427_v20  ;;  %v1060_v33 = vunpack.c.h.bf16 %v1427_v20  ;;  %v1316_v35 = vpack.c.bf16 %v504_v25, %v503_v22  ;;  %v251_v37 = vadd.f32 %v1551_v7, %v180_v27 }
  0x31   :  { %v505_v36 = vmax.f32 %v441_v26, 0.0  ;;  %v252_v38 = vadd.f32 %v1551_v7, %v181_v28  ;;  %v506_v39 = vmax.f32 %v442_v30, 0.0  ;;  %v1187_v42 = vunpack.c.l.bf16 %v1458_v29 }
  0x32   :  { %v182_v40 = vmul.f32 %v1059_v32, %v1537_v1  ;;  %v183_v41 = vmul.f32 %v1060_v33, %v1537_v1  ;;  %1486 = vst [vmem:[%s1961_s4 + $0x60] sm:$0xff] %v1316_v35   ;;  %v443_v44 = vadd.f32 %v1183_v24, %v251_v37  ;;  %v1188_v46 = vunpack.c.h.bf16 %v1458_v29  ;;  %v1432_v32 = vld [vmem:[%s1957_s0 + $0xa0] sm:$0xff]  }
  0x33   :  { %v444_v45 = vadd.f32 %v1184_v31, %v252_v38  ;;  %v1063_v47 = vunpack.c.l.bf16 %v1428_v34  ;;  %v1321_v48 = vpack.c.bf16 %v506_v39, %v505_v36  ;;  %v1064_v51 = vunpack.c.h.bf16 %v1428_v34 }
  0x34   :  { %v253_v49 = vadd.f32 %v1551_v7, %v182_v40  ;;  %v254_v50 = vadd.f32 %v1551_v7, %v183_v41  ;;  %v507_v53 = vmax.f32 %v443_v44, 0.0  ;;  %v1191_v56 = vunpack.c.l.bf16 %v1459_v43  ;;  %v1463_v41 = vld [vmem:[%s1960_s3 + $0xa0] sm:$0xff]  }
  0x35   :  { %v508_v54 = vmax.f32 %v444_v45, 0.0  ;;  %v184_v55 = vmul.f32 %v1063_v47, %v1537_v1  ;;  %1487 = vst [vmem:[%s1961_s4 + $0x68] sm:$0xff] %v1321_v48   ;;  %v185_v60 = vmul.f32 %v1064_v51, %v1537_v1  ;;  %v1192_v61 = vunpack.c.h.bf16 %v1459_v43 }
  0x36   :  { %v445_v58 = vadd.f32 %v1187_v42, %v253_v49  ;;  %v446_v59 = vadd.f32 %v1188_v46, %v254_v50  ;;  %v1067_v0 = vunpack.c.l.bf16 %v1429_v52  ;;  %v1068_v2 = vunpack.c.h.bf16 %v1429_v52  ;;  %v1433_v50 = vld [vmem:[%s1957_s0 + $0xa8] sm:$0xff]  }
  0x37   :  { %v1326_v62 = vpack.c.bf16 %v508_v54, %v507_v53  ;;  %v255_v63 = vadd.f32 %v1551_v7, %v184_v55  ;;  %v256_v6 = vadd.f32 %v1551_v7, %v185_v60  ;;  %v1195_v8 = vunpack.c.l.bf16 %v1460_v57  ;;  %v1464_v55 = vld [vmem:[%s1960_s3 + $0xa8] sm:$0xff]  }
  0x38   :  { %v509_v4 = vmax.f32 %v445_v58, 0.0  ;;  %v510_v5 = vmax.f32 %v446_v59, 0.0  ;;  %v186_v11 = vmul.f32 %v1067_v0, %v1537_v1  ;;  %v187_v12 = vmul.f32 %v1068_v2, %v1537_v1  ;;  %v1434_v0 = vld [vmem:[%s1957_s0 + $0xb0] sm:$0xff]  }
  0x39   :  { %1488 = vst [vmem:[%s1961_s4 + $0x70] sm:$0xff] %v1326_v62   ;;  %v447_v10 = vadd.f32 %v1191_v56, %v255_v63  ;;  %v1196_v13 = vunpack.c.h.bf16 %v1460_v57  ;;  %v448_v15 = vadd.f32 %v1192_v61, %v256_v6  ;;  %v1071_v16 = vunpack.c.l.bf16 %v1430_v3  ;;  %v1465_v6 = vld [vmem:[%s1960_s3 + $0xb0] sm:$0xff]  }
  0x3a   :  { %v1331_v14 = vpack.c.bf16 %v510_v5, %v509_v4  ;;  %v1072_v17 = vunpack.c.h.bf16 %v1430_v3  ;;  %v257_v20 = vadd.f32 %v1551_v7, %v186_v11  ;;  %v258_v21 = vadd.f32 %v1551_v7, %v187_v12 }
  0x3b   :  { %v511_v19 = vmax.f32 %v447_v10, 0.0  ;;  %v1199_v22 = vunpack.c.l.bf16 %v1461_v9  ;;  %v512_v24 = vmax.f32 %v448_v15, 0.0  ;;  %v188_v25 = vmul.f32 %v1071_v16, %v1537_v1  ;;  %v1435_v16 = vld [vmem:[%s1957_s0 + $0xb8] sm:$0xff]  }
  0x3c   :  { %1489 = vst [vmem:[%s1961_s4 + $0x78] sm:$0xff] %v1331_v14   ;;  %v189_v26 = vmul.f32 %v1072_v17, %v1537_v1  ;;  %v1200_v27 = vunpack.c.h.bf16 %v1461_v9  ;;  %v449_v28 = vadd.f32 %v1195_v8, %v257_v20  ;;  %v450_v29 = vadd.f32 %v1196_v13, %v258_v21  ;;  %v1466_v21 = vld [vmem:[%s1960_s3 + $0xb8] sm:$0xff]  }
  0x3d   :  { %v1075_v30 = vunpack.c.l.bf16 %v1431_v18  ;;  %v1076_v31 = vunpack.c.h.bf16 %v1431_v18  ;;  %v1336_v33 = vpack.c.bf16 %v512_v24, %v511_v19  ;;  %v259_v34 = vadd.f32 %v1551_v7, %v188_v25 }
  0x3e   :  { %v260_v35 = vadd.f32 %v1551_v7, %v189_v26  ;;  %v1203_v36 = vunpack.c.l.bf16 %v1462_v23  ;;  %v513_v37 = vmax.f32 %v449_v28, 0.0  ;;  %v514_v38 = vmax.f32 %v450_v29, 0.0 }
  0x3f   :  { %v190_v39 = vmul.f32 %v1075_v30, %v1537_v1  ;;  %v191_v40 = vmul.f32 %v1076_v31, %v1537_v1  ;;  %1490 = vst [vmem:[%s1961_s4 + $0x80] sm:$0xff] %v1336_v33   ;;  %v451_v42 = vadd.f32 %v1199_v22, %v259_v34  ;;  %v1204_v44 = vunpack.c.h.bf16 %v1462_v23  ;;  %v1436_v30 = vld [vmem:[%s1957_s0 + $0xc0] sm:$0xff]  }
  0x40   :  { %v452_v43 = vadd.f32 %v1200_v27, %v260_v35  ;;  %v1079_v45 = vunpack.c.l.bf16 %v1432_v32  ;;  %v1341_v46 = vpack.c.bf16 %v514_v38, %v513_v37  ;;  %v1080_v49 = vunpack.c.h.bf16 %v1432_v32 }
  0x41   :  { %v261_v47 = vadd.f32 %v1551_v7, %v190_v39  ;;  %v262_v48 = vadd.f32 %v1551_v7, %v191_v40  ;;  %v515_v51 = vmax.f32 %v451_v42, 0.0  ;;  %v1207_v54 = vunpack.c.l.bf16 %v1463_v41  ;;  %v1467_v39 = vld [vmem:[%s1960_s3 + $0xc0] sm:$0xff]  }
  0x42   :  { %v516_v52 = vmax.f32 %v452_v43, 0.0  ;;  %v192_v53 = vmul.f32 %v1079_v45, %v1537_v1  ;;  %1491 = vst [vmem:[%s1961_s4 + $0x88] sm:$0xff] %v1341_v46   ;;  %v193_v58 = vmul.f32 %v1080_v49, %v1537_v1  ;;  %v1208_v59 = vunpack.c.h.bf16 %v1463_v41 }
  0x43   :  { %v453_v56 = vadd.f32 %v1203_v36, %v261_v47  ;;  %v454_v57 = vadd.f32 %v1204_v44, %v262_v48  ;;  %v1083_v62 = vunpack.c.l.bf16 %v1433_v50  ;;  %v1084_v63 = vunpack.c.h.bf16 %v1433_v50  ;;  %v1437_v48 = vld [vmem:[%s1957_s0 + $0xc8] sm:$0xff]  }
  0x44   :  { %v1346_v60 = vpack.c.bf16 %v516_v52, %v515_v51  ;;  %v263_v61 = vadd.f32 %v1551_v7, %v192_v53  ;;  %v264_v4 = vadd.f32 %v1551_v7, %v193_v58  ;;  %v1211_v5 = vunpack.c.l.bf16 %v1464_v55  ;;  %v1468_v53 = vld [vmem:[%s1960_s3 + $0xc8] sm:$0xff]  }
  0x45   :  { %v517_v2 = vmax.f32 %v453_v56, 0.0  ;;  %v518_v3 = vmax.f32 %v454_v57, 0.0  ;;  %v194_v9 = vmul.f32 %v1083_v62, %v1537_v1  ;;  %v195_v10 = vmul.f32 %v1084_v63, %v1537_v1  ;;  %v1438_v62 = vld [vmem:[%s1957_s0 + $0xd0] sm:$0xff]  }
  0x46   :  { %1492 = vst [vmem:[%s1961_s4 + $0x90] sm:$0xff] %v1346_v60   ;;  %v455_v8 = vadd.f32 %v1207_v54, %v263_v61  ;;  %v1212_v11 = vunpack.c.h.bf16 %v1464_v55  ;;  %v456_v13 = vadd.f32 %v1208_v59, %v264_v4  ;;  %v1087_v14 = vunpack.c.l.bf16 %v1434_v0  ;;  %v1469_v4 = vld [vmem:[%s1960_s3 + $0xd0] sm:$0xff]  }
  0x47   :  { %v1351_v12 = vpack.c.bf16 %v518_v3, %v517_v2  ;;  %v1088_v15 = vunpack.c.h.bf16 %v1434_v0  ;;  %v265_v18 = vadd.f32 %v1551_v7, %v194_v9  ;;  %v266_v19 = vadd.f32 %v1551_v7, %v195_v10 }
  0x48   :  { %v519_v17 = vmax.f32 %v455_v8, 0.0  ;;  %v1215_v20 = vunpack.c.l.bf16 %v1465_v6  ;;  %v520_v22 = vmax.f32 %v456_v13, 0.0  ;;  %v196_v23 = vmul.f32 %v1087_v14, %v1537_v1  ;;  %v1439_v14 = vld [vmem:[%s1957_s0 + $0xd8] sm:$0xff]  }
  0x49   :  { %1493 = vst [vmem:[%s1961_s4 + $0x98] sm:$0xff] %v1351_v12   ;;  %v197_v24 = vmul.f32 %v1088_v15, %v1537_v1  ;;  %v1216_v25 = vunpack.c.h.bf16 %v1465_v6  ;;  %v457_v26 = vadd.f32 %v1211_v5, %v265_v18  ;;  %v458_v27 = vadd.f32 %v1212_v11, %v266_v19  ;;  %v1470_v19 = vld [vmem:[%s1960_s3 + $0xd8] sm:$0xff]  }
  0x4a   :  { %v1091_v28 = vunpack.c.l.bf16 %v1435_v16  ;;  %v1092_v29 = vunpack.c.h.bf16 %v1435_v16  ;;  %v1356_v31 = vpack.c.bf16 %v520_v22, %v519_v17  ;;  %v267_v32 = vadd.f32 %v1551_v7, %v196_v23 }
  0x4b   :  { %v268_v33 = vadd.f32 %v1551_v7, %v197_v24  ;;  %v1219_v34 = vunpack.c.l.bf16 %v1466_v21  ;;  %v521_v35 = vmax.f32 %v457_v26, 0.0  ;;  %v522_v36 = vmax.f32 %v458_v27, 0.0 }
  0x4c   :  { %v198_v37 = vmul.f32 %v1091_v28, %v1537_v1  ;;  %v199_v38 = vmul.f32 %v1092_v29, %v1537_v1  ;;  %1494 = vst [vmem:[%s1961_s4 + $0xa0] sm:$0xff] %v1356_v31   ;;  %v459_v40 = vadd.f32 %v1215_v20, %v267_v32  ;;  %v1220_v42 = vunpack.c.h.bf16 %v1466_v21  ;;  %v1440_v28 = vld [vmem:[%s1957_s0 + $0xe0] sm:$0xff]  }
  0x4d   :  { %v460_v41 = vadd.f32 %v1216_v25, %v268_v33  ;;  %v1095_v43 = vunpack.c.l.bf16 %v1436_v30  ;;  %v1361_v44 = vpack.c.bf16 %v522_v36, %v521_v35  ;;  %v1096_v47 = vunpack.c.h.bf16 %v1436_v30 }
  0x4e   :  { %v269_v45 = vadd.f32 %v1551_v7, %v198_v37  ;;  %v270_v46 = vadd.f32 %v1551_v7, %v199_v38  ;;  %v523_v49 = vmax.f32 %v459_v40, 0.0  ;;  %v1223_v52 = vunpack.c.l.bf16 %v1467_v39  ;;  %v1471_v37 = vld [vmem:[%s1960_s3 + $0xe0] sm:$0xff]  }
  0x4f   :  { %v524_v50 = vmax.f32 %v460_v41, 0.0  ;;  %v200_v51 = vmul.f32 %v1095_v43, %v1537_v1  ;;  %1495 = vst [vmem:[%s1961_s4 + $0xa8] sm:$0xff] %v1361_v44   ;;  %v201_v56 = vmul.f32 %v1096_v47, %v1537_v1  ;;  %v1224_v57 = vunpack.c.h.bf16 %v1467_v39 }
  0x50   :  { %v461_v54 = vadd.f32 %v1219_v34, %v269_v45  ;;  %v462_v55 = vadd.f32 %v1220_v42, %v270_v46  ;;  %v1099_v60 = vunpack.c.l.bf16 %v1437_v48  ;;  %v1100_v61 = vunpack.c.h.bf16 %v1437_v48  ;;  %v1441_v46 = vld [vmem:[%s1957_s0 + $0xe8] sm:$0xff]  }
  0x51   :  { %v1366_v58 = vpack.c.bf16 %v524_v50, %v523_v49  ;;  %v271_v59 = vadd.f32 %v1551_v7, %v200_v51  ;;  %v272_v2 = vadd.f32 %v1551_v7, %v201_v56  ;;  %v1227_v3 = vunpack.c.l.bf16 %v1468_v53  ;;  %v1472_v51 = vld [vmem:[%s1960_s3 + $0xe8] sm:$0xff]  }
  0x52   :  { %v525_v63 = vmax.f32 %v461_v54, 0.0  ;;  %v526_v0 = vmax.f32 %v462_v55, 0.0  ;;  %v202_v6 = vmul.f32 %v1099_v60, %v1537_v1  ;;  %v203_v8 = vmul.f32 %v1100_v61, %v1537_v1  ;;  %v1442_v60 = vld [vmem:[%s1957_s0 + $0xf0] sm:$0xff]  }
  0x53   :  { %1496 = vst [vmem:[%s1961_s4 + $0xb0] sm:$0xff] %v1366_v58   ;;  %v463_v5 = vadd.f32 %v1223_v52, %v271_v59  ;;  %v1228_v9 = vunpack.c.h.bf16 %v1468_v53  ;;  %v464_v11 = vadd.f32 %v1224_v57, %v272_v2  ;;  %v1103_v12 = vunpack.c.l.bf16 %v1438_v62  ;;  %v1473_v2 = vld [vmem:[%s1960_s3 + $0xf0] sm:$0xff]  }
  0x54   :  { %v1371_v10 = vpack.c.bf16 %v526_v0, %v525_v63  ;;  %v1104_v13 = vunpack.c.h.bf16 %v1438_v62  ;;  %v273_v16 = vadd.f32 %v1551_v7, %v202_v6  ;;  %v274_v17 = vadd.f32 %v1551_v7, %v203_v8 }
  0x55   :  { %v527_v15 = vmax.f32 %v463_v5, 0.0  ;;  %v1231_v18 = vunpack.c.l.bf16 %v1469_v4  ;;  %v528_v20 = vmax.f32 %v464_v11, 0.0  ;;  %v204_v21 = vmul.f32 %v1103_v12, %v1537_v1  ;;  %v1443_v12 = vld [vmem:[%s1957_s0 + $0xf8] sm:$0xff]  }
  0x56   :  { %1497 = vst [vmem:[%s1961_s4 + $0xb8] sm:$0xff] %v1371_v10   ;;  %v205_v22 = vmul.f32 %v1104_v13, %v1537_v1  ;;  %v1232_v23 = vunpack.c.h.bf16 %v1469_v4  ;;  %v465_v24 = vadd.f32 %v1227_v3, %v273_v16  ;;  %v466_v25 = vadd.f32 %v1228_v9, %v274_v17  ;;  %v1474_v17 = vld [vmem:[%s1960_s3 + $0xf8] sm:$0xff]  }
  0x57   :  { %v1107_v26 = vunpack.c.l.bf16 %v1439_v14  ;;  %v1108_v27 = vunpack.c.h.bf16 %v1439_v14  ;;  %v1376_v29 = vpack.c.bf16 %v528_v20, %v527_v15  ;;  %v275_v30 = vadd.f32 %v1551_v7, %v204_v21 }
  0x58   :  { %v276_v31 = vadd.f32 %v1551_v7, %v205_v22  ;;  %v1235_v32 = vunpack.c.l.bf16 %v1470_v19  ;;  %v529_v33 = vmax.f32 %v465_v24, 0.0  ;;  %v530_v34 = vmax.f32 %v466_v25, 0.0 }
  0x59   :  { %v206_v35 = vmul.f32 %v1107_v26, %v1537_v1  ;;  %v207_v36 = vmul.f32 %v1108_v27, %v1537_v1  ;;  %1498 = vst [vmem:[%s1961_s4 + $0xc0] sm:$0xff] %v1376_v29   ;;  %v467_v38 = vadd.f32 %v1231_v18, %v275_v30  ;;  %v1236_v40 = vunpack.c.h.bf16 %v1470_v19 }
  0x5a   :  { %v468_v39 = vadd.f32 %v1232_v23, %v276_v31  ;;  %v1111_v41 = vunpack.c.l.bf16 %v1440_v28  ;;  %v1381_v42 = vpack.c.bf16 %v530_v34, %v529_v33  ;;  %v1112_v45 = vunpack.c.h.bf16 %v1440_v28 }
  0x5b   :  { %v277_v43 = vadd.f32 %v1551_v7, %v206_v35  ;;  %v278_v44 = vadd.f32 %v1551_v7, %v207_v36  ;;  %v531_v47 = vmax.f32 %v467_v38, 0.0  ;;  %v1239_v50 = vunpack.c.l.bf16 %v1471_v37 }
  0x5c   :  { %v532_v48 = vmax.f32 %v468_v39, 0.0  ;;  %v208_v49 = vmul.f32 %v1111_v41, %v1537_v1  ;;  %1499 = vst [vmem:[%s1961_s4 + $0xc8] sm:$0xff] %v1381_v42   ;;  %v209_v54 = vmul.f32 %v1112_v45, %v1537_v1  ;;  %v1240_v55 = vunpack.c.h.bf16 %v1471_v37 }
  0x5d   :  { %v469_v52 = vadd.f32 %v1235_v32, %v277_v43  ;;  %v470_v53 = vadd.f32 %v1236_v40, %v278_v44  ;;  %v1115_v58 = vunpack.c.l.bf16 %v1441_v46  ;;  %v1116_v59 = vunpack.c.h.bf16 %v1441_v46 }
  0x5e   :  { %v1386_v56 = vpack.c.bf16 %v532_v48, %v531_v47  ;;  %v279_v57 = vadd.f32 %v1551_v7, %v208_v49  ;;  %v280_v63 = vadd.f32 %v1551_v7, %v209_v54  ;;  %v1243_v0 = vunpack.c.l.bf16 %v1472_v51 }
  0x5f   :  { %v533_v61 = vmax.f32 %v469_v52, 0.0  ;;  %v534_v62 = vmax.f32 %v470_v53, 0.0  ;;  %v210_v4 = vmul.f32 %v1115_v58, %v1537_v1  ;;  %v211_v5 = vmul.f32 %v1116_v59, %v1537_v1 }
  0x60   :  { %1500 = vst [vmem:[%s1961_s4 + $0xd0] sm:$0xff] %v1386_v56   ;;  %v471_v3 = vadd.f32 %v1239_v50, %v279_v57  ;;  %v1244_v6 = vunpack.c.h.bf16 %v1472_v51  ;;  %v472_v9 = vadd.f32 %v1240_v55, %v280_v63  ;;  %v1119_v10 = vunpack.c.l.bf16 %v1442_v60 }
  0x61   :  { %v1391_v8 = vpack.c.bf16 %v534_v62, %v533_v61  ;;  %v1120_v11 = vunpack.c.h.bf16 %v1442_v60  ;;  %v281_v14 = vadd.f32 %v1551_v7, %v210_v4  ;;  %v282_v15 = vadd.f32 %v1551_v7, %v211_v5 }
  0x62   :  { %v535_v13 = vmax.f32 %v471_v3, 0.0  ;;  %v1247_v16 = vunpack.c.l.bf16 %v1473_v2  ;;  %v536_v18 = vmax.f32 %v472_v9, 0.0  ;;  %v212_v19 = vmul.f32 %v1119_v10, %v1537_v1 }
  0x63   :  { %1501 = vst [vmem:[%s1961_s4 + $0xd8] sm:$0xff] %v1391_v8   ;;  %v213_v20 = vmul.f32 %v1120_v11, %v1537_v1  ;;  %v1248_v21 = vunpack.c.h.bf16 %v1473_v2  ;;  %v473_v22 = vadd.f32 %v1243_v0, %v281_v14  ;;  %v474_v23 = vadd.f32 %v1244_v6, %v282_v15 }
  0x64   :  { %v1123_v24 = vunpack.c.l.bf16 %v1443_v12  ;;  %v1124_v25 = vunpack.c.h.bf16 %v1443_v12  ;;  %v1396_v26 = vpack.c.bf16 %v536_v18, %v535_v13  ;;  %v283_v27 = vadd.f32 %v1551_v7, %v212_v19 }
  0x65   :  { %v284_v28 = vadd.f32 %v1551_v7, %v213_v20  ;;  %v1251_v29 = vunpack.c.l.bf16 %v1474_v17  ;;  %v537_v30 = vmax.f32 %v473_v22, 0.0  ;;  %v538_v31 = vmax.f32 %v474_v23, 0.0 }
  0x66   :  { %v214_v32 = vmul.f32 %v1123_v24, %v1537_v1  ;;  %v215_v33 = vmul.f32 %v1124_v25, %v1537_v1  ;;  %1502 = vst [vmem:[%s1961_s4 + $0xe0] sm:$0xff] %v1396_v26   ;;  %v475_v34 = vadd.f32 %v1247_v16, %v283_v27  ;;  %v1252_v36 = vunpack.c.h.bf16 %v1474_v17 }
  0x67   :  { %v476_v35 = vadd.f32 %v1248_v21, %v284_v28  ;;  %v1401_v37 = vpack.c.bf16 %v538_v31, %v537_v30 }
  0x68   :  { %v285_v38 = vadd.f32 %v1551_v7, %v214_v32  ;;  %v286_v39 = vadd.f32 %v1551_v7, %v215_v33  ;;  %v539_v40 = vmax.f32 %v475_v34, 0.0 }
  0x69   :  { %v540_v41 = vmax.f32 %v476_v35, 0.0  ;;  %1503 = vst [vmem:[%s1961_s4 + $0xe8] sm:$0xff] %v1401_v37  }
  0x6a   :  { %v477_v42 = vadd.f32 %v1251_v29, %v285_v38  ;;  %v478_v1 = vadd.f32 %v1252_v36, %v286_v39 }
  0x6b   :  { %v1406_v43 = vpack.c.bf16 %v540_v41, %v539_v40 }
  0x6c   :  { %v541_v44 = vmax.f32 %v477_v42, 0.0  ;;  %v542_v45 = vmax.f32 %v478_v1, 0.0 }
  0x6d   :  { %1504 = vst [vmem:[%s1961_s4 + $0xf0] sm:$0xff] %v1406_v43  }
  0x6e   :  { %v1411_v46 = vpack.c.bf16 %v542_v45, %v541_v44 }
  0x70   :  { %1505 = vst [vmem:[%s1961_s4 + $0xf8] sm:$0xff] %v1411_v46  }

// kernel: res_unet_block_forward.28
= control target key start
LH: loop header
LB: loop body
LE: loop exit
PB: predicated region body
PF: predicated region fallthrough
CT: control target
= control target key end

     0   :  { %s7046_s12 = smov 0   ;;  %s7048_s13 = smov 0   ;;  %s9717_s0 = inlined_call_operand.vmem [shape: bf16[2,18,18,128], index: 0, kind: input, shape index: {}]   ;;  %s9718_s1 = inlined_call_operand.vmem [shape: bf16[3,3,128,128], index: 1, kind: input, shape index: {}]   ;;  %s9719_s2 = inlined_call_operand.vmem [shape: bf16[2,16,16,128], index: 2, kind: output, shape index: {0}]   ;;  %s9720_s3 = inlined_call_operand.vmem [shape: f32[2,1,2,128], index: 3, kind: output, shape index: {1}]  }
   0x1   :  { %s7050_s14 = smov 0  }
   0x2 LB: > { %s26_s15 = sadd.s32 1, %s7020_s13  ;;  %p5433_p0 = scmp.ge.s32.totalorder %s7024_s14, 1  ;;  %s7024_s14 = sphi %s7050_s14, %s14_s14   ;;  %s7020_s13 = sphi %s7048_s13, %s9941_s13   ;;  %s7016_s12 = sphi %s7046_s12, %s9940_s12  }
   0x3   : > { %p28_p1 = scmp.ge.s32.totalorder %s26_s15, 2  ;;  %p160_p2 = scmp.lt.s32.totalorder %s7024_s14, 3 }
   0x5   : > { %s9943_s15 = smov (%p28_p1, %s26_s15), 0  ;;  %p161_p3 = pnand %p5433_p0, %p160_p2 }
   0x7   : > { %164 = sbr.rel (%p161_p3) target bundleno = 574 (0x23e), region = 28 }
   0xc   : > { %v6873_v0 = vld [vmem:[%s9718_s1 + $0x78] sm:$0xff]   ;;  %p198_p4 = scmp.lt.s32.totalorder %s7016_s12, 1  ;;  %v6874_v1 = vld [vmem:[%s9718_s1 + $0x70] sm:$0xff]   ;;  %v6875_v2 = vld [vmem:[%s9718_s1 + $0x68] sm:$0xff]   ;;  %vm287_vm0 = vsmask.f32 3328 }
   0xd   : > { %6400 = vmatprep.subr.bf16.mxu0 %v6873_v0  ;;  %6832 = vmatprep.subr.bf16.mxu1 %v6873_v0  ;;  %v6876_v3 = vld [vmem:[%s9718_s1 + $0x60] sm:$0xff]   ;;  %vm288_vm1 = vsmask.f32 7440  ;;  %v6877_v17 = vld [vmem:[%s9718_s1 + $0x58] sm:$0xff]   ;;  %v6878_v33 = vld [vmem:[%s9718_s1 + $0x50] sm:$0xff]   ;;  %vm1317_vm3 = vcmask 1042432  }
   0xe   : > { %s9945_s12 = smov (!%p198_p4, %s7016_s12), 1  ;;  %6401 = vmatpush3.bf16.msra.mxu0 %v6873_v0  ;;  %6840 = vmatpush3.bf16.msra.mxu1 %v6873_v0  ;;  %vm7110_vm2 = vmor %vm287_vm0, %vm288_vm1  ;;  %v6879_v58 = vld [vmem:[%s9718_s1 + $0x48] sm:$0xff]   ;;  %vm1318_vm4 = vcmask 1046532   ;;  %vm5138_vm6 = vcmask 1040384  }
   0xf   : > { %6402 = vmatprep.subr.bf16.mxu0 %v6874_v1  ;;  %6833 = vmatprep.subr.bf16.mxu1 %v6874_v1  ;;  %s6848_s22 = smul.u32 216, %s9945_s12  ;;  %vm7421_vm5 = vmor %vm1317_vm3, %vm1318_vm4  ;;  %s5437_s8 = sshll.u32 %s9945_s12, 1 }
  0x10   : > { %s221_s11 = scalar_lea.vmem %s9720_s3, %s5437_s8 }
  0x11   : > { %s7079_s25 = scalar_lea.vmem %s9717_s0, %s6848_s22 }
  0x12   : > { %6403 = vmatpush3.bf16.msra.mxu0 %v6874_v1  ;;  %6841 = vmatpush3.bf16.msra.mxu1 %v6874_v1  ;;  %v7085_v4 = vld [vmem:[%s7079_s25] sm:$0xf]  ;;  %v7088_v5 = vld [vmem:[%s7079_s25 + $0x4] sm:$0xf]  ;;  %v7091_v6 = vld [vmem:[%s7079_s25 + $0x8] sm:$0x1] }
  0x13   : > { %6404 = vmatprep.subr.bf16.mxu0 %v6875_v2  ;;  %6834 = vmatprep.subr.bf16.mxu1 %v6875_v2  ;;  %v291_v7 = vshrl.u32 %v7085_v4, 16  ;;  %v294_v8 = vshll.u32 %v7085_v4, 16  ;;  %v300_v9 = vshll.u32 %v7088_v5, 16  ;;  %v304_v10 = vshrl.u32 %v7088_v5, 16  ;;  %v239_v12 = vld [vmem:[%s7079_s25 + $0x60] sm:$0xf] }
  0x14   : > { %v310_v11 = vshll.u32 %v7091_v6, 16  ;;  %v240_v15 = vld [vmem:[%s7079_s25 + $0x64] sm:$0xf]  ;;  %v279_v16 = vld [vmem:[%s7079_s25 + $0x68] sm:$0x1]  ;;  %v483_v21 = vshrl.u32 %v239_v12, 16 }
  0x15   : > { %v293_v13 = vrot.slane %v291_v7, 4  ;;  %v296_v14 = vrot.slane %v294_v8, 5  ;;  %v302_v18 = vrot.slane %v300_v9, 5  ;;  %v306_v19 = vrot.slane %v304_v10, 4  ;;  %v7106_v26 = vld [vmem:[%s7079_s25 + $0xc] sm:$0xf] }
  0x16   : > { %6405 = vmatpush3.bf16.msra.mxu0 %v6875_v2  ;;  %6842 = vmatpush3.bf16.msra.mxu1 %v6875_v2  ;;  %v486_v23 = vshll.u32 %v239_v12, 16  ;;  %v492_v24 = vshll.u32 %v240_v15, 16  ;;  %v496_v25 = vshrl.u32 %v240_v15, 16  ;;  %v312_v29 = vrot.slane %v310_v11, 5  ;;  %v7115_v32 = vld [vmem:[%s7079_s25 + $0x10] sm:$0xf] }
  0x17   : > { %6406 = vmatprep.subr.bf16.mxu0 %v6876_v3  ;;  %6835 = vmatprep.subr.bf16.mxu1 %v6876_v3  ;;  %v297_v22 = vor.u32 %v296_v14, %v293_v13  ;;  %v307_v28 = vor.u32 %v306_v19, %v302_v18  ;;  %v485_v30 = vrot.slane %v483_v21, 4  ;;  %v502_v31 = vshll.u32 %v279_v16, 16  ;;  %v7121_v40 = vld [vmem:[%s7079_s25 + $0x14] sm:$0x1]  ;;  %v241_v47 = vld [vmem:[%s7079_s25 + $0x6c] sm:$0xf] }
  0x18   : > { %v488_v35 = vrot.slane %v486_v23, 5  ;;  %v494_v36 = vrot.slane %v492_v24, 5  ;;  %v498_v37 = vrot.slane %v496_v25, 4  ;;  %v315_v41 = vshrl.u32 %v7106_v26, 16  ;;  %v242_v52 = vld [vmem:[%s7079_s25 + $0x70] sm:$0xf] }
  0x19   : > { %v298_v34 = vrot.slane %v297_v22, 4  ;;  %v308_v38 = vrot.slane %v307_v28, 4  ;;  %v504_v39 = vrot.slane %v502_v31, 5  ;;  %v318_v42 = vshll.u32 %v7106_v26, 16  ;;  %v280_v57 = vld [vmem:[%s7079_s25 + $0x74] sm:$0x1] }
  0x1a   : > { %6407 = vmatpush3.bf16.msra.mxu0 %v6876_v3  ;;  %6843 = vmatpush3.bf16.msra.mxu1 %v6876_v3  ;;  %v489_v44 = vor.u32 %v488_v35, %v485_v30  ;;  %v499_v45 = vor.u32 %v498_v37, %v494_v36  ;;  %v324_v46 = vshll.u32 %v7115_v32, 16  ;;  %v317_v49 = vrot.slane %v315_v41, 4  ;;  %v7144_v14 = vld [vmem:[%s7079_s25 + $0x18] sm:$0xf]  ;;  %v6880_v15 = vld [vmem:[%s9718_s1 + $0x40] sm:$0xff]  }
  0x1b   : > { %6408 = vmatprep.subr.bf16.mxu0 %v6877_v17  ;;  %6836 = vmatprep.subr.bf16.mxu1 %v6877_v17  ;;  %v303_v43 = vsel %vm7110_vm2, %v298_v34, %v302_v18  ;;  %v313_v48 = vsel %vm7110_vm2, %v308_v38, %v312_v29  ;;  %v320_v50 = vrot.slane %v318_v42, 5  ;;  %v328_v51 = vshrl.u32 %v7115_v32, 16  ;;  %v7152_v19 = vld [vmem:[%s7079_s25 + $0x1c] sm:$0xf]  ;;  %v7157_v25 = vld [vmem:[%s7079_s25 + $0x20] sm:$0x1] }
  0x1c   : > { %v5454_v53 = vcombine.low %v303_v43, %v313_v48  ;;  %v490_v54 = vrot.slane %v489_v44, 4  ;;  %v500_v55 = vrot.slane %v499_v45, 4  ;;  %v326_v56 = vrot.slane %v324_v46, 5  ;;  %v243_v34 = vld [vmem:[%s7079_s25 + $0x78] sm:$0xf] }
  0x1d   : > { %v321_v59 = vor.u32 %v320_v50, %v317_v49  ;;  %v330_v60 = vrot.slane %v328_v51, 4  ;;  %v334_v61 = vshll.u32 %v7121_v40, 16  ;;  %v507_v1 = vshrl.u32 %v241_v47, 16  ;;  %v6881_v41 = vld [vmem:[%s9718_s1 + $0x38] sm:$0xff]   ;;  %v281_v49 = vld [vmem:[%s7079_s25 + $0x80] sm:$0x1] }
  0x1e   : > { %6409 = vmatpush3.bf16.msra.mxu0 %v6877_v17  ;;  %6844 = vmatpush3.bf16.msra.mxu1 %v6877_v17  ;;  %v495_v63 = vsel %vm7110_vm2, %v490_v54, %v494_v36  ;;  %v505_v0 = vsel %vm7110_vm2, %v500_v55, %v504_v39  ;;  %v510_v2 = vshll.u32 %v241_v47, 16  ;;  %v516_v12 = vshll.u32 %v242_v52, 16  ;;  %v7166_v39 = vld [vmem:[%s7079_s25 + $0x7c] sm:$0xf] }
  0x1f   : > { %6410 = vmatprep.subr.bf16.mxu0 %v6878_v33  ;;  %6837 = vmatprep.subr.bf16.mxu1 %v6878_v33  ;;  %v5462_v3 = vcombine.low %v495_v63, %v505_v0  ;;  %v322_v7 = vrot.slane %v321_v59, 4  ;;  %v331_v8 = vor.u32 %v330_v60, %v326_v56  ;;  %v336_v9 = vrot.slane %v334_v61, 5  ;;  %v6882_v42 = vld [vmem:[%s9718_s1 + $0xb8] sm:$0xff]   ;;  %v6884_v59 = vld [vmem:[%s9718_s1 + $0xb0] sm:$0xff]   ;;  %v7193_v0 = vld [vmem:[%s7079_s25 + $0x28] sm:$0xf] }
  0x20   : > { %6416 = vmatprep.mubr.bf16.mxu0 %v5454_v53  ;;  %v509_v10 = vrot.slane %v507_v1, 4  ;;  %v512_v11 = vrot.slane %v510_v2, 5  ;;  %v520_v13 = vshrl.u32 %v242_v52, 16  ;;  %v526_v18 = vshll.u32 %v280_v57, 16  ;;  %v6883_v52 = vld [vmem:[%s9718_s1 + $0x30] sm:$0xff]  }
  0x21   : > { %v327_v16 = vsel %vm7110_vm2, %v322_v7, %v326_v56  ;;  %v332_v17 = vrot.slane %v331_v8, 4  ;;  %6432 = vmatprep.mubr.bf16.mxu1 %v5462_v3  ;;  %v518_v23 = vrot.slane %v516_v12, 5  ;;  %v339_v28 = vshrl.u32 %v7144_v14, 16  ;;  %v7184_v57 = vld [vmem:[%s7079_s25 + $0x24] sm:$0xf] }
  0x22   : > { %6411 = vmatpush3.bf16.msra.mxu0 %v6878_v33  ;;  %6845 = vmatpush3.bf16.msra.mxu1 %v6878_v33  ;;  %v513_v22 = vor.u32 %v512_v11, %v509_v10  ;;  %v522_v24 = vrot.slane %v520_v13, 4  ;;  %v528_v30 = vrot.slane %v526_v18, 5  ;;  %v342_v31 = vshll.u32 %v7144_v14, 16  ;;  %v7196_v8 = vld [vmem:[%s7079_s25 + $0x2c] sm:$0x1] }
  0x23   : > { %6412 = vmatprep.subr.bf16.mxu0 %v6879_v58  ;;  %6838 = vmatprep.subr.bf16.mxu1 %v6879_v58  ;;  %v337_v29 = vsel %vm7110_vm2, %v332_v17, %v336_v9  ;;  %v348_v33 = vshll.u32 %v7152_v19, 16  ;;  %v341_v38 = vrot.slane %v339_v28, 4  ;;  %v352_v45 = vshrl.u32 %v7152_v19, 16  ;;  %v7200_v13 = vld [vmem:[%s7079_s25 + $0x84] sm:$0xf] }
  0x24   : > { %v5455_v35 = vcombine.low %v327_v16, %v337_v29  ;;  %v514_v36 = vrot.slane %v513_v22, 4  ;;  %v523_v37 = vor.u32 %v522_v24, %v518_v23  ;;  %v344_v43 = vrot.slane %v342_v31, 5  ;;  %v7207_v22 = vld [vmem:[%s7079_s25 + $0x88] sm:$0xf] }
  0x25   : > { %v350_v44 = vrot.slane %v348_v33, 5  ;;  %v358_v46 = vshll.u32 %v7157_v25, 16  ;;  %v531_v50 = vshrl.u32 %v243_v34, 16  ;;  %v534_v51 = vshll.u32 %v243_v34, 16 }
  0x26   : > { %6413 = vmatpush3.bf16.msra.mxu0 %v6879_v58  ;;  %6846 = vmatpush3.bf16.msra.mxu1 %v6879_v58  ;;  %v519_v47 = vsel %vm7110_vm2, %v514_v36, %v518_v23  ;;  %v524_v48 = vrot.slane %v523_v37, 4  ;;  %v345_v53 = vor.u32 %v344_v43, %v341_v38  ;;  %v354_v54 = vrot.slane %v352_v45, 4  ;;  %v7216_v36 = vld [vmem:[%s7079_s25 + $0x8c] sm:$0x1] }
  0x27   : > { %6414 = vmatprep.subr.bf16.mxu0 %v6880_v15  ;;  %6839 = vmatprep.subr.bf16.mxu1 %v6880_v15  ;;  %v360_v55 = vrot.slane %v358_v46, 5  ;;  %v540_v56 = vshll.u32 %v7166_v39, 16  ;;  %v533_v60 = vrot.slane %v531_v50, 4  ;;  %v536_v61 = vrot.slane %v534_v51, 5  ;;  %v6886_v37 = vld [vmem:[%s9718_s1 + $0xa8] sm:$0xff]  }
  0x28   : > { %v529_v58 = vsel %vm7110_vm2, %v524_v48, %v528_v30  ;;  %v544_v63 = vshrl.u32 %v7166_v39, 16  ;;  %v346_v2 = vrot.slane %v345_v53, 4  ;;  %v355_v3 = vor.u32 %v354_v54, %v350_v44  ;;  %v6885_v30 = vld [vmem:[%s9718_s1 + $0x28] sm:$0xff]   ;;  %v7231_v53 = vld [vmem:[%s7079_s25 + $0x30] sm:$0xf] }
  0x29   : > { %v5463_v1 = vcombine.low %v519_v47, %v529_v58  ;;  %v542_v7 = vrot.slane %v540_v56, 5  ;;  %v537_v9 = vor.u32 %v536_v61, %v533_v60  ;;  %v550_v11 = vshll.u32 %v281_v49, 16  ;;  %v7240_v60 = vld [vmem:[%s7079_s25 + $0x34] sm:$0xf] }
  0x2a   : > { %6415 = vmatpush3.bf16.msra.mxu0 %v6880_v15  ;;  %6847 = vmatpush3.bf16.msra.mxu1 %v6880_v15  ;;  %v546_v10 = vrot.slane %v544_v63, 4  ;;  %v363_v12 = vshrl.u32 %v7184_v57, 16  ;;  %v351_v15 = vsel %vm7110_vm2, %v346_v2, %v350_v44  ;;  %v356_v16 = vrot.slane %v355_v3, 4 }
  0x2b   : > { %6448 = vmatprep.subr.bf16.mxu1 %v6881_v41  ;;  %6496 = vmatprep.subr.bf16.mxu0 %v6882_v42  ;;  %v366_v17 = vshll.u32 %v7184_v57, 16  ;;  %v372_v18 = vshll.u32 %v7193_v0, 16  ;;  %v538_v23 = vrot.slane %v537_v9, 4  ;;  %v552_v28 = vrot.slane %v550_v11, 5 }
  0x2c   : > { %v547_v24 = vor.u32 %v546_v10, %v542_v7  ;;  %v365_v29 = vrot.slane %v363_v12, 4  ;;  %v361_v31 = vsel %vm7110_vm2, %v356_v16, %v360_v55  ;;  %v382_v43 = vshll.u32 %v7196_v8, 16  ;;  %v7248_v16 = vld [vmem:[%s7079_s25 + $0x38] sm:$0x1] }
  0x2d   : > { %6417 = vmatmul.mubr.bf16.vlgmr.msra.gmra.mxu0 %v5455_v35  ;;  %6433 = vmatmul.mubr.bf16.vlgmr.msra.gmra.mxu1 %v5463_v1  ;;  %v368_v33 = vrot.slane %v366_v17, 5  ;;  %v374_v34 = vrot.slane %v372_v18, 5  ;;  %v376_v35 = vshrl.u32 %v7193_v0, 16  ;;  %v5456_v38 = vcombine.low %v351_v15, %v361_v31  ;;  %v7252_v18 = vld [vmem:[%s7079_s25 + $0x90] sm:$0xf] }
  0x2e   : > { %6449 = vmatpush3.bf16.msra.mxu1 %v6881_v41  ;;  %6497 = vmatpush3.bf16.msra.mxu0 %v6882_v42  ;;  %v543_v41 = vsel %vm7110_vm2, %v538_v23, %v542_v7  ;;  %v548_v42 = vrot.slane %v547_v24, 4  ;;  %v555_v46 = vshrl.u32 %v7200_v13, 16  ;;  %v558_v47 = vshll.u32 %v7200_v13, 16  ;;  %v7258_v31 = vld [vmem:[%s7079_s25 + $0x94] sm:$0xf] }
  0x2f   : > { %6450 = vmatprep.subr.bf16.mxu1 %v6883_v52  ;;  %6498 = vmatprep.subr.bf16.mxu0 %v6884_v59  ;;  %v369_v44 = vor.u32 %v368_v33, %v365_v29  ;;  %v378_v45 = vrot.slane %v376_v35, 4  ;;  %v384_v49 = vrot.slane %v382_v43, 5  ;;  %v564_v50 = vshll.u32 %v7207_v22, 16 }
  0x30   : > { %v553_v48 = vsel %vm7110_vm2, %v548_v42, %v552_v28  ;;  %v568_v51 = vshrl.u32 %v7207_v22, 16  ;;  %6420 = vmatprep.mubr.bf16.mxu0 %v5456_v38  ;;  %v557_v58 = vrot.slane %v555_v46, 4  ;;  %v560_v61 = vrot.slane %v558_v47, 5  ;;  %v6890_v38 = vld [vmem:[%s9718_s1 + $0x98] sm:$0xff]   ;;  %v6891_v46 = vld [vmem:[%s9718_s1 + $0x10] sm:$0xff]  }
  0x31   : > { %v5464_v54 = vcombine.low %v543_v41, %v553_v48  ;;  %v370_v55 = vrot.slane %v369_v44, 4  ;;  %v379_v56 = vor.u32 %v378_v45, %v374_v34  ;;  %v566_v63 = vrot.slane %v564_v50, 5  ;;  %v7268_v44 = vld [vmem:[%s7079_s25 + $0x98] sm:$0x1] }
  0x32   : > { %6451 = vmatpush3.bf16.msra.mxu1 %v6883_v52  ;;  %6499 = vmatpush3.bf16.msra.mxu0 %v6884_v59  ;;  %v6887_v52 = vld [vmem:[%s9718_s1 + $0x20] sm:$0xff]   ;;  %v570_v1 = vrot.slane %v568_v51, 4  ;;  %v574_v2 = vshll.u32 %v7216_v36, 16  ;;  %v387_v9 = vshrl.u32 %v7231_v53, 16  ;;  %v390_v10 = vshll.u32 %v7231_v53, 16 }
  0x33   : > { %6452 = vmatprep.subr.bf16.mxu1 %v6885_v30  ;;  %v6888_v59 = vld [vmem:[%s9718_s1 + $0xa0] sm:$0xff]   ;;  %6500 = vmatprep.subr.bf16.mxu0 %v6886_v37  ;;  %v375_v3 = vsel %vm7110_vm2, %v370_v55, %v374_v34  ;;  %v380_v7 = vrot.slane %v379_v56, 4  ;;  %v561_v11 = vor.u32 %v560_v61, %v557_v58  ;;  %v396_v17 = vshll.u32 %v7240_v60, 16  ;;  %v7281_v51 = vld [vmem:[%s7079_s25 + $0x3c] sm:$0xf]  ;;  %v6892_v55 = vld [vmem:[%s9718_s1 + $0x90] sm:$0xff]  }
  0x34   : > { %6436 = vmatprep.mubr.bf16.mxu1 %v5464_v54  ;;  %v571_v12 = vor.u32 %v570_v1, %v566_v63  ;;  %v576_v15 = vrot.slane %v574_v2, 5  ;;  %v389_v24 = vrot.slane %v387_v9, 4  ;;  %v392_v28 = vrot.slane %v390_v10, 5  ;;  %v7284_v54 = vld [vmem:[%s7079_s25 + $0x40] sm:$0xf] }
  0x35   : > { %v385_v23 = vsel %vm7110_vm2, %v380_v7, %v384_v49  ;;  %v400_v29 = vshrl.u32 %v7240_v60, 16  ;;  %v562_v34 = vrot.slane %v561_v11, 4  ;;  %v406_v43 = vshll.u32 %v7248_v16, 16  ;;  %v7291_v7 = vld [vmem:[%s7079_s25 + $0x44] sm:$0x1] }
  0x36   : > { %6453 = vmatpush3.bf16.msra.mxu1 %v6885_v30  ;;  %6501 = vmatpush3.bf16.msra.mxu0 %v6886_v37  ;;  %v6889_v30 = vld [vmem:[%s9718_s1 + $0x18] sm:$0xff]   ;;  %v5457_v33 = vcombine.low %v375_v3, %v385_v23  ;;  %v572_v35 = vrot.slane %v571_v12, 4  ;;  %v398_v37 = vrot.slane %v396_v17, 5  ;;  %v393_v41 = vor.u32 %v392_v28, %v389_v24  ;;  %v7303_v28 = vld [vmem:[%s7079_s25 + $0xa0] sm:$0xf] }
  0x37   : > { %6454 = vmatprep.subr.bf16.mxu1 %v6887_v52  ;;  %6502 = vmatprep.subr.bf16.mxu0 %v6888_v59  ;;  %v402_v42 = vrot.slane %v400_v29, 4  ;;  %v579_v45 = vshrl.u32 %v7252_v18, 16  ;;  %v567_v47 = vsel %vm7110_vm2, %v562_v34, %v566_v63  ;;  %v582_v49 = vshll.u32 %v7252_v18, 16  ;;  %v7294_v9 = vld [vmem:[%s7079_s25 + $0x9c] sm:$0xf]  ;;  %v6893_v29 = vld [vmem:[%s9718_s1 + $0x8] sm:$0xff]  }
  0x38   : > { %6421 = vmatmul.mubr.bf16.gmra.mxu0 %v5457_v33  ;;  %v577_v48 = vsel %vm7110_vm2, %v572_v35, %v576_v15  ;;  %v588_v50 = vshll.u32 %v7258_v31, 16  ;;  %v394_v58 = vrot.slane %v393_v41, 4  ;;  %v408_v63 = vrot.slane %v406_v43, 5  ;;  %v6894_v41 = vld [vmem:[%s9718_s1 + $0x88] sm:$0xff]  }
  0x39   : > { %v5465_v56 = vcombine.low %v567_v47, %v577_v48  ;;  %v403_v61 = vor.u32 %v402_v42, %v398_v37  ;;  %v584_v1 = vrot.slane %v582_v49, 5  ;;  %v592_v3 = vshrl.u32 %v7258_v31, 16 }
  0x3a   : > { %6455 = vmatpush3.bf16.msra.mxu1 %v6887_v52  ;;  %6503 = vmatpush3.bf16.msra.mxu0 %v6888_v59  ;;  %v581_v52 = vrot.slane %v579_v45, 4  ;;  %v590_v2 = vrot.slane %v588_v50, 5  ;;  %v399_v10 = vsel %vm7110_vm2, %v394_v58, %v398_v37  ;;  %v598_v11 = vshll.u32 %v7268_v44, 16 }
  0x3b   : > { %6456 = vmatprep.subr.bf16.mxu1 %v6889_v30  ;;  %6504 = vmatprep.subr.bf16.mxu0 %v6890_v38  ;;  %v404_v59 = vrot.slane %v403_v61, 4  ;;  %v411_v12 = vshrl.u32 %v7281_v51, 16  ;;  %v594_v17 = vrot.slane %v592_v3, 4  ;;  %v414_v23 = vshll.u32 %v7281_v51, 16  ;;  %v7319_v61 = vld [vmem:[%s7079_s25 + $0xa4] sm:$0x1] }
  0x3c   : > { %6437 = vmatmul.mubr.bf16.gmra.mxu1 %v5465_v56  ;;  %v585_v15 = vor.u32 %v584_v1, %v581_v52  ;;  %v420_v24 = vshll.u32 %v7284_v54, 16  ;;  %v600_v34 = vrot.slane %v598_v11, 5  ;;  %v424_v37 = vshrl.u32 %v7284_v54, 16 }
  0x3d   : > { %v409_v33 = vsel %vm7110_vm2, %v404_v59, %v408_v63  ;;  %v413_v35 = vrot.slane %v411_v12, 4  ;;  %v595_v43 = vor.u32 %v594_v17, %v590_v2  ;;  %v416_v45 = vrot.slane %v414_v23, 5  ;;  %v7324_v59 = vld [vmem:[%s7079_s25 + $0x48] sm:$0xf]  ;;  %v7333_v17 = vld [vmem:[%s7079_s25 + $0x4c] sm:$0xf] }
  0x3e   : > { %6457 = vmatpush3.bf16.msra.mxu1 %v6889_v30  ;;  %6505 = vmatpush3.bf16.msra.mxu0 %v6890_v38  ;;  %v5458_v42 = vcombine.low %v399_v10, %v409_v33  ;;  %v586_v30 = vrot.slane %v585_v15, 4  ;;  %v422_v47 = vrot.slane %v420_v24, 5  ;;  %v426_v48 = vrot.slane %v424_v37, 4 }
  0x3f   : > { %6458 = vmatprep.subr.bf16.mxu1 %v6891_v46  ;;  %6506 = vmatprep.subr.bf16.mxu0 %v6892_v55  ;;  %v430_v49 = vshll.u32 %v7291_v7, 16  ;;  %v603_v50 = vshrl.u32 %v7294_v9, 16  ;;  %v596_v56 = vrot.slane %v595_v43, 4  ;;  %v417_v58 = vor.u32 %v416_v45, %v413_v35 }
  0x40   : > { %6424 = vmatprep.mubr.bf16.mxu0 %v5458_v42  ;;  %v591_v38 = vsel %vm7110_vm2, %v586_v30, %v590_v2  ;;  %v606_v63 = vshll.u32 %v7294_v9, 16  ;;  %v427_v52 = vor.u32 %v426_v48, %v422_v47  ;;  %v612_v10 = vshll.u32 %v7303_v28, 16  ;;  %v6895_v2 = vld [vmem:[%s9718_s1] sm:$0xff]   ;;  %v7342_v30 = vld [vmem:[%s7079_s25 + $0x50] sm:$0x1] }
  0x41   : > { %v432_v1 = vrot.slane %v430_v49, 5  ;;  %v605_v3 = vrot.slane %v603_v50, 4  ;;  %v601_v11 = vsel %vm7110_vm2, %v596_v56, %v600_v34  ;;  %v418_v12 = vrot.slane %v417_v58, 4 }
  0x42   : > { %6459 = vmatpush3.bf16.msra.mxu1 %v6891_v46  ;;  %6507 = vmatpush3.bf16.msra.mxu0 %v6892_v55  ;;  %v608_v15 = vrot.slane %v606_v63, 5  ;;  %v616_v46 = vshrl.u32 %v7303_v28, 16  ;;  %v6896_v55 = vld [vmem:[%s9718_s1 + $0x80] sm:$0xff]   ;;  %v5466_v23 = vcombine.low %v591_v38, %v601_v11  ;;  %v428_v24 = vrot.slane %v427_v52, 4  ;;  %v7350_v38 = vld [vmem:[%s7079_s25 + $0xa8] sm:$0xf] }
  0x43   : > { %6460 = vmatprep.subr.bf16.mxu1 %v6893_v29  ;;  %6508 = vmatprep.subr.bf16.mxu0 %v6894_v41  ;;  %v614_v33 = vrot.slane %v612_v10, 5  ;;  %v622_v35 = vshll.u32 %v7319_v61, 16  ;;  %v423_v34 = vsel %vm7110_vm2, %v418_v12, %v422_v47  ;;  %v435_v43 = vshrl.u32 %v7324_v59, 16  ;;  %9747 = vst [vmem:[#allocation2_spill] sm:$0xff] %v7350_v38  ;;  %v7355_v47 = vld [vmem:[%s9718_s1 + $0xf8] sm:$0xff]  }
  0x44   : > { %v609_v37 = vor.u32 %v608_v15, %v605_v3  ;;  %v618_v42 = vrot.slane %v616_v46, 4  ;;  %6440 = vmatprep.mubr.bf16.mxu1 %v5466_v23  ;;  %v433_v45 = vsel %vm7110_vm2, %v428_v24, %v432_v1  ;;  %v438_v49 = vshll.u32 %v7324_v59, 16  ;;  %v7358_v52 = vld [vmem:[%s7079_s25 + $0xac] sm:$0xf]  ;;  %v7363_v1 = vld [vmem:[%s9718_s1 + $0x138] sm:$0xff]  }
  0x45   : > { %v624_v48 = vrot.slane %v622_v35, 5  ;;  %v444_v50 = vshll.u32 %v7333_v17, 16  ;;  %v437_v63 = vrot.slane %v435_v43, 4  ;;  %v448_v10 = vshrl.u32 %v7333_v17, 16  ;;  %v7368_v12 = vld [vmem:[%s7079_s25 + $0xb0] sm:$0x1] }
  0x46   : > { %6461 = vmatpush3.bf16.msra.mxu1 %v6893_v29  ;;  %6509 = vmatpush3.bf16.msra.mxu0 %v6894_v41  ;;  %v5459_v29 = vcombine.low %v423_v34, %v433_v45  ;;  %v610_v56 = vrot.slane %v609_v37, 4  ;;  %v619_v58 = vor.u32 %v618_v42, %v614_v33  ;;  %v440_v41 = vrot.slane %v438_v49, 5  ;;  %9748 = vst [vmem:[#allocation3_spill] sm:$0xff] %v7368_v12  ;;  %v7371_v15 = vld [vmem:[%s7079_s25 + $0x54] sm:$0xf] }
  0x47   : > { %6462 = vmatprep.subr.bf16.mxu1 %v6895_v2  ;;  %6510 = vmatprep.subr.bf16.mxu0 %v6896_v55  ;;  %v446_v3 = vrot.slane %v444_v50, 5  ;;  %v454_v11 = vshll.u32 %v7342_v30, 16  ;;  %v627_v24 = vshrl.u32 %v7350_v38, 16  ;;  %v630_v35 = vshll.u32 %v7350_v38, 16  ;;  %v7378_v34 = vld [vmem:[%s7079_s25 + $0x58] sm:$0xf] }
  0x48   : > { %6425 = vmatmul.mubr.bf16.gmra.mxu0 %v5459_v29  ;;  %v615_v46 = vsel %vm7110_vm2, %v610_v56, %v614_v33  ;;  %v620_v23 = vrot.slane %v619_v58, 4  ;;  %v441_v37 = vor.u32 %v440_v41, %v437_v63  ;;  %v450_v42 = vrot.slane %v448_v10, 4 }
  0x49   : > { %v456_v43 = vrot.slane %v454_v11, 5  ;;  %v636_v45 = vshll.u32 %v7358_v52, 16  ;;  %v629_v49 = vrot.slane %v627_v24, 4  ;;  %v632_v50 = vrot.slane %v630_v35, 5 }
  0x4a   : > { %6463 = vmatpush3.bf16.msra.mxu1 %v6895_v2  ;;  %6511 = vmatpush3.bf16.msra.mxu0 %v6896_v55  ;;  %v625_v33 = vsel %vm7110_vm2, %v620_v23, %v624_v48  ;;  %v640_v29 = vshrl.u32 %v7358_v52, 16  ;;  %v442_v56 = vrot.slane %v441_v37, 4  ;;  %v451_v58 = vor.u32 %v450_v42, %v446_v3  ;;  %v7387_v55 = vld [vmem:[%s7079_s25 + $0x5c] sm:$0x1]  ;;  %v7392_v48 = vld [vmem:[%s7079_s25 + $0xb4] sm:$0xf] }
  0x4b   : > { %6544 = vmatprep.subr.bf16.mxu1 %v7355_v47  ;;  %6592 = vmatprep.subr.bf16.mxu0 %v7363_v1  ;;  %v5467_v2 = vcombine.low %v615_v46, %v625_v33  ;;  %v638_v63 = vrot.slane %v636_v45, 5  ;;  %v633_v41 = vor.u32 %v632_v50, %v629_v49  ;;  %v646_v11 = vshll.u32 %v7368_v12, 16  ;;  %9749 = vst [vmem:[#allocation4_spill] sm:$0xff] %v7392_v48  ;;  %v7399_v37 = vld [vmem:[%s7079_s25 + $0xb8] sm:$0xf] }
  0x4c   : > { %v642_v10 = vrot.slane %v640_v29, 4  ;;  %v459_v21 = vshrl.u32 %v7371_v15, 16  ;;  %v447_v23 = vsel %vm7110_vm2, %v442_v56, %v446_v3  ;;  %v452_v24 = vrot.slane %v451_v58, 4  ;;  %9750 = vst [vmem:[#allocation5_spill] sm:$0xff] %v7399_v37  ;;  %v7405_v3 = vld [vmem:[%s7079_s25 + $0xbc] sm:$0x1] }
  0x4d   : > { %6441 = vmatmul.mubr.bf16.gmra.mxu1 %v5467_v2  ;;  %v462_v46 = vshll.u32 %v7371_v15, 16  ;;  %v468_v35 = vshll.u32 %v7378_v34, 16  ;;  %v634_v42 = vrot.slane %v633_v41, 4  ;;  %v648_v33 = vrot.slane %v646_v11, 5  ;;  %9751 = vst [vmem:[#allocation6_spill] sm:$0xff] %v7405_v3 }
  0x4e   : > { %v643_v45 = vor.u32 %v642_v10, %v638_v63  ;;  %v461_v49 = vrot.slane %v459_v21, 4  ;;  %v457_v50 = vsel %vm7110_vm2, %v452_v24, %v456_v43  ;;  %v472_v62 = vshrl.u32 %v7378_v34, 16  ;;  %v1269_v10 = vld [vmem:[%s7079_s25] sm:$0xe] }
  0x4f   : > { %v464_v29 = vrot.slane %v462_v46, 5  ;;  %v470_v2 = vrot.slane %v468_v35, 5  ;;  %v5460_v56 = vcombine.low %v447_v23, %v457_v50  ;;  %v639_v58 = vsel %vm7110_vm2, %v634_v42, %v638_v63 }
  0x50   : > { %v644_v20 = vrot.slane %v643_v45, 4  ;;  %v478_v41 = vshll.u32 %v7387_v55, 16  ;;  %v474_v21 = vrot.slane %v472_v62, 4  ;;  %v651_v12 = vshrl.u32 %v7392_v48, 16 }
  0x51   : > { %v465_v11 = vor.u32 %v464_v29, %v461_v49  ;;  %v654_v43 = vshll.u32 %v7392_v48, 16  ;;  %6428 = vmatprep.mubr.bf16.mxu0 %v5460_v56  ;;  %v660_v46 = vshll.u32 %v7399_v37, 16  ;;  %v664_v63 = vshrl.u32 %v7399_v37, 16  ;;  %v1270_v49 = vld [vmem:[%s7079_s25 + $0xc] sm:$0xe] }
  0x52   : > { %v649_v24 = vsel %vm7110_vm2, %v644_v20, %v648_v33  ;;  %v480_v23 = vrot.slane %v478_v41, 5  ;;  %v475_v45 = vor.u32 %v474_v21, %v470_v2  ;;  %v653_v50 = vrot.slane %v651_v12, 4  ;;  %v1271_v20 = vld [vmem:[%s7079_s25 + $0x18] sm:$0xe] }
  0x53   : > { %v5468_v35 = vcombine.low %v639_v58, %v649_v24  ;;  %v466_v42 = vrot.slane %v465_v11, 4  ;;  %v656_v62 = vrot.slane %v654_v43, 5  ;;  %v662_v29 = vrot.slane %v660_v46, 5 }
  0x54   : > { %v666_v38 = vrot.slane %v664_v63, 4  ;;  %v670_v48 = vshll.u32 %v7405_v3, 16  ;;  %v476_v58 = vrot.slane %v475_v45, 4  ;;  %v5502_v41 = vrot.slane %v1269_v10, 9 }
  0x55   : > { %6444 = vmatprep.mubr.bf16.mxu1 %v5468_v35  ;;  %v471_v33 = vsel %vm7110_vm2, %v466_v42, %v470_v2  ;;  %v1322_v12 = vrot.slane %v7088_v5, 5  ;;  %v657_v11 = vor.u32 %v656_v62, %v653_v50  ;;  %v5503_v24 = vrot.slane %v1270_v49, 9 }
  0x56   : > { %v667_v21 = vor.u32 %v666_v38, %v662_v29  ;;  %v672_v43 = vrot.slane %v670_v48, 5  ;;  %v481_v46 = vsel %vm7110_vm2, %v476_v58, %v480_v23  ;;  %v1329_v35 = vrot.slane %v7115_v32, 5 }
  0x57   : > { %v1323_v63 = vsel %vm7421_vm5, %v5502_v41, %v1322_v12  ;;  %v1324_v3 = vrot.slane %v1322_v12, 4  ;;  %v5461_v37 = vcombine.low %v471_v33, %v481_v46  ;;  %v658_v2 = vrot.slane %v657_v11, 4  ;;  %v1273_v12 = vld [vmem:[%s7079_s25 + $0x30] sm:$0xe]  ;;  %v1275_v46 = vld [vmem:[%s7079_s25 + $0x48] sm:$0xe] }
  0x58   : > { %v668_v42 = vrot.slane %v667_v21, 4  ;;  %v5478_v10 = vcombine.low %v7085_v4, %v7088_v5  ;;  %v9754_v38 = vrot.slane %v7091_v6, 5  ;;  %v1331_v45 = vrot.slane %v1329_v35, 4 }
  0x59   : > { %v5504_v23 = vrot.slane %v1271_v20, 9  ;;  %6429 = vmatmul.mubr.bf16.gmra.mxu0 %v5461_v37  ;;  %v663_v50 = vsel %vm7110_vm2, %v658_v2, %v662_v29  ;;  %v1336_v33 = vrot.slane %v7152_v19, 5  ;;  %v1330_v4 = vsel %vm7421_vm5, %v5503_v24, %v1329_v35  ;;  %v1274_v24 = vld [vmem:[%s7079_s25 + $0x3c] sm:$0xe] }
  0x5a   : > { %v1326_v48 = vsel %vm7421_vm5, %v1324_v3, %v9754_v38  ;;  %v673_v49 = vsel %vm7110_vm2, %v668_v42, %v672_v43  ;;  %v9755_v5 = vrot.slane %v7121_v40, 5  ;;  %v1339_v37 = vrot.slane %v7157_v25, 5  ;;  %v1272_v3 = vld [vmem:[%s7079_s25 + $0x24] sm:$0xe]  ;;  %v6904_v25 = vld [vmem:[%s9718_s1 + $0x130] sm:$0xff]  }
  0x5b   : > { %v5534_v62 = vcombine.low %v1323_v63, %v1326_v48  ;;  %v5469_v58 = vcombine.low %v663_v50, %v673_v49  ;;  %v1337_v29 = vsel %vm7421_vm5, %v5504_v23, %v1336_v33  ;;  %v1338_v20 = vrot.slane %v1336_v33, 4  ;;  %v6903_v23 = vld [vmem:[%s9718_s1 + $0xf0] sm:$0xff]  }
  0x5c   : > { %v1333_v6 = vsel %vm7421_vm5, %v1331_v45, %v9755_v5  ;;  %v1343_v41 = vrot.slane %v7193_v0, 5  ;;  %v5505_v21 = vrot.slane %v1272_v3, 9  ;;  %v1350_v43 = vrot.slane %v7240_v60, 5  ;;  %v7496_v3 = vld [vmem:[%s7079_s25 + $0x68] sm:$0x1] }
  0x5d   : > { %6512 = vmatprep.mubr.bf16.mxu0 %v5534_v62  ;;  %6445 = vmatmul.mubr.bf16.gmra.mxu1 %v5469_v58  ;;  %v5535_v11 = vcombine.low %v1330_v4, %v1333_v6  ;;  %v1340_v40 = vsel %vm7421_vm5, %v1338_v20, %v1339_v37  ;;  %v1346_v2 = vrot.slane %v7196_v8, 5  ;;  %v5506_v42 = vrot.slane %v1273_v12, 9  ;;  %v1276_v37 = vld [vmem:[%s7079_s25 + $0x54] sm:$0xe]  ;;  %v7520_v12 = vld [vmem:[%s7079_s25 + $0x60] sm:$0xe] }
  0x5e   : > { %6464 = vmatprep.mubr.bf16.mxu1 %v5478_v10  ;;  %v5536_v63 = vcombine.low %v1337_v29, %v1340_v40  ;;  %v1345_v35 = vrot.slane %v1343_v41, 4  ;;  %v1352_v38 = vrot.slane %v1350_v43, 4  ;;  %v1353_v10 = vrot.slane %v7248_v16, 5 }
  0x5f   : > { %v1357_v48 = vrot.slane %v7284_v54, 5  ;;  %v5480_v45 = vcombine.low %v7144_v14, %v7152_v19  ;;  %v1364_v50 = vrot.slane %v7333_v17, 5  ;;  %v5507_v49 = vrot.slane %v1274_v24, 9  ;;  %v6912_v24 = vld [vmem:[%s9718_s1 + $0x120] sm:$0xff]  }
  0x60   : > { %v1360_v8 = vrot.slane %v7291_v7, 5  ;;  %v5508_v33 = vrot.slane %v1275_v46, 9  ;;  %v1344_v14 = vsel %vm7421_vm5, %v5505_v21, %v1343_v41  ;;  %v1347_v19 = vsel %vm7421_vm5, %v1345_v35, %v1346_v2  ;;  %v7532_v46 = vld [vmem:[%s7079_s25 + $0x78] sm:$0xe]  ;;  %v6911_v2 = vld [vmem:[%s9718_s1 + $0xe0] sm:$0xff]  }
  0x61   : > { %6513 = vmatmul.mubr.bf16.vlgmr.msra.gmra.mxu0 %v5535_v11  ;;  %v1359_v62 = vrot.slane %v1357_v48, 4  ;;  %v1366_v16 = vrot.slane %v1364_v50, 4  ;;  %v1367_v58 = vrot.slane %v7342_v30, 5  ;;  %v1351_v4 = vsel %vm7421_vm5, %v5506_v42, %v1350_v43  ;;  %v7523_v11 = vld [vmem:[%s7079_s25 + $0x6c] sm:$0xe] }
  0x62   : > { %6593 = vmatpush3.bf16.msra.mxu0 %v7363_v1  ;;  %6516 = vmatprep.mubr.bf16.mxu0 %v5536_v63  ;;  %v1354_v7 = vsel %vm7421_vm5, %v1352_v38, %v1353_v10  ;;  %v6908_v1 = vld [vmem:[%s9718_s1 + $0x128] sm:$0xff]   ;;  %v1371_v5 = vrot.slane %v7378_v34, 5  ;;  %v9756_v6 = vcombine.low %v7106_v26, %v7115_v32  ;;  %v5481_v30 = vcombine.low %v7184_v57, %v7193_v0  ;;  %v1280_v63 = vld [vmem:[%s7079_s25 + $0x84] sm:$0xe]  ;;  %v1281_v42 = vld [vmem:[%s7079_s25 + $0x90] sm:$0xe] }
  0x63   : > { %6594 = vmatprep.subr.bf16.mxu0 %v6904_v25  ;;  %v1381_v29 = vrot.slane %v7496_v3, 5  ;;  %v5537_v20 = vcombine.low %v1344_v14, %v1347_v19  ;;  %v7502_v41 = vsel %vm7421_vm5, %v5507_v49, %v1357_v48  ;;  %v7506_v26 = vsel %vm7421_vm5, %v1359_v62, %v1360_v8  ;;  %v6907_v32 = vld [vmem:[%s9718_s1 + $0xe8] sm:$0xff]   ;;  %v7551_v48 = vld [vmem:[%s7079_s25 + $0x64] sm:$0xf]  ;;  %v1282_v49 = vld [vmem:[%s7079_s25 + $0x9c] sm:$0xe] }
  0x64   : > { %v5538_v57 = vcombine.low %v1351_v4, %v1354_v7  ;;  %v7513_v0 = vsel %vm7421_vm5, %v5508_v33, %v1364_v50  ;;  %v5482_v40 = vcombine.low %v7231_v53, %v7240_v60  ;;  %v5509_v21 = vrot.slane %v1276_v37, 9  ;;  %v7573_v4 = vld [vmem:[%s7079_s25 + $0x74] sm:$0x1] }
  0x65   : > { %6465 = vmatmul.mubr.bf16.vlgmr.msra.gmra.mxu1 %v9756_v6  ;;  %v1374_v43 = vrot.slane %v7387_v55, 5  ;;  %v5483_v35 = vcombine.low %v7281_v51, %v7284_v54  ;;  %v5539_v53 = vcombine.low %v7502_v41, %v7506_v26  ;;  %v5484_v60 = vcombine.low %v7324_v59, %v7333_v17  ;;  %v6997_v54 = vld [vmem:[%s7079_s25 + $0x80] sm:$0x1] }
  0x66   : > { %6545 = vmatpush3.bf16.msra.mxu1 %v7355_v47  ;;  %6468 = vmatprep.mubr.bf16.mxu1 %v5480_v45  ;;  %v7517_v47 = vsel %vm7421_vm5, %v1366_v16, %v1367_v58  ;;  %v5485_v55 = vcombine.low %v7371_v15, %v7378_v34  ;;  %v5510_v10 = vrot.slane %v7520_v12, 9  ;;  %v1378_v45 = vrot.slane %v7551_v48, 5  ;;  %v7569_v16 = vld [vmem:[%s7079_s25 + $0x70] sm:$0xf]  ;;  %v6998_v17 = vld [vmem:[%s7079_s25 + $0x60] sm:$0xf] }
  0x67   : > { %6546 = vmatprep.subr.bf16.mxu1 %v6903_v23  ;;  %6595 = vmatpush3.bf16.msra.mxu0 %v6904_v25  ;;  %v1373_v25 = vrot.slane %v1371_v5, 4  ;;  %v5540_v38 = vcombine.low %v7513_v0, %v7517_v47  ;;  %v5511_v62 = vrot.slane %v7523_v11, 9  ;;  %v1399_v8 = vrot.slane %v7207_v22, 5  ;;  %v1283_v0 = vld [vmem:[%s7079_s25 + $0xa8] sm:$0xe]  ;;  %v7753_v15 = vld [vmem:[%s9718_s1 + $0x1b8] sm:$0xff]  }
  0x68   : > { %6596 = vmatprep.subr.bf16.mxu0 %v6908_v1  ;;  %v1402_v33 = vrot.slane %v7216_v36, 5  ;;  %v7562_v14 = vsel %vm7421_vm5, %v5509_v21, %v1371_v5  ;;  %v1385_v58 = vrot.slane %v7569_v16, 5  ;;  %v1388_v7 = vrot.slane %v7573_v4, 5  ;;  %v6915_v36 = vld [vmem:[%s9718_s1 + $0xd8] sm:$0xff]  }
  0x69   : > { %6517 = vmatmul.mubr.bf16.gmra.mxu0 %v5537_v20  ;;  %v7566_v19 = vsel %vm7421_vm5, %v1373_v25, %v1374_v43  ;;  %v5512_v5 = vrot.slane %v7532_v46, 9  ;;  %v1401_v37 = vrot.slane %v1399_v8, 4  ;;  %v5514_v41 = vrot.slane %v1281_v42, 9  ;;  %v5630_v42 = vld [vmem:[%s7079_s25 + $0xc] sm:$0xf] }
  0x6a   : > { %6547 = vmatpush3.bf16.msra.mxu1 %v6903_v23  ;;  %6520 = vmatprep.mubr.bf16.mxu0 %v5538_v57  ;;  %v5513_v23 = vrot.slane %v1280_v63, 9  ;;  %v1406_v26 = vrot.slane %v7258_v31, 5  ;;  %v1409_v57 = vrot.slane %v7268_v44, 5  ;;  %v1392_v47 = vrot.slane %v7166_v39, 5 }
  0x6b   : > { %6548 = vmatprep.subr.bf16.mxu1 %v6907_v32  ;;  %6597 = vmatpush3.bf16.msra.mxu0 %v6908_v1  ;;  %v6916_v1 = vld [vmem:[%s9718_s1 + $0x118] sm:$0xff]   ;;  %v7597_v21 = vsel %vm7421_vm5, %v1401_v37, %v1402_v33  ;;  %v1413_v63 = vrot.slane %v7303_v28, 5  ;;  %v5516_v33 = vrot.slane %v1283_v0, 9  ;;  %v1420_v37 = vrot.slane %v7358_v52, 5  ;;  %v6919_v0 = vld [vmem:[%s9718_s1 + $0xd0] sm:$0xff]  }
  0x6c   : > { %6598 = vmatprep.subr.bf16.mxu0 %v6912_v24  ;;  %v7585_v6 = vsel %vm7421_vm5, %v5513_v23, %v1399_v8  ;;  %v7605_v44 = vsel %vm7421_vm5, %v5514_v41, %v1406_v26  ;;  %v1408_v43 = vrot.slane %v1406_v26, 4  ;;  %v6920_v23 = vld [vmem:[%s9718_s1 + $0x110] sm:$0xff]   ;;  %v1416_v8 = vrot.slane %v7319_v61, 5  ;;  %v9758_v61 = vld [vmem:[#allocation3_spill] sm:$0xff] }
  0x6d   : > { %6469 = vmatmul.mubr.bf16.gmra.mxu1 %v5481_v30  ;;  %v1380_v30 = vrot.slane %v1378_v45, 4  ;;  %v1415_v20 = vrot.slane %v1413_v63, 4  ;;  %v1423_v50 = vrot.slane %v9758_v61, 5  ;;  %v1379_v61 = vsel %vm7421_vm5, %v5510_v10, %v1378_v45  ;;  %v5633_v45 = vld [vmem:[%s7079_s25 + $0x18] sm:$0xf] }
  0x6e   : > { %6472 = vmatprep.mubr.bf16.mxu1 %v5482_v40  ;;  %6549 = vmatpush3.bf16.msra.mxu1 %v6907_v32  ;;  %v5515_v40 = vrot.slane %v1282_v49, 9  ;;  %v7617_v32 = vld [vmem:[%s7079_s25 + $0x10] sm:$0xf]  ;;  %v7621_v41 = vsel %vm7421_vm5, %v1408_v43, %v1409_v57  ;;  %v1422_v57 = vrot.slane %v1420_v37, 4  ;;  %v2190_v12 = vshrl.u32 %v5630_v42, 16 }
  0x6f   : > { %6550 = vmatprep.subr.bf16.mxu1 %v6911_v2  ;;  %6599 = vmatpush3.bf16.msra.mxu0 %v6912_v24  ;;  %v9757_v24 = vld [vmem:[#allocation2_spill] sm:$0xff]  ;;  %v9760_v43 = vld [vmem:[#allocation4_spill] sm:$0xff]  ;;  %v2193_v10 = vshll.u32 %v5630_v42, 16  ;;  %v1387_v51 = vrot.slane %v1385_v58, 4  ;;  %v2199_v59 = vshll.u32 %v7617_v32, 16  ;;  %v1393_v4 = vsel %vm7421_vm5, %v5512_v5, %v1392_v47 }
  0x70   : > { %6600 = vmatprep.subr.bf16.mxu0 %v6916_v1  ;;  %v7625_v26 = vsel %vm7421_vm5, %v5515_v40, %v1413_v63  ;;  %v9759_v40 = vld [vmem:[#allocation5_spill] sm:$0xff]  ;;  %v7691_v42 = vld [vmem:[%s7079_s25 + $0x14] sm:$0x1]  ;;  %v2192_v63 = vrot.slane %v2190_v12, 4  ;;  %v9762_v5 = vld [vmem:[#allocation6_spill] sm:$0xff] }
  0x71   : > { %6521 = vmatmul.mubr.bf16.gmra.mxu0 %v5539_v53  ;;  %v2195_v49 = vrot.slane %v2193_v10, 5  ;;  %v5636_v53 = vld [vmem:[%s7079_s25 + $0x24] sm:$0xf]  ;;  %v1389_v11 = vsel %vm7421_vm5, %v1387_v51, %v1388_v7 }
  0x72   : > { %6551 = vmatpush3.bf16.msra.mxu1 %v6911_v2  ;;  %6524 = vmatprep.mubr.bf16.mxu0 %v5540_v38  ;;  %v7635_v2 = vsel %vm7421_vm5, %v5516_v33, %v1420_v37  ;;  %v5541_v38 = vcombine.low %v7562_v14, %v7566_v19  ;;  %v1382_v33 = vsel %vm7421_vm5, %v1380_v30, %v1381_v29  ;;  %v6924_v14 = vld [vmem:[%s9718_s1 + $0x108] sm:$0xff]   ;;  %v6928_v30 = vld [vmem:[%s9718_s1 + $0x100] sm:$0xff]   ;;  %v7710_v19 = vrot.slane %v2199_v59, 5 }
  0x73   : > { %6552 = vmatprep.subr.bf16.mxu1 %v6915_v36  ;;  %6601 = vmatpush3.bf16.msra.mxu0 %v6916_v1  ;;  %v7653_v37 = vsel %vm7421_vm5, %v1415_v20, %v1416_v8  ;;  %v7665_v29 = vsel %vm7421_vm5, %v1422_v57, %v1423_v50  ;;  %v6923_v50 = vld [vmem:[%s9718_s1 + $0xc8] sm:$0xff]   ;;  %v7680_v1 = vld [vmem:[%s7079_s25 + $0xb4] sm:$0xe]  ;;  %v5542_v20 = vcombine.low %v1379_v61, %v1382_v33  ;;  %v2203_v8 = vshrl.u32 %v7617_v32, 16  ;;  %v7708_v61 = vld [vmem:[%s7079_s25 + $0x1c] sm:$0xf] }
  0x74   : > { %6602 = vmatprep.subr.bf16.mxu0 %v6920_v23  ;;  %v7695_v57 = vld [vmem:[%s7079_s25 + $0x6c] sm:$0xf]  ;;  %v2214_v33 = vshrl.u32 %v5633_v45, 16  ;;  %v2223_v51 = vshll.u32 %v7708_v61, 16  ;;  %v2227_v39 = vshrl.u32 %v7708_v61, 16  ;;  %v2238_v59 = vshrl.u32 %v5636_v53, 16 }
  0x75   : > { %6473 = vmatmul.mubr.bf16.gmra.mxu1 %v5483_v35  ;;  %v1395_v35 = vrot.slane %v6997_v54, 5  ;;  %v5487_v54 = vcombine.low %v7695_v57, %v7569_v16  ;;  %v2205_v3 = vrot.slane %v2203_v8, 4  ;;  %v2241_v46 = vshll.u32 %v5636_v53, 16  ;;  %v7001_v8 = vld [vmem:[%s7079_s25 + $0x7c] sm:$0xf] }
  0x76   : > { %6476 = vmatprep.mubr.bf16.mxu1 %v5484_v60  ;;  %6553 = vmatpush3.bf16.msra.mxu1 %v6915_v36  ;;  %v5486_v60 = vcombine.low %v6998_v17, %v7551_v48  ;;  %v1394_v36 = vrot.slane %v1392_v47, 4  ;;  %v7705_v48 = vsel %vm7421_vm5, %v5511_v62, %v1385_v58  ;;  %v2217_v17 = vshll.u32 %v5633_v45, 16  ;;  %v6927_v58 = vld [vmem:[%s9718_s1 + $0xc0] sm:$0xff]   ;;  %v7735_v45 = vld [vmem:[%s7079_s25 + $0x28] sm:$0xf] }
  0x77   : > { %6554 = vmatprep.subr.bf16.mxu1 %v6919_v0  ;;  %6603 = vmatpush3.bf16.msra.mxu0 %v6920_v23  ;;  %v9730_v62 = vrot.slane %v9759_v40, 5  ;;  %v7722_v23 = vld [vmem:[%s7079_s25 + $0x20] sm:$0x1]  ;;  %v2216_v12 = vrot.slane %v2214_v33, 4  ;;  %9761 = vst [vmem:[#allocation2_spill] sm:$0xff] %v7735_v45  ;;  %v5543_v34 = vcombine.low %v7705_v48, %v1389_v11  ;;  %v2247_v53 = vshll.u32 %v7735_v45, 16 }
  0x78   : > { %6604 = vmatprep.subr.bf16.mxu0 %v6924_v14  ;;  %v2219_v10 = vrot.slane %v2217_v17, 5  ;;  %v1396_v7 = vsel %vm7421_vm5, %v1394_v36, %v1395_v35  ;;  %v2196_v35 = vor.u32 %v2195_v49, %v2192_v63  ;;  %v7748_v36 = vld [vmem:[%s9718_s1 + $0x178] sm:$0xff]   ;;  %v5639_v63 = vld [vmem:[%s7079_s25 + $0x30] sm:$0xf]  ;;  %v7769_v48 = vld [vmem:[%s7079_s25 + $0x34] sm:$0xf] }
  0x79   : > { %6525 = vmatmul.mubr.bf16.gmra.mxu0 %v5541_v38  ;;  %v2209_v38 = vshll.u32 %v7691_v42, 16  ;;  %v5544_v17 = vcombine.low %v1393_v4, %v1396_v7  ;;  %9764 = vst [vmem:[#allocation5_spill] sm:$0xff] %v7769_v48  ;;  %v7771_v11 = vrot.slane %v2223_v51, 5  ;;  %v2243_v47 = vrot.slane %v2241_v46, 5  ;;  %v7790_v46 = vld [vmem:[%s7079_s25 + $0x40] sm:$0xf] }
  0x7a   : > { %6555 = vmatpush3.bf16.msra.mxu1 %v6919_v0  ;;  %6528 = vmatprep.mubr.bf16.mxu0 %v5542_v20  ;;  %v2206_v20 = vor.u32 %v2205_v3, %v7710_v19  ;;  %v2220_v49 = vor.u32 %v2219_v10, %v2216_v12  ;;  %v7000_v3 = vld [vmem:[%s7079_s25 + $0x78] sm:$0xf]  ;;  %v2229_v12 = vrot.slane %v2227_v39, 4  ;;  %v2240_v10 = vrot.slane %v2238_v59, 4  ;;  %9765 = vst [vmem:[#allocation4_spill] sm:$0xff] %v7790_v46 }
  0x7b   : > { %6556 = vmatprep.subr.bf16.mxu1 %v6923_v50  ;;  %6605 = vmatpush3.bf16.msra.mxu0 %v6924_v14  ;;  %v2233_v14 = vshll.u32 %v7722_v23, 16  ;;  %v5488_v33 = vcombine.low %v7000_v3, %v7001_v8  ;;  %v7762_v25 = vrot.slane %v2209_v38, 5  ;;  %v7774_v0 = vld [vmem:[%s7079_s25 + $0x38] sm:$0x1]  ;;  %v7776_v4 = vrot.slane %v2196_v35, 4 }
  0x7c   : > { %6606 = vmatprep.subr.bf16.mxu0 %v6928_v30  ;;  %v7778_v7 = vrot.slane %v2206_v20, 4  ;;  %v2262_v3 = vshrl.u32 %v5639_v63, 16  ;;  %v5642_v8 = vld [vmem:[%s7079_s25 + $0x3c] sm:$0xf]  ;;  %v7786_v51 = vrot.slane %v2247_v53, 5  ;;  %v2265_v39 = vshll.u32 %v5639_v63, 16 }
  0x7d   : > { %6477 = vmatmul.mubr.bf16.gmra.mxu1 %v5485_v55  ;;  %v1429_v55 = vrot.slane %v9730_v62, 4  ;;  %v7780_v38 = vrot.slane %v2233_v14, 5  ;;  %v2271_v59 = vshll.u32 %v7769_v48, 16  ;;  %v2275_v20 = vshrl.u32 %v7769_v48, 16 }
  0x7e   : > { %6480 = vmatprep.mubr.bf16.mxu1 %v5486_v60  ;;  %6557 = vmatpush3.bf16.msra.mxu1 %v6923_v50  ;;  %v7765_v60 = vld [vmem:[%s7079_s25 + $0x2c] sm:$0x1]  ;;  %v2251_v50 = vshrl.u32 %v7735_v45, 16  ;;  %v2230_v14 = vor.u32 %v2229_v12, %v7771_v11  ;;  %v2264_v53 = vrot.slane %v2262_v3, 4  ;;  %v2267_v63 = vrot.slane %v2265_v39, 5 }
  0x7f   : > { %6558 = vmatprep.subr.bf16.mxu1 %v6927_v58  ;;  %9763 = vst [vmem:[#allocation3_spill] sm:$0xff] %v7765_v60  ;;  %6607 = vmatpush3.bf16.msra.mxu0 %v6928_v30  ;;  %v7784_v30 = vrot.slane %v2220_v49, 4  ;;  %v2286_v49 = vshrl.u32 %v5642_v8, 16  ;;  %v2289_v62 = vshll.u32 %v5642_v8, 16  ;;  %v2277_v48 = vrot.slane %v2275_v20, 4 }
  0x80   : > { %6688 = vmatprep.subr.bf16.mxu0 %v7753_v15  ;;  %v2253_v35 = vrot.slane %v2251_v50, 4  ;;  %v7800_v50 = vrot.slane %v2271_v59, 5  ;;  %v7803_v45 = vld [vmem:[%s7079_s25 + $0x44] sm:$0x1]  ;;  %v2299_v12 = vshrl.u32 %v7790_v46, 16  ;;  %v9766_v16 = vrot.slane %v9759_v40, 5 }
  0x81   : > { %6529 = vmatmul.mubr.bf16.gmra.mxu0 %v5543_v34  ;;  %v2257_v34 = vshll.u32 %v7765_v60, 16  ;;  %v9767_v57 = vrot.slane %v7680_v1, 9  ;;  %v7824_v39 = vld [vmem:[%s7079_s25 + $0x4c] sm:$0xf]  ;;  %v2288_v59 = vrot.slane %v2286_v49, 4  ;;  %v2291_v20 = vrot.slane %v2289_v62, 5 }
  0x82   : > { %6559 = vmatpush3.bf16.msra.mxu1 %v6927_v58  ;;  %6532 = vmatprep.mubr.bf16.mxu0 %v5544_v17  ;;  %v2244_v58 = vor.u32 %v2243_v47, %v2240_v10  ;;  %v2281_v17 = vshll.u32 %v7774_v0, 16  ;;  %v2295_v47 = vshll.u32 %v7790_v46, 16  ;;  %v5645_v10 = vld [vmem:[%s7079_s25 + $0x48] sm:$0xf]  ;;  %v2254_v8 = vor.u32 %v2253_v35, %v7786_v51 }
  0x83   : > { %6640 = vmatprep.subr.bf16.mxu1 %v7748_v36  ;;  %v2301_v1 = vrot.slane %v2299_v12, 4  ;;  %v7828_v46 = vrot.slane %v2230_v14, 4  ;;  %v2202_v62 = vsel %vm7110_vm2, %v7776_v4, %v7710_v19  ;;  %v2212_v35 = vsel %vm7110_vm2, %v7778_v7, %v7762_v25  ;;  %v5648_v4 = vld [vmem:[%s7079_s25 + $0x54] sm:$0xf] }
  0x84   : > { %v7826_v60 = vrot.slane %v2295_v47, 5  ;;  %v2313_v14 = vshll.u32 %v5645_v10, 16  ;;  %v2305_v49 = vshll.u32 %v7803_v45, 16  ;;  %v2323_v19 = vshrl.u32 %v7824_v39, 16 }
  0x85   : > { %6481 = vmatmul.mubr.bf16.gmra.mxu1 %v5487_v54  ;;  %v7814_v54 = vsel %vm7421_vm5, %v9767_v57, %v9766_v16  ;;  %v7830_v16 = vrot.slane %v2244_v58, 4  ;;  %v7832_v57 = vrot.slane %v2257_v34, 5  ;;  %v2319_v58 = vshll.u32 %v7824_v39, 16 }
  0x86   : > { %6484 = vmatprep.mubr.bf16.mxu1 %v5488_v33  ;;  %v9768_v33 = vrot.slane %v9762_v5, 5  ;;  %v2310_v5 = vshrl.u32 %v5645_v10, 16  ;;  %v9770_v34 = vcombine.low %v7605_v44, %v7621_v41  ;;  %v7853_v47 = vrot.slane %v2254_v8, 4  ;;  %v7859_v10 = vld [vmem:[%s7079_s25 + $0x58] sm:$0xf] }
  0x87   : > { %v7855_v12 = vrot.slane %v2281_v17, 5  ;;  %v2292_v25 = vor.u32 %v2291_v20, %v2288_v59  ;;  %v2302_v7 = vor.u32 %v2301_v1, %v7826_v60  ;;  %v9771_v44 = vcombine.low %v7200_v13, %v7207_v22  ;;  %v7865_v41 = vld [vmem:[%s7079_s25 + $0x50] sm:$0x1] }
  0x88   : > { %v7820_v3 = vsel %vm7421_vm5, %v1429_v55, %v9768_v33  ;;  %v9769_v55 = vcombine.low %v7585_v6, %v7597_v21  ;;  %v2268_v6 = vor.u32 %v2267_v63, %v2264_v53  ;;  %v2278_v21 = vor.u32 %v2277_v48, %v7800_v50 }
  0x89   : > { %v2312_v48 = vrot.slane %v2310_v5, 4  ;;  %v2315_v53 = vrot.slane %v2313_v14, 5  ;;  %v7867_v63 = vrot.slane %v2319_v58, 5  ;;  %v2325_v17 = vrot.slane %v2323_v19, 4  ;;  %v5651_v5 = vld [vmem:[%s7079_s25 + $0x60] sm:$0xf] }
  0x8a   : > { %6533 = vmatmul.mubr.bf16.gmra.mxu0 %v9769_v55  ;;  %v9772_v33 = vcombine.low %v7252_v18, %v7258_v31  ;;  %v2334_v8 = vshrl.u32 %v5648_v4, 16  ;;  %v2337_v59 = vshll.u32 %v5648_v4, 16  ;;  %v7872_v20 = vrot.slane %v2268_v6, 4  ;;  %v7889_v31 = vld [vmem:[%s7079_s25 + $0x64] sm:$0xf] }
  0x8b   : > { %6536 = vmatprep.mubr.bf16.mxu0 %v9770_v34  ;;  %v7874_v1 = vrot.slane %v2278_v21, 4  ;;  %v7876_v13 = vrot.slane %v2305_v49, 5  ;;  %v2343_v22 = vshll.u32 %v7859_v10, 16  ;;  %v5549_v55 = vcombine.low %v7814_v54, %v7820_v3  ;;  %v7885_v34 = vld [vmem:[%s7079_s25 + $0x5c] sm:$0x1] }
  0x8c   : > { %v5694_v14 = vcombine.low %v2202_v62, %v2212_v35  ;;  %v7882_v58 = vrot.slane %v2292_v25, 4  ;;  %v2347_v18 = vshrl.u32 %v7859_v10, 16  ;;  %v7891_v6 = vrot.slane %v2302_v7, 4 }
  0x8d   : > { %6485 = vmatmul.mubr.bf16.gmra.mxu1 %v9771_v44  ;;  %v2329_v21 = vshll.u32 %v7865_v41, 16  ;;  %v2358_v49 = vshrl.u32 %v5651_v5, 16  ;;  %v2361_v19 = vshll.u32 %v5651_v5, 16  ;;  %v9773_v4 = vcombine.low %v7625_v26, %v7653_v37 }
  0x8e   : > { %6488 = vmatprep.mubr.bf16.mxu1 %v9772_v33  ;;  %v2316_v54 = vor.u32 %v2315_v53, %v2312_v48  ;;  %v2326_v3 = vor.u32 %v2325_v17, %v7867_v63  ;;  %v2336_v62 = vrot.slane %v2334_v8, 4  ;;  %v2339_v35 = vrot.slane %v2337_v59, 5  ;;  %v7929_v8 = vld [vmem:[%s7079_s25 + $0x70] sm:$0xf] }
  0x8f   : > { %v9774_v25 = vcombine.low %v7635_v2, %v7665_v29  ;;  %v7901_v7 = vrot.slane %v2343_v22, 5  ;;  %v2349_v44 = vrot.slane %v2347_v18, 4  ;;  %v2353_v33 = vshll.u32 %v7885_v34, 16 }
  0x90   : > { %v2367_v26 = vshll.u32 %v7889_v31, 16  ;;  %v2226_v37 = vsel %vm7110_vm2, %v7784_v30, %v7771_v11  ;;  %v2236_v2 = vsel %vm7110_vm2, %v7828_v46, %v7780_v38  ;;  %v2360_v29 = vrot.slane %v2358_v49, 4  ;;  %v5654_v46 = vld [vmem:[%s7079_s25 + $0x6c] sm:$0xf] }
  0x91   : > { %v2363_v48 = vrot.slane %v2361_v19, 5  ;;  %v9775_v53 = vcombine.low %v7294_v9, %v7303_v28  ;;  %v2250_v17 = vsel %vm7110_vm2, %v7830_v16, %v7786_v51  ;;  %v2260_v11 = vsel %vm7110_vm2, %v7853_v47, %v7832_v57  ;;  %v7937_v16 = vld [vmem:[%s7079_s25 + $0x68] sm:$0x1] }
  0x92   : > { %6537 = vmatmul.mubr.bf16.gmra.mxu0 %v9773_v4  ;;  %v7924_v30 = vrot.slane %v2329_v21, 5  ;;  %v2371_v38 = vshrl.u32 %v7889_v31, 16  ;;  %v9776_v9 = vcombine.low %v9757_v24, %v7358_v52  ;;  %v7934_v28 = vrot.slane %v2316_v54, 4  ;;  %v6929_v52 = vld [vmem:[%s7079_s25 + $0xc] sm:$0xff]  }
  0x93   : > { %6540 = vmatprep.mubr.bf16.mxu0 %v9774_v25  ;;  %v2340_v51 = vor.u32 %v2339_v35, %v2336_v62  ;;  %v2382_v59 = vshrl.u32 %v5654_v46, 16  ;;  %v2385_v57 = vshll.u32 %v5654_v46, 16  ;;  %v7939_v47 = vrot.slane %v2326_v3, 4  ;;  %v7950_v62 = vld [vmem:[%s7079_s25 + $0x74] sm:$0x1] }
  0x94   : > { %v2350_v22 = vor.u32 %v2349_v44, %v7901_v7  ;;  %v7942_v5 = vrot.slane %v2353_v33, 5  ;;  %v2391_v18 = vshll.u32 %v7929_v8, 16  ;;  %v2364_v24 = vor.u32 %v2363_v48, %v2360_v29  ;;  %v5657_v25 = vld [vmem:[%s7079_s25 + $0x78] sm:$0xf]  ;;  %v7954_v44 = vld [vmem:[%s7079_s25 + $0x7c] sm:$0xf] }
  0x95   : > { %6489 = vmatmul.mubr.bf16.gmra.mxu1 %v9775_v53  ;;  %v7946_v21 = vrot.slane %v2367_v26, 5  ;;  %v2373_v49 = vrot.slane %v2371_v38, 4  ;;  %v2395_v19 = vshrl.u32 %v7929_v8, 16  ;;  %v5695_v4 = vcombine.low %v2226_v37, %v2236_v2  ;;  %v7961_v26 = vld [vmem:[%s7079_s25 + $0x80] sm:$0x1] }
  0x96   : > { %6492 = vmatprep.mubr.bf16.mxu1 %v9776_v9  ;;  %v5696_v54 = vcombine.low %v2250_v17, %v2260_v11  ;;  %v2384_v3 = vrot.slane %v2382_v59, 4  ;;  %v2387_v35 = vrot.slane %v2385_v57, 5  ;;  %v7956_v33 = vrot.slane %v2340_v51, 4 }
  0x97   : > { %v7958_v53 = vrot.slane %v2391_v18, 5  ;;  %v2397_v29 = vrot.slane %v2395_v19, 4  ;;  %v2406_v48 = vshrl.u32 %v5657_v25, 16  ;;  %v2377_v37 = vshll.u32 %v7937_v16, 16  ;;  %v5660_v19 = vld [vmem:[%s7079_s25 + $0x84] sm:$0xf] }
  0x98   : > { %v2409_v2 = vshll.u32 %v5657_v25, 16  ;;  %v2415_v17 = vshll.u32 %v7954_v44, 16  ;;  %v2419_v11 = vshrl.u32 %v7954_v44, 16  ;;  %v7966_v38 = vrot.slane %v2350_v22, 4  ;;  %v6933_v25 = vld [vmem:[%s7079_s25 + $0x24] sm:$0xff]  }
  0x99   : > { %v7968_v46 = vrot.slane %v2364_v24, 4  ;;  %v2408_v9 = vrot.slane %v2406_v48, 4  ;;  %v9777_v51 = vcombine.low %v9760_v43, %v9759_v40  ;;  %v2274_v22 = vsel %vm7110_vm2, %v7872_v20, %v7800_v50 }
  0x9a   : > { %6541 = vmatmul.mubr.bf16.gmra.mxu0 %v5549_v55  ;;  %v2374_v55 = vor.u32 %v2373_v49, %v7946_v21  ;;  %v2411_v59 = vrot.slane %v2409_v2, 5  ;;  %v7974_v57 = vrot.slane %v2415_v17, 5  ;;  %v2421_v18 = vrot.slane %v2419_v11, 4  ;;  %v8023_v17 = vld [vmem:[%s7079_s25 + $0x8c] sm:$0x1] }
  0x9b   : > { %6608 = vmatprep.mubr.bf16.mxu0 %v5694_v14  ;;  %v2388_v14 = vor.u32 %v2387_v35, %v2384_v3  ;;  %v2398_v24 = vor.u32 %v2397_v29, %v7958_v53  ;;  %v2401_v49 = vshll.u32 %v7950_v62, 16  ;;  %v2425_v40 = vshll.u32 %v7961_v26, 16  ;;  %v7997_v3 = vld [vmem:[%s7079_s25 + $0x88] sm:$0xf]  ;;  %v6930_v35 = vld [vmem:[%s7079_s25 + $0x18] sm:$0xff]  }
  0x9c   : > { %v2284_v43 = vsel %vm7110_vm2, %v7874_v1, %v7855_v12  ;;  %v2308_v50 = vsel %vm7110_vm2, %v7891_v6, %v7876_v13  ;;  %v2412_v20 = vor.u32 %v2411_v59, %v2408_v9  ;;  %v6936_v12 = vld [vmem:[%s9718_s1 + $0x1b0] sm:$0xff]   ;;  %v8004_v1 = vrot.slane %v2377_v37, 5  ;;  %v8028_v11 = vld [vmem:[%s9718_s1 + $0x1a8] sm:$0xff]  }
  0x9d   : > { %6493 = vmatmul.mubr.bf16.gmra.mxu1 %v9777_v51  ;;  %v2433_v29 = vshll.u32 %v5660_v19, 16  ;;  %v6935_v13 = vld [vmem:[%s9718_s1 + $0x170] sm:$0xff]   ;;  %v2322_v6 = vsel %vm7110_vm2, %v7934_v28, %v7867_v63  ;;  %v2332_v48 = vsel %vm7110_vm2, %v7939_v47, %v7924_v30  ;;  %v8018_v37 = vrot.slane %v2374_v55, 4 }
  0x9e   : > { %6560 = vmatprep.mubr.bf16.mxu1 %v6929_v52  ;;  %v2298_v52 = vsel %vm7110_vm2, %v7882_v58, %v7826_v60  ;;  %v2422_v60 = vor.u32 %v2421_v18, %v7974_v57  ;;  %v2430_v58 = vshrl.u32 %v5660_v19, 16  ;;  %v8020_v2 = vrot.slane %v2388_v14, 4  ;;  %v5663_v14 = vld [vmem:[%s7079_s25 + $0x90] sm:$0xf]  ;;  %v8051_v59 = vld [vmem:[%s7079_s25 + $0x94] sm:$0xf] }
  0x9f   : > { %v8030_v63 = vrot.slane %v2398_v24, 4  ;;  %v8032_v28 = vrot.slane %v2401_v49, 5  ;;  %v2439_v30 = vshll.u32 %v7997_v3, 16  ;;  %v2443_v47 = vshrl.u32 %v7997_v3, 16  ;;  %9778 = vst [vmem:[#allocation6_spill] sm:$0xff] %v8051_v59 }
  0xa0   : > { %v2356_v55 = vsel %vm7110_vm2, %v7966_v38, %v7942_v5  ;;  %v8045_v9 = vrot.slane %v2412_v20, 4  ;;  %v8047_v51 = vrot.slane %v2425_v40, 5  ;;  %v2435_v18 = vrot.slane %v2433_v29, 5  ;;  %v6939_v5 = vld [vmem:[%s9718_s1 + $0x168] sm:$0xff]  }
  0xa1   : > { %v2457_v38 = vshll.u32 %v5663_v14, 16  ;;  %v2463_v24 = vshll.u32 %v8051_v59, 16  ;;  %v2467_v49 = vshrl.u32 %v8051_v59, 16  ;;  %v5697_v40 = vcombine.low %v2274_v22, %v2284_v43 }
  0xa2   : > { %6609 = vmatmul.mubr.bf16.vlgmr.msra.gmra.mxu0 %v5695_v4  ;;  %v2346_v4 = vsel %vm7110_vm2, %v7956_v33, %v7901_v7  ;;  %v2449_v7 = vshll.u32 %v8023_v17, 16  ;;  %v2454_v33 = vshrl.u32 %v5663_v14, 16  ;;  %v5698_v20 = vcombine.low %v2298_v52, %v2308_v50 }
  0xa3   : > { %6689 = vmatpush3.bf16.msra.mxu0 %v7753_v15  ;;  %6612 = vmatprep.mubr.bf16.mxu0 %v5696_v54  ;;  %v8053_v15 = vrot.slane %v2422_v60, 4  ;;  %v2432_v54 = vrot.slane %v2430_v58, 4  ;;  %v8062_v19 = vrot.slane %v2439_v30, 5  ;;  %v6934_v60 = vld [vmem:[%s7079_s25 + $0x30] sm:$0xff]   ;;  %v6944_v58 = vld [vmem:[%s9718_s1 + $0x1a0] sm:$0xff]   ;;  %v2459_v14 = vrot.slane %v2457_v38, 5 }
  0xa4   : > { %6690 = vmatprep.subr.bf16.mxu0 %v6936_v12  ;;  %v2456_v29 = vrot.slane %v2454_v33, 4  ;;  %v2469_v22 = vrot.slane %v2467_v49, 4  ;;  %v8070_v43 = vcombine.low %v2322_v6, %v2332_v48  ;;  %v8073_v52 = vcombine.low %v2346_v4, %v2356_v55  ;;  %v5666_v30 = vld [vmem:[%s7079_s25 + $0x9c] sm:$0xf]  ;;  %v8095_v4 = vld [vmem:[%s7079_s25 + $0xa4] sm:$0x1] }
  0xa5   : > { %6561 = vmatmul.mubr.bf16.vlgmr.msra.gmra.mxu1 %v6930_v35  ;;  %v2445_v35 = vrot.slane %v2443_v47, 4  ;;  %v2436_v48 = vor.u32 %v2435_v18, %v2432_v54  ;;  %v8092_v47 = vld [vmem:[%s7079_s25 + $0xa0] sm:$0xf]  ;;  %9781 = vst [vmem:[#allocation9_spill] sm:$0xff] %v8095_v4  ;;  %v2478_v55 = vshrl.u32 %v5666_v30, 16  ;;  %v2481_v33 = vshll.u32 %v5666_v30, 16 }
  0xa6   : > { %6641 = vmatpush3.bf16.msra.mxu1 %v7748_v36  ;;  %6564 = vmatprep.mubr.bf16.mxu1 %v6933_v25  ;;  %v8068_v36 = vrot.slane %v2463_v24, 5  ;;  %v2380_v25 = vsel %vm7110_vm2, %v8018_v37, %v8004_v1  ;;  %9780 = vst [vmem:[#allocation8_spill] sm:$0xff] %v8092_v47  ;;  %v6937_v38 = vld [vmem:[%s7079_s25 + $0x3c] sm:$0xff]   ;;  %v2487_v37 = vshll.u32 %v8092_v47, 16  ;;  %v2491_v24 = vshrl.u32 %v8092_v47, 16 }
  0xa7   : > { %6642 = vmatprep.subr.bf16.mxu1 %v6935_v13  ;;  %6691 = vmatpush3.bf16.msra.mxu0 %v6936_v12  ;;  %v8084_v12 = vld [vmem:[%s7079_s25 + $0x98] sm:$0x1]  ;;  %v2446_v1 = vor.u32 %v2445_v35, %v8062_v19  ;;  %v6943_v54 = vld [vmem:[%s9718_s1 + $0x160] sm:$0xff]   ;;  %v2460_v18 = vor.u32 %v2459_v14, %v2456_v29  ;;  %v2480_v30 = vrot.slane %v2478_v55, 4  ;;  %v2483_v49 = vrot.slane %v2481_v33, 5 }
  0xa8   : > { %6692 = vmatprep.subr.bf16.mxu0 %v8028_v11  ;;  %9779 = vst [vmem:[#allocation7_spill] sm:$0xff] %v8084_v12  ;;  %v2473_v35 = vshll.u32 %v8084_v12, 16  ;;  %v2493_v6 = vrot.slane %v2491_v24, 4  ;;  %v2497_v50 = vshll.u32 %v8095_v4, 16  ;;  %v5669_v47 = vld [vmem:[%s7079_s25 + $0xa8] sm:$0xf] }
  0xa9   : > { %v6947_v29 = vld [vmem:[%s9718_s1 + $0x158] sm:$0xff]   ;;  %v8118_v14 = vrot.slane %v2436_v48, 4  ;;  %v2502_v55 = vshrl.u32 %v5669_v47, 16  ;;  %v2505_v33 = vshll.u32 %v5669_v47, 16  ;;  %v8131_v4 = vld [vmem:[%s7079_s25 + $0xb0] sm:$0x1] }
  0xaa   : > { %6613 = vmatmul.mubr.bf16.gmra.mxu0 %v5697_v40  ;;  %6643 = vmatpush3.bf16.msra.mxu1 %v6935_v13  ;;  %v6948_v13 = vld [vmem:[%s9718_s1 + $0x198] sm:$0xff]   ;;  %v2470_v40 = vor.u32 %v2469_v22, %v8068_v36  ;;  %v8120_v22 = vrot.slane %v2449_v7, 5  ;;  %v6938_v48 = vld [vmem:[%s7079_s25 + $0x48] sm:$0xff]   ;;  %v8134_v7 = vrot.slane %v2446_v1, 4  ;;  %v8136_v12 = vrot.slane %v2460_v18, 4 }
  0xab   : > { %6616 = vmatprep.mubr.bf16.mxu0 %v5698_v20  ;;  %6644 = vmatprep.subr.bf16.mxu1 %v6939_v5  ;;  %v8111_v20 = vrot.slane %v2487_v37, 5  ;;  %v2484_v37 = vor.u32 %v2483_v49, %v2480_v30  ;;  %v8138_v59 = vrot.slane %v2473_v35, 5  ;;  %v6951_v49 = vld [vmem:[%s9718_s1 + $0x150] sm:$0xff]   ;;  %v8155_v18 = vrot.slane %v2505_v33, 5 }
  0xac   : > { %6693 = vmatpush3.bf16.msra.mxu0 %v8028_v11  ;;  %v8123_v11 = vld [vmem:[%s7079_s25 + $0xac] sm:$0xf]  ;;  %v2521_v35 = vshll.u32 %v8131_v4, 16 }
  0xad   : > { %6565 = vmatmul.mubr.bf16.gmra.mxu1 %v6934_v60  ;;  %6694 = vmatprep.subr.bf16.mxu0 %v6944_v58  ;;  %9782 = vst [vmem:[#allocation10_spill] sm:$0xff] %v8123_v11  ;;  %v2404_v60 = vsel %vm7110_vm2, %v8030_v63, %v8032_v28  ;;  %v2494_v24 = vor.u32 %v2493_v6, %v8111_v20  ;;  %v2511_v47 = vshll.u32 %v8123_v11, 16  ;;  %v6941_v63 = vld [vmem:[%s7079_s25 + $0x54] sm:$0xff]   ;;  %v8145_v28 = vrot.slane %v2470_v40, 4 }
  0xae   : > { %6568 = vmatprep.mubr.bf16.mxu1 %v6937_v38  ;;  %6645 = vmatpush3.bf16.msra.mxu1 %v6939_v5  ;;  %v6952_v5 = vld [vmem:[%s9718_s1 + $0x190] sm:$0xff]   ;;  %v8147_v6 = vrot.slane %v2497_v50, 5  ;;  %v8149_v38 = vrot.slane %v2502_v55, 4  ;;  %v2515_v1 = vshrl.u32 %v8123_v11, 16  ;;  %v8164_v40 = vrot.slane %v2484_v37, 4 }
  0xaf   : > { %6646 = vmatprep.subr.bf16.mxu1 %v6943_v54  ;;  %v8166_v30 = vrot.slane %v2494_v24, 4  ;;  %v5672_v55 = vld [vmem:[%s7079_s25 + $0xb4] sm:$0xf]  ;;  %v8170_v11 = vld [vmem:[%s7079_s25 + $0xb8] sm:$0xf]  ;;  %v6955_v24 = vld [vmem:[%s9718_s1 + $0x148] sm:$0xff]  }
  0xb0   : > { %6695 = vmatpush3.bf16.msra.mxu0 %v6944_v58  ;;  %v9783_v58 = vsel %vm7110_vm2, %v7968_v46, %v7946_v21  ;;  %9784 = vst [vmem:[#allocation11_spill] sm:$0xff] %v8170_v11  ;;  %v2418_v21 = vsel %vm7110_vm2, %v8045_v9, %v7974_v57  ;;  %v8182_v46 = vrot.slane %v2511_v47, 5  ;;  %v5675_v37 = vld [vmem:[%s7079_s25 + $0xc0] sm:$0xf]  ;;  %v2428_v57 = vsel %vm7110_vm2, %v8053_v15, %v8047_v51  ;;  %v8209_v47 = vld [vmem:[%s7079_s25 + $0xc4] sm:$0xf] }
  0xb1   : > { %6696 = vmatprep.subr.bf16.mxu0 %v6948_v13  ;;  %v5701_v50 = vcombine.low %v9783_v58, %v2380_v25  ;;  %v2526_v25 = vshrl.u32 %v5672_v55, 16  ;;  %v2442_v9 = vsel %vm7110_vm2, %v8118_v14, %v8062_v19  ;;  %9787 = vst [vmem:[#allocation13_spill] sm:$0xff] %v8209_v47  ;;  %v8212_v51 = vld [vmem:[%s7079_s25 + $0xc8] sm:$0x1]  ;;  %v2559_v58 = vshll.u32 %v8209_v47, 16 }
  0xb2   : > { %6617 = vmatmul.mubr.bf16.gmra.mxu0 %v8070_v43  ;;  %6647 = vmatpush3.bf16.msra.mxu1 %v6943_v54  ;;  %v9785_v43 = vsel %vm7110_vm2, %v8020_v2, %v7958_v53  ;;  %v2517_v54 = vrot.slane %v2515_v1, 4  ;;  %v2529_v53 = vshll.u32 %v5672_v55, 16  ;;  %v2535_v2 = vshll.u32 %v8170_v11, 16 }
  0xb3   : > { %6620 = vmatprep.mubr.bf16.mxu0 %v8073_v52  ;;  %v5702_v33 = vcombine.low %v9785_v43, %v2404_v60  ;;  %6648 = vmatprep.subr.bf16.mxu1 %v6947_v29  ;;  %v6956_v52 = vld [vmem:[%s9718_s1 + $0x188] sm:$0xff]   ;;  %v2539_v60 = vshrl.u32 %v8170_v11, 16  ;;  %v2528_v15 = vrot.slane %v2526_v25, 4  ;;  %v9788_v55 = vrot.slane %v7617_v32, 5 }
  0xb4   : > { %6697 = vmatpush3.bf16.msra.mxu0 %v6948_v13  ;;  %v2452_v13 = vsel %vm7110_vm2, %v8134_v7, %v8120_v22  ;;  %v2531_v19 = vrot.slane %v2529_v53, 5  ;;  %v8214_v14 = vrot.slane %v2535_v2, 5  ;;  %v2550_v22 = vshrl.u32 %v5675_v37, 16  ;;  %v6942_v2 = vld [vmem:[%s7079_s25 + $0x60] sm:$0xff]  }
  0xb5   : > { %6569 = vmatmul.mubr.bf16.gmra.mxu1 %v6938_v48  ;;  %6698 = vmatprep.subr.bf16.mxu0 %v6952_v5  ;;  %v8206_v48 = vld [vmem:[%s7079_s25 + $0xbc] sm:$0x1]  ;;  %v2541_v1 = vrot.slane %v2539_v60, 4  ;;  %v2553_v7 = vshll.u32 %v5675_v37, 16  ;;  %v8219_v43 = vrot.slane %v9788_v55, 4  ;;  %v8224_v25 = vrot.slane %v2521_v35, 5 }
  0xb6   : > { %9786 = vst [vmem:[#allocation12_spill] sm:$0xff] %v8206_v48  ;;  %6572 = vmatprep.mubr.bf16.mxu1 %v6941_v63  ;;  %6649 = vmatpush3.bf16.msra.mxu1 %v6947_v29  ;;  %v2508_v63 = vor.u32 %v8155_v18, %v8149_v38  ;;  %v2518_v29 = vor.u32 %v2517_v54, %v8182_v46  ;;  %v2563_v53 = vshrl.u32 %v8209_v47, 16  ;;  %v2545_v60 = vshll.u32 %v8206_v48, 16  ;;  %v6945_v38 = vld [vmem:[%s7079_s25 + $0x6c] sm:$0xff]   ;;  %v8244_v48 = vld [vmem:[%s7079_s25 + $0x18] sm:$0xe] }
  0xb7   : > { %6650 = vmatprep.subr.bf16.mxu1 %v6951_v49  ;;  %v2552_v37 = vrot.slane %v2550_v22, 4  ;;  %v2555_v11 = vrot.slane %v2553_v7, 5  ;;  %v8229_v55 = vrot.slane %v2559_v58, 5  ;;  %v2532_v18 = vor.u32 %v2531_v19, %v2528_v15  ;;  %v6959_v22 = vld [vmem:[%s9718_s1 + $0x140] sm:$0xff]   ;;  %v8241_v58 = vld [vmem:[%s7079_s25 + $0xc] sm:$0xe] }
  0xb8   : > { %6699 = vmatpush3.bf16.msra.mxu0 %v6952_v5  ;;  %v6960_v5 = vld [vmem:[%s9718_s1 + $0x180] sm:$0xff]   ;;  %v2542_v35 = vor.u32 %v2541_v1, %v8214_v14  ;;  %v2565_v54 = vrot.slane %v2563_v53, 4  ;;  %v2569_v47 = vshll.u32 %v8212_v51, 16  ;;  %v5703_v15 = vcombine.low %v2418_v21, %v2428_v57 }
  0xb9   : > { %6700 = vmatprep.subr.bf16.mxu0 %v6956_v52  ;;  %v2556_v7 = vor.u32 %v2555_v11, %v2552_v37  ;;  %v5704_v19 = vcombine.low %v2442_v9, %v2452_v13  ;;  %v8252_v1 = vrot.slane %v2508_v63, 4  ;;  %v8254_v11 = vrot.slane %v2518_v29, 4  ;;  %v6946_v9 = vld [vmem:[%s7079_s25 + $0x78] sm:$0xff]   ;;  %v6949_v37 = vld [vmem:[%s7079_s25 + $0x84] sm:$0xff]  }
  0xba   : > { %6621 = vmatmul.mubr.bf16.gmra.mxu0 %v5701_v50  ;;  %6651 = vmatpush3.bf16.msra.mxu1 %v6951_v49  ;;  %v8249_v49 = vld [vmem:[%s9718_s1 + $0x238] sm:$0xff]   ;;  %v2566_v50 = vor.u32 %v2565_v54, %v8229_v55  ;;  %v8263_v53 = vrot.slane %v2542_v35, 4  ;;  %v8265_v21 = vrot.slane %v2545_v60, 5  ;;  %v8271_v63 = vrot.slane %v2569_v47, 5  ;;  %v5721_v60 = vld [vmem:[%s7079_s25 + $0x30] sm:$0xe] }
  0xbb   : > { %6624 = vmatprep.mubr.bf16.mxu0 %v5702_v33  ;;  %6652 = vmatprep.subr.bf16.mxu1 %v6955_v24  ;;  %v8259_v33 = vld [vmem:[%s9718_s1 + $0x1f8] sm:$0xff]   ;;  %v8269_v13 = vrot.slane %v2556_v7, 4  ;;  %v2964_v29 = vrot.slane %v7691_v42, 5  ;;  %v9789_v35 = vld [vmem:[#allocation2_spill] sm:$0xff]  ;;  %v5737_v47 = vrot.slane %v5721_v60, 9  ;;  %v9792_v60 = vld [vmem:[#allocation3_spill] sm:$0xff] }
  0xbc   : > { %6701 = vmatpush3.bf16.msra.mxu0 %v6956_v52  ;;  %v8261_v52 = vrot.slane %v2532_v18, 4  ;;  %v9790_v7 = vld [vmem:[#allocation5_spill] sm:$0xff]  ;;  %v2985_v18 = vrot.slane %v7774_v0, 5  ;;  %v2500_v0 = vsel %vm7110_vm2, %v8166_v30, %v8147_v6  ;;  %v2999_v30 = vrot.slane %v7865_v41, 5 }
  0xbd   : > { %6573 = vmatmul.mubr.bf16.gmra.mxu1 %v6942_v2  ;;  %6702 = vmatprep.subr.bf16.mxu0 %v6960_v5  ;;  %v2982_v57 = vrot.slane %v9790_v7, 5  ;;  %v9791_v2 = vld [vmem:[#allocation4_spill] sm:$0xff] }
  0xbe   : > { %6576 = vmatprep.mubr.bf16.mxu1 %v6945_v38  ;;  %6653 = vmatpush3.bf16.msra.mxu1 %v6955_v24  ;;  %v8276_v24 = vrot.slane %v2566_v50, 4  ;;  %v2968_v38 = vrot.slane %v7708_v61, 5  ;;  %v2466_v50 = vsel %vm7110_vm2, %v8136_v12, %v8068_v36  ;;  %v2989_v54 = vrot.slane %v9791_v2, 5  ;;  %v5722_v12 = vld [vmem:[%s7079_s25 + $0x3c] sm:$0xe] }
  0xbf   : > { %6654 = vmatprep.subr.bf16.mxu1 %v6959_v22  ;;  %v8298_v7 = vsel %vm7421_vm5, %v5737_v47, %v2982_v57  ;;  %v2984_v36 = vrot.slane %v2982_v57, 4  ;;  %v5738_v2 = vrot.slane %v5722_v12, 9  ;;  %v6950_v47 = vld [vmem:[%s7079_s25 + $0x90] sm:$0xff]   ;;  %v3006_v12 = vrot.slane %v7885_v34, 5 }
  0xc0   : > { %6703 = vmatpush3.bf16.msra.mxu0 %v6960_v5  ;;  %v2476_v5 = vsel %vm7110_vm2, %v8145_v28, %v8138_v59  ;;  %v2490_v59 = vsel %vm7110_vm2, %v8164_v40, %v8111_v20  ;;  %v2991_v28 = vrot.slane %v2989_v54, 4  ;;  %v2996_v20 = vrot.slane %v7824_v39, 5 }
  0xc1   : > { %6784 = vmatprep.subr.bf16.mxu0 %v8249_v49  ;;  %v8312_v57 = vsel %vm7421_vm5, %v2984_v36, %v2985_v18  ;;  %v5706_v18 = vcombine.low %v2490_v59, %v2500_v0  ;;  %v8327_v39 = vsel %vm7421_vm5, %v5738_v2, %v2989_v54  ;;  %v2514_v36 = vsel %vm7110_vm2, %v8252_v1, %v8182_v46  ;;  %v5724_v54 = vld [vmem:[%s7079_s25 + $0x54] sm:$0xe] }
  0xc2   : > { %6625 = vmatmul.mubr.bf16.gmra.mxu0 %v5703_v15  ;;  %6655 = vmatpush3.bf16.msra.mxu1 %v6959_v22  ;;  %v2978_v15 = vrot.slane %v9792_v60, 5  ;;  %v2992_v22 = vrot.slane %v7803_v45, 5  ;;  %v5769_v40 = vcombine.low %v8298_v7, %v8312_v57  ;;  %v5723_v45 = vld [vmem:[%s7079_s25 + $0x48] sm:$0xe]  ;;  %v2524_v46 = vsel %vm7110_vm2, %v8254_v11, %v8224_v25  ;;  %v6970_v7 = vld [vmem:[%s7079_s25 + $0x54] sm:$0xff]  }
  0xc3   : > { %6628 = vmatprep.mubr.bf16.mxu0 %v5704_v19  ;;  %6736 = vmatprep.subr.bf16.mxu1 %v8259_v33  ;;  %v5705_v19 = vcombine.low %v2466_v50, %v2476_v5  ;;  %v2998_v50 = vrot.slane %v2996_v20, 4  ;;  %v6953_v5 = vld [vmem:[%s7079_s25 + $0x9c] sm:$0xff]   ;;  %v3010_v2 = vrot.slane %v7889_v31, 5  ;;  %v2538_v34 = vsel %vm7110_vm2, %v8261_v52, %v8214_v14 }
  0xc4   : > { %v8319_v6 = vsel %vm7421_vm5, %v2991_v28, %v2992_v22  ;;  %v5740_v28 = vrot.slane %v5724_v54, 9  ;;  %v5725_v22 = vld [vmem:[%s7079_s25 + $0x60] sm:$0xe]  ;;  %v3013_v25 = vrot.slane %v7937_v16, 5  ;;  %v2548_v11 = vsel %vm7110_vm2, %v8263_v53, %v8265_v21 }
  0xc5   : > { %6577 = vmatmul.mubr.bf16.gmra.mxu1 %v6946_v9  ;;  %v3003_v9 = vrot.slane %v7859_v10, 5  ;;  %v5770_v41 = vcombine.low %v8327_v39, %v8319_v6  ;;  %v8342_v59 = vsel %vm7421_vm5, %v2998_v50, %v2999_v30  ;;  %v3017_v14 = vrot.slane %v7929_v8, 5  ;;  %v5951_v6 = vld [vmem:[%s7079_s25 + $0x24] sm:$0xe] }
  0xc6   : > { %6580 = vmatprep.mubr.bf16.mxu1 %v6949_v37  ;;  %v5739_v37 = vrot.slane %v5723_v45, 9  ;;  %v3012_v45 = vrot.slane %v3010_v2, 4  ;;  %v5707_v52 = vcombine.low %v2514_v36, %v2524_v46  ;;  %v3020_v8 = vrot.slane %v7950_v62, 5  ;;  %v5727_v36 = vld [vmem:[%s7079_s25 + $0x78] sm:$0xe] }
  0xc7   : > { %v3005_v0 = vrot.slane %v3003_v9, 4  ;;  %v8369_v31 = vsel %vm7421_vm5, %v5740_v28, %v3003_v9  ;;  %v3019_v9 = vrot.slane %v3017_v14, 4  ;;  %v3024_v54 = vrot.slane %v7954_v44, 5 }
  0xc8   : > { %v8338_v10 = vsel %vm7421_vm5, %v5739_v37, %v2996_v20  ;;  %v5741_v20 = vrot.slane %v5725_v22, 9  ;;  %v8381_v53 = vsel %vm7421_vm5, %v3012_v45, %v3013_v25  ;;  %v5708_v37 = vcombine.low %v2538_v34, %v2548_v11 }
  0xc9   : > { %v8397_v46 = vsel %vm7421_vm5, %v3019_v9, %v3020_v8  ;;  %v5743_v62 = vrot.slane %v5727_v36, 9  ;;  %v3031_v28 = vrot.slane %v7997_v3, 5  ;;  %v3026_v44 = vrot.slane %v3024_v54, 4  ;;  %v6961_v8 = vld [vmem:[%s7079_s25 + $0x18] sm:$0xff]   ;;  %v9797_v36 = vld [vmem:[#allocation8_spill] sm:$0xff] }
  0xca   : > { %6629 = vmatmul.mubr.bf16.gmra.mxu0 %v5705_v19  ;;  %v8360_v19 = vsel %vm7421_vm5, %v3005_v0, %v3006_v12  ;;  %v8376_v16 = vsel %vm7421_vm5, %v5741_v20, %v3010_v2  ;;  %v3027_v0 = vrot.slane %v7961_v26, 5  ;;  %v3034_v26 = vrot.slane %v8023_v17, 5  ;;  %v5728_v20 = vld [vmem:[%s7079_s25 + $0x84] sm:$0xe] }
  0xcb   : > { %6632 = vmatprep.mubr.bf16.mxu0 %v5706_v18  ;;  %v5726_v18 = vld [vmem:[%s7079_s25 + $0x6c] sm:$0xe]  ;;  %v2562_v2 = vsel %vm7110_vm2, %v8269_v13, %v8229_v55  ;;  %v8409_v34 = vsel %vm7421_vm5, %v5743_v62, %v3024_v54  ;;  %v2572_v3 = vsel %vm7110_vm2, %v8276_v24, %v8271_v63  ;;  %v5744_v25 = vrot.slane %v5728_v20, 9  ;;  %v9795_v63 = vld [vmem:[#allocation6_spill] sm:$0xff] }
  0xcc   : > { %v5742_v21 = vrot.slane %v5726_v18, 9  ;;  %v8418_v17 = vsel %vm7421_vm5, %v3026_v44, %v3027_v0  ;;  %v3033_v11 = vrot.slane %v3031_v28, 4  ;;  %v9793_v45 = vrot.slane %v7617_v32, 5  ;;  %v5729_v18 = vld [vmem:[%s7079_s25 + $0x90] sm:$0xe]  ;;  %v6973_v62 = vld [vmem:[%s7079_s25 + $0x60] sm:$0xff]  }
  0xcd   : > { %6581 = vmatmul.mubr.bf16.gmra.mxu1 %v6950_v47  ;;  %v6954_v47 = vld [vmem:[%s7079_s25 + $0xa8] sm:$0xff]   ;;  %v9794_v55 = vrot.slane %v8241_v58, 9  ;;  %v3038_v24 = vrot.slane %v9795_v63, 5  ;;  %v8435_v32 = vsel %vm7421_vm5, %v5744_v25, %v3031_v28  ;;  %v3045_v54 = vrot.slane %v9797_v36, 5 }
  0xce   : > { %6584 = vmatprep.mubr.bf16.mxu1 %v6953_v5  ;;  %v6957_v5 = vld [vmem:[%s7079_s25 + $0xb4] sm:$0xff]   ;;  %v8393_v12 = vsel %vm7421_vm5, %v5742_v21, %v3017_v14  ;;  %v5720_v14 = vld [vmem:[%s7079_s25 + $0x24] sm:$0xe]  ;;  %v9796_v21 = vld [vmem:[#allocation7_spill] sm:$0xff]  ;;  %v8439_v58 = vsel %vm7421_vm5, %v3033_v11, %v3034_v26  ;;  %v5709_v0 = vcombine.low %v2562_v2, %v2572_v3  ;;  %v2965_v28 = vsel %vm7421_vm5, %v8219_v43, %v2964_v29 }
  0xcf   : > { %v2962_v13 = vsel %vm7421_vm5, %v9794_v55, %v9793_v45  ;;  %v3041_v9 = vrot.slane %v9796_v21, 5  ;;  %v3040_v44 = vrot.slane %v3038_v24, 4  ;;  %v6958_v45 = vld [vmem:[%s7079_s25 + $0xc0] sm:$0xff]   ;;  %v2970_v26 = vrot.slane %v2968_v38, 4  ;;  %v5730_v2 = vld [vmem:[%s7079_s25 + $0x9c] sm:$0xe] }
  0xd0   : > { %v3047_v3 = vrot.slane %v3045_v54, 4  ;;  %v5746_v11 = vrot.slane %v5730_v2, 9  ;;  %v9799_v55 = vld [vmem:[#allocation10_spill] sm:$0xff]  ;;  %v5731_v63 = vld [vmem:[%s7079_s25 + $0xa8] sm:$0xe]  ;;  %v5766_v21 = vcombine.low %v2962_v13, %v2965_v28  ;;  %v9803_v28 = vrot.slane %v8244_v48, 9 }
  0xd1   : > { %v8460_v25 = vsel %vm7421_vm5, %v3040_v44, %v3041_v9  ;;  %v3052_v42 = vrot.slane %v9799_v55, 5  ;;  %v8583_v43 = vld [vmem:[%s7079_s25 + $0x34] sm:$0xf] }
  0xd2   : > { %6633 = vmatmul.mubr.bf16.gmra.mxu0 %v5707_v52  ;;  %v8473_v9 = vsel %vm7421_vm5, %v5746_v11, %v3045_v54  ;;  %v5732_v54 = vld [vmem:[%s7079_s25 + $0xb4] sm:$0xe]  ;;  %v3886_v39 = vshll.u32 %v8583_v43, 16 }
  0xd3   : > { %6636 = vmatprep.mubr.bf16.mxu0 %v5708_v37  ;;  %v5745_v37 = vrot.slane %v5729_v18, 9  ;;  %v5736_v18 = vrot.slane %v5720_v14, 9  ;;  %v3054_v36 = vrot.slane %v3052_v42, 4  ;;  %v9800_v14 = vrot.slane %v9789_v35, 5 }
  0xd4   : > { %v5748_v55 = vrot.slane %v5732_v54, 9 }
  0xd5   : > { %6585 = vmatmul.mubr.bf16.gmra.mxu1 %v6954_v47  ;;  %v9798_v47 = vld [vmem:[#allocation9_spill] sm:$0xff]  ;;  %v2977_v44 = vrot.slane %v9800_v14, 4  ;;  %v9805_v61 = vmov %v9800_v14  ;;  %v3069_v14 = vrot.slane %v8212_v51, 5  ;;  %v5868_v51 = vld [vmem:[%s7079_s25 + $0x30] sm:$0xf] }
  0xd6   : > { %6588 = vmatprep.mubr.bf16.mxu1 %v6957_v5  ;;  %v3048_v20 = vrot.slane %v9798_v47, 5  ;;  %v8455_v5 = vsel %vm7421_vm5, %v5745_v37, %v3038_v24  ;;  %v3055_v24 = vrot.slane %v8131_v4, 5  ;;  %v5747_v37 = vrot.slane %v5731_v63, 9 }
  0xd7   : > { %v9804_v63 = vrot.slane %v7722_v23, 5  ;;  %v2976_v48 = vsel %vm7421_vm5, %v5736_v18, %v9805_v61  ;;  %v2979_v23 = vsel %vm7421_vm5, %v2977_v44, %v2978_v15  ;;  %v8553_v61 = vld [vmem:[%s7079_s25 + $0x28] sm:$0xf] }
  0xd8   : > { %v8467_v29 = vsel %vm7421_vm5, %v3047_v3, %v3048_v20  ;;  %v9801_v20 = vld [vmem:[#allocation11_spill] sm:$0xff]  ;;  %v8482_v4 = vsel %vm7421_vm5, %v5747_v37, %v3052_v42  ;;  %v8486_v13 = vsel %vm7421_vm5, %v3054_v36, %v3055_v24  ;;  %v2969_v3 = vsel %vm7421_vm5, %v9803_v28, %v2968_v38  ;;  %v5733_v37 = vld [vmem:[%s7079_s25 + $0xc0] sm:$0xe]  ;;  %v9806_v38 = vld [vmem:[#allocation13_spill] sm:$0xff] }
  0xd9   : > { %v3059_v2 = vrot.slane %v9801_v20, 5  ;;  %v2972_v24 = vsel %vm7421_vm5, %v2970_v26, %v9804_v63  ;;  %v3066_v36 = vrot.slane %v9806_v38, 5  ;;  %v5749_v18 = vrot.slane %v5733_v37, 9  ;;  %v6968_v20 = vld [vmem:[%s9718_s1 + $0x230] sm:$0xff]   ;;  %v5865_v63 = vld [vmem:[%s7079_s25 + $0x24] sm:$0xf] }
  0xda   : > { %6637 = vmatmul.mubr.bf16.gmra.mxu0 %v5709_v0  ;;  %v5767_v15 = vcombine.low %v2969_v3, %v2972_v24  ;;  %v5768_v54 = vcombine.low %v2976_v48, %v2979_v23  ;;  %v6967_v28 = vld [vmem:[%s9718_s1 + $0x1f0] sm:$0xff]   ;;  %v6966_v48 = vld [vmem:[%s7079_s25 + $0x3c] sm:$0xff]   ;;  %v3853_v37 = vshrl.u32 %v5865_v63, 16  ;;  %v6969_v38 = vld [vmem:[%s7079_s25 + $0x48] sm:$0xff]   ;;  %v3862_v23 = vshll.u32 %v8553_v61, 16 }
  0xdb   : > { %6704 = vmatprep.mubr.bf16.mxu0 %v6961_v8  ;;  %v9802_v8 = vld [vmem:[#allocation12_spill] sm:$0xff]  ;;  %v3061_v42 = vrot.slane %v3059_v2, 4  ;;  %v8517_v26 = vsel %vm7421_vm5, %v5748_v55, %v3059_v2  ;;  %v3068_v60 = vrot.slane %v3066_v36, 4  ;;  %v8530_v44 = vsel %vm7421_vm5, %v5749_v18, %v3066_v36  ;;  %v5862_v2 = vld [vmem:[%s7079_s25 + $0x18] sm:$0xf]  ;;  %v6972_v55 = vld [vmem:[%s9718_s1 + $0x228] sm:$0xff]  }
  0xdc   : > { %v3062_v0 = vrot.slane %v9802_v8, 5  ;;  %v3832_v24 = vshll.u32 %v5862_v2, 16  ;;  %v6971_v36 = vld [vmem:[%s9718_s1 + $0x1e8] sm:$0xff]   ;;  %v5864_v18 = vld [vmem:[%s7079_s25 + $0x20] sm:$0x1]  ;;  %v3855_v11 = vrot.slane %v3853_v37, 4 }
  0xdd   : > { %6589 = vmatmul.mubr.bf16.gmra.mxu1 %v6958_v45  ;;  %v6962_v45 = vld [vmem:[%s7079_s25 + $0x24] sm:$0xff]   ;;  %v8535_v8 = vsel %vm7421_vm5, %v3068_v60, %v3069_v14  ;;  %v3856_v14 = vshll.u32 %v5865_v63, 16  ;;  %v8573_v63 = vld [vmem:[%s7079_s25 + $0x2c] sm:$0x1]  ;;  %v3877_v37 = vshrl.u32 %v5868_v51, 16 }
  0xde   : > { %6656 = vmatprep.mubr.bf16.mxu1 %v5766_v21  ;;  %v6965_v21 = vld [vmem:[%s7079_s25 + $0x30] sm:$0xff]   ;;  %v8521_v35 = vsel %vm7421_vm5, %v3061_v42, %v3062_v0  ;;  %v8538_v0 = vld [vmem:[%s7079_s25 + $0x1c] sm:$0xf]  ;;  %v3829_v42 = vshrl.u32 %v5862_v2, 16 }
  0xdf   : > { %v4600_v3 = vrot.slane %v8538_v0, 5  ;;  %v3858_v47 = vrot.slane %v3856_v14, 5 }
  0xe0   : > { %v3831_v60 = vrot.slane %v3829_v42, 4  ;;  %v6975_v42 = vld [vmem:[%s9718_s1 + $0x1e0] sm:$0xff]  }
  0xe2   : > { %6705 = vmatmul.mubr.bf16.vlgmr.msra.gmra.mxu0 %v6962_v45  ;;  %v3842_v45 = vshrl.u32 %v8538_v0, 16 }
  0xe3   : > { %6785 = vmatpush3.bf16.msra.mxu0 %v8249_v49  ;;  %6708 = vmatprep.mubr.bf16.mxu0 %v6965_v21  ;;  %v3838_v49 = vshll.u32 %v8538_v0, 16  ;;  %v3866_v21 = vshrl.u32 %v8553_v61, 16 }
  0xe4   : > { %6786 = vmatprep.subr.bf16.mxu0 %v6968_v20 }
  0xe5   : > { %6657 = vmatmul.mubr.bf16.vlgmr.msra.gmra.mxu1 %v5767_v15  ;;  %v5950_v15 = vld [vmem:[%s7079_s25 + $0x18] sm:$0xe]  ;;  %v8568_v2 = vrot.slane %v3838_v49, 5  ;;  %v3848_v49 = vshll.u32 %v5864_v18, 16  ;;  %v3868_v0 = vrot.slane %v3866_v21, 4 }
  0xe6   : > { %6737 = vmatpush3.bf16.msra.mxu1 %v8259_v33  ;;  %6660 = vmatprep.mubr.bf16.mxu1 %v5768_v54  ;;  %v6976_v33 = vld [vmem:[%s9718_s1 + $0x220] sm:$0xff]   ;;  %v3844_v54 = vrot.slane %v3842_v45, 4  ;;  %v8580_v45 = vrot.slane %v3862_v23, 5  ;;  %v6980_v23 = vld [vmem:[%s9718_s1 + $0x218] sm:$0xff]  }
  0xe7   : > { %6738 = vmatprep.subr.bf16.mxu1 %v6967_v28  ;;  %6787 = vmatpush3.bf16.msra.mxu0 %v6968_v20  ;;  %v3834_v20 = vrot.slane %v3832_v24, 5 }
  0xe8   : > { %6788 = vmatprep.subr.bf16.mxu0 %v6972_v55  ;;  %v3845_v21 = vor.u32 %v3844_v54, %v8568_v2  ;;  %v3869_v54 = vor.u32 %v3868_v0, %v8580_v45 }
  0xea   : > { %6709 = vmatmul.mubr.bf16.gmra.mxu0 %v6966_v48  ;;  %6739 = vmatpush3.bf16.msra.mxu1 %v6967_v28  ;;  %v5966_v48 = vrot.slane %v5950_v15, 9  ;;  %v4603_v28 = vrot.slane %v5864_v18, 5  ;;  %v4602_v18 = vrot.slane %v4600_v3, 4  ;;  %v3872_v15 = vshll.u32 %v8573_v63, 16 }
  0xeb   : > { %6712 = vmatprep.mubr.bf16.mxu0 %v6969_v38  ;;  %6740 = vmatprep.subr.bf16.mxu1 %v6971_v36  ;;  %v3880_v38 = vshll.u32 %v5868_v51, 16  ;;  %v4607_v51 = vrot.slane %v8553_v61, 5  ;;  %v3890_v61 = vshrl.u32 %v8583_v43, 16 }
  0xec   : > { %6789 = vmatpush3.bf16.msra.mxu0 %v6972_v55  ;;  %v3835_v55 = vor.u32 %v3834_v20, %v3831_v60  ;;  %v6979_v60 = vld [vmem:[%s9718_s1 + $0x1d8] sm:$0xff]   ;;  %v8606_v20 = vrot.slane %v3848_v49, 5  ;;  %v6984_v49 = vld [vmem:[%s9718_s1 + $0x210] sm:$0xff]  }
  0xed   : > { %v8578_v24 = vpop.f32.mrf.mxu0  ;;  %6661 = vmatmul.mubr.bf16.gmra.mxu1 %v5769_v40  ;;  %6790 = vmatprep.subr.bf16.mxu0 %v6976_v33  ;;  %v8588_v14 = vpop.f32.mrf.mxu1  ;;  %v3859_v40 = vor.u32 %v3858_v47, %v3855_v11  ;;  %v3879_v47 = vrot.slane %v3877_v37, 4  ;;  %v3882_v11 = vrot.slane %v3880_v38, 5  ;;  %v8633_v37 = vld [vmem:[%s7079_s25 + $0x40] sm:$0xf]  ;;  %v4609_v50 = vrot.slane %v4607_v51, 4 }
  0xee   : > { %9807 = vst [vmem:[#allocation2_spill] sm:$0xff] %v8588_v14  ;;  %6664 = vmatprep.mubr.bf16.mxu1 %v5770_v41  ;;  %6741 = vmatpush3.bf16.msra.mxu1 %v6971_v36  ;;  %v8613_v41 = vsel %vm7421_vm5, %v5966_v48, %v4600_v3  ;;  %v5871_v36 = vld [vmem:[%s7079_s25 + $0x3c] sm:$0xf]  ;;  %v8622_v0 = vrot.slane %v3835_v55, 4  ;;  %v8628_v3 = vsel %vm7421_vm5, %v4602_v18, %v4603_v28  ;;  %v8630_v48 = vrot.slane %v3872_v15, 5  ;;  %v6983_v55 = vld [vmem:[%s9718_s1 + $0x1d0] sm:$0xff]  }
  0xef   : > { %v8599_v57 = vpop.f32.mrf.mxu0  ;;  %6742 = vmatprep.subr.bf16.mxu1 %v6975_v42  ;;  %v8617_v52 = vpop.f32.mrf.mxu1  ;;  %v8640_v22 = vrot.slane %v3859_v40, 4  ;;  %v4610_v28 = vrot.slane %v8573_v63, 5  ;;  %v3870_v18 = vrot.slane %v3869_v54, 4  ;;  %v8644_v15 = vld [vmem:[%s7079_s25 + $0x38] sm:$0x1]  ;;  %v3904_v30 = vshll.u32 %v5871_v36, 16 }
  0xf0   : > { %6791 = vmatpush3.bf16.msra.mxu0 %v6976_v33  ;;  %9808 = vst [vmem:[#allocation5_spill] sm:$0xff] %v8617_v52  ;;  %v8624_v33 = vrot.slane %v3845_v21, 4  ;;  %v5967_v21 = vrot.slane %v5951_v6, 9  ;;  %v3883_v1 = vor.u32 %v3882_v11, %v3879_v47  ;;  %v8648_v52 = vrot.slane %v3890_v61, 4  ;;  %v5952_v40 = vld [vmem:[%s7079_s25 + $0x30] sm:$0xe] }
  0xf1   : > { %6792 = vmatprep.subr.bf16.mxu0 %v6980_v23  ;;  %v8635_v38 = vpop.f32.mrf.mxu0  ;;  %v3910_v6 = vshll.u32 %v8633_v37, 16  ;;  %v3914_v63 = vshrl.u32 %v8633_v37, 16  ;;  %v8656_v54 = vpop.f32.mrf.mxu1  ;;  %v9811_v11 = vcombine.low %v8369_v31, %v8360_v19  ;;  %v6974_v61 = vld [vmem:[%s7079_s25 + $0x6c] sm:$0xff]   ;;  %v8689_v19 = vsel %vm7421_vm5, %v4609_v50, %v4610_v28  ;;  %v8707_v28 = vld [vmem:[%s7079_s25 + $0x44] sm:$0x1] }
  0xf2   : > { %6713 = vmatmul.mubr.bf16.gmra.mxu0 %v6970_v7  ;;  %6743 = vmatpush3.bf16.msra.mxu1 %v6975_v42  ;;  %v8646_v7 = vrot.slane %v3886_v39, 5  ;;  %v3901_v42 = vshrl.u32 %v5871_v36, 16  ;;  %9810 = vst [vmem:[#allocation4_spill] sm:$0xff] %v8656_v54  ;;  %v3841_v39 = vsel %vm7110_vm2, %v8622_v0, %v8568_v2  ;;  %v3851_v47 = vsel %vm7110_vm2, %v8624_v33, %v8606_v20  ;;  %v6977_v36 = vld [vmem:[%s7079_s25 + $0x78] sm:$0xff]   ;;  %v8700_v33 = vld [vmem:[%s7079_s25 + $0x4c] sm:$0xf] }
  0xf3   : > { %6716 = vmatprep.mubr.bf16.mxu0 %v6973_v62  ;;  %6744 = vmatprep.subr.bf16.mxu1 %v6979_v60  ;;  %v9809_v62 = vcombine.low %v8338_v10, %v8342_v59  ;;  %v4614_v59 = vrot.slane %v8583_v43, 5  ;;  %v3865_v2 = vsel %vm7110_vm2, %v8640_v22, %v8580_v45  ;;  %v8685_v20 = vsel %vm7421_vm5, %v5967_v21, %v4607_v51  ;;  %v5874_v43 = vld [vmem:[%s7079_s25 + $0x48] sm:$0xf]  ;;  %v8711_v54 = vpop.f32.mrf.mxu1  ;;  %v5953_v14 = vld [vmem:[%s7079_s25 + $0x3c] sm:$0xe] }
  0xf4   : > { %6793 = vmatpush3.bf16.msra.mxu0 %v6980_v23  ;;  %v6988_v23 = vld [vmem:[%s9718_s1 + $0x208] sm:$0xff]   ;;  %v3896_v31 = vshll.u32 %v8644_v15, 16  ;;  %v3875_v22 = vsel %vm7110_vm2, %v3870_v18, %v8630_v48  ;;  %v5968_v45 = vrot.slane %v5952_v40, 9  ;;  %v3903_v0 = vrot.slane %v3901_v42, 4  ;;  %9813 = vst [vmem:[#allocation6_spill] sm:$0xff] %v8711_v54  ;;  %v6991_v42 = vld [vmem:[%s9718_s1 + $0x1c0] sm:$0xff]  }
  0xf5   : > { %6665 = vmatmul.mubr.bf16.gmra.mxu1 %v9809_v62  ;;  %6794 = vmatprep.subr.bf16.mxu0 %v6984_v49  ;;  %v8677_v62 = vpop.f32.mrf.mxu0  ;;  %v3906_v51 = vrot.slane %v3904_v30, 5  ;;  %v8702_v50 = vrot.slane %v3883_v1, 4  ;;  %v3893_v21 = vor.u32 %v8648_v52, %v8646_v7  ;;  %v3916_v10 = vrot.slane %v3914_v63, 4  ;;  %v6992_v30 = vld [vmem:[%s9718_s1 + $0x200] sm:$0xff]  }
  0xf6   : > { %6668 = vmatprep.mubr.bf16.mxu1 %v9811_v11  ;;  %6745 = vmatpush3.bf16.msra.mxu1 %v6979_v60  ;;  %9812 = vst [vmem:[#allocation3_spill] sm:$0xff] %v8677_v62  ;;  %v6987_v60 = vld [vmem:[%s9718_s1 + $0x1c8] sm:$0xff]   ;;  %v8709_v11 = vrot.slane %v3910_v6, 5  ;;  %v4616_v48 = vrot.slane %v4614_v59, 4  ;;  %v3925_v1 = vshrl.u32 %v5874_v43, 16  ;;  %v3928_v18 = vshll.u32 %v5874_v43, 16 }
  0xf7   : > { %6746 = vmatprep.subr.bf16.mxu1 %v6983_v55  ;;  %v8722_v40 = vcombine.low %v3841_v39, %v3851_v47  ;;  %v3938_v63 = vshrl.u32 %v8700_v33, 16  ;;  %v8730_v43 = vrot.slane %v3896_v31, 5  ;;  %v3920_v54 = vshll.u32 %v8707_v28, 16  ;;  %v5877_v39 = vld [vmem:[%s7079_s25 + $0x54] sm:$0xf]  ;;  %v6978_v6 = vld [vmem:[%s7079_s25 + $0x84] sm:$0xff]  }
  0xf8   : > { %6795 = vmatpush3.bf16.msra.mxu0 %v6984_v49  ;;  %v4617_v49 = vrot.slane %v8644_v15, 5  ;;  %v8717_v52 = vpop.f32.mrf.mxu0  ;;  %v3934_v15 = vshll.u32 %v8700_v33, 16  ;;  %v4621_v31 = vrot.slane %v8633_v37, 5  ;;  %v9817_v37 = vcombine.low %v8393_v12, %v8397_v46  ;;  %v6981_v47 = vld [vmem:[%s7079_s25 + $0x90] sm:$0xff]  }
  0xf9   : > { %6796 = vmatprep.subr.bf16.mxu0 %v6988_v23  ;;  %9814 = vst [vmem:[#allocation7_spill] sm:$0xff] %v8717_v52 }
  0xfa   : > { %6717 = vmatmul.mubr.bf16.gmra.mxu0 %v6974_v61  ;;  %6747 = vmatpush3.bf16.msra.mxu1 %v6983_v55  ;;  %v8728_v61 = vcombine.low %v3865_v2, %v3875_v22  ;;  %v3907_v55 = vor.u32 %v3906_v51, %v3903_v0  ;;  %v3917_v2 = vor.u32 %v3916_v10, %v8709_v11  ;;  %v8746_v22 = vld [vmem:[%s7079_s25 + $0x58] sm:$0xf]  ;;  %v8753_v51 = vrot.slane %v3893_v21, 4 }
  0xfb   : > { %6720 = vmatprep.mubr.bf16.mxu0 %v6977_v36  ;;  %6748 = vmatprep.subr.bf16.mxu1 %v6987_v60  ;;  %v8741_v36 = vsel %vm7421_vm5, %v5968_v45, %v4614_v59  ;;  %v9815_v0 = vcombine.low %v8376_v16, %v8381_v53  ;;  %v8757_v59 = vsel %vm7421_vm5, %v4616_v48, %v4617_v49  ;;  %v3927_v45 = vrot.slane %v3925_v1, 4  ;;  %v8764_v16 = vpop.f32.mrf.mxu0  ;;  %v5876_v1 = vld [vmem:[%s7079_s25 + $0x50] sm:$0x1] }
  0xfc   : > { %6797 = vmatpush3.bf16.msra.mxu0 %v6988_v23  ;;  %v8751_v23 = vpop.f32.mrf.mxu1  ;;  %v3930_v10 = vrot.slane %v3928_v18, 5  ;;  %9818 = vst [vmem:[#allocation9_spill] sm:$0xff] %v8764_v16  ;;  %v5969_v53 = vrot.slane %v5953_v14, 9  ;;  %v3940_v21 = vrot.slane %v3938_v63, 4  ;;  %v3908_v48 = vrot.slane %v3907_v55, 4 }
  0xfd   : > { %6669 = vmatmul.mubr.bf16.gmra.mxu1 %v9815_v0  ;;  %9816 = vst [vmem:[#allocation8_spill] sm:$0xff] %v8751_v23  ;;  %6798 = vmatprep.subr.bf16.mxu0 %v6992_v30  ;;  %v8766_v0 = vrot.slane %v3934_v15, 5  ;;  %v3949_v23 = vshrl.u32 %v5877_v39, 16  ;;  %v3922_v49 = vrot.slane %v3920_v54, 5  ;;  %v3952_v18 = vshll.u32 %v5877_v39, 16  ;;  %v8782_v39 = vpop.f32.mrf.mxu0 }
  0xfe   : > { %6672 = vmatprep.mubr.bf16.mxu1 %v9817_v37  ;;  %6749 = vmatpush3.bf16.msra.mxu1 %v6987_v60  ;;  %v3958_v52 = vshll.u32 %v8746_v22, 16  ;;  %v3918_v12 = vrot.slane %v3917_v2, 4  ;;  %v4623_v46 = vrot.slane %v4621_v31, 4  ;;  %v4624_v37 = vrot.slane %v8707_v28, 5  ;;  %v8772_v60 = vpop.f32.mrf.mxu1  ;;  %v5880_v55 = vld [vmem:[%s7079_s25 + $0x60] sm:$0xf] }
  0xff   : > { %6750 = vmatprep.subr.bf16.mxu1 %v6991_v42  ;;  %v3962_v14 = vshrl.u32 %v8746_v22, 16  ;;  %9819 = vst [vmem:[#allocation10_spill] sm:$0xff] %v8772_v60  ;;  %v3899_v15 = vsel %vm7110_vm2, %v8753_v51, %v8730_v43  ;;  %v3931_v63 = vor.u32 %v3930_v10, %v3927_v45  ;;  %v3941_v28 = vor.u32 %v3940_v21, %v8766_v0  ;;  %v5954_v60 = vld [vmem:[%s7079_s25 + $0x48] sm:$0xe] }
 0x100   : > { %6799 = vmatpush3.bf16.msra.mxu0 %v6992_v30  ;;  %v4628_v30 = vrot.slane %v8700_v33, 5  ;;  %v3944_v2 = vshll.u32 %v5876_v1, 16  ;;  %v3951_v16 = vrot.slane %v3949_v23, 4  ;;  %v3954_v62 = vrot.slane %v3952_v18, 5  ;;  %v8807_v10 = vpop.f32.mrf.mxu1 }
 0x101   : > { %v3913_v43 = vsel %vm7110_vm2, %v3908_v48, %v8709_v11  ;;  %v8791_v33 = vsel %vm7421_vm5, %v5969_v53, %v4621_v31  ;;  %v3923_v51 = vsel %vm7110_vm2, %v3918_v12, %v3922_v49  ;;  %v8799_v23 = vsel %vm7421_vm5, %v4623_v46, %v4624_v37  ;;  %9821 = vst [vmem:[#allocation11_spill] sm:$0xff] %v8807_v10  ;;  %v8810_v49 = vld [vmem:[%s7079_s25 + $0x64] sm:$0xf]  ;;  %v6982_v12 = vld [vmem:[%s7079_s25 + $0x9c] sm:$0xff]   ;;  %v8816_v46 = vpop.f32.mrf.mxu0 }
 0x102   : > { %6721 = vmatmul.mubr.bf16.gmra.mxu0 %v6978_v6  ;;  %6751 = vmatpush3.bf16.msra.mxu1 %v6991_v42  ;;  %v8793_v6 = vrot.slane %v3958_v52, 5  ;;  %v3964_v42 = vrot.slane %v3962_v14, 4  ;;  %v3973_v45 = vshrl.u32 %v5880_v55, 16  ;;  %v3976_v11 = vshll.u32 %v5880_v55, 16  ;;  %v6985_v55 = vld [vmem:[%s7079_s25 + $0xa8] sm:$0xff]  }
 0x103   : > { %6724 = vmatprep.mubr.bf16.mxu0 %v6981_v47  ;;  %v8802_v47 = vld [vmem:[%s7079_s25 + $0x5c] sm:$0x1]  ;;  %v9820_v31 = vcombine.low %v8409_v34, %v8418_v17  ;;  %v3932_v52 = vrot.slane %v3931_v63, 4  ;;  %v5970_v53 = vrot.slane %v5954_v60, 9  ;;  %v4630_v21 = vrot.slane %v4628_v30, 4 }
 0x104   : > { %v4631_v48 = vrot.slane %v5876_v1, 5  ;;  %v9822_v18 = vcombine.low %v8435_v32, %v8439_v58  ;;  %v3942_v37 = vrot.slane %v3941_v28, 4  ;;  %v3946_v14 = vrot.slane %v3944_v2, 5  ;;  %v5955_v63 = vld [vmem:[%s7079_s25 + $0x54] sm:$0xe]  ;;  %v8834_v28 = vpop.f32.mrf.mxu1 }
 0x105   : > { %6673 = vmatmul.mubr.bf16.gmra.mxu1 %v9820_v31  ;;  %v3955_v34 = vor.u32 %v3954_v62, %v3951_v16  ;;  %v4635_v17 = vrot.slane %v8746_v22, 5  ;;  %v3965_v60 = vor.u32 %v3964_v42, %v8793_v6  ;;  %v3968_v1 = vshll.u32 %v8802_v47, 16  ;;  %9824 = vst [vmem:[#allocation12_spill] sm:$0xff] %v8834_v28  ;;  %v5956_v62 = vld [vmem:[%s7079_s25 + $0x60] sm:$0xe] }
 0x106   : > { %6676 = vmatprep.mubr.bf16.mxu1 %v9822_v18  ;;  %v3975_v31 = vrot.slane %v3973_v45, 4  ;;  %v3978_v54 = vrot.slane %v3976_v11, 5  ;;  %v9823_v32 = vsel %vm7110_vm2, %v8702_v50, %v8646_v7  ;;  %v3982_v22 = vshll.u32 %v8810_v49, 16 }
 0x107   : > { %v8828_v58 = vcombine.low %v9823_v32, %v3899_v15  ;;  %v3986_v16 = vshrl.u32 %v8810_v49, 16  ;;  %v8836_v2 = vcombine.low %v3913_v43, %v3923_v51  ;;  %v3937_v42 = vsel %vm7110_vm2, %v3932_v52, %v8766_v0  ;;  %v5883_v15 = vld [vmem:[%s7079_s25 + $0x6c] sm:$0xf]  ;;  %v8854_v32 = vld [vmem:[%s7079_s25 + $0x70] sm:$0xf] }
 0x108   : > { %v8843_v7 = vsel %vm7421_vm5, %v5970_v53, %v4628_v30  ;;  %v8847_v50 = vsel %vm7421_vm5, %v4630_v21, %v4631_v48  ;;  %v8850_v45 = vpop.f32.mrf.mxu0  ;;  %v3956_v43 = vrot.slane %v3955_v34, 4  ;;  %v5971_v51 = vrot.slane %v5955_v63, 9  ;;  %v5882_v53 = vld [vmem:[%s7079_s25 + $0x68] sm:$0x1] }
 0x109   : > { %9825 = vst [vmem:[#allocation13_spill] sm:$0xff] %v8850_v45  ;;  %v4637_v11 = vrot.slane %v4635_v17, 4  ;;  %v4638_v18 = vrot.slane %v8802_v47, 5  ;;  %v3947_v0 = vsel %vm7110_vm2, %v3942_v37, %v3946_v14  ;;  %v3966_v30 = vrot.slane %v3965_v60, 4  ;;  %v5958_v45 = vld [vmem:[%s7079_s25 + $0x78] sm:$0xe] }
 0x10a   : > { %6725 = vmatmul.mubr.bf16.gmra.mxu0 %v6982_v12  ;;  %v3970_v52 = vrot.slane %v3968_v1, 5  ;;  %v3979_v21 = vor.u32 %v3978_v54, %v3975_v31  ;;  %v8859_v48 = vrot.slane %v3982_v22, 5  ;;  %v3988_v12 = vrot.slane %v3986_v16, 4  ;;  %v6986_v31 = vld [vmem:[%s7079_s25 + $0xb4] sm:$0xff]  }
 0x10b   : > { %6728 = vmatprep.mubr.bf16.mxu0 %v6985_v55  ;;  %v3997_v34 = vshrl.u32 %v5883_v15, 16  ;;  %v4000_v63 = vshll.u32 %v5883_v15, 16  ;;  %v9826_v47 = vcombine.low %v8455_v5, %v8460_v25  ;;  %v4642_v14 = vrot.slane %v8810_v49, 5  ;;  %v8876_v5 = vpop.f32.mrf.mxu0 }
 0x10c   : > { %v4006_v54 = vshll.u32 %v8854_v32, 16  ;;  %v4010_v60 = vshrl.u32 %v8854_v32, 16  ;;  %v9828_v1 = vcombine.low %v8473_v9, %v8467_v29  ;;  %9829 = vst [vmem:[#allocation15_spill] sm:$0xff] %v8876_v5  ;;  %v8878_v25 = vcombine.low %v3937_v42, %v3947_v0  ;;  %v5886_v29 = vld [vmem:[%s7079_s25 + $0x78] sm:$0xf]  ;;  %v6989_v9 = vld [vmem:[%s7079_s25 + $0xc0] sm:$0xff]  }
 0x10d   : > { %6677 = vmatmul.mubr.bf16.gmra.mxu1 %v9826_v47  ;;  %v8865_v55 = vpop.f32.mrf.mxu1  ;;  %v3961_v22 = vsel %vm7110_vm2, %v3956_v43, %v8793_v6  ;;  %v8885_v49 = vsel %vm7421_vm5, %v5971_v51, %v4635_v17  ;;  %v8889_v16 = vsel %vm7421_vm5, %v4637_v11, %v4638_v18  ;;  %v3971_v15 = vsel %vm7110_vm2, %v3966_v30, %v3970_v52  ;;  %v8902_v43 = vld [vmem:[%s7079_s25 + $0x74] sm:$0x1]  ;;  %v8959_v5 = vld [vmem:[%s7079_s25 + $0x8c] sm:$0x1] }
 0x10e   : > { %9827 = vst [vmem:[#allocation14_spill] sm:$0xff] %v8865_v55  ;;  %6680 = vmatprep.mubr.bf16.mxu1 %v9828_v1  ;;  %v8895_v47 = vrot.slane %v3979_v21, 4  ;;  %v3992_v42 = vshll.u32 %v5882_v53, 16  ;;  %v5972_v0 = vrot.slane %v5956_v62, 9  ;;  %v8898_v1 = vld [vmem:[%s7079_s25 + $0x7c] sm:$0xf]  ;;  %v3989_v6 = vor.u32 %v3988_v12, %v8859_v48  ;;  %v8908_v21 = vpop.f32.mrf.mxu0 }
 0x10f   : > { %v4645_v17 = vrot.slane %v5882_v53, 5  ;;  %v3999_v51 = vrot.slane %v3997_v34, 4  ;;  %v4002_v11 = vrot.slane %v4000_v63, 5  ;;  %v8904_v18 = vpop.f32.mrf.mxu1  ;;  %v4644_v37 = vrot.slane %v4642_v14, 4  ;;  %9831 = vst [vmem:[#allocation17_spill] sm:$0xff] %v8908_v21 }
 0x110   : > { %9830 = vst [vmem:[#allocation16_spill] sm:$0xff] %v8904_v18  ;;  %v8906_v55 = vrot.slane %v4006_v54, 5  ;;  %v4012_v30 = vrot.slane %v4010_v60, 4  ;;  %v4021_v52 = vshrl.u32 %v5886_v29, 16  ;;  %v5957_v53 = vld [vmem:[%s7079_s25 + $0x6c] sm:$0xe]  ;;  %v8915_v18 = vcombine.low %v3961_v22, %v3971_v15 }
 0x111   : > { %v4024_v12 = vshll.u32 %v5886_v29, 16  ;;  %v4030_v34 = vshll.u32 %v8898_v1, 16  ;;  %v4034_v63 = vshrl.u32 %v8898_v1, 16  ;;  %v8917_v54 = vrot.slane %v3992_v42, 5  ;;  %v5889_v62 = vld [vmem:[%s7079_s25 + $0x84] sm:$0xf]  ;;  %v8938_v42 = vpop.f32.mrf.mxu1 }
 0x112   : > { %6729 = vmatmul.mubr.bf16.gmra.mxu0 %v6986_v31  ;;  %9832 = vst [vmem:[#allocation18_spill] sm:$0xff] %v8915_v18  ;;  %v8921_v60 = vsel %vm7421_vm5, %v5972_v0, %v4642_v14  ;;  %v4016_v31 = vshll.u32 %v8902_v43, 16  ;;  %v8929_v28 = vrot.slane %v3989_v6, 4  ;;  %v4649_v22 = vrot.slane %v8854_v32, 5  ;;  %v8933_v15 = vld [vmem:[%s7079_s25 + $0x88] sm:$0xf] }
 0x113   : > { %6732 = vmatprep.mubr.bf16.mxu0 %v6989_v9  ;;  %v4003_v9 = vor.u32 %v4002_v11, %v3999_v51  ;;  %v9833_v14 = vcombine.low %v8482_v4, %v8486_v13  ;;  %9834 = vst [vmem:[#allocation19_spill] sm:$0xff] %v8938_v42  ;;  %v6990_v0 = vld [vmem:[%s7079_s25 + $0xcc] sm:$0xff]   ;;  %v8943_v10 = vsel %vm7421_vm5, %v4644_v37, %v4645_v17  ;;  %v5973_v6 = vrot.slane %v5957_v53, 9  ;;  %v8946_v11 = vpop.f32.mrf.mxu0  ;;  %v8952_v4 = vld [vmem:[%s7079_s25 + $0x80] sm:$0x1] }
 0x114   : > { %v4013_v29 = vor.u32 %v4012_v30, %v8906_v55  ;;  %v4023_v51 = vrot.slane %v4021_v52, 4  ;;  %9835 = vst [vmem:[#allocation20_spill] sm:$0xff] %v8946_v11  ;;  %v9836_v32 = vcombine.low %v8517_v26, %v8521_v35  ;;  %v4026_v13 = vrot.slane %v4024_v12, 5 }
 0x115   : > { %6681 = vmatmul.mubr.bf16.gmra.mxu1 %v9833_v14  ;;  %v8954_v14 = vrot.slane %v4030_v34, 5  ;;  %v4036_v42 = vrot.slane %v4034_v63, 4  ;;  %v4045_v21 = vshrl.u32 %v5889_v62, 16  ;;  %v4018_v37 = vrot.slane %v4016_v31, 5 }
 0x116   : > { %6684 = vmatprep.mubr.bf16.mxu1 %v9836_v32  ;;  %v4652_v17 = vrot.slane %v8902_v43, 5  ;;  %v4048_v30 = vshll.u32 %v5889_v62, 16  ;;  %v4054_v52 = vshll.u32 %v8933_v15, 16  ;;  %v4004_v53 = vrot.slane %v4003_v9, 4  ;;  %v8962_v32 = vpop.f32.mrf.mxu1 }
 0x117   : > { %v4651_v11 = vrot.slane %v4649_v22, 4  ;;  %v4047_v26 = vrot.slane %v4045_v21, 4  ;;  %v4058_v35 = vshrl.u32 %v8933_v15, 16  ;;  %v4014_v12 = vrot.slane %v4013_v29, 4 }
 0x118   : > { %v4040_v34 = vshll.u32 %v8952_v4, 16  ;;  %v4050_v63 = vrot.slane %v4048_v30, 5  ;;  %v8965_v31 = vrot.slane %v4054_v52, 5  ;;  %v4027_v62 = vor.u32 %v4026_v13, %v4023_v51  ;;  %v5959_v52 = vld [vmem:[%s7079_s25 + $0x84] sm:$0xe] }
 0x119   : > { %v8967_v43 = vpop.f32.mrf.mxu0  ;;  %v4037_v9 = vor.u32 %v4036_v42, %v8954_v14  ;;  %v4656_v21 = vrot.slane %v8898_v1, 5  ;;  %v4060_v18 = vrot.slane %v4058_v35, 4  ;;  %v9837_v29 = vcombine.low %v8613_v41, %v8628_v3 }
 0x11a   : > { %6733 = vmatmul.mubr.bf16.gmra.mxu0 %v6990_v0  ;;  %v3995_v30 = vsel %vm7110_vm2, %v8929_v28, %v8917_v54  ;;  %v8983_v51 = vsel %vm7421_vm5, %v5973_v6, %v4649_v22  ;;  %v4064_v42 = vshll.u32 %v8959_v5, 16  ;;  %v4009_v41 = vsel %vm7110_vm2, %v4004_v53, %v8906_v55  ;;  %v5892_v54 = vld [vmem:[%s7079_s25 + $0x90] sm:$0xf] }
 0x11b   : > { %6800 = vmatprep.mubr.bf16.mxu0 %v9837_v29  ;;  %v8986_v1 = vpop.f32.mrf.mxu0  ;;  %v4051_v3 = vor.u32 %v4050_v63, %v4047_v26  ;;  %v4061_v13 = vor.u32 %v4060_v18, %v8965_v31  ;;  %v4663_v28 = vrot.slane %v8933_v15, 5  ;;  %v9839_v22 = vcombine.low %v8530_v44, %v8535_v8 }
 0x11c   : > { %v4019_v6 = vsel %vm7110_vm2, %v4014_v12, %v4018_v37  ;;  %v9004_v55 = vsel %vm7421_vm5, %v4651_v11, %v4652_v17  ;;  %v4042_v53 = vrot.slane %v4040_v34, 5  ;;  %v5974_v18 = vrot.slane %v5958_v45, 9  ;;  %v9013_v12 = vld [vmem:[%s7079_s25 + $0x94] sm:$0xf] }
 0x11d   : > { %v8995_v35 = vpop.f32.mrf.mxu1  ;;  %6685 = vmatmul.mubr.bf16.gmra.mxu1 %v9839_v22  ;;  %v9006_v26 = vpop.f32.mrf.mxu0  ;;  %v4028_v15 = vrot.slane %v4027_v62, 4  ;;  %v4038_v63 = vrot.slane %v4037_v9, 4  ;;  %v4658_v29 = vrot.slane %v4656_v21, 4  ;;  %v4659_v0 = vrot.slane %v8952_v4, 5 }
 0x11e   : > { %9838 = vst [vmem:[#allocation21_spill] sm:$0xff] %v8995_v35  ;;  %6752 = vmatprep.mubr.bf16.mxu1 %v8722_v40  ;;  %v4066_v8 = vrot.slane %v4064_v42, 5  ;;  %v5975_v37 = vrot.slane %v5959_v52, 9  ;;  %v4069_v11 = vshrl.u32 %v5892_v54, 16  ;;  %v4072_v17 = vshll.u32 %v5892_v54, 16 }
 0x11f   : > { %v9010_v44 = vpop.f32.mrf.mxu1  ;;  %v9015_v34 = vpop.f32.mrf.mxu0  ;;  %v4052_v45 = vrot.slane %v4051_v3, 4  ;;  %v4062_v22 = vrot.slane %v4061_v13, 4  ;;  %v4665_v40 = vrot.slane %v4663_v28, 4  ;;  %v4666_v62 = vrot.slane %v8959_v5, 5  ;;  %v9036_v54 = vld [vmem:[%s7079_s25 + $0x98] sm:$0x1] }
 0x120   : > { %9840 = vst [vmem:[#allocation22_spill] sm:$0xff] %v9010_v44  ;;  %v9842_v4 = vsel %vm7110_vm2, %v8895_v47, %v8859_v48  ;;  %v9027_v52 = vcombine.low %v4009_v41, %v4019_v6  ;;  %v9033_v13 = vsel %vm7421_vm5, %v5974_v18, %v4656_v21  ;;  %v4033_v48 = vsel %vm7110_vm2, %v4028_v15, %v8954_v14  ;;  %v5895_v41 = vld [vmem:[%s7079_s25 + $0x9c] sm:$0xf]  ;;  %v9053_v6 = vld [vmem:[%s7079_s25 + $0xa0] sm:$0xf] }
 0x121   : > { %v9018_v9 = vpop.f32.mrf.mxu1  ;;  %v9025_v42 = vcombine.low %v9842_v4, %v3995_v30  ;;  %v6514_v5 = vpop.f32.mrf.mxu0  ;;  %v4043_v47 = vsel %vm7110_vm2, %v4038_v63, %v4042_v53  ;;  %v9048_v30 = vsel %vm7421_vm5, %v4658_v29, %v4659_v0  ;;  %v4078_v21 = vshll.u32 %v9013_v12, 16  ;;  %v9140_v35 = vld [vmem:[%s7079_s25 + $0xb0] sm:$0x1] }
 0x122   : > { %9841 = vst [vmem:[#allocation23_spill] sm:$0xff] %v9018_v9  ;;  %v9843_v9 = vcombine.low %v8685_v20, %v8689_v19  ;;  %v9845_v20 = vcombine.low %v8741_v36, %v8757_v59  ;;  %v9062_v19 = vsel %vm7421_vm5, %v5975_v37, %v4663_v28  ;;  %v4071_v14 = vrot.slane %v4069_v11, 4  ;;  %v9077_v37 = vld [vmem:[%s7079_s25 + $0x90] sm:$0xe] }
 0x123   : > { %v9055_v18 = vpop.f32.mrf.mxu1  ;;  %v4074_v53 = vrot.slane %v4072_v17, 5  ;;  %v4082_v0 = vshrl.u32 %v9013_v12, 16  ;;  %v1595_v15 = vpop.f32.mrf.mxu0  ;;  %v4057_v63 = vsel %vm7110_vm2, %v4052_v45, %v8965_v31  ;;  %v4067_v29 = vsel %vm7110_vm2, %v4062_v22, %v4066_v8 }
 0x124   : > { %6801 = vmatmul.mubr.bf16.vlgmr.msra.gmra.mxu0 %v9843_v9  ;;  %9844 = vst [vmem:[#allocation24_spill] sm:$0xff] %v9055_v18  ;;  %v9072_v36 = vsel %vm7421_vm5, %v4665_v40, %v4666_v62  ;;  %v4088_v59 = vshll.u32 %v9036_v54, 16  ;;  %v4093_v11 = vshrl.u32 %v5895_v41, 16  ;;  %v4096_v17 = vshll.u32 %v5895_v41, 16 }
 0x125   : > { %6804 = vmatprep.mubr.bf16.mxu0 %v9845_v20  ;;  %v6466_v28 = vpop.f32.mrf.mxu1  ;;  %6753 = vmatmul.mubr.bf16.vlgmr.msra.gmra.mxu1 %v8728_v61  ;;  %v4102_v9 = vshll.u32 %v9053_v6, 16  ;;  %v4106_v31 = vshrl.u32 %v9053_v6, 16  ;;  %v6515_v45 = vpop.f32.mrf.mxu0  ;;  %v9083_v22 = vcombine.low %v4033_v48, %v4043_v47  ;;  %v9087_v40 = vrot.slane %v4078_v21, 5  ;;  %v9101_v61 = vld [vmem:[%s7079_s25 + $0xa4] sm:$0x1] }
 0x126   : > { %v1151_v8 = vadd.f32 %v6466_v28, %v8578_v24  ;;  %6756 = vmatprep.mubr.bf16.mxu1 %v8828_v58  ;;  %v9089_v4 = vcombine.low %v4057_v63, %v4067_v29  ;;  %v4075_v20 = vor.u32 %v4074_v53, %v4071_v14  ;;  %v4084_v24 = vrot.slane %v4082_v0, 4  ;;  %v5898_v28 = vld [vmem:[%s7079_s25 + $0xa8] sm:$0xf]  ;;  %v9106_v14 = vld [vmem:[%s7079_s25 + $0xac] sm:$0xf] }
 0x127   : > { %v1142_v62 = vpop.f32.mrf.mxu1  ;;  %v1598_v48 = vpop.f32.mrf.mxu0  ;;  %v9097_v47 = vrot.slane %v4088_v59, 5  ;;  %v5976_v21 = vrot.slane %v9077_v37, 9  ;;  %v4095_v29 = vrot.slane %v4093_v11, 4  ;;  %v4098_v18 = vrot.slane %v4096_v17, 5 }
 0x128   : > { %v9094_v3 = vadd.f32 %v6514_v5, %v1151_v8  ;;  %v1143_v58 = vadd.f32 %v1142_v62, %v8599_v57  ;;  %v9103_v44 = vrot.slane %v4102_v9, 5  ;;  %v4108_v41 = vrot.slane %v4106_v31, 4  ;;  %v9851_v62 = vld [vmem:[#allocation3_spill] sm:$0xff] }
 0x129   : > { %v6467_v63 = vpop.f32.mrf.mxu1  ;;  %v6518_v5 = vpop.f32.mrf.mxu0  ;;  %v9848_v0 = vcombine.low %v8791_v33, %v8799_v23  ;;  %v4117_v59 = vshrl.u32 %v5898_v28, 16  ;;  %v4120_v37 = vshll.u32 %v5898_v28, 16  ;;  %v9849_v11 = vcombine.low %v8843_v7, %v8847_v50 }
 0x12a   : > { %9846 = vst [vmem:[#allocation25_spill] sm:$0xff] %v9094_v3  ;;  %v9108_v53 = vadd.f32 %v1595_v15, %v1143_v58  ;;  %v1154_v57 = vadd.f32 %v6467_v63, %v8635_v38  ;;  %v9117_v17 = vrot.slane %v4075_v20, 4  ;;  %v4085_v15 = vor.u32 %v4084_v24, %v9087_v40  ;;  %v5961_v58 = vld [vmem:[%s7079_s25 + $0x9c] sm:$0xe] }
 0x12b   : > { %v1145_v8 = vpop.f32.mrf.mxu1  ;;  %v4670_v9 = vrot.slane %v9013_v12, 5  ;;  %v4112_v38 = vshll.u32 %v9101_v61, 16  ;;  %v1611_v23 = vpop.f32.mrf.mxu0  ;;  %v4673_v28 = vrot.slane %v9036_v54, 5  ;;  %v4126_v63 = vshll.u32 %v9106_v14, 16 }
 0x12c   : > { %9847 = vst [vmem:[#allocation26_spill] sm:$0xff] %v9108_v53  ;;  %6805 = vmatmul.mubr.bf16.gmra.mxu0 %v9848_v0  ;;  %v9122_v31 = vadd.f32 %v6515_v45, %v1154_v57  ;;  %v1146_v33 = vadd.f32 %v1145_v8, %v9851_v62  ;;  %v4099_v50 = vor.u32 %v4098_v18, %v4095_v29  ;;  %v4677_v12 = vrot.slane %v9053_v6, 5  ;;  %v9852_v57 = vld [vmem:[#allocation7_spill] sm:$0xff]  ;;  %v9853_v6 = vld [vmem:[#allocation9_spill] sm:$0xff] }
 0x12d   : > { %6808 = vmatprep.mubr.bf16.mxu0 %v9849_v11  ;;  %v6470_v7 = vpop.f32.mrf.mxu1  ;;  %6757 = vmatmul.mubr.bf16.gmra.mxu1 %v8836_v2  ;;  %v4109_v20 = vor.u32 %v4108_v41, %v9103_v44  ;;  %v4130_v45 = vshrl.u32 %v9106_v14, 16  ;;  %v6519_v8 = vpop.f32.mrf.mxu0  ;;  %v4119_v54 = vrot.slane %v4117_v59, 4  ;;  %v4122_v11 = vrot.slane %v4120_v37, 5 }
 0x12e   : > { %9850 = vst [vmem:[#allocation27_spill] sm:$0xff] %v9122_v31  ;;  %v9132_v24 = vadd.f32 %v1598_v48, %v1146_v33  ;;  %v1167_v0 = vadd.f32 %v6470_v7, %v9852_v57  ;;  %6760 = vmatprep.mubr.bf16.mxu1 %v8878_v25  ;;  %v4086_v31 = vrot.slane %v4085_v15, 4  ;;  %v4672_v2 = vrot.slane %v4670_v9, 4 }
 0x12f   : > { %v1158_v62 = vpop.f32.mrf.mxu1  ;;  %v4114_v18 = vrot.slane %v4112_v38, 5  ;;  %v5977_v29 = vrot.slane %v5961_v58, 9  ;;  %v1614_v3 = vpop.f32.mrf.mxu0  ;;  %v9142_v48 = vrot.slane %v4126_v63, 5  ;;  %v4132_v33 = vrot.slane %v4130_v45, 4 }
 0x130   : > { %v9136_v41 = vadd.f32 %v6518_v5, %v1167_v0  ;;  %v1159_v53 = vadd.f32 %v1158_v62, %v9853_v6  ;;  %v4100_v57 = vrot.slane %v4099_v50, 4  ;;  %v4110_v25 = vrot.slane %v4109_v20, 4 }
 0x131   : > { %v6471_v7 = vpop.f32.mrf.mxu1  ;;  %v4679_v59 = vrot.slane %v4677_v12, 4  ;;  %v4680_v37 = vrot.slane %v9101_v61, 5  ;;  %v6522_v38 = vpop.f32.mrf.mxu0  ;;  %v9854_v58 = vcombine.low %v8885_v49, %v8889_v16  ;;  %v9153_v63 = vsel %vm7421_vm5, %v5976_v21, %v4670_v9  ;;  %v5962_v21 = vld [vmem:[%s7079_s25 + $0xa8] sm:$0xe] }
 0x132   : > { %v9145_v15 = vadd.f32 %v1611_v23, %v1159_v53  ;;  %v1170_v5 = vadd.f32 %v6471_v7, %v8782_v39  ;;  %v4123_v50 = vor.u32 %v4122_v11, %v4119_v54  ;;  %v9855_v20 = vcombine.low %v8921_v60, %v8943_v10 }
 0x133   : > { %v1161_v45 = vpop.f32.mrf.mxu1  ;;  %v4081_v39 = vsel %vm7110_vm2, %v9117_v17, %v9087_v40  ;;  %v4091_v49 = vsel %vm7110_vm2, %v4086_v31, %v9097_v47  ;;  %v9167_v16 = vsel %vm7421_vm5, %v4672_v2, %v4673_v28  ;;  %v4136_v61 = vshll.u32 %v9140_v35, 16  ;;  %v1627_v60 = vpop.f32.mrf.mxu0  ;;  %v5901_v17 = vld [vmem:[%s7079_s25 + $0xb4] sm:$0xf]  ;;  %v9856_v47 = vld [vmem:[#allocation18_spill] sm:$0xff]  ;;  %v9196_v2 = vld [vmem:[%s7079_s25 + $0xb8] sm:$0xf] }
 0x134   : > { %6809 = vmatmul.mubr.bf16.gmra.mxu0 %v9854_v58  ;;  %v9171_v53 = vadd.f32 %v6519_v8, %v1170_v5  ;;  %v1162_v10 = vadd.f32 %v1161_v45, %v8816_v46  ;;  %v4133_v9 = vor.u32 %v4132_v33, %v9142_v48  ;;  %v4684_v40 = vrot.slane %v9106_v14, 5  ;;  %v9857_v8 = vld [vmem:[#allocation13_spill] sm:$0xff] }
 0x135   : > { %6812 = vmatprep.mubr.bf16.mxu0 %v9855_v20  ;;  %v6474_v23 = vpop.f32.mrf.mxu1  ;;  %6761 = vmatmul.mubr.bf16.gmra.mxu1 %v9856_v47  ;;  %v4105_v31 = vsel %vm7110_vm2, %v4100_v57, %v9103_v44  ;;  %v4115_v28 = vsel %vm7110_vm2, %v4110_v25, %v4114_v18  ;;  %v9185_v46 = vsel %vm7421_vm5, %v5977_v29, %v4677_v12  ;;  %v6523_v11 = vpop.f32.mrf.mxu0  ;;  %v4124_v62 = vrot.slane %v4123_v50, 4  ;;  %v9858_v57 = vld [vmem:[#allocation15_spill] sm:$0xff]  ;;  %v9862_v47 = vld [vmem:[#allocation20_spill] sm:$0xff] }
 0x136   : > { %v9189_v0 = vsel %vm7421_vm5, %v4679_v59, %v4680_v37  ;;  %v9191_v14 = vadd.f32 %v1614_v3, %v1162_v10  ;;  %v1183_v54 = vadd.f32 %v6474_v23, %v9857_v8  ;;  %6764 = vmatprep.mubr.bf16.mxu1 %v9025_v42  ;;  %v5978_v44 = vrot.slane %v5962_v21, 9 }
 0x137   : > { %v1174_v18 = vpop.f32.mrf.mxu1  ;;  %v4138_v6 = vrot.slane %v4136_v61, 5  ;;  %v4687_v12 = vrot.slane %v9140_v35, 5  ;;  %v4141_v29 = vshrl.u32 %v5901_v17, 16  ;;  %v4144_v33 = vshll.u32 %v5901_v17, 16  ;;  %v1630_v25 = vpop.f32.mrf.mxu0 }
 0x138   : > { %v9199_v7 = vadd.f32 %v6522_v38, %v1183_v54  ;;  %v1175_v3 = vadd.f32 %v1174_v18, %v9858_v57  ;;  %v4134_v59 = vrot.slane %v4133_v9, 4  ;;  %v4686_v37 = vrot.slane %v4684_v40, 4  ;;  %v9859_v38 = vld [vmem:[#allocation17_spill] sm:$0xff] }
 0x139   : > { %v6475_v42 = vpop.f32.mrf.mxu1  ;;  %v9202_v5 = vcombine.low %v4081_v39, %v4091_v49  ;;  %v6008_v58 = vcombine.low %v9153_v63, %v9167_v16  ;;  %v9206_v50 = vcombine.low %v4105_v31, %v4115_v28  ;;  %v4150_v35 = vshll.u32 %v9196_v2, 16  ;;  %v6526_v61 = vpop.f32.mrf.mxu0  ;;  %v5904_v49 = vld [vmem:[%s7079_s25 + $0xc0] sm:$0xf]  ;;  %v9220_v16 = vld [vmem:[%s7079_s25 + $0xc4] sm:$0xf] }
 0x13a   : > { %v9209_v45 = vadd.f32 %v1627_v60, %v1175_v3  ;;  %v1186_v20 = vadd.f32 %v6475_v42, %v9859_v38  ;;  %v9860_v21 = vcombine.low %v8983_v51, %v9004_v55  ;;  %v6009_v39 = vcombine.low %v9185_v46, %v9189_v0  ;;  %v9867_v46 = vld [vmem:[#allocation6_spill] sm:$0xff] }
 0x13b   : > { %v4154_v63 = vshrl.u32 %v9196_v2, 16  ;;  %v1177_v10 = vpop.f32.mrf.mxu1  ;;  %v9861_v60 = vcombine.low %v9033_v13, %v9048_v30  ;;  %v4129_v51 = vsel %vm7110_vm2, %v4124_v62, %v9142_v48  ;;  %v9230_v55 = vsel %vm7421_vm5, %v5978_v44, %v4684_v40  ;;  %v1643_v28 = vpop.f32.mrf.mxu0  ;;  %v9242_v30 = vld [vmem:[%s7079_s25 + $0xbc] sm:$0x1]  ;;  %v5963_v48 = vld [vmem:[%s7079_s25 + $0xb4] sm:$0xe] }
 0x13c   : > { %6813 = vmatmul.mubr.bf16.gmra.mxu0 %v9860_v21  ;;  %v4143_v9 = vrot.slane %v4141_v29, 4  ;;  %v4146_v17 = vrot.slane %v4144_v33, 5  ;;  %v9232_v23 = vadd.f32 %v6523_v11, %v1186_v20  ;;  %v1178_v31 = vadd.f32 %v1177_v10, %v9862_v47  ;;  %v9264_v20 = vld [vmem:[%s7079_s25 + $0xc8] sm:$0x1] }
 0x13d   : > { %6816 = vmatprep.mubr.bf16.mxu0 %v9861_v60  ;;  %v4139_v8 = vsel %vm7110_vm2, %v4134_v59, %v4138_v6  ;;  %v9239_v13 = vsel %vm7421_vm5, %v4686_v37, %v4687_v12  ;;  %v6478_v54 = vpop.f32.mrf.mxu1  ;;  %6765 = vmatmul.mubr.bf16.gmra.mxu1 %v9027_v52  ;;  %v9246_v40 = vrot.slane %v4150_v35, 5  ;;  %v4165_v11 = vshrl.u32 %v5904_v49, 16  ;;  %v6527_v29 = vpop.f32.mrf.mxu0 }
 0x13e   : > { %v4168_v62 = vshll.u32 %v5904_v49, 16  ;;  %v4174_v44 = vshll.u32 %v9220_v16, 16  ;;  %v9249_v18 = vadd.f32 %v1630_v25, %v1178_v31  ;;  %v1199_v6 = vadd.f32 %v6478_v54, %v8967_v43  ;;  %6768 = vmatprep.mubr.bf16.mxu1 %v9083_v22 }
 0x13f   : > { %v4156_v12 = vrot.slane %v4154_v63, 4  ;;  %v4178_v33 = vshrl.u32 %v9220_v16, 16  ;;  %v1190_v57 = vpop.f32.mrf.mxu1  ;;  %v4147_v3 = vor.u32 %v4146_v17, %v4143_v9  ;;  %v4160_v52 = vshll.u32 %v9242_v30, 16  ;;  %v1646_v43 = vpop.f32.mrf.mxu0  ;;  %v5907_v9 = vld [vmem:[%s7079_s25 + $0xcc] sm:$0xf] }
 0x140   : > { %v5979_v59 = vrot.slane %v5963_v48, 9  ;;  %v4691_v37 = vrot.slane %v9196_v2, 5  ;;  %v9256_v42 = vadd.f32 %v6526_v61, %v1199_v6  ;;  %v1191_v25 = vadd.f32 %v1190_v57, %v8986_v1  ;;  %v5964_v48 = vld [vmem:[%s7079_s25 + $0xc0] sm:$0xe] }
 0x141   : > { %v9259_v35 = vcombine.low %v4129_v51, %v4139_v8  ;;  %v6010_v22 = vcombine.low %v9230_v55, %v9239_v13  ;;  %v6479_v38 = vpop.f32.mrf.mxu1  ;;  %v4167_v21 = vrot.slane %v4165_v11, 4  ;;  %v4170_v63 = vrot.slane %v4168_v62, 5  ;;  %v6530_v10 = vpop.f32.mrf.mxu0  ;;  %v9286_v8 = vld [vmem:[%s7079_s25 + $0xd0] sm:$0xf] }
 0x142   : > { %v9266_v49 = vrot.slane %v4174_v44, 5  ;;  %v4180_v2 = vrot.slane %v4178_v33, 4  ;;  %v9268_v61 = vadd.f32 %v1643_v28, %v1191_v25  ;;  %v1202_v1 = vadd.f32 %v6479_v38, %v9006_v26 }
 0x143   : > { %v9863_v60 = vcombine.low %v9062_v19, %v9072_v36  ;;  %v4157_v51 = vor.u32 %v4156_v12, %v9246_v40  ;;  %v4694_v55 = vrot.slane %v9242_v30, 5  ;;  %v1193_v17 = vpop.f32.mrf.mxu1  ;;  %v9277_v47 = vrot.slane %v4147_v3, 4  ;;  %v1659_v13 = vpop.f32.mrf.mxu0 }
 0x144   : > { %v9279_v31 = vrot.slane %v4160_v52, 5  ;;  %v9283_v26 = vsel %vm7421_vm5, %v5979_v59, %v4691_v37  ;;  %v4693_v28 = vrot.slane %v4691_v37, 4  ;;  %v9288_v19 = vadd.f32 %v6527_v29, %v1202_v1  ;;  %v9864_v29 = vld [vmem:[#allocation2_spill] sm:$0xff] }
 0x145   : > { %6817 = vmatmul.mubr.bf16.gmra.mxu0 %v9863_v60  ;;  %v1194_v36 = vadd.f32 %v1193_v17, %v9015_v34  ;;  %v4184_v30 = vshll.u32 %v9264_v20, 16  ;;  %v6482_v54 = vpop.f32.mrf.mxu1  ;;  %6769 = vmatmul.mubr.bf16.gmra.mxu1 %v9089_v4  ;;  %v4171_v11 = vor.u32 %v4170_v63, %v4167_v21  ;;  %v4181_v62 = vor.u32 %v4180_v2, %v9266_v49  ;;  %v6531_v57 = vpop.f32.mrf.mxu0 }
 0x146   : > { %6820 = vmatprep.mubr.bf16.mxu0 %v6008_v58  ;;  %v4698_v58 = vrot.slane %v9220_v16, 5  ;;  %v4189_v44 = vshrl.u32 %v5907_v9, 16  ;;  %v4192_v6 = vshll.u32 %v5907_v9, 16  ;;  %v1215_v33 = vadd.f32 %v6482_v54, %v9864_v29  ;;  %6772 = vmatprep.mubr.bf16.mxu1 %v9202_v5 }
 0x147   : > { %v9296_v12 = vadd.f32 %v1646_v43, %v1194_v36  ;;  %v4198_v34 = vshll.u32 %v9286_v8, 16  ;;  %v4202_v3 = vshrl.u32 %v9286_v8, 16  ;;  %v1206_v16 = vpop.f32.mrf.mxu1  ;;  %v4158_v52 = vrot.slane %v4157_v51, 4  ;;  %v9865_v43 = vld [vmem:[#allocation5_spill] sm:$0xff]  ;;  %v1662_v21 = vpop.f32.mrf.mxu0  ;;  %v9866_v36 = vld [vmem:[#allocation4_spill] sm:$0xff] }
 0x148   : > { %v4695_v4 = vsel %vm7421_vm5, %v4693_v28, %v4694_v55  ;;  %v5980_v59 = vrot.slane %v5964_v48, 9  ;;  %v4701_v37 = vrot.slane %v9264_v20, 5  ;;  %v9305_v25 = vadd.f32 %v6530_v10, %v1215_v33  ;;  %v5909_v20 = vld [vmem:[%s7079_s25 + $0xd4] sm:$0x1] }
 0x149   : > { %v1207_v38 = vadd.f32 %v1206_v16, %v9865_v43  ;;  %v4186_v63 = vrot.slane %v4184_v30, 5  ;;  %v4700_v5 = vrot.slane %v4698_v58, 4  ;;  %v6483_v2 = vpop.f32.mrf.mxu1  ;;  %v4172_v1 = vrot.slane %v4171_v11, 4 }
 0x14a   : > { %v4182_v60 = vrot.slane %v4181_v62, 4  ;;  %v4191_v9 = vrot.slane %v4189_v44, 4  ;;  %v4194_v17 = vrot.slane %v4192_v6, 5  ;;  %v1218_v55 = vadd.f32 %v6483_v2, %v9866_v36  ;;  %v6534_v28 = vpop.f32.mrf.mxu0  ;;  %v5965_v6 = vld [vmem:[%s7079_s25 + $0xcc] sm:$0xe]  ;;  %s6056_s25 = sshll.u32 %s9945_s12, 7 }
 0x14b   : > { %v9308_v51 = vadd.f32 %v1659_v13, %v1207_v38  ;;  %v9315_v10 = vrot.slane %v4198_v34, 5  ;;  %v4204_v30 = vrot.slane %v4202_v3, 4  ;;  %v1209_v48 = vpop.f32.mrf.mxu1  ;;  %v4153_v13 = vsel %vm7110_vm2, %v9277_v47, %v9246_v40  ;;  %s9622_s7 = scalar_lea.vmem %s9719_s2, %s6056_s25 }
 0x14c   : > { %v4163_v54 = vsel %vm7110_vm2, %v4158_v52, %v9279_v31  ;;  %v4705_v11 = vrot.slane %v9286_v8, 5  ;;  %v9325_v62 = vadd.f32 %v6531_v57, %v1218_v55  ;;  %v1210_v0 = vadd.f32 %v1209_v48, %v9867_v46  ;;  %v9868_v57 = vld [vmem:[#allocation8_spill] sm:$0xff] }
 0x14d   : > { %6821 = vmatmul.mubr.bf16.gmra.mxu0 %v6009_v39  ;;  %v1675_v39 = vpop.f32.mrf.mxu0  ;;  %v4699_v44 = vsel %vm7421_vm5, %v5980_v59, %v4698_v58  ;;  %v6486_v29 = vpop.f32.mrf.mxu1  ;;  %6773 = vmatmul.mubr.bf16.gmra.mxu1 %v9206_v50  ;;  %v6011_v40 = vcombine.low %v9283_v26, %v4695_v4  ;;  %v4177_v47 = vsel %vm7110_vm2, %v4172_v1, %v9266_v49  ;;  %v4208_v8 = vshll.u32 %v5909_v20, 16  ;;  %v9871_v48 = vld [vmem:[#allocation12_spill] sm:$0xff] }
 0x14e   : > { %6824 = vmatprep.mubr.bf16.mxu0 %v6010_v22  ;;  %v4702_v22 = vsel %vm7421_vm5, %v4700_v5, %v4701_v37  ;;  %v4195_v31 = vor.u32 %v4194_v17, %v4191_v9  ;;  %v9338_v33 = vadd.f32 %v1662_v21, %v1210_v0  ;;  %v1231_v34 = vadd.f32 %v6486_v29, %v9868_v57  ;;  %v9869_v37 = vld [vmem:[#allocation10_spill] sm:$0xff]  ;;  %v9870_v9 = vld [vmem:[#allocation11_spill] sm:$0xff] }
 0x14f   : > { %v6535_v58 = vpop.f32.mrf.mxu0  ;;  %6776 = vmatprep.mubr.bf16.mxu1 %v9259_v35  ;;  %v4187_v3 = vsel %vm7110_vm2, %v4182_v60, %v4186_v63  ;;  %v4205_v50 = vor.u32 %v4204_v30, %v9315_v10  ;;  %v1222_v16 = vpop.f32.mrf.mxu1  ;;  %v6012_v26 = vcombine.low %v4699_v44, %v4702_v22  ;;  %v5981_v52 = vrot.slane %v5965_v6, 9  ;;  %v9872_v44 = vld [vmem:[#allocation14_spill] sm:$0xff] }
 0x150   : > { %v4707_v4 = vrot.slane %v4705_v11, 4  ;;  %v4708_v59 = vrot.slane %v5909_v20, 5  ;;  %v9345_v49 = vadd.f32 %v6534_v28, %v1231_v34  ;;  %v1223_v43 = vadd.f32 %v1222_v16, %v9869_v37  ;;  %v9875_v37 = vld [vmem:[#allocation21_spill] sm:$0xff] }
 0x151   : > { %v1678_v38 = vpop.f32.mrf.mxu0  ;;  %v6487_v21 = vpop.f32.mrf.mxu1  ;;  %v5939_v5 = vcombine.low %v4153_v13, %v4163_v54  ;;  %v5940_v2 = vcombine.low %v4177_v47, %v4187_v3  ;;  %v4196_v1 = vrot.slane %v4195_v31, 4  ;;  %v4206_v17 = vrot.slane %v4205_v50, 4  ;;  %v9873_v47 = vld [vmem:[#allocation16_spill] sm:$0xff] }
 0x152   : > { %v9348_v35 = vadd.f32 %v1675_v39, %v1223_v43  ;;  %v1234_v63 = vadd.f32 %v6487_v21, %v9870_v9  ;;  %v4210_v36 = vrot.slane %v4208_v8, 5  ;;  %v4706_v28 = vsel %vm7421_vm5, %v5981_v52, %v4705_v11 }
 0x153   : > { %v6538_v60 = vpop.f32.mrf.mxu0  ;;  %v1225_v55 = vpop.f32.mrf.mxu1  ;;  %v4709_v20 = vsel %vm7421_vm5, %v4707_v4, %v4708_v59  ;;  %v4201_v0 = vsel %vm7110_vm2, %v4196_v1, %v9315_v10  ;;  %v9874_v10 = vld [vmem:[#allocation19_spill] sm:$0xff] }
 0x154   : > { %v9355_v30 = vadd.f32 %v6535_v58, %v1234_v63  ;;  %v1226_v13 = vadd.f32 %v1225_v55, %v9871_v48  ;;  %v4211_v56 = vsel %vm7110_vm2, %v4206_v17, %v4210_v36  ;;  %v6013_v11 = vcombine.low %v4706_v28, %v4709_v20  ;;  %v9877_v17 = vld [vmem:[#allocation23_spill] sm:$0xff]  ;;  %v9878_v20 = vld [vmem:[#allocation24_spill] sm:$0xff] }
 0x155   : > { %6825 = vmatmul.mubr.bf16.gmra.mxu0 %v6011_v40  ;;  %v1691_v54 = vpop.f32.mrf.mxu0  ;;  %v6490_v46 = vpop.f32.mrf.mxu1  ;;  %6777 = vmatmul.mubr.bf16.gmra.mxu1 %v5939_v5  ;;  %v5941_v34 = vcombine.low %v4201_v0, %v4211_v56  ;;  %v9879_v0 = vld [vmem:[#allocation25_spill] sm:$0xff] }
 0x156   : > { %6828 = vmatprep.mubr.bf16.mxu0 %v6012_v26  ;;  %v9361_v39 = vadd.f32 %v1678_v38, %v1226_v13  ;;  %v1247_v22 = vadd.f32 %v6490_v46, %v9872_v44  ;;  %6780 = vmatprep.mubr.bf16.mxu1 %v5940_v2  ;;  %v9876_v2 = vld [vmem:[#allocation22_spill] sm:$0xff] }
 0x157   : > { %v6539_v6 = vpop.f32.mrf.mxu0  ;;  %v1238_v29 = vpop.f32.mrf.mxu1 }
 0x158   : > { %v9366_v40 = vadd.f32 %v6538_v60, %v1247_v22  ;;  %v1239_v31 = vadd.f32 %v1238_v29, %v9873_v47 }
 0x159   : > { %v1694_v8 = vpop.f32.mrf.mxu0  ;;  %v6491_v57 = vpop.f32.mrf.mxu1 }
 0x15a   : > { %v9369_v58 = vadd.f32 %v1691_v54, %v1239_v31  ;;  %v1250_v3 = vadd.f32 %v6491_v57, %v9874_v10  ;;  %v9881_v57 = vld [vmem:[#allocation27_spill] sm:$0xff] }
 0x15b   : > { %v6542_v50 = vpop.f32.mrf.mxu0  ;;  %v1241_v16 = vpop.f32.mrf.mxu1 }
 0x15c   : > { %v9372_v26 = vadd.f32 %v6539_v6, %v1250_v3  ;;  %v1242_v27 = vadd.f32 %v1241_v16, %v8962_v32 }
 0x15d   : > { %6829 = vmatmul.mubr.bf16.gmra.mxu0 %v6013_v11  ;;  %v1707_v52 = vpop.f32.mrf.mxu0  ;;  %v6494_v4 = vpop.f32.mrf.mxu1  ;;  %6781 = vmatmul.mubr.bf16.gmra.mxu1 %v5941_v34  ;;  %v9880_v11 = vld [vmem:[#allocation26_spill] sm:$0xff] }
 0x15e   : > { %v9375_v59 = vadd.f32 %v1694_v8, %v1242_v27  ;;  %v1263_v43 = vadd.f32 %v6494_v4, %v9875_v37 }
 0x15f   : > { %v6543_v38 = vpop.f32.mrf.mxu0  ;;  %v1254_v21 = vpop.f32.mrf.mxu1 }
 0x160   : > { %v9378_v5 = vadd.f32 %v6542_v50, %v1263_v43  ;;  %v1255_v1 = vadd.f32 %v1254_v21, %v9876_v2 }
 0x161   : > { %v1710_v9 = vpop.f32.mrf.mxu0  ;;  %v6495_v63 = vpop.f32.mrf.mxu1 }
 0x162   : > { %v9381_v60 = vadd.f32 %v1707_v52, %v1255_v1  ;;  %v1266_v36 = vadd.f32 %v6495_v63, %v9877_v17 }
 0x163   : > { %v6610_v32 = vpop.f32.mrf.mxu0  ;;  %v1257_v55 = vpop.f32.mrf.mxu1 }
 0x164   : > { %v9384_v28 = vadd.f32 %v6543_v38, %v1266_v36  ;;  %v1258_v48 = vadd.f32 %v1257_v55, %v9878_v20 }
 0x165   : > { %v2736_v13 = vpop.f32.mrf.mxu0  ;;  %v6562_v54 = vpop.f32.mrf.mxu1 }
 0x166   : > { %v9387_v46 = vadd.f32 %v1710_v9, %v1258_v48  ;;  %v2111_v44 = vadd.f32 %v6562_v54, %v9879_v0 }
 0x167   : > { %v6611_v22 = vpop.f32.mrf.mxu0  ;;  %v1982_v6 = vpop.f32.mrf.mxu1 }
 0x168   : > { %v9390_v56 = vadd.f32 %v6610_v32, %v2111_v44  ;;  %v2109_v29 = vadd.f32 %v1982_v6, %v9880_v11 }
 0x169   : > { %v2739_v47 = vpop.f32.mrf.mxu0  ;;  %v6563_v31 = vpop.f32.mrf.mxu1 }
 0x16a   : > { %v9393_v8 = vadd.f32 %v2736_v13, %v2109_v29  ;;  %v2112_v34 = vadd.f32 %v6563_v31, %v9881_v57 }
 0x16b   : > { %v6614_v10 = vpop.f32.mrf.mxu0  ;;  %v1985_v3 = vpop.f32.mrf.mxu1 }
 0x16c   : > { %v9396_v50 = vadd.f32 %v6611_v22, %v2112_v34  ;;  %v2110_v16 = vadd.f32 %v1985_v3, %v9132_v24 }
 0x16d   : > { %v2752_v27 = vpop.f32.mrf.mxu0  ;;  %v6566_v52 = vpop.f32.mrf.mxu1 }
 0x16e   : > { %v9399_v4 = vadd.f32 %v2739_v47, %v2110_v16  ;;  %v2115_v37 = vadd.f32 %v6566_v52, %v9136_v41 }
 0x16f   : > { %v6615_v43 = vpop.f32.mrf.mxu0  ;;  %v1998_v38 = vpop.f32.mrf.mxu1 }
 0x170   : > { %v9402_v21 = vadd.f32 %v6614_v10, %v2115_v37  ;;  %v2113_v2 = vadd.f32 %v1998_v38, %v9145_v15 }
 0x171   : > { %v2755_v1 = vpop.f32.mrf.mxu0  ;;  %v6567_v9 = vpop.f32.mrf.mxu1 }
 0x172   : > { %v9405_v63 = vadd.f32 %v2752_v27, %v2113_v2  ;;  %v2116_v17 = vadd.f32 %v6567_v9, %v9171_v53 }
 0x173   : > { %v6618_v36 = vpop.f32.mrf.mxu0  ;;  %v2001_v24 = vpop.f32.mrf.mxu1 }
 0x174   : > { %v9408_v32 = vadd.f32 %v6615_v43, %v2116_v17  ;;  %v2114_v55 = vadd.f32 %v2001_v24, %v9191_v14 }
 0x175   : > { %v2768_v20 = vpop.f32.mrf.mxu0  ;;  %v6570_v41 = vpop.f32.mrf.mxu1 }
 0x176   : > { %v9411_v48 = vadd.f32 %v2755_v1, %v2114_v55  ;;  %v2119_v13 = vadd.f32 %v6570_v41, %v9199_v7 }
 0x177   : > { %v6619_v54 = vpop.f32.mrf.mxu0  ;;  %v2014_v15 = vpop.f32.mrf.mxu1 }
 0x178   : > { %v9414_v0 = vadd.f32 %v6618_v36, %v2119_v13  ;;  %v2117_v44 = vadd.f32 %v2014_v15, %v9209_v45 }
 0x179   : > { %v2771_v22 = vpop.f32.mrf.mxu0  ;;  %v6571_v53 = vpop.f32.mrf.mxu1 }
 0x17a   : > { %v9417_v6 = vadd.f32 %v2768_v20, %v2117_v44  ;;  %v2120_v11 = vadd.f32 %v6571_v53, %v9232_v23 }
 0x17b   : > { %v6622_v29 = vpop.f32.mrf.mxu0  ;;  %v2017_v14 = vpop.f32.mrf.mxu1 }
 0x17c   : > { %v9420_v47 = vadd.f32 %v6619_v54, %v2120_v11  ;;  %v2118_v31 = vadd.f32 %v2017_v14, %v9249_v18 }
 0x17d   : > { %v2784_v57 = vpop.f32.mrf.mxu0  ;;  %v6574_v7 = vpop.f32.mrf.mxu1 }
 0x17e   : > { %v9423_v34 = vadd.f32 %v2771_v22, %v2118_v31  ;;  %v2123_v10 = vadd.f32 %v6574_v7, %v9256_v42 }
 0x17f   : > { %v6623_v3 = vpop.f32.mrf.mxu0  ;;  %v2030_v45 = vpop.f32.mrf.mxu1 }
 0x180   : > { %v9426_v16 = vadd.f32 %v6622_v29, %v2123_v10  ;;  %v2121_v27 = vadd.f32 %v2030_v45, %v9268_v61 }
 0x181   : > { %v2787_v52 = vpop.f32.mrf.mxu0  ;;  %v6575_v23 = vpop.f32.mrf.mxu1 }
 0x182   : > { %v9429_v37 = vadd.f32 %v2784_v57, %v2121_v27  ;;  %v2124_v43 = vadd.f32 %v6575_v23, %v9288_v19 }
 0x183   : > { %v6626_v38 = vpop.f32.mrf.mxu0  ;;  %v2033_v18 = vpop.f32.mrf.mxu1 }
 0x184   : > { %v9432_v2 = vadd.f32 %v6623_v3, %v2124_v43  ;;  %v2122_v1 = vadd.f32 %v2033_v18, %v9296_v12 }
 0x185   : > { %v2800_v9 = vpop.f32.mrf.mxu0  ;;  %v6578_v42 = vpop.f32.mrf.mxu1 }
 0x186   : > { %v9435_v17 = vadd.f32 %v2787_v52, %v2122_v1  ;;  %v2127_v36 = vadd.f32 %v6578_v42, %v9305_v25 }
 0x187   : > { %v6627_v24 = vpop.f32.mrf.mxu0  ;;  %v2046_v61 = vpop.f32.mrf.mxu1 }
 0x188   : > { %v9438_v55 = vadd.f32 %v6626_v38, %v2127_v36  ;;  %v2125_v20 = vadd.f32 %v2046_v61, %v9308_v51 }
 0x189   : > { %v2803_v41 = vpop.f32.mrf.mxu0  ;;  %v6579_v19 = vpop.f32.mrf.mxu1 }
 0x18a   : > { %v9441_v13 = vadd.f32 %v2800_v9, %v2125_v20  ;;  %v2128_v54 = vadd.f32 %v6579_v19, %v9325_v62 }
 0x18b   : > { %v6630_v15 = vpop.f32.mrf.mxu0  ;;  %v2049_v12 = vpop.f32.mrf.mxu1 }
 0x18c   : > { %v9444_v44 = vadd.f32 %v6627_v24, %v2128_v54  ;;  %v2126_v22 = vadd.f32 %v2049_v12, %v9338_v33 }
 0x18d   : > { %v2816_v53 = vpop.f32.mrf.mxu0  ;;  %v6582_v25 = vpop.f32.mrf.mxu1 }
 0x18e   : > { %v9447_v11 = vadd.f32 %v2803_v41, %v2126_v22  ;;  %v2131_v29 = vadd.f32 %v6582_v25, %v9345_v49 }
 0x18f   : > { %v6631_v14 = vpop.f32.mrf.mxu0  ;;  %v2062_v51 = vpop.f32.mrf.mxu1 }
 0x190   : > { %v9450_v31 = vadd.f32 %v6630_v15, %v2131_v29  ;;  %v2129_v57 = vadd.f32 %v2062_v51, %v9348_v35 }
 0x191   : > { %v2819_v7 = vpop.f32.mrf.mxu0  ;;  %v6583_v62 = vpop.f32.mrf.mxu1 }
 0x192   : > { %v9453_v10 = vadd.f32 %v2816_v53, %v2129_v57  ;;  %v2132_v3 = vadd.f32 %v6583_v62, %v9355_v30 }
 0x193   : > { %v6634_v45 = vpop.f32.mrf.mxu0  ;;  %v2065_v33 = vpop.f32.mrf.mxu1 }
 0x194   : > { %9882 = vst [vmem:[#allocation3_spill] sm:$0xff] %v9453_v10  ;;  %v9456_v27 = vadd.f32 %v6631_v14, %v2132_v3  ;;  %v2130_v52 = vadd.f32 %v2065_v33, %v9361_v39 }
 0x195   : > { %v2832_v23 = vpop.f32.mrf.mxu0  ;;  %v6586_v49 = vpop.f32.mrf.mxu1 }
 0x196   : > { %9883 = vst [vmem:[#allocation7_spill] sm:$0xff] %v9456_v27  ;;  %v9459_v43 = vadd.f32 %v2819_v7, %v2130_v52  ;;  %v2135_v38 = vadd.f32 %v6586_v49, %v9366_v40 }
 0x197   : > { %v6635_v18 = vpop.f32.mrf.mxu0  ;;  %v2078_v35 = vpop.f32.mrf.mxu1 }
 0x198   : > { %9884 = vst [vmem:[#allocation9_spill] sm:$0xff] %v9459_v43  ;;  %v9462_v1 = vadd.f32 %v6634_v45, %v2135_v38  ;;  %v2133_v9 = vadd.f32 %v2078_v35, %v9369_v58 }
 0x199   : > { %v2835_v42 = vpop.f32.mrf.mxu0  ;;  %v6587_v30 = vpop.f32.mrf.mxu1 }
 0x19a   : > { %v9465_v36 = vadd.f32 %v2832_v23, %v2133_v9  ;;  %v2136_v24 = vadd.f32 %v6587_v30, %v9372_v26 }
 0x19b   : > { %v6638_v61 = vpop.f32.mrf.mxu0  ;;  %v2081_v39 = vpop.f32.mrf.mxu1 }
 0x19c   : > { %9885 = vst [vmem:[#allocation18_spill] sm:$0xff] %v9465_v36  ;;  %v9468_v20 = vadd.f32 %v6635_v18, %v2136_v24  ;;  %v2134_v41 = vadd.f32 %v2081_v39, %v9375_v59 }
 0x19d   : > { %v2848_v19 = vpop.f32.mrf.mxu0  ;;  %v6590_v40 = vpop.f32.mrf.mxu1 }
 0x19e   : > { %9886 = vst [vmem:[#allocation13_spill] sm:$0xff] %v9468_v20  ;;  %v9471_v54 = vadd.f32 %v2835_v42, %v2134_v41  ;;  %v2139_v15 = vadd.f32 %v6590_v40, %v9378_v5 }
 0x19f   : > { %v6639_v12 = vpop.f32.mrf.mxu0  ;;  %v2094_v58 = vpop.f32.mrf.mxu1 }
 0x1a0   : > { %9887 = vst [vmem:[#allocation15_spill] sm:$0xff] %v9471_v54  ;;  %v9474_v22 = vadd.f32 %v6638_v61, %v2139_v15  ;;  %v2137_v53 = vadd.f32 %v2094_v58, %v9381_v60 }
 0x1a1   : > { %v2851_v25 = vpop.f32.mrf.mxu0  ;;  %v6591_v26 = vpop.f32.mrf.mxu1 }
 0x1a2   : > { %v9477_v29 = vadd.f32 %v2848_v19, %v2137_v53  ;;  %v2140_v14 = vadd.f32 %v6591_v26, %v9384_v28 }
 0x1a3   : > { %v6706_v51 = vpop.f32.mrf.mxu0  ;;  %v2097_v59 = vpop.f32.mrf.mxu1 }
 0x1a4   : > { %9888 = vst [vmem:[#allocation17_spill] sm:$0xff] %v9477_v29  ;;  %v9480_v57 = vadd.f32 %v6639_v12, %v2140_v14  ;;  %v2138_v7 = vadd.f32 %v2097_v59, %v9387_v46 }
 0x1a5   : > { %v3621_v62 = vpop.f32.mrf.mxu0  ;;  %v6658_v5 = vpop.f32.mrf.mxu1 }
 0x1a6   : > { %9889 = vst [vmem:[#allocation20_spill] sm:$0xff] %v9480_v57  ;;  %v9483_v3 = vadd.f32 %v2851_v25, %v2138_v7  ;;  %v3363_v45 = vadd.f32 %v6658_v5, %v9390_v56 }
 0x1a7   : > { %v9486_v33 = vpop.f32.mrf.mxu0  ;;  %v3234_v60 = vpop.f32.mrf.mxu1 }
 0x1a8   : > { %9890 = vst [vmem:[#allocation2_spill] sm:$0xff] %v9483_v3  ;;  %v9488_v52 = vadd.f32 %v6706_v51, %v3363_v45  ;;  %v3361_v23 = vadd.f32 %v3234_v60, %v9393_v8 }
 0x1a9   : > { %v9491_v28 = vpop.f32.mrf.mxu0  ;;  %v9493_v49 = vpop.f32.mrf.mxu1 }
 0x1aa   : > { %v9495_v38 = vadd.f32 %v3621_v62, %v3361_v23 }
 0x1ab   : > { %v6710_v46 = vpop.f32.mrf.mxu0  ;;  %v9497_v18 = vpop.f32.mrf.mxu1 }
 0x1ad   : > { %v9499_v35 = vpop.f32.mrf.mxu0  ;;  %v6662_v9 = vpop.f32.mrf.mxu1 }
 0x1ae   : > { %v3367_v56 = vadd.f32 %v6662_v9, %v9402_v21 }
 0x1af   : > { %v9502_v42 = vpop.f32.mrf.mxu0  ;;  %v9504_v30 = vpop.f32.mrf.mxu1 }
 0x1b0   : > { %v9506_v24 = vadd.f32 %v6710_v46, %v3367_v56 }
 0x1b1   : > { %v9508_v8 = vpop.f32.mrf.mxu0  ;;  %v9510_v61 = vpop.f32.mrf.mxu1 }
 0x1b3   : > { %v6714_v39 = vpop.f32.mrf.mxu0  ;;  %v9512_v41 = vpop.f32.mrf.mxu1 }
 0x1b5   : > { %v9514_v19 = vpop.f32.mrf.mxu0  ;;  %v6666_v40 = vpop.f32.mrf.mxu1 }
 0x1b6   : > { %v3371_v15 = vadd.f32 %v6666_v40, %v9414_v0 }
 0x1b7   : > { %v9517_v12 = vpop.f32.mrf.mxu0  ;;  %v9519_v21 = vpop.f32.mrf.mxu1 }
 0x1b8   : > { %v9521_v58 = vadd.f32 %v6714_v39, %v3371_v15 }
 0x1b9   : > { %v9523_v53 = vpop.f32.mrf.mxu0  ;;  %v9525_v25 = vpop.f32.mrf.mxu1 }
 0x1bb   : > { %v6718_v26 = vpop.f32.mrf.mxu0  ;;  %v9527_v14 = vpop.f32.mrf.mxu1 }
 0x1bd   : > { %v9529_v51 = vpop.f32.mrf.mxu0  ;;  %v6670_v59 = vpop.f32.mrf.mxu1 }
 0x1be   : > { %v3375_v7 = vadd.f32 %v6670_v59, %v9426_v16 }
 0x1bf   : > { %v9532_v62 = vpop.f32.mrf.mxu0  ;;  %v9534_v0 = vpop.f32.mrf.mxu1 }
 0x1c0   : > { %v9536_v5 = vadd.f32 %v6718_v26, %v3375_v7 }
 0x1c1   : > { %v9538_v45 = vpop.f32.mrf.mxu0  ;;  %v9540_v60 = vpop.f32.mrf.mxu1 }
 0x1c3   : > { %v6722_v23 = vpop.f32.mrf.mxu0  ;;  %v9542_v46 = vpop.f32.mrf.mxu1 }
 0x1c5   : > { %v9544_v9 = vpop.f32.mrf.mxu0  ;;  %v6674_v56 = vpop.f32.mrf.mxu1 }
 0x1c6   : > { %v3379_v39 = vadd.f32 %v6674_v56, %v9438_v55 }
 0x1c7   : > { %v9547_v40 = vpop.f32.mrf.mxu0  ;;  %v9549_v16 = vpop.f32.mrf.mxu1 }
 0x1c8   : > { %v9551_v15 = vadd.f32 %v6722_v23, %v3379_v39 }
 0x1c9   : > { %v9553_v26 = vpop.f32.mrf.mxu0  ;;  %v9555_v59 = vpop.f32.mrf.mxu1 }
 0x1ca   : > { %9891 = vst [vmem:[#allocation5_spill] sm:$0xff] %v9553_v26 }
 0x1cb   : > { %v6726_v7 = vpop.f32.mrf.mxu0  ;;  %v9557_v3 = vpop.f32.mrf.mxu1 }
 0x1cd   : > { %v9559_v57 = vpop.f32.mrf.mxu0  ;;  %v6678_v29 = vpop.f32.mrf.mxu1 }
 0x1ce   : > { %9892 = vst [vmem:[#allocation4_spill] sm:$0xff] %v9559_v57  ;;  %v3383_v54 = vadd.f32 %v6678_v29, %v9450_v31 }
 0x1cf   : > { %v9562_v20 = vpop.f32.mrf.mxu0  ;;  %v9564_v55 = vpop.f32.mrf.mxu1 }
 0x1d0   : > { %9893 = vst [vmem:[#allocation6_spill] sm:$0xff] %v9562_v20  ;;  %v9566_v56 = vadd.f32 %v6726_v7, %v3383_v54 }
 0x1d1   : > { %v9568_v23 = vpop.f32.mrf.mxu0  ;;  %v9570_v39 = vpop.f32.mrf.mxu1 }
 0x1d2   : > { %9894 = vst [vmem:[#allocation8_spill] sm:$0xff] %v9566_v56  ;;  %9895 = vst [vmem:[#allocation10_spill] sm:$0xff] %v9568_v23 }
 0x1d3   : > { %9896 = vst [vmem:[#allocation11_spill] sm:$0xff] %v9570_v39  ;;  %v6730_v36 = vpop.f32.mrf.mxu0  ;;  %v9572_v43 = vpop.f32.mrf.mxu1 }
 0x1d4   : > { %9897 = vst [vmem:[#allocation12_spill] sm:$0xff] %v9572_v43 }
 0x1d5   : > { %v9574_v27 = vpop.f32.mrf.mxu0  ;;  %v6682_v10 = vpop.f32.mrf.mxu1 }
 0x1d6   : > { %9898 = vst [vmem:[#allocation14_spill] sm:$0xff] %v9574_v27  ;;  %v3387_v57 = vadd.f32 %v6682_v10, %v9462_v1 }
 0x1d7   : > { %v9577_v26 = vpop.f32.mrf.mxu0  ;;  %v9579_v31 = vpop.f32.mrf.mxu1 }
 0x1d8   : > { %9899 = vst [vmem:[#allocation16_spill] sm:$0xff] %v9577_v26  ;;  %v9581_v29 = vadd.f32 %v6730_v36, %v3387_v57 }
 0x1d9   : > { %v9583_v54 = vpop.f32.mrf.mxu0  ;;  %v9585_v7 = vpop.f32.mrf.mxu1 }
 0x1da   : > { %9900 = vst [vmem:[#allocation19_spill] sm:$0xff] %v9581_v29  ;;  %9901 = vst [vmem:[#allocation21_spill] sm:$0xff] %v9583_v54 }
 0x1db   : > { %9902 = vst [vmem:[#allocation22_spill] sm:$0xff] %v9585_v7  ;;  %v6734_v23 = vpop.f32.mrf.mxu0  ;;  %v9587_v56 = vpop.f32.mrf.mxu1 }
 0x1dc   : > { %9903 = vst [vmem:[#allocation23_spill] sm:$0xff] %v9587_v56 }
 0x1dd   : > { %v9589_v20 = vpop.f32.mrf.mxu0  ;;  %v6686_v43 = vpop.f32.mrf.mxu1 }
 0x1de   : > { %9904 = vst [vmem:[#allocation24_spill] sm:$0xff] %v9589_v20  ;;  %v3391_v27 = vadd.f32 %v6686_v43, %v9474_v22  ;;  %v3364_v20 = vadd.f32 %v9493_v49, %v9396_v50  ;;  %v3362_v43 = vadd.f32 %v9497_v18, %v9399_v4  ;;  %v3365_v49 = vadd.f32 %v9504_v30, %v9405_v63 }
 0x1df   : > { %v9592_v39 = vpop.f32.mrf.mxu0  ;;  %v9594_v10 = vpop.f32.mrf.mxu1  ;;  %v3368_v4 = vadd.f32 %v9510_v61, %v9408_v32 }
 0x1e0   : > { %9905 = vst [vmem:[#allocation25_spill] sm:$0xff] %v9592_v39  ;;  %9906 = vst [vmem:[#allocation26_spill] sm:$0xff] %v9594_v10  ;;  %v9596_v1 = vadd.f32 %v6734_v23, %v3391_v27  ;;  %v3751_v27 = vadd.f32 %v9486_v33, %v3364_v20  ;;  %v3752_v32 = vadd.f32 %v9499_v35, %v3365_v49 }
 0x1e1   : > { %v9598_v36 = vpop.f32.mrf.mxu0  ;;  %v9600_v57 = vpop.f32.mrf.mxu1  ;;  %v3755_v61 = vadd.f32 %v9502_v42, %v3368_v4  ;;  %v3372_v49 = vadd.f32 %v9525_v25, %v9420_v47 }
 0x1e2   : > { %9907 = vst [vmem:[#allocation27_spill] sm:$0xff] %v9596_v1  ;;  %9908 = vst [vmem:[#allocation28_spill] sm:$0xff] %v9598_v36 }
 0x1e3   : > { %9909 = vst [vmem:[#allocation29_spill] sm:$0xff] %v9600_v57  ;;  %v9602_v29 = vpop.f32.mrf.mxu1 }
 0x1e4   : > { %v6802_v54 = vpop.f32.mrf.mxu0  ;;  %9910 = vst [vmem:[#allocation30_spill] sm:$0xff] %v9602_v29  ;;  %v3749_v29 = vadd.f32 %v9491_v28, %v3362_v43 }
 0x1e5   : > { %v6754_v56 = vpop.f32.mrf.mxu1 }
 0x1e6   : > { %v4873_v26 = vpop.f32.mrf.mxu0  ;;  %v4504_v23 = vadd.f32 %v6754_v56, %v9488_v52 }
 0x1e7   : > { %v4375_v39 = vpop.f32.mrf.mxu1 }
 0x1e8   : > { %v6803_v22 = vpop.f32.mrf.mxu0  ;;  %v4502_v36 = vadd.f32 %v4375_v39, %v9495_v38  ;;  %v5002_v7 = vadd.f32 %v6802_v54, %v4504_v23  ;;  %v3366_v38 = vadd.f32 %v9512_v41, %v9411_v48 }
 0x1e9   : > { %v6755_v57 = vpop.f32.mrf.mxu1 }
 0x1ea   : > { %v4876_v1 = vpop.f32.mrf.mxu0  ;;  %v4505_v10 = vadd.f32 %v6755_v57, %v3751_v27  ;;  %v5000_v20 = vadd.f32 %v4873_v26, %v4502_v36  ;;  %v3753_v57 = vadd.f32 %v9508_v8, %v3366_v38  ;;  %v5071_v35 = vmul.f32 %v5002_v7, %v5002_v7 }
 0x1eb   : > { %v4378_v18 = vpop.f32.mrf.mxu1 }
 0x1ec   : > { %v6806_v50 = vpop.f32.mrf.mxu0  ;;  %v5003_v33 = vadd.f32 %v6803_v22, %v4505_v10  ;;  %v4503_v52 = vadd.f32 %v4378_v18, %v3749_v29  ;;  %v5069_v54 = vmul.f32 %v5000_v20, %v5000_v20 }
 0x1ed   : > { %v6758_v28 = vpop.f32.mrf.mxu1 }
 0x1ee   : > { %v4889_v56 = vpop.f32.mrf.mxu0  ;;  %v6097_v63 = vpack.c.bf16 %v5003_v33, %v5002_v7  ;;  %v5001_v30 = vadd.f32 %v4876_v1, %v4503_v52  ;;  %v4508_v26 = vadd.f32 %v6758_v28, %v9506_v24  ;;  %v3369_v1 = vadd.f32 %v9519_v21, %v9417_v6 }
 0x1ef   : > { %v4391_v29 = vpop.f32.mrf.mxu1  ;;  %v5072_v4 = vmul.f32 %v5003_v33, %v5003_v33 }
 0x1f0   : > { %v6807_v39 = vpop.f32.mrf.mxu0  ;;  %6169 = vst [vmem:[%s9622_s7 + $0x8] sm:$0xff] %v6097_v63   ;;  %v5032_v48 = vadd.f32 %v5001_v30, %v5000_v20  ;;  %v5070_v41 = vmul.f32 %v5001_v30, %v5001_v30  ;;  %v6092_v10 = vpack.c.bf16 %v5001_v30, %v5000_v20  ;;  %v4506_v43 = vadd.f32 %v4391_v29, %v3752_v32 }
 0x1f1   : > { %v6759_v22 = vpop.f32.mrf.mxu1  ;;  %v5006_v18 = vadd.f32 %v6806_v50, %v4508_v26  ;;  %v3756_v63 = vadd.f32 %v9514_v19, %v3369_v1  ;;  %v3759_v26 = vadd.f32 %v9517_v12, %v3372_v49 }
 0x1f2   : > { %v4892_v36 = vpop.f32.mrf.mxu0  ;;  %v5033_v27 = vadd.f32 %v5032_v48, %v5002_v7  ;;  %v5101_v42 = vadd.f32 %v5070_v41, %v5069_v54  ;;  %6093 = vst [vmem:[%s9622_s7] sm:$0xff] %v6092_v10   ;;  %v4509_v23 = vadd.f32 %v6759_v22, %v3755_v61  ;;  %v5004_v20 = vadd.f32 %v4889_v56, %v4506_v43 }
 0x1f3   : > { %v4394_v52 = vpop.f32.mrf.mxu1  ;;  %v3370_v7 = vadd.f32 %v9527_v14, %v9423_v34  ;;  %v5075_v43 = vmul.f32 %v5006_v18, %v5006_v18 }
 0x1f4   : > { %v6810_v24 = vpop.f32.mrf.mxu0  ;;  %v5102_v28 = vadd.f32 %v5101_v42, %v5071_v35  ;;  %v5034_v8 = vadd.f32 %v5033_v27, %v5003_v33  ;;  %v5007_v38 = vadd.f32 %v6807_v39, %v4509_v23  ;;  %v4507_v6 = vadd.f32 %v4394_v52, %v3753_v57 }
 0x1f5   : > { %v6762_v30 = vpop.f32.mrf.mxu1  ;;  %v5073_v61 = vmul.f32 %v5004_v20, %v5004_v20  ;;  %v3757_v10 = vadd.f32 %v9523_v53, %v3370_v7  ;;  %v3373_v57 = vadd.f32 %v9534_v0, %v9429_v37 }
 0x1f6   : > { %v4905_v21 = vpop.f32.mrf.mxu0  ;;  %v5035_v32 = vadd.f32 %v5034_v8, %v5004_v20  ;;  %v5103_v29 = vadd.f32 %v5102_v28, %v5072_v4  ;;  %v6107_v47 = vpack.c.bf16 %v5007_v38, %v5006_v18  ;;  %v5005_v50 = vadd.f32 %v4892_v36, %v4507_v6 }
 0x1f7   : > { %v4407_v56 = vpop.f32.mrf.mxu1  ;;  %v4512_v39 = vadd.f32 %v6762_v30, %v9521_v58  ;;  %v3376_v36 = vadd.f32 %v9540_v60, %v9432_v2  ;;  %v5076_v53 = vmul.f32 %v5007_v38, %v5007_v38  ;;  %v3760_v0 = vadd.f32 %v9529_v51, %v3373_v57 }
 0x1f8   : > { %v6811_v25 = vpop.f32.mrf.mxu0  ;;  %v5104_v33 = vadd.f32 %v5103_v29, %v5073_v61  ;;  %6171 = vst [vmem:[%s9622_s7 + $0x18] sm:$0xff] %v6107_v47   ;;  %v4510_v54 = vadd.f32 %v4407_v56, %v3756_v63  ;;  %v5036_v48 = vadd.f32 %v5035_v32, %v5005_v50  ;;  %v5074_v41 = vmul.f32 %v5005_v50, %v5005_v50 }
 0x1f9   : > { %v6102_v34 = vpack.c.bf16 %v5005_v50, %v5004_v20  ;;  %v6763_v14 = vpop.f32.mrf.mxu1  ;;  %v5010_v42 = vadd.f32 %v6810_v24, %v4512_v39  ;;  %v3374_v2 = vadd.f32 %v9542_v46, %v9435_v17  ;;  %v3763_v8 = vadd.f32 %v9532_v62, %v3376_v36 }
 0x1fa   : > { %v4908_v19 = vpop.f32.mrf.mxu0  ;;  %v4513_v12 = vadd.f32 %v6763_v14, %v3759_v26  ;;  %v5037_v22 = vadd.f32 %v5036_v48, %v5006_v18  ;;  %v5105_v35 = vadd.f32 %v5104_v33, %v5074_v41  ;;  %v5008_v58 = vadd.f32 %v4905_v21, %v4510_v54 }
 0x1fb   : > { %6170 = vst [vmem:[%s9622_s7 + $0x10] sm:$0xff] %v6102_v34   ;;  %v4410_v27 = vpop.f32.mrf.mxu1  ;;  %v3761_v46 = vadd.f32 %v9538_v45, %v3374_v2  ;;  %v3377_v62 = vadd.f32 %v9549_v16, %v9441_v13  ;;  %v3380_v47 = vadd.f32 %v9555_v59, %v9444_v44  ;;  %v5079_v56 = vmul.f32 %v5010_v42, %v5010_v42 }
 0x1fc   : > { %v6814_v1 = vpop.f32.mrf.mxu0  ;;  %v5011_v23 = vadd.f32 %v6811_v25, %v4513_v12  ;;  %v4511_v49 = vadd.f32 %v4410_v27, %v3757_v10  ;;  %v5106_v20 = vadd.f32 %v5105_v35, %v5075_v43  ;;  %v5038_v52 = vadd.f32 %v5037_v22, %v5007_v38 }
 0x1fd   : > { %v6766_v37 = vpop.f32.mrf.mxu1  ;;  %v5077_v24 = vmul.f32 %v5008_v58, %v5008_v58  ;;  %v3764_v16 = vadd.f32 %v9544_v9, %v3377_v62  ;;  %v3378_v44 = vadd.f32 %v9557_v3, %v9447_v11  ;;  %v3767_v36 = vadd.f32 %v9547_v40, %v3380_v47  ;;  %v9911_v3 = vld [vmem:[#allocation5_spill] sm:$0xff] }
 0x1fe   : > { %v4921_v4 = vpop.f32.mrf.mxu0  ;;  %v6117_v60 = vpack.c.bf16 %v5011_v23, %v5010_v42  ;;  %v5009_v18 = vadd.f32 %v4908_v19, %v4511_v49  ;;  %v5039_v6 = vadd.f32 %v5038_v52, %v5008_v58  ;;  %v5107_v21 = vadd.f32 %v5106_v20, %v5076_v53  ;;  %v9912_v53 = vld [vmem:[#allocation3_spill] sm:$0xff] }
 0x1ff   : > { %v4423_v63 = vpop.f32.mrf.mxu1  ;;  %v4516_v38 = vadd.f32 %v6766_v37, %v9536_v5  ;;  %v5080_v45 = vmul.f32 %v5011_v23, %v5011_v23  ;;  %v3381_v40 = vadd.f32 %v9564_v55, %v9912_v53  ;;  %v9913_v20 = vld [vmem:[#allocation7_spill] sm:$0xff] }
 0x200   : > { %v6815_v28 = vpop.f32.mrf.mxu0  ;;  %6173 = vst [vmem:[%s9622_s7 + $0x28] sm:$0xff] %v6117_v60   ;;  %v5078_v7 = vmul.f32 %v5009_v18, %v5009_v18  ;;  %v6112_v30 = vpack.c.bf16 %v5009_v18, %v5008_v58  ;;  %v4514_v32 = vadd.f32 %v4423_v63, %v3760_v0  ;;  %v5108_v61 = vadd.f32 %v5107_v21, %v5077_v24  ;;  %v9914_v52 = vld [vmem:[#allocation11_spill] sm:$0xff] }
 0x201   : > { %v5040_v29 = vadd.f32 %v5039_v6, %v5009_v18  ;;  %v6767_v17 = vpop.f32.mrf.mxu1  ;;  %v5014_v54 = vadd.f32 %v6814_v1, %v4516_v38  ;;  %v3384_v37 = vadd.f32 %v9914_v52, %v9913_v20  ;;  %v9925_v52 = vld [vmem:[#allocation15_spill] sm:$0xff] }
 0x202   : > { %v4924_v51 = vpop.f32.mrf.mxu0  ;;  %6172 = vst [vmem:[%s9622_s7 + $0x20] sm:$0xff] %v6112_v30   ;;  %v4517_v25 = vadd.f32 %v6767_v17, %v3763_v8  ;;  %v5109_v33 = vadd.f32 %v5108_v61, %v5078_v7  ;;  %v5012_v5 = vadd.f32 %v4921_v4, %v4514_v32  ;;  %v3765_v4 = vadd.f32 %v9911_v3, %v3378_v44  ;;  %v9915_v32 = vld [vmem:[#allocation4_spill] sm:$0xff]  ;;  %v9916_v61 = vld [vmem:[#allocation9_spill] sm:$0xff] }
 0x203   : > { %v5041_v26 = vadd.f32 %v5040_v29, %v5010_v42  ;;  %v4426_v39 = vpop.f32.mrf.mxu1  ;;  %v5083_v60 = vmul.f32 %v5014_v54, %v5014_v54  ;;  %v9917_v29 = vld [vmem:[#allocation12_spill] sm:$0xff] }
 0x204   : > { %v5015_v19 = vadd.f32 %v6815_v28, %v4517_v25  ;;  %v4515_v48 = vadd.f32 %v4426_v39, %v3761_v46  ;;  %v5110_v34 = vadd.f32 %v5109_v33, %v5079_v56  ;;  %v5081_v1 = vmul.f32 %v5012_v5, %v5012_v5  ;;  %v9918_v25 = vld [vmem:[#allocation6_spill] sm:$0xff] }
 0x205   : > { %v6818_v50 = vpop.f32.mrf.mxu0  ;;  %v5042_v14 = vadd.f32 %v5041_v26, %v5011_v23  ;;  %v6770_v13 = vpop.f32.mrf.mxu1  ;;  %v3382_v17 = vadd.f32 %v9917_v29, %v9916_v61  ;;  %v3771_v56 = vadd.f32 %v9918_v25, %v3384_v37  ;;  %v9926_v37 = vld [vmem:[#allocation23_spill] sm:$0xff] }
 0x206   : > { %v6127_v59 = vpack.c.bf16 %v5015_v19, %v5014_v54  ;;  %v5013_v10 = vadd.f32 %v4924_v51, %v4515_v48  ;;  %v5111_v43 = vadd.f32 %v5110_v34, %v5080_v45  ;;  %v4520_v27 = vadd.f32 %v6770_v13, %v9551_v15 }
 0x207   : > { %v4937_v41 = vpop.f32.mrf.mxu0  ;;  %v5043_v12 = vadd.f32 %v5042_v14, %v5012_v5  ;;  %v4439_v22 = vpop.f32.mrf.mxu1  ;;  %v5084_v7 = vmul.f32 %v5015_v19, %v5015_v19  ;;  %v3768_v51 = vadd.f32 %v9915_v32, %v3381_v40  ;;  %v9924_v40 = vld [vmem:[#allocation14_spill] sm:$0xff] }
 0x208   : > { %6175 = vst [vmem:[%s9622_s7 + $0x38] sm:$0xff] %v6127_v59   ;;  %v5082_v35 = vmul.f32 %v5013_v10, %v5013_v10  ;;  %v6122_v58 = vpack.c.bf16 %v5013_v10, %v5012_v5  ;;  %v4518_v42 = vadd.f32 %v4439_v22, %v3764_v16  ;;  %v5112_v23 = vadd.f32 %v5111_v43, %v5081_v1  ;;  %v9920_v16 = vld [vmem:[#allocation10_spill] sm:$0xff] }
 0x209   : > { %v6819_v57 = vpop.f32.mrf.mxu0  ;;  %v5044_v49 = vadd.f32 %v5043_v12, %v5013_v10  ;;  %v6771_v11 = vpop.f32.mrf.mxu1  ;;  %v5018_v6 = vadd.f32 %v6818_v50, %v4520_v27  ;;  %v3769_v44 = vadd.f32 %v9920_v16, %v3382_v17  ;;  %v9921_v59 = vld [vmem:[#allocation18_spill] sm:$0xff]  ;;  %v9929_v17 = vld [vmem:[#allocation21_spill] sm:$0xff] }
 0x20a   : > { %6174 = vst [vmem:[%s9622_s7 + $0x30] sm:$0xff] %v6122_v58   ;;  %v4521_v0 = vadd.f32 %v6771_v11, %v3767_v36  ;;  %v5113_v28 = vadd.f32 %v5112_v23, %v5082_v35  ;;  %v5016_v15 = vadd.f32 %v4937_v41, %v4518_v42  ;;  %v3385_v10 = vadd.f32 %v9579_v31, %v9921_v59  ;;  %v9923_v36 = vld [vmem:[#allocation22_spill] sm:$0xff] }
 0x20b   : > { %v4940_v9 = vpop.f32.mrf.mxu0  ;;  %v5045_v18 = vadd.f32 %v5044_v49, %v5014_v54  ;;  %v4442_v8 = vpop.f32.mrf.mxu1  ;;  %v5087_v22 = vmul.f32 %v5018_v6, %v5018_v6 }
 0x20c   : > { %v5019_v24 = vadd.f32 %v6819_v57, %v4521_v0  ;;  %v4519_v21 = vadd.f32 %v4442_v8, %v3765_v4  ;;  %v5114_v30 = vadd.f32 %v5113_v28, %v5083_v60  ;;  %v5085_v50 = vmul.f32 %v5016_v15, %v5016_v15  ;;  %v9922_v57 = vld [vmem:[#allocation13_spill] sm:$0xff] }
 0x20d   : > { %v6822_v2 = vpop.f32.mrf.mxu0  ;;  %v5046_v38 = vadd.f32 %v5045_v18, %v5015_v19  ;;  %v6774_v55 = vpop.f32.mrf.mxu1  ;;  %v9919_v19 = vld [vmem:[#allocation8_spill] sm:$0xff]  ;;  %v3388_v12 = vadd.f32 %v9923_v36, %v9922_v57  ;;  %v3772_v20 = vadd.f32 %v9924_v40, %v3385_v10  ;;  %v3386_v0 = vadd.f32 %v9926_v37, %v9925_v52 }
 0x20e   : > { %v6137_v46 = vpack.c.bf16 %v5019_v24, %v5018_v6  ;;  %v5017_v62 = vadd.f32 %v4940_v9, %v4519_v21  ;;  %v5115_v33 = vadd.f32 %v5114_v30, %v5084_v7  ;;  %v4524_v48 = vadd.f32 %v6774_v55, %v9919_v19  ;;  %v9934_v57 = vld [vmem:[#allocation24_spill] sm:$0xff] }
 0x20f   : > { %v4953_v63 = vpop.f32.mrf.mxu0  ;;  %v5047_v26 = vadd.f32 %v5046_v38, %v5016_v15  ;;  %v4455_v5 = vpop.f32.mrf.mxu1  ;;  %v5088_v3 = vmul.f32 %v5019_v24, %v5019_v24 }
 0x210   : > { %6177 = vst [vmem:[%s9622_s7 + $0x48] sm:$0xff] %v6137_v46   ;;  %v5086_v39 = vmul.f32 %v5017_v62, %v5017_v62  ;;  %v6132_v54 = vpack.c.bf16 %v5017_v62, %v5016_v15  ;;  %v4522_v41 = vadd.f32 %v4455_v5, %v3768_v51  ;;  %v5116_v34 = vadd.f32 %v5115_v33, %v5085_v50  ;;  %v9927_v15 = vld [vmem:[#allocation16_spill] sm:$0xff] }
 0x211   : > { %v6823_v47 = vpop.f32.mrf.mxu0  ;;  %v5048_v14 = vadd.f32 %v5047_v26, %v5017_v62  ;;  %v6775_v13 = vpop.f32.mrf.mxu1  ;;  %v5022_v9 = vadd.f32 %v6822_v2, %v4524_v48  ;;  %v3775_v8 = vadd.f32 %v9927_v15, %v3388_v12  ;;  %v3773_v46 = vadd.f32 %v9929_v17, %v3386_v0  ;;  %v9930_v62 = vld [vmem:[#allocation17_spill] sm:$0xff]  ;;  %v9935_v12 = vld [vmem:[#allocation2_spill] sm:$0xff]  ;;  %v9939_v0 = vld [vmem:[#allocation28_spill] sm:$0xff] }
 0x212   : > { %6176 = vst [vmem:[%s9622_s7 + $0x40] sm:$0xff] %v6132_v54   ;;  %v4525_v1 = vadd.f32 %v6775_v13, %v3771_v56  ;;  %v5117_v58 = vadd.f32 %v5116_v34, %v5086_v39  ;;  %v5020_v27 = vadd.f32 %v4953_v63, %v4522_v41  ;;  %v9932_v56 = vld [vmem:[#allocation20_spill] sm:$0xff]  ;;  %v9933_v26 = vld [vmem:[#allocation29_spill] sm:$0xff] }
 0x213   : > { %v4956_v45 = vpop.f32.mrf.mxu0  ;;  %v5049_v35 = vadd.f32 %v5048_v14, %v5018_v6  ;;  %v4458_v42 = vpop.f32.mrf.mxu1  ;;  %v3392_v50 = vadd.f32 %v9933_v26, %v9932_v56  ;;  %v5091_v39 = vmul.f32 %v5022_v9, %v5022_v9 }
 0x214   : > { %v5023_v23 = vadd.f32 %v6823_v47, %v4525_v1  ;;  %v4523_v49 = vadd.f32 %v4458_v42, %v3769_v44  ;;  %v5118_v4 = vadd.f32 %v5117_v58, %v5087_v22  ;;  %v5089_v2 = vmul.f32 %v5020_v27, %v5020_v27  ;;  %v9931_v47 = vld [vmem:[#allocation26_spill] sm:$0xff] }
 0x215   : > { %v6826_v43 = vpop.f32.mrf.mxu0  ;;  %v5050_v53 = vadd.f32 %v5049_v35, %v5019_v24  ;;  %v6778_v31 = vpop.f32.mrf.mxu1  ;;  %v9928_v24 = vld [vmem:[#allocation19_spill] sm:$0xff]  ;;  %v3389_v25 = vadd.f32 %v9931_v47, %v9930_v62  ;;  %v9936_v1 = vld [vmem:[#allocation30_spill] sm:$0xff] }
 0x216   : > { %v6147_v60 = vpack.c.bf16 %v5023_v23, %v5022_v9  ;;  %v5021_v18 = vadd.f32 %v4956_v45, %v4523_v49  ;;  %v5119_v21 = vadd.f32 %v5118_v4, %v5088_v3  ;;  %v4528_v38 = vadd.f32 %v6778_v31, %v9928_v24 }
 0x217   : > { %v4969_v11 = vpop.f32.mrf.mxu0  ;;  %v5051_v6 = vadd.f32 %v5050_v53, %v5020_v27  ;;  %v4471_v63 = vpop.f32.mrf.mxu1  ;;  %v5092_v13 = vmul.f32 %v5023_v23, %v5023_v23  ;;  %v3776_v36 = vadd.f32 %v9934_v57, %v3389_v25  ;;  %v3390_v22 = vadd.f32 %v9936_v1, %v9935_v12 }
 0x218   : > { %6179 = vst [vmem:[%s9622_s7 + $0x58] sm:$0xff] %v6147_v60   ;;  %v5090_v7 = vmul.f32 %v5021_v18, %v5021_v18  ;;  %v6142_v30 = vpack.c.bf16 %v5021_v18, %v5020_v27  ;;  %v4526_v55 = vadd.f32 %v4471_v63, %v3772_v20  ;;  %v5120_v51 = vadd.f32 %v5119_v21, %v5089_v2  ;;  %v9937_v27 = vld [vmem:[#allocation25_spill] sm:$0xff] }
 0x219   : > { %v6827_v28 = vpop.f32.mrf.mxu0  ;;  %v5052_v61 = vadd.f32 %v5051_v6, %v5021_v18  ;;  %v6779_v29 = vpop.f32.mrf.mxu1  ;;  %v5026_v45 = vadd.f32 %v6826_v43, %v4528_v38  ;;  %v3779_v42 = vadd.f32 %v9937_v27, %v3392_v50  ;;  %v3777_v60 = vadd.f32 %v9939_v0, %v3390_v22 }
 0x21a   : > { %6178 = vst [vmem:[%s9622_s7 + $0x50] sm:$0xff] %v6142_v30   ;;  %v4529_v33 = vadd.f32 %v6779_v29, %v3775_v8  ;;  %v5121_v19 = vadd.f32 %v5120_v51, %v5090_v7  ;;  %v5024_v48 = vadd.f32 %v4969_v11, %v4526_v55 }
 0x21b   : > { %v4972_v32 = vpop.f32.mrf.mxu0  ;;  %v5053_v54 = vadd.f32 %v5052_v61, %v5022_v9  ;;  %v4474_v41 = vpop.f32.mrf.mxu1 }
 0x21c   : > { %v5027_v34 = vadd.f32 %v6827_v28, %v4529_v33  ;;  %v4527_v14 = vadd.f32 %v4474_v41, %v3773_v46  ;;  %v5122_v16 = vadd.f32 %v5121_v19, %v5091_v39  ;;  %v5093_v43 = vmul.f32 %v5024_v48, %v5024_v48 }
 0x21d   : > { %v6830_v5 = vpop.f32.mrf.mxu0  ;;  %v5054_v44 = vadd.f32 %v5053_v54, %v5023_v23  ;;  %v6782_v59 = vpop.f32.mrf.mxu1  ;;  %v9938_v23 = vld [vmem:[#allocation27_spill] sm:$0xff]  ;;  %v5095_v28 = vmul.f32 %v5026_v45, %v5026_v45 }
 0x21e   : > { %v6157_v35 = vpack.c.bf16 %v5027_v34, %v5026_v45  ;;  %v5025_v58 = vadd.f32 %v4972_v32, %v4527_v14  ;;  %v5123_v49 = vadd.f32 %v5122_v16, %v5092_v13  ;;  %v4532_v53 = vadd.f32 %v6782_v59, %v9938_v23 }
 0x21f   : > { %v4985_v10 = vpop.f32.mrf.mxu0  ;;  %v5055_v9 = vadd.f32 %v5054_v44, %v5024_v48  ;;  %v4487_v11 = vpop.f32.mrf.mxu1  ;;  %v5096_v30 = vmul.f32 %v5027_v34, %v5027_v34 }
 0x220   : > { %6181 = vst [vmem:[%s9622_s7 + $0x68] sm:$0xff] %v6157_v35   ;;  %v5094_v3 = vmul.f32 %v5025_v58, %v5025_v58  ;;  %v6152_v4 = vpack.c.bf16 %v5025_v58, %v5024_v48  ;;  %v4530_v31 = vadd.f32 %v4487_v11, %v3776_v36  ;;  %v5124_v40 = vadd.f32 %v5123_v49, %v5093_v43 }
 0x221   : > { %v5056_v20 = vadd.f32 %v5055_v9, %v5025_v58  ;;  %v6783_v52 = vpop.f32.mrf.mxu1  ;;  %v6831_v37 = vpop.f32.mrf.mxu0  ;;  %v5030_v21 = vadd.f32 %v6830_v5, %v4532_v53 }
 0x222   : > { %6180 = vst [vmem:[%s9622_s7 + $0x60] sm:$0xff] %v6152_v4   ;;  %v4533_v18 = vadd.f32 %v6783_v52, %v3779_v42  ;;  %v5125_v8 = vadd.f32 %v5124_v40, %v5094_v3  ;;  %v5028_v6 = vadd.f32 %v4985_v10, %v4530_v31 }
 0x223   : > { %v5057_v15 = vadd.f32 %v5056_v20, %v5026_v45  ;;  %v4490_v2 = vpop.f32.mrf.mxu1  ;;  %v4988_v55 = vpop.f32.mrf.mxu0  ;;  %v5099_v56 = vmul.f32 %v5030_v21, %v5030_v21 }
 0x224   : > { %v5031_v63 = vadd.f32 %v6831_v37, %v4533_v18  ;;  %v4531_v7 = vadd.f32 %v4490_v2, %v3777_v60  ;;  %v5126_v24 = vadd.f32 %v5125_v8, %v5095_v28  ;;  %v5097_v29 = vmul.f32 %v5028_v6, %v5028_v6 }
 0x225   : > { %v5058_v38 = vadd.f32 %v5057_v15, %v5027_v34 }
 0x226   : > { %v6167_v32 = vpack.c.bf16 %v5031_v63, %v5030_v21  ;;  %v5029_v51 = vadd.f32 %v4988_v55, %v4531_v7  ;;  %v5127_v17 = vadd.f32 %v5126_v24, %v5096_v30  ;;  %v5100_v33 = vmul.f32 %v5031_v63, %v5031_v63 }
 0x227   : > { %v5059_v61 = vadd.f32 %v5058_v38, %v5028_v6 }
 0x228   : > { %6183 = vst [vmem:[%s9622_s7 + $0x78] sm:$0xff] %v6167_v32   ;;  %v5098_v46 = vmul.f32 %v5029_v51, %v5029_v51  ;;  %v6162_v62 = vpack.c.bf16 %v5029_v51, %v5028_v6  ;;  %v5128_v47 = vadd.f32 %v5127_v17, %v5097_v29 }
 0x229   : > { %v5060_v25 = vadd.f32 %v5059_v61, %v5029_v51 }
 0x22a   : > { %6182 = vst [vmem:[%s9622_s7 + $0x70] sm:$0xff] %v6162_v62   ;;  %v5129_v50 = vadd.f32 %v5128_v47, %v5098_v46 }
 0x22b   : > { %v5061_v26 = vadd.f32 %v5060_v25, %v5030_v21 }
 0x22c   : > { %v5130_v39 = vadd.f32 %v5129_v50, %v5099_v56 }
 0x22d   : > { %v5062_v5 = vadd.f32 %v5061_v26, %v5031_v63 }
 0x22e   : > { %v5131_v19 = vadd.f32 %v5130_v39, %v5100_v33 }
 0x22f   : > { %v5063_v54 = vrot.slane %v5062_v5, 4 }
 0x230   : > { %v5132_v41 = vrot.slane %v5131_v19, 4 }
 0x231   : > { %v5064_v48 = vadd.f32 %v5063_v54, %v5062_v5 }
 0x232   : > { %v5133_v34 = vadd.f32 %v5132_v41, %v5131_v19 }
 0x233   : > { %v5065_v45 = vrot.slane %v5064_v48, 2 }
 0x234   : > { %v5134_v13 = vrot.slane %v5133_v34, 2 }
 0x235   : > { %v5066_v14 = vadd.f32 %v5065_v45, %v5064_v48 }
 0x236   : > { %v5135_v44 = vadd.f32 %v5134_v13, %v5133_v34 }
 0x237   : > { %v5067_v16 = vrot.slane %v5066_v14, 1 }
 0x238   : > { %v5136_v59 = vrot.slane %v5135_v44, 1 }
 0x239   : > { %v5068_v10 = vadd.f32 %v5067_v16, %v5066_v14 }
 0x23a   : > { %v5137_v57 = vadd.f32 %v5136_v59, %v5135_v44 }
 0x23c   : > { %v5139_v36 = vsel %vm5138_vm6, %v5068_v10, %v5137_v57 }
 0x23d   : > { %5140 = vst [vmem:[%s221_s11] sm:$0x3] %v5139_v36 }
 0x23e PF: > { %s14_s14 = sadd.s32 1, %s7024_s14   ;;  %s9940_s12 = smov %s7020_s13 }
 0x23f   : > { %p11_p5 = scmp.ge.s32.totalorder %s14_s14, 4   ;;  %s9941_s13 = smov %s9943_s15 }
 0x241   :  { %13 = sbr.rel (!%p11_p5) target bundleno = 2 (0x2), region = 80 }

</bundles_post_ra>
